<compile_context>
chip_gen: v7x
topology: tpu7x:2x2x1
jax: 0.10.0
libtpu: 0.0.40
codegen_flags: <defaults>
</compile_context>

<pallas_src>
import numpy as np
import jax
import jax.numpy as jnp
from jax.experimental import pallas as pl
from jax.experimental.pallas import tpu as pltpu

MULTIRES = 10
EMB_DIM = MULTIRES * 6 + 3      # 63
N_BLOCKS = 5                    # skips=[2] hard-wired into the kernel body
TN = 512                        # points per grid step (lane-dim tile)

# NOTE: the reference code uses torch.linspace(2**0, 2**max_freq, N_freqs),
# i.e. *linearly* spaced frequencies -- reproduced here.
_FREQS = np.linspace(2.0 ** 0, 2.0 ** (MULTIRES - 1), MULTIRES).astype(np.float32)

# torch embedding column order: [x,y,z, sin(f0*xyz), cos(f0*xyz), sin(f1*xyz), ...]
# -> per-coordinate column index lists used to split / permute the
#    pts_linears[0] and skip-layer weights host-side.
_SIN_COLS = [np.array([3 + 6 * j + k for j in range(MULTIRES)], np.int32)
             for k in range(3)]
_COS_COLS = [np.array([6 + 6 * j + k for j in range(MULTIRES)], np.int32)
             for k in range(3)]


# ---------------------------------------------------------------------------
# Kernel
# ---------------------------------------------------------------------------
def _mlp_kernel(p_ref, c_ref, freq_ref,
                w_eraw_ref, w_esin_ref, w_ecos_ref,
                w_hh_ref, b_pts_ref, w_c_ref, b_c_ref,
                w_out_ref, b_out_ref, out_ref):
    """All tensors are (features, points); the point axis sits on TPU lanes."""

    def dot(a, b):
        return jnp.dot(a, b, preferred_element_type=jnp.float32)

    freqs = freq_ref[...]                              # (MULTIRES, 1)

    # Exact f32 scaled arguments per coordinate, then one sin + one cos each
    # (60 transcendentals / point total).
    sin_p, cos_p = [], []
    for k in range(3):
        xk = freqs * p_ref[k:k + 1, :]                 # (MULTIRES, TN)
        sin_p.append(jnp.sin(xk))
        cos_p.append(jnp.cos(xk))

    def emb_dot(layer):
        # == embedded_pts @ W, with W split host-side into raw / sin / cos
        # per-coordinate blocks (mathematically identical).
        acc = dot(w_eraw_ref[layer], p_ref[...])       # (H, TN), K = 3
        for k in range(3):
            acc = acc + dot(w_esin_ref[3 * layer + k], sin_p[k])
            acc = acc + dot(w_ecos_ref[3 * layer + k], cos_p[k])
        return acc

    def fc_c(i):
        return dot(w_c_ref[i], c_ref[...]) + b_c_ref[i]

    # block 0: embedding -> hidden
    h = jnp.maximum(emb_dot(0) + b_pts_ref[0], 0.0) + fc_c(0)
    # blocks 1, 2
    h = jnp.maximum(dot(w_hh_ref[0], h) + b_pts_ref[1], 0.0) + fc_c(1)
    h = jnp.maximum(dot(w_hh_ref[1], h) + b_pts_ref[2], 0.0) + fc_c(2)
    # skip (torch i == 2): layer 3 consumes cat([embedded_pts, h], -1); its
    # (63+H, H) weight is split into an emb part and an h part.
    h = jnp.maximum(emb_dot(1) + dot(w_hh_ref[2], h) + b_pts_ref[3], 0.0) + fc_c(3)
    # block 4
    h = jnp.maximum(dot(w_hh_ref[3], h) + b_pts_ref[4], 0.0) + fc_c(4)
    # output linear (color=False -> 1 channel), stored as a lane-dense row.
    out_ref[...] = dot(w_out_ref[...], h) + b_out_ref[...]


# ---------------------------------------------------------------------------
# Plain-JAX glue: trilinear grid sampling (data-dependent gather)
# ---------------------------------------------------------------------------
def sample_grid_feature(p, c_grid, bound):
    """Plain-JAX equivalent of normalize_3d_coordinate + F.grid_sample
    (mode='bilinear', padding_mode='border', align_corners=True).
    p: (N, 3) world coords mapped as x->W, y->H, z->D (consistent with the
    reference below); c_grid: (1, C, D, H, W).  Returns (C, N)."""
    lo, hi = bound[:, 0], bound[:, 1]
    p_nor = (p - lo) / (hi - lo) * 2.0 - 1.0           # (N, 3) in [-1, 1]
    c = c_grid[0]                                      # (C, D, H, W)
    C, D, H, W = c.shape

    def unnorm(v, size):
        return jnp.clip((v + 1.0) * 0.5 * (size - 1), 0.0, size - 1.0)

    ix = unnorm(p_nor[:, 0], W)
    iy = unnorm(p_nor[:, 1], H)
    iz = unnorm(p_nor[:, 2], D)
    x0 = jnp.floor(ix); y0 = jnp.floor(iy); z0 = jnp.floor(iz)
    wx = ix - x0; wy = iy - y0; wz = iz - z0
    x0i = x0.astype(jnp.int32); y0i = y0.astype(jnp.int32); z0i = z0.astype(jnp.int32)
    x1i = jnp.clip(x0i + 1, 0, W - 1)
    y1i = jnp.clip(y0i + 1, 0, H - 1)
    z1i = jnp.clip(z0i + 1, 0, D - 1)

    def g(zi, yi, xi):
        return c[:, zi, yi, xi]                        # (C, N)

    out = (g(z0i, y0i, x0i) * ((1 - wz) * (1 - wy) * (1 - wx))[None, :]
           + g(z0i, y0i, x1i) * ((1 - wz) * (1 - wy) * wx)[None, :]
           + g(z0i, y1i, x0i) * ((1 - wz) * wy * (1 - wx))[None, :]
           + g(z0i, y1i, x1i) * ((1 - wz) * wy * wx)[None, :]
           + g(z1i, y0i, x0i) * (wz * (1 - wy) * (1 - wx))[None, :]
           + g(z1i, y0i, x1i) * (wz * (1 - wy) * wx)[None, :]
           + g(z1i, y1i, x0i) * (wz * wy * (1 - wx))[None, :]
           + g(z1i, y1i, x1i) * (wz * wy * wx)[None, :])
    return out                                         # (C, N)


# ---------------------------------------------------------------------------
# Host-side weight packing (canonical x@W layout -> kernel layout)
# ---------------------------------------------------------------------------
def _pack_params(params):
    w_layers = [params["w_pts0"], params["w_skip_e"]]              # (63, H) each
    w_eraw = jnp.stack([w[:3, :].T for w in w_layers])             # (2, H, 3)
    w_esin = jnp.stack([w[_SIN_COLS[k], :].T
                        for w in w_layers for k in range(3)])      # (6, H, 10)
    w_ecos = jnp.stack([w[_COS_COLS[k], :].T
                        for w in w_layers for k in range(3)])      # (6, H, 10)
    return dict(
        freqs=jnp.asarray(_FREQS).reshape(MULTIRES, 1),
        w_eraw=w_eraw, w_esin=w_esin, w_ecos=w_ecos,
        w_hh=jnp.transpose(params["w_hh"], (0, 2, 1)),             # (4, H, H)
        b_pts=jnp.transpose(params["b_pts"], (0, 2, 1)),           # (5, H, 1)
        w_c=jnp.transpose(params["w_c"], (0, 2, 1)),               # (5, H, C)
        b_c=jnp.transpose(params["b_c"], (0, 2, 1)),               # (5, H, 1)
        w_out=params["w_out"].T,                                   # (1, H)
        b_out=params["b_out"],                                     # (1, 1)
    )


# ---------------------------------------------------------------------------
# Wrapper
# ---------------------------------------------------------------------------
def mlp_forward_pallas(p, c_grid, params, bound, tn=TN):
    p_flat = p.reshape(-1, 3).astype(jnp.float32)                  # (N, 3)
    n = p_flat.shape[0]
    n_pad = ((n + tn - 1) // tn) * tn
    if n_pad != n:
        p_flat = jnp.pad(p_flat, ((0, n_pad - n), (0, 0)))         # zero-pad points

    cT = sample_grid_feature(p_flat, c_grid, bound)                # (C, n_pad)
    pT = p_flat.T                                                  # (3, n_pad)

    kp = _pack_params(params)
    hidden = params["w_pts0"].shape[1]
    c_dim = cT.shape[0]
    grid = (n_pad // tn,)

    const3 = lambda i: (0, 0, 0)
    const2 = lambda i: (0, 0)
    in_specs = [
        pl.BlockSpec((3, tn), lambda i: (0, i)),                   # raw coords
        pl.BlockSpec((c_dim, tn), lambda i: (0, i)),               # grid features
        pl.BlockSpec((MULTIRES, 1), const2),                       # frequencies
        pl.BlockSpec((2, hidden, 3), const3),                      # w_eraw
        pl.BlockSpec((6, hidden, MULTIRES), const3),               # w_esin
        pl.BlockSpec((6, hidden, MULTIRES), const3),               # w_ecos
        pl.BlockSpec((4, hidden, hidden), const3),                 # w_hh
        pl.BlockSpec((N_BLOCKS, hidden, 1), const3),               # b_pts
        pl.BlockSpec((N_BLOCKS, hidden, c_dim), const3),           # w_c
        pl.BlockSpec((N_BLOCKS, hidden, 1), const3),               # b_c
        pl.BlockSpec((1, hidden), const2),                         # w_out
        pl.BlockSpec((1, 1), const2),                              # b_out
    ]
    out = pl.pallas_call(
        _mlp_kernel,
        out_shape=jax.ShapeDtypeStruct((1, n_pad), jnp.float32),
        grid=grid,
        in_specs=in_specs,
        out_specs=pl.BlockSpec((1, tn), lambda i: (0, i)),
        compiler_params=pltpu.CompilerParams(dimension_semantics=("parallel",)),
    )(pT, cT, kp["freqs"], kp["w_eraw"], kp["w_esin"], kp["w_ecos"],
      kp["w_hh"], kp["b_pts"], kp["w_c"], kp["b_c"], kp["w_out"], kp["b_out"])
    return out[0, :n]                                  # == torch .squeeze(-1)


# ---------------------------------------------------------------------------
# Pure-JAX reference mirroring the PyTorch forward (canonical params)
# ---------------------------------------------------------------------------
def mlp_forward_reference(p, c_grid, params, bound):
    p_flat = p.reshape(-1, 3).astype(jnp.float32)
    c = sample_grid_feature(p_flat, c_grid, bound).T               # (N, C)
    outs = [p_flat]
    for f in _FREQS:
        outs.append(jnp.sin(p_flat * f))
        outs.append(jnp.cos(p_flat * f))
    emb = jnp.concatenate(outs, axis=1)                            # (N, 63)
    w_hh, b_pts = params["w_hh"], params["b_pts"]
    w_c, b_c = params["w_c"], params["b_c"]
    h = jnp.maximum(emb @ params["w_pts0"] + b_pts[0], 0.0) + c @ w_c[0] + b_c[0]
    h = jnp.maximum(h @ w_hh[0] + b_pts[1], 0.0) + c @ w_c[1] + b_c[1]
    h = jnp.maximum(h @ w_hh[1] + b_pts[2], 0.0) + c @ w_c[2] + b_c[2]
    h = jnp.maximum(emb @ params["w_skip_e"] + h @ w_hh[2] + b_pts[3], 0.0) + c @ w_c[3] + b_c[3]
    h = jnp.maximum(h @ w_hh[3] + b_pts[4], 0.0) + c @ w_c[4] + b_c[4]
    out = h @ params["w_out"] + params["b_out"]
    return out[:, 0]


# ---------------------------------------------------------------------------
# Deterministic synthetic init (xavier-uniform for DenseLayers, zero bias;
# default-Linear-style uniform for fc_c), in the canonical x@W layout.
# ---------------------------------------------------------------------------
def init_params(key, c_dim, hidden):
    ks = jax.random.split(key, 9)
    g_relu = float(np.sqrt(2.0))

    def xavier(k, fan_in, fan_out, gain):
        a = gain * np.sqrt(6.0 / (fan_in + fan_out))
        return jax.random.uniform(k, (fan_in, fan_out), jnp.float32, -a, a)

    w_pts0 = xavier(ks[0], EMB_DIM, hidden, g_relu)
    w3_full = xavier(ks[1], EMB_DIM + hidden, hidden, g_relu)      # skip layer
    w_hh = jnp.stack([xavier(ks[2], hidden, hidden, g_relu),
                      xavier(ks[3], hidden, hidden, g_relu),
                      w3_full[EMB_DIM:],
                      xavier(ks[4], hidden, hidden, g_relu)])
    w_skip_e = w3_full[:EMB_DIM]
    b_pts = jnp.zeros((N_BLOCKS, 1, hidden), jnp.float32)
    bnd = 1.0 / np.sqrt(c_dim)
    w_c = jax.random.uniform(ks[5], (N_BLOCKS, c_dim, hidden), jnp.float32, -bnd, bnd)
    b_c = jax.random.uniform(ks[6], (N_BLOCKS, 1, hidden), jnp.float32, -bnd, bnd)
    w_out = xavier(ks[7], hidden, 1, 1.0)
    b_out = jnp.zeros((1, 1), jnp.float32)
    return dict(w_pts0=w_pts0, w_hh=w_hh, w_skip_e=w_skip_e, b_pts=b_pts,
                w_c=w_c, b_c=b_c, w_out=w_out, b_out=b_out)


if __name__ == "__main__":
    key = jax.random.PRNGKey(0)
    kp, kc, kw = jax.random.split(key, 3)

    c_dim, hidden = 32, 64          # small config consistent with the module
    grid_res = 16
    n_pts = 2000                    # not a multiple of TN -> exercises padding;
                                    # padded grid length 4 keeps both v7x TCs busy

    p = jax.random.uniform(kp, (1, n_pts, 3), jnp.float32, -1.0, 1.0)
    c_grid = 0.1 * jax.random.normal(kc, (1, c_dim, grid_res, grid_res, grid_res),
                                     jnp.float32)
    bound = jnp.array([[-1.0, 1.0], [-1.0, 1.0], [-1.0, 1.0]], jnp.float32)
    params = init_params(kw, c_dim, hidden)

    out = jax.block_until_ready(mlp_forward_pallas(p, c_grid, params, bound))
    ref = mlp_forward_reference(p, c_grid, params, bound)

    assert out.shape == (n_pts,)
    np.testing.assert_allclose(np.asarray(out), np.asarray(ref), rtol=2e-2, atol=3e-2)
    print("KERNEL_OK")
</pallas_src>

<mosaic_0001>
module attributes {stable_mosaic.version = 11 : i64} {
  func.func @_mlp_kernel(%arg0: i32, %arg1: memref<3x512xf32, #tpu.memory_space<vmem>>, %arg2: memref<32x512xf32, #tpu.memory_space<vmem>>, %arg3: memref<10x1xf32, #tpu.memory_space<vmem>>, %arg4: memref<2x64x3xf32, #tpu.memory_space<vmem>>, %arg5: memref<6x64x10xf32, #tpu.memory_space<vmem>>, %arg6: memref<6x64x10xf32, #tpu.memory_space<vmem>>, %arg7: memref<4x64x64xf32, #tpu.memory_space<vmem>>, %arg8: memref<5x64x1xf32, #tpu.memory_space<vmem>>, %arg9: memref<5x64x32xf32, #tpu.memory_space<vmem>>, %arg10: memref<5x64x1xf32, #tpu.memory_space<vmem>>, %arg11: memref<1x64xf32, #tpu.memory_space<vmem>>, %arg12: memref<1x1xf32, #tpu.memory_space<vmem>>, %arg13: memref<1x512xf32, #tpu.memory_space<vmem>>) attributes {dimension_semantics = [#tpu.dimension_semantics<parallel>], iteration_bounds = array<i64: 4>, scalar_prefetch = 0 : i64, scratch_operands = 0 : i64, tpu.core_type = #tpu.core_type<tc>, window_params = [{transform_indices = @transform_0, window_bounds = array<i64: 3, 512>}, {transform_indices = @transform_1, window_bounds = array<i64: 32, 512>}, {pipeline_mode = #tpu.pipeline_mode<synchronous>, transform_indices = @transform_2, window_bounds = array<i64: 10, 1>}, {pipeline_mode = #tpu.pipeline_mode<synchronous>, transform_indices = @transform_3, window_bounds = array<i64: 2, 64, 3>}, {pipeline_mode = #tpu.pipeline_mode<synchronous>, transform_indices = @transform_4, window_bounds = array<i64: 6, 64, 10>}, {pipeline_mode = #tpu.pipeline_mode<synchronous>, transform_indices = @transform_5, window_bounds = array<i64: 6, 64, 10>}, {pipeline_mode = #tpu.pipeline_mode<synchronous>, transform_indices = @transform_6, window_bounds = array<i64: 4, 64, 64>}, {pipeline_mode = #tpu.pipeline_mode<synchronous>, transform_indices = @transform_7, window_bounds = array<i64: 5, 64, 1>}, {pipeline_mode = #tpu.pipeline_mode<synchronous>, transform_indices = @transform_8, window_bounds = array<i64: 5, 64, 32>}, {pipeline_mode = #tpu.pipeline_mode<synchronous>, transform_indices = @transform_9, window_bounds = array<i64: 5, 64, 1>}, {pipeline_mode = #tpu.pipeline_mode<synchronous>, transform_indices = @transform_10, window_bounds = array<i64: 1, 64>}, {pipeline_mode = #tpu.pipeline_mode<synchronous>, transform_indices = @transform_11, window_bounds = array<i64: 1, 1>}, {transform_indices = @transform_12, window_bounds = array<i64: 1, 512>}]} {
    %c0 = arith.constant 0 : index
    %c0_0 = arith.constant 0 : index
    %0 = vector.load %arg3[%c0, %c0_0] : memref<10x1xf32, #tpu.memory_space<vmem>>, vector<10x1xf32>
    %c0_1 = arith.constant 0 : index
    %c0_2 = arith.constant 0 : index
    %1 = vector.load %arg1[%c0_1, %c0_2] : memref<3x512xf32, #tpu.memory_space<vmem>>, vector<1x512xf32>
    %2 = vector.broadcast %0 : vector<10x1xf32> to vector<10x512xf32>
    %3 = vector.broadcast %1 : vector<1x512xf32> to vector<10x512xf32>
    %4 = arith.mulf %2, %3 : vector<10x512xf32>
    %5 = math.sin %4 : vector<10x512xf32>
    %6 = math.cos %4 : vector<10x512xf32>
    %c1 = arith.constant 1 : index
    %c0_3 = arith.constant 0 : index
    %7 = vector.load %arg1[%c1, %c0_3] : memref<3x512xf32, #tpu.memory_space<vmem>>, vector<1x512xf32>
    %8 = vector.broadcast %0 : vector<10x1xf32> to vector<10x512xf32>
    %9 = vector.broadcast %7 : vector<1x512xf32> to vector<10x512xf32>
    %10 = arith.mulf %8, %9 : vector<10x512xf32>
    %11 = math.sin %10 : vector<10x512xf32>
    %12 = math.cos %10 : vector<10x512xf32>
    %c2 = arith.constant 2 : index
    %c0_4 = arith.constant 0 : index
    %13 = vector.load %arg1[%c2, %c0_4] : memref<3x512xf32, #tpu.memory_space<vmem>>, vector<1x512xf32>
    %14 = vector.broadcast %0 : vector<10x1xf32> to vector<10x512xf32>
    %15 = vector.broadcast %13 : vector<1x512xf32> to vector<10x512xf32>
    %16 = arith.mulf %14, %15 : vector<10x512xf32>
    %17 = math.sin %16 : vector<10x512xf32>
    %18 = math.cos %16 : vector<10x512xf32>
    %c0_5 = arith.constant 0 : index
    %c0_6 = arith.constant 0 : index
    %c0_7 = arith.constant 0 : index
    %19 = vector.load %arg4[%c0_5, %c0_6, %c0_7] : memref<2x64x3xf32, #tpu.memory_space<vmem>>, vector<1x64x3xf32>
    %20 = vector.shape_cast %19 : vector<1x64x3xf32> to vector<64x3xf32>
    %c0_8 = arith.constant 0 : index
    %c0_9 = arith.constant 0 : index
    %21 = vector.load %arg1[%c0_8, %c0_9] : memref<3x512xf32, #tpu.memory_space<vmem>>, vector<3x512xf32>
    %cst = arith.constant dense<0.000000e+00> : vector<64x512xf32>
    %22 = tpu.matmul %20, %21, %cst {dimension_numbers = #tpu.dot_dimension_numbers<[1], [0], [0], [1], [0, 0, 1, 1], [], []>} : vector<64x3xf32>, vector<3x512xf32>, vector<64x512xf32> -> vector<64x512xf32>
    %c0_10 = arith.constant 0 : index
    %c0_11 = arith.constant 0 : index
    %c0_12 = arith.constant 0 : index
    %23 = vector.load %arg5[%c0_10, %c0_11, %c0_12] : memref<6x64x10xf32, #tpu.memory_space<vmem>>, vector<1x64x10xf32>
    %24 = vector.shape_cast %23 : vector<1x64x10xf32> to vector<64x10xf32>
    %cst_13 = arith.constant dense<0.000000e+00> : vector<64x512xf32>
    %25 = tpu.matmul %24, %5, %cst_13 {dimension_numbers = #tpu.dot_dimension_numbers<[1], [0], [0], [1], [0, 0, 1, 1], [], []>} : vector<64x10xf32>, vector<10x512xf32>, vector<64x512xf32> -> vector<64x512xf32>
    %26 = arith.addf %22, %25 : vector<64x512xf32>
    %c0_14 = arith.constant 0 : index
    %c0_15 = arith.constant 0 : index
    %c0_16 = arith.constant 0 : index
    %27 = vector.load %arg6[%c0_14, %c0_15, %c0_16] : memref<6x64x10xf32, #tpu.memory_space<vmem>>, vector<1x64x10xf32>
    %28 = vector.shape_cast %27 : vector<1x64x10xf32> to vector<64x10xf32>
    %cst_17 = arith.constant dense<0.000000e+00> : vector<64x512xf32>
    %29 = tpu.matmul %28, %6, %cst_17 {dimension_numbers = #tpu.dot_dimension_numbers<[1], [0], [0], [1], [0, 0, 1, 1], [], []>} : vector<64x10xf32>, vector<10x512xf32>, vector<64x512xf32> -> vector<64x512xf32>
    %30 = arith.addf %26, %29 : vector<64x512xf32>
    %c1_18 = arith.constant 1 : index
    %c0_19 = arith.constant 0 : index
    %c0_20 = arith.constant 0 : index
    %31 = vector.load %arg5[%c1_18, %c0_19, %c0_20] : memref<6x64x10xf32, #tpu.memory_space<vmem>>, vector<1x64x10xf32>
    %32 = vector.shape_cast %31 : vector<1x64x10xf32> to vector<64x10xf32>
    %cst_21 = arith.constant dense<0.000000e+00> : vector<64x512xf32>
    %33 = tpu.matmul %32, %11, %cst_21 {dimension_numbers = #tpu.dot_dimension_numbers<[1], [0], [0], [1], [0, 0, 1, 1], [], []>} : vector<64x10xf32>, vector<10x512xf32>, vector<64x512xf32> -> vector<64x512xf32>
    %34 = arith.addf %30, %33 : vector<64x512xf32>
    %c1_22 = arith.constant 1 : index
    %c0_23 = arith.constant 0 : index
    %c0_24 = arith.constant 0 : index
    %35 = vector.load %arg6[%c1_22, %c0_23, %c0_24] : memref<6x64x10xf32, #tpu.memory_space<vmem>>, vector<1x64x10xf32>
    %36 = vector.shape_cast %35 : vector<1x64x10xf32> to vector<64x10xf32>
    %cst_25 = arith.constant dense<0.000000e+00> : vector<64x512xf32>
    %37 = tpu.matmul %36, %12, %cst_25 {dimension_numbers = #tpu.dot_dimension_numbers<[1], [0], [0], [1], [0, 0, 1, 1], [], []>} : vector<64x10xf32>, vector<10x512xf32>, vector<64x512xf32> -> vector<64x512xf32>
    %38 = arith.addf %34, %37 : vector<64x512xf32>
    %c2_26 = arith.constant 2 : index
    %c0_27 = arith.constant 0 : index
    %c0_28 = arith.constant 0 : index
    %39 = vector.load %arg5[%c2_26, %c0_27, %c0_28] : memref<6x64x10xf32, #tpu.memory_space<vmem>>, vector<1x64x10xf32>
    %40 = vector.shape_cast %39 : vector<1x64x10xf32> to vector<64x10xf32>
    %cst_29 = arith.constant dense<0.000000e+00> : vector<64x512xf32>
    %41 = tpu.matmul %40, %17, %cst_29 {dimension_numbers = #tpu.dot_dimension_numbers<[1], [0], [0], [1], [0, 0, 1, 1], [], []>} : vector<64x10xf32>, vector<10x512xf32>, vector<64x512xf32> -> vector<64x512xf32>
    %42 = arith.addf %38, %41 : vector<64x512xf32>
    %c2_30 = arith.constant 2 : index
    %c0_31 = arith.constant 0 : index
    %c0_32 = arith.constant 0 : index
    %43 = vector.load %arg6[%c2_30, %c0_31, %c0_32] : memref<6x64x10xf32, #tpu.memory_space<vmem>>, vector<1x64x10xf32>
    %44 = vector.shape_cast %43 : vector<1x64x10xf32> to vector<64x10xf32>
    %cst_33 = arith.constant dense<0.000000e+00> : vector<64x512xf32>
    %45 = tpu.matmul %44, %18, %cst_33 {dimension_numbers = #tpu.dot_dimension_numbers<[1], [0], [0], [1], [0, 0, 1, 1], [], []>} : vector<64x10xf32>, vector<10x512xf32>, vector<64x512xf32> -> vector<64x512xf32>
    %46 = arith.addf %42, %45 : vector<64x512xf32>
    %c0_34 = arith.constant 0 : index
    %c0_35 = arith.constant 0 : index
    %c0_36 = arith.constant 0 : index
    %47 = vector.load %arg8[%c0_34, %c0_35, %c0_36] : memref<5x64x1xf32, #tpu.memory_space<vmem>>, vector<1x64x1xf32>
    %48 = vector.shape_cast %47 : vector<1x64x1xf32> to vector<64x1xf32>
    %49 = vector.broadcast %48 : vector<64x1xf32> to vector<64x512xf32>
    %50 = arith.addf %46, %49 : vector<64x512xf32>
    %cst_37 = arith.constant 0.000000e+00 : f32
    %51 = vector.broadcast %cst_37 : f32 to vector<64x512xf32>
    %52 = arith.maximumf %50, %51 : vector<64x512xf32>
    %c0_38 = arith.constant 0 : index
    %c0_39 = arith.constant 0 : index
    %c0_40 = arith.constant 0 : index
    %53 = vector.load %arg9[%c0_38, %c0_39, %c0_40] : memref<5x64x32xf32, #tpu.memory_space<vmem>>, vector<1x64x32xf32>
    %54 = vector.shape_cast %53 : vector<1x64x32xf32> to vector<64x32xf32>
    %c0_41 = arith.constant 0 : index
    %c0_42 = arith.constant 0 : index
    %55 = vector.load %arg2[%c0_41, %c0_42] : memref<32x512xf32, #tpu.memory_space<vmem>>, vector<32x512xf32>
    %cst_43 = arith.constant dense<0.000000e+00> : vector<64x512xf32>
    %56 = tpu.matmul %54, %55, %cst_43 {dimension_numbers = #tpu.dot_dimension_numbers<[1], [0], [0], [1], [0, 0, 1, 1], [], []>} : vector<64x32xf32>, vector<32x512xf32>, vector<64x512xf32> -> vector<64x512xf32>
    %c0_44 = arith.constant 0 : index
    %c0_45 = arith.constant 0 : index
    %c0_46 = arith.constant 0 : index
    %57 = vector.load %arg10[%c0_44, %c0_45, %c0_46] : memref<5x64x1xf32, #tpu.memory_space<vmem>>, vector<1x64x1xf32>
    %58 = vector.shape_cast %57 : vector<1x64x1xf32> to vector<64x1xf32>
    %59 = vector.broadcast %58 : vector<64x1xf32> to vector<64x512xf32>
    %60 = arith.addf %56, %59 : vector<64x512xf32>
    %61 = arith.addf %52, %60 : vector<64x512xf32>
    %c0_47 = arith.constant 0 : index
    %c0_48 = arith.constant 0 : index
    %c0_49 = arith.constant 0 : index
    %62 = vector.load %arg7[%c0_47, %c0_48, %c0_49] : memref<4x64x64xf32, #tpu.memory_space<vmem>>, vector<1x64x64xf32>
    %63 = vector.shape_cast %62 : vector<1x64x64xf32> to vector<64x64xf32>
    %cst_50 = arith.constant dense<0.000000e+00> : vector<64x512xf32>
    %64 = tpu.matmul %63, %61, %cst_50 {dimension_numbers = #tpu.dot_dimension_numbers<[1], [0], [0], [1], [0, 0, 1, 1], [], []>} : vector<64x64xf32>, vector<64x512xf32>, vector<64x512xf32> -> vector<64x512xf32>
    %c1_51 = arith.constant 1 : index
    %c0_52 = arith.constant 0 : index
    %c0_53 = arith.constant 0 : index
    %65 = vector.load %arg8[%c1_51, %c0_52, %c0_53] : memref<5x64x1xf32, #tpu.memory_space<vmem>>, vector<1x64x1xf32>
    %66 = vector.shape_cast %65 : vector<1x64x1xf32> to vector<64x1xf32>
    %67 = vector.broadcast %66 : vector<64x1xf32> to vector<64x512xf32>
    %68 = arith.addf %64, %67 : vector<64x512xf32>
    %cst_54 = arith.constant 0.000000e+00 : f32
    %69 = vector.broadcast %cst_54 : f32 to vector<64x512xf32>
    %70 = arith.maximumf %68, %69 : vector<64x512xf32>
    %c1_55 = arith.constant 1 : index
    %c0_56 = arith.constant 0 : index
    %c0_57 = arith.constant 0 : index
    %71 = vector.load %arg9[%c1_55, %c0_56, %c0_57] : memref<5x64x32xf32, #tpu.memory_space<vmem>>, vector<1x64x32xf32>
    %72 = vector.shape_cast %71 : vector<1x64x32xf32> to vector<64x32xf32>
    %c0_58 = arith.constant 0 : index
    %c0_59 = arith.constant 0 : index
    %73 = vector.load %arg2[%c0_58, %c0_59] : memref<32x512xf32, #tpu.memory_space<vmem>>, vector<32x512xf32>
    %cst_60 = arith.constant dense<0.000000e+00> : vector<64x512xf32>
    %74 = tpu.matmul %72, %73, %cst_60 {dimension_numbers = #tpu.dot_dimension_numbers<[1], [0], [0], [1], [0, 0, 1, 1], [], []>} : vector<64x32xf32>, vector<32x512xf32>, vector<64x512xf32> -> vector<64x512xf32>
    %c1_61 = arith.constant 1 : index
    %c0_62 = arith.constant 0 : index
    %c0_63 = arith.constant 0 : index
    %75 = vector.load %arg10[%c1_61, %c0_62, %c0_63] : memref<5x64x1xf32, #tpu.memory_space<vmem>>, vector<1x64x1xf32>
    %76 = vector.shape_cast %75 : vector<1x64x1xf32> to vector<64x1xf32>
    %77 = vector.broadcast %76 : vector<64x1xf32> to vector<64x512xf32>
    %78 = arith.addf %74, %77 : vector<64x512xf32>
    %79 = arith.addf %70, %78 : vector<64x512xf32>
    %c1_64 = arith.constant 1 : index
    %c0_65 = arith.constant 0 : index
    %c0_66 = arith.constant 0 : index
    %80 = vector.load %arg7[%c1_64, %c0_65, %c0_66] : memref<4x64x64xf32, #tpu.memory_space<vmem>>, vector<1x64x64xf32>
    %81 = vector.shape_cast %80 : vector<1x64x64xf32> to vector<64x64xf32>
    %cst_67 = arith.constant dense<0.000000e+00> : vector<64x512xf32>
    %82 = tpu.matmul %81, %79, %cst_67 {dimension_numbers = #tpu.dot_dimension_numbers<[1], [0], [0], [1], [0, 0, 1, 1], [], []>} : vector<64x64xf32>, vector<64x512xf32>, vector<64x512xf32> -> vector<64x512xf32>
    %c2_68 = arith.constant 2 : index
    %c0_69 = arith.constant 0 : index
    %c0_70 = arith.constant 0 : index
    %83 = vector.load %arg8[%c2_68, %c0_69, %c0_70] : memref<5x64x1xf32, #tpu.memory_space<vmem>>, vector<1x64x1xf32>
    %84 = vector.shape_cast %83 : vector<1x64x1xf32> to vector<64x1xf32>
    %85 = vector.broadcast %84 : vector<64x1xf32> to vector<64x512xf32>
    %86 = arith.addf %82, %85 : vector<64x512xf32>
    %cst_71 = arith.constant 0.000000e+00 : f32
    %87 = vector.broadcast %cst_71 : f32 to vector<64x512xf32>
    %88 = arith.maximumf %86, %87 : vector<64x512xf32>
    %c2_72 = arith.constant 2 : index
    %c0_73 = arith.constant 0 : index
    %c0_74 = arith.constant 0 : index
    %89 = vector.load %arg9[%c2_72, %c0_73, %c0_74] : memref<5x64x32xf32, #tpu.memory_space<vmem>>, vector<1x64x32xf32>
    %90 = vector.shape_cast %89 : vector<1x64x32xf32> to vector<64x32xf32>
    %c0_75 = arith.constant 0 : index
    %c0_76 = arith.constant 0 : index
    %91 = vector.load %arg2[%c0_75, %c0_76] : memref<32x512xf32, #tpu.memory_space<vmem>>, vector<32x512xf32>
    %cst_77 = arith.constant dense<0.000000e+00> : vector<64x512xf32>
    %92 = tpu.matmul %90, %91, %cst_77 {dimension_numbers = #tpu.dot_dimension_numbers<[1], [0], [0], [1], [0, 0, 1, 1], [], []>} : vector<64x32xf32>, vector<32x512xf32>, vector<64x512xf32> -> vector<64x512xf32>
    %c2_78 = arith.constant 2 : index
    %c0_79 = arith.constant 0 : index
    %c0_80 = arith.constant 0 : index
    %93 = vector.load %arg10[%c2_78, %c0_79, %c0_80] : memref<5x64x1xf32, #tpu.memory_space<vmem>>, vector<1x64x1xf32>
    %94 = vector.shape_cast %93 : vector<1x64x1xf32> to vector<64x1xf32>
    %95 = vector.broadcast %94 : vector<64x1xf32> to vector<64x512xf32>
    %96 = arith.addf %92, %95 : vector<64x512xf32>
    %97 = arith.addf %88, %96 : vector<64x512xf32>
    %c1_81 = arith.constant 1 : index
    %c0_82 = arith.constant 0 : index
    %c0_83 = arith.constant 0 : index
    %98 = vector.load %arg4[%c1_81, %c0_82, %c0_83] : memref<2x64x3xf32, #tpu.memory_space<vmem>>, vector<1x64x3xf32>
    %99 = vector.shape_cast %98 : vector<1x64x3xf32> to vector<64x3xf32>
    %c0_84 = arith.constant 0 : index
    %c0_85 = arith.constant 0 : index
    %100 = vector.load %arg1[%c0_84, %c0_85] : memref<3x512xf32, #tpu.memory_space<vmem>>, vector<3x512xf32>
    %cst_86 = arith.constant dense<0.000000e+00> : vector<64x512xf32>
    %101 = tpu.matmul %99, %100, %cst_86 {dimension_numbers = #tpu.dot_dimension_numbers<[1], [0], [0], [1], [0, 0, 1, 1], [], []>} : vector<64x3xf32>, vector<3x512xf32>, vector<64x512xf32> -> vector<64x512xf32>
    %c3 = arith.constant 3 : index
    %c0_87 = arith.constant 0 : index
    %c0_88 = arith.constant 0 : index
    %102 = vector.load %arg5[%c3, %c0_87, %c0_88] : memref<6x64x10xf32, #tpu.memory_space<vmem>>, vector<1x64x10xf32>
    %103 = vector.shape_cast %102 : vector<1x64x10xf32> to vector<64x10xf32>
    %cst_89 = arith.constant dense<0.000000e+00> : vector<64x512xf32>
    %104 = tpu.matmul %103, %5, %cst_89 {dimension_numbers = #tpu.dot_dimension_numbers<[1], [0], [0], [1], [0, 0, 1, 1], [], []>} : vector<64x10xf32>, vector<10x512xf32>, vector<64x512xf32> -> vector<64x512xf32>
    %105 = arith.addf %101, %104 : vector<64x512xf32>
    %c3_90 = arith.constant 3 : index
    %c0_91 = arith.constant 0 : index
    %c0_92 = arith.constant 0 : index
    %106 = vector.load %arg6[%c3_90, %c0_91, %c0_92] : memref<6x64x10xf32, #tpu.memory_space<vmem>>, vector<1x64x10xf32>
    %107 = vector.shape_cast %106 : vector<1x64x10xf32> to vector<64x10xf32>
    %cst_93 = arith.constant dense<0.000000e+00> : vector<64x512xf32>
    %108 = tpu.matmul %107, %6, %cst_93 {dimension_numbers = #tpu.dot_dimension_numbers<[1], [0], [0], [1], [0, 0, 1, 1], [], []>} : vector<64x10xf32>, vector<10x512xf32>, vector<64x512xf32> -> vector<64x512xf32>
    %109 = arith.addf %105, %108 : vector<64x512xf32>
    %c4 = arith.constant 4 : index
    %c0_94 = arith.constant 0 : index
    %c0_95 = arith.constant 0 : index
    %110 = vector.load %arg5[%c4, %c0_94, %c0_95] : memref<6x64x10xf32, #tpu.memory_space<vmem>>, vector<1x64x10xf32>
    %111 = vector.shape_cast %110 : vector<1x64x10xf32> to vector<64x10xf32>
    %cst_96 = arith.constant dense<0.000000e+00> : vector<64x512xf32>
    %112 = tpu.matmul %111, %11, %cst_96 {dimension_numbers = #tpu.dot_dimension_numbers<[1], [0], [0], [1], [0, 0, 1, 1], [], []>} : vector<64x10xf32>, vector<10x512xf32>, vector<64x512xf32> -> vector<64x512xf32>
    %113 = arith.addf %109, %112 : vector<64x512xf32>
    %c4_97 = arith.constant 4 : index
    %c0_98 = arith.constant 0 : index
    %c0_99 = arith.constant 0 : index
    %114 = vector.load %arg6[%c4_97, %c0_98, %c0_99] : memref<6x64x10xf32, #tpu.memory_space<vmem>>, vector<1x64x10xf32>
    %115 = vector.shape_cast %114 : vector<1x64x10xf32> to vector<64x10xf32>
    %cst_100 = arith.constant dense<0.000000e+00> : vector<64x512xf32>
    %116 = tpu.matmul %115, %12, %cst_100 {dimension_numbers = #tpu.dot_dimension_numbers<[1], [0], [0], [1], [0, 0, 1, 1], [], []>} : vector<64x10xf32>, vector<10x512xf32>, vector<64x512xf32> -> vector<64x512xf32>
    %117 = arith.addf %113, %116 : vector<64x512xf32>
    %c5 = arith.constant 5 : index
    %c0_101 = arith.constant 0 : index
    %c0_102 = arith.constant 0 : index
    %118 = vector.load %arg5[%c5, %c0_101, %c0_102] : memref<6x64x10xf32, #tpu.memory_space<vmem>>, vector<1x64x10xf32>
    %119 = vector.shape_cast %118 : vector<1x64x10xf32> to vector<64x10xf32>
    %cst_103 = arith.constant dense<0.000000e+00> : vector<64x512xf32>
    %120 = tpu.matmul %119, %17, %cst_103 {dimension_numbers = #tpu.dot_dimension_numbers<[1], [0], [0], [1], [0, 0, 1, 1], [], []>} : vector<64x10xf32>, vector<10x512xf32>, vector<64x512xf32> -> vector<64x512xf32>
    %121 = arith.addf %117, %120 : vector<64x512xf32>
    %c5_104 = arith.constant 5 : index
    %c0_105 = arith.constant 0 : index
    %c0_106 = arith.constant 0 : index
    %122 = vector.load %arg6[%c5_104, %c0_105, %c0_106] : memref<6x64x10xf32, #tpu.memory_space<vmem>>, vector<1x64x10xf32>
    %123 = vector.shape_cast %122 : vector<1x64x10xf32> to vector<64x10xf32>
    %cst_107 = arith.constant dense<0.000000e+00> : vector<64x512xf32>
    %124 = tpu.matmul %123, %18, %cst_107 {dimension_numbers = #tpu.dot_dimension_numbers<[1], [0], [0], [1], [0, 0, 1, 1], [], []>} : vector<64x10xf32>, vector<10x512xf32>, vector<64x512xf32> -> vector<64x512xf32>
    %125 = arith.addf %121, %124 : vector<64x512xf32>
    %c2_108 = arith.constant 2 : index
    %c0_109 = arith.constant 0 : index
    %c0_110 = arith.constant 0 : index
    %126 = vector.load %arg7[%c2_108, %c0_109, %c0_110] : memref<4x64x64xf32, #tpu.memory_space<vmem>>, vector<1x64x64xf32>
    %127 = vector.shape_cast %126 : vector<1x64x64xf32> to vector<64x64xf32>
    %cst_111 = arith.constant dense<0.000000e+00> : vector<64x512xf32>
    %128 = tpu.matmul %127, %97, %cst_111 {dimension_numbers = #tpu.dot_dimension_numbers<[1], [0], [0], [1], [0, 0, 1, 1], [], []>} : vector<64x64xf32>, vector<64x512xf32>, vector<64x512xf32> -> vector<64x512xf32>
    %129 = arith.addf %125, %128 : vector<64x512xf32>
    %c3_112 = arith.constant 3 : index
    %c0_113 = arith.constant 0 : index
    %c0_114 = arith.constant 0 : index
    %130 = vector.load %arg8[%c3_112, %c0_113, %c0_114] : memref<5x64x1xf32, #tpu.memory_space<vmem>>, vector<1x64x1xf32>
    %131 = vector.shape_cast %130 : vector<1x64x1xf32> to vector<64x1xf32>
    %132 = vector.broadcast %131 : vector<64x1xf32> to vector<64x512xf32>
    %133 = arith.addf %129, %132 : vector<64x512xf32>
    %cst_115 = arith.constant 0.000000e+00 : f32
    %134 = vector.broadcast %cst_115 : f32 to vector<64x512xf32>
    %135 = arith.maximumf %133, %134 : vector<64x512xf32>
    %c3_116 = arith.constant 3 : index
    %c0_117 = arith.constant 0 : index
    %c0_118 = arith.constant 0 : index
    %136 = vector.load %arg9[%c3_116, %c0_117, %c0_118] : memref<5x64x32xf32, #tpu.memory_space<vmem>>, vector<1x64x32xf32>
    %137 = vector.shape_cast %136 : vector<1x64x32xf32> to vector<64x32xf32>
    %c0_119 = arith.constant 0 : index
    %c0_120 = arith.constant 0 : index
    %138 = vector.load %arg2[%c0_119, %c0_120] : memref<32x512xf32, #tpu.memory_space<vmem>>, vector<32x512xf32>
    %cst_121 = arith.constant dense<0.000000e+00> : vector<64x512xf32>
    %139 = tpu.matmul %137, %138, %cst_121 {dimension_numbers = #tpu.dot_dimension_numbers<[1], [0], [0], [1], [0, 0, 1, 1], [], []>} : vector<64x32xf32>, vector<32x512xf32>, vector<64x512xf32> -> vector<64x512xf32>
    %c3_122 = arith.constant 3 : index
    %c0_123 = arith.constant 0 : index
    %c0_124 = arith.constant 0 : index
    %140 = vector.load %arg10[%c3_122, %c0_123, %c0_124] : memref<5x64x1xf32, #tpu.memory_space<vmem>>, vector<1x64x1xf32>
    %141 = vector.shape_cast %140 : vector<1x64x1xf32> to vector<64x1xf32>
    %142 = vector.broadcast %141 : vector<64x1xf32> to vector<64x512xf32>
    %143 = arith.addf %139, %142 : vector<64x512xf32>
    %144 = arith.addf %135, %143 : vector<64x512xf32>
    %c3_125 = arith.constant 3 : index
    %c0_126 = arith.constant 0 : index
    %c0_127 = arith.constant 0 : index
    %145 = vector.load %arg7[%c3_125, %c0_126, %c0_127] : memref<4x64x64xf32, #tpu.memory_space<vmem>>, vector<1x64x64xf32>
    %146 = vector.shape_cast %145 : vector<1x64x64xf32> to vector<64x64xf32>
    %cst_128 = arith.constant dense<0.000000e+00> : vector<64x512xf32>
    %147 = tpu.matmul %146, %144, %cst_128 {dimension_numbers = #tpu.dot_dimension_numbers<[1], [0], [0], [1], [0, 0, 1, 1], [], []>} : vector<64x64xf32>, vector<64x512xf32>, vector<64x512xf32> -> vector<64x512xf32>
    %c4_129 = arith.constant 4 : index
    %c0_130 = arith.constant 0 : index
    %c0_131 = arith.constant 0 : index
    %148 = vector.load %arg8[%c4_129, %c0_130, %c0_131] : memref<5x64x1xf32, #tpu.memory_space<vmem>>, vector<1x64x1xf32>
    %149 = vector.shape_cast %148 : vector<1x64x1xf32> to vector<64x1xf32>
    %150 = vector.broadcast %149 : vector<64x1xf32> to vector<64x512xf32>
    %151 = arith.addf %147, %150 : vector<64x512xf32>
    %cst_132 = arith.constant 0.000000e+00 : f32
    %152 = vector.broadcast %cst_132 : f32 to vector<64x512xf32>
    %153 = arith.maximumf %151, %152 : vector<64x512xf32>
    %c4_133 = arith.constant 4 : index
    %c0_134 = arith.constant 0 : index
    %c0_135 = arith.constant 0 : index
    %154 = vector.load %arg9[%c4_133, %c0_134, %c0_135] : memref<5x64x32xf32, #tpu.memory_space<vmem>>, vector<1x64x32xf32>
    %155 = vector.shape_cast %154 : vector<1x64x32xf32> to vector<64x32xf32>
    %c0_136 = arith.constant 0 : index
    %c0_137 = arith.constant 0 : index
    %156 = vector.load %arg2[%c0_136, %c0_137] : memref<32x512xf32, #tpu.memory_space<vmem>>, vector<32x512xf32>
    %cst_138 = arith.constant dense<0.000000e+00> : vector<64x512xf32>
    %157 = tpu.matmul %155, %156, %cst_138 {dimension_numbers = #tpu.dot_dimension_numbers<[1], [0], [0], [1], [0, 0, 1, 1], [], []>} : vector<64x32xf32>, vector<32x512xf32>, vector<64x512xf32> -> vector<64x512xf32>
    %c4_139 = arith.constant 4 : index
    %c0_140 = arith.constant 0 : index
    %c0_141 = arith.constant 0 : index
    %158 = vector.load %arg10[%c4_139, %c0_140, %c0_141] : memref<5x64x1xf32, #tpu.memory_space<vmem>>, vector<1x64x1xf32>
    %159 = vector.shape_cast %158 : vector<1x64x1xf32> to vector<64x1xf32>
    %160 = vector.broadcast %159 : vector<64x1xf32> to vector<64x512xf32>
    %161 = arith.addf %157, %160 : vector<64x512xf32>
    %162 = arith.addf %153, %161 : vector<64x512xf32>
    %c0_142 = arith.constant 0 : index
    %c0_143 = arith.constant 0 : index
    %163 = vector.load %arg11[%c0_142, %c0_143] : memref<1x64xf32, #tpu.memory_space<vmem>>, vector<1x64xf32>
    %cst_144 = arith.constant dense<0.000000e+00> : vector<1x512xf32>
    %164 = tpu.matmul %163, %162, %cst_144 {dimension_numbers = #tpu.dot_dimension_numbers<[1], [0], [0], [1], [0, 0, 1, 1], [], []>} : vector<1x64xf32>, vector<64x512xf32>, vector<1x512xf32> -> vector<1x512xf32>
    %c0_145 = arith.constant 0 : index
    %c0_146 = arith.constant 0 : index
    %165 = vector.load %arg12[%c0_145, %c0_146] : memref<1x1xf32, #tpu.memory_space<vmem>>, vector<1x1xf32>
    %166 = vector.broadcast %165 : vector<1x1xf32> to vector<1x512xf32>
    %167 = arith.addf %164, %166 : vector<1x512xf32>
    %c0_147 = arith.constant 0 : index
    %c0_148 = arith.constant 0 : index
    %168 = vector.load %arg13[%c0_147, %c0_148] : memref<1x512xf32, #tpu.memory_space<vmem>>, vector<1x512xf32>
    tpu.vector_store %arg13[%c0_147, %c0_148], %167 {strides = array<i32>} : memref<1x512xf32, #tpu.memory_space<vmem>>, vector<1x512xf32>,
    return
  }
  func.func @transform_0(%arg0: i32) -> (i32, i32) {
    %c0_i32 = arith.constant 0 : i32
    %c0_i32_0 = arith.constant 0 : i32
    return %c0_i32, %arg0 : i32, i32
  }
  func.func @transform_1(%arg0: i32) -> (i32, i32) {
    %c0_i32 = arith.constant 0 : i32
    %c0_i32_0 = arith.constant 0 : i32
    return %c0_i32, %arg0 : i32, i32
  }
  func.func @transform_2(%arg0: i32) -> (i32, i32) {
    %c0_i32 = arith.constant 0 : i32
    %c0_i32_0 = arith.constant 0 : i32
    %c0_i32_1 = arith.constant 0 : i32
    return %c0_i32, %c0_i32_0 : i32, i32
  }
  func.func @transform_3(%arg0: i32) -> (i32, i32, i32) {
    %c0_i32 = arith.constant 0 : i32
    %c0_i32_0 = arith.constant 0 : i32
    %c0_i32_1 = arith.constant 0 : i32
    %c0_i32_2 = arith.constant 0 : i32
    return %c0_i32, %c0_i32_0, %c0_i32_1 : i32, i32, i32
  }
  func.func @transform_4(%arg0: i32) -> (i32, i32, i32) {
    %c0_i32 = arith.constant 0 : i32
    %c0_i32_0 = arith.constant 0 : i32
    %c0_i32_1 = arith.constant 0 : i32
    %c0_i32_2 = arith.constant 0 : i32
    return %c0_i32, %c0_i32_0, %c0_i32_1 : i32, i32, i32
  }
  func.func @transform_5(%arg0: i32) -> (i32, i32, i32) {
    %c0_i32 = arith.constant 0 : i32
    %c0_i32_0 = arith.constant 0 : i32
    %c0_i32_1 = arith.constant 0 : i32
    %c0_i32_2 = arith.constant 0 : i32
    return %c0_i32, %c0_i32_0, %c0_i32_1 : i32, i32, i32
  }
  func.func @transform_6(%arg0: i32) -> (i32, i32, i32) {
    %c0_i32 = arith.constant 0 : i32
    %c0_i32_0 = arith.constant 0 : i32
    %c0_i32_1 = arith.constant 0 : i32
    %c0_i32_2 = arith.constant 0 : i32
    return %c0_i32, %c0_i32_0, %c0_i32_1 : i32, i32, i32
  }
  func.func @transform_7(%arg0: i32) -> (i32, i32, i32) {
    %c0_i32 = arith.constant 0 : i32
    %c0_i32_0 = arith.constant 0 : i32
    %c0_i32_1 = arith.constant 0 : i32
    %c0_i32_2 = arith.constant 0 : i32
    return %c0_i32, %c0_i32_0, %c0_i32_1 : i32, i32, i32
  }
  func.func @transform_8(%arg0: i32) -> (i32, i32, i32) {
    %c0_i32 = arith.constant 0 : i32
    %c0_i32_0 = arith.constant 0 : i32
    %c0_i32_1 = arith.constant 0 : i32
    %c0_i32_2 = arith.constant 0 : i32
    return %c0_i32, %c0_i32_0, %c0_i32_1 : i32, i32, i32
  }
  func.func @transform_9(%arg0: i32) -> (i32, i32, i32) {
    %c0_i32 = arith.constant 0 : i32
    %c0_i32_0 = arith.constant 0 : i32
    %c0_i32_1 = arith.constant 0 : i32
    %c0_i32_2 = arith.constant 0 : i32
    return %c0_i32, %c0_i32_0, %c0_i32_1 : i32, i32, i32
  }
  func.func @transform_10(%arg0: i32) -> (i32, i32) {
    %c0_i32 = arith.constant 0 : i32
    %c0_i32_0 = arith.constant 0 : i32
    %c0_i32_1 = arith.constant 0 : i32
    return %c0_i32, %c0_i32_0 : i32, i32
  }
  func.func @transform_11(%arg0: i32) -> (i32, i32) {
    %c0_i32 = arith.constant 0 : i32
    %c0_i32_0 = arith.constant 0 : i32
    %c0_i32_1 = arith.constant 0 : i32
    return %c0_i32, %c0_i32_0 : i32, i32
  }
  func.func @transform_12(%arg0: i32) -> (i32, i32) {
    %c0_i32 = arith.constant 0 : i32
    %c0_i32_0 = arith.constant 0 : i32
    return %c0_i32, %arg0 : i32, i32
  }
}

</mosaic_0001>

<bundles_post_ra>
// kernel: tpu_custom_call.1
= control target key start
LH: loop header
LB: loop body
LE: loop exit
PB: predicated region body
PF: predicated region fallthrough
CT: control target
= control target key end

     0   :  { %s21288_s0 = inlined_call_operand.vmem [shape: f32[3,2048], index: 0, kind: input, shape index: {}]   ;;  %s21289_s1 = inlined_call_operand.vmem [shape: f32[32,2048], index: 1, kind: input, shape index: {}]   ;;  %s21290_s2 = inlined_call_operand.vmem [shape: f32[10,1], index: 2, kind: input, shape index: {}]   ;;  %s21291_s3 = inlined_call_operand.vmem [shape: f32[2,64,3], index: 3, kind: input, shape index: {}]   ;;  %s21292_s4 = inlined_call_operand.vmem [shape: f32[6,64,10], index: 4, kind: input, shape index: {}]   ;;  %s21293_s5 = inlined_call_operand.vmem [shape: f32[6,64,10], index: 5, kind: input, shape index: {}]   ;;  %s21294_s6 = inlined_call_operand.vmem [shape: f32[4,64,64], index: 6, kind: input, shape index: {}]   ;;  %s21295_s7 = inlined_call_operand.vmem [shape: f32[5,64,1], index: 7, kind: input, shape index: {}]   ;;  %s21296_s8 = inlined_call_operand.vmem [shape: f32[5,64,32], index: 8, kind: input, shape index: {}]   ;;  %s21297_s9 = inlined_call_operand.vmem [shape: f32[5,64,1], index: 9, kind: input, shape index: {}]   ;;  %s21298_s10 = inlined_call_operand.vmem [shape: f32[1,64], index: 10, kind: input, shape index: {}]   ;;  %s21299_s11 = inlined_call_operand.<no memory space> [shape: f32[1,1], index: 11, kind: input, shape index: {}]   ;;  %s21300_s12 = inlined_call_operand.hbm [shape: f32[1,2048], index: 12, kind: output, shape index: {}]  }
   0x1   :  { %21376 = sst [smem:[#allocation28_spill]] %s21288_s0  ;;  %v17_v0 = vstv %s21299_s11 }
   0x2   :  { %18 = vst [vmem:[#allocation2] sm:$0x1] %v17_v0 }
   0x3   :  { %19 = vsyncpa [#allocation5], 0 }
   0x4   :  { %21 = vsyncpa [#allocation5 + $0x1], 0  ;;  %s15164_s23 = smov 0   ;;  %s15166_s24 = smov 0  }
   0x5   :  { %s15168_s25 = smov 0   ;;  %s15170_s26 = smov 0  }
   0x6 LB: > { %s15185_s11 = sadd.s32 4294967295, %s15083_s26   ;;  %s13126_s27 = sadd.s32 4294967294, %s15083_s26   ;;  %s15083_s26 = sphi %s15170_s26, %s21708_s26   ;;  %s15079_s25 = sphi %s15168_s25, %s21707_s25   ;;  %s15075_s24 = sphi %s15166_s24, %s21706_s24   ;;  %s15071_s23 = sphi %s15164_s23, %s21705_s23  }
   0x7   : > { %s15189_s28 = sadd.s32 1, %s15083_s26   ;;  %s60_s29 = sadd.s32 1, %s15079_s25 }
   0x8   : > { %s57_s30 = ssub.s32 %s15083_s26, %s15189_s28  ;;  %p67_p0 = scmp.ne.s32.totalorder %s15079_s25, %s15075_s24 }
   0x9   : > { %p58_p1 = scmp.eq.s32.totalorder %s57_s30, 0  ;;  %p68_p2 = scmp.eq.s32.totalorder %s15083_s26, 0 }
   0xa   : > { %p307_p3 = scmp.eq.s32.totalorder %s15185_s11, 3  ;;  %p312_p4 = scmp.ne.s32.totalorder %s15075_s24, %s15071_s23 }
   0xb   : > { %s15201_s13 = scalar_select %p58_p1, %s15079_s25, %s60_s29  }
   0xc   : > { %p69_p5 = por %p68_p2, %p67_p0  ;;  %p15203_p6 = por %p307_p3, %p67_p0 }
   0xd   : > { %p313_p7 = scmp.eq.s32.totalorder %s13126_s27, 3  ;;  %p13128_p9 = scmp.ge.s32.totalorder %s15083_s26, 4 }
   0xf   : > { %p15207_p8 = por %p313_p7, %p312_p4  ;;  %359 = sbr.rel (%p13128_p9) target bundleno = 34 (0x22), region = 56 }
  0x16   : > { %371 = sbr.rel (!%p69_p5) target bundleno = 34 (0x22), region = 64  ;;  %s373_s16 = sand.u32 (%p69_p5), 1, %s15079_s25  }
  0x17   : > { %s13970_s17 = sshll.u32 (%p69_p5), %s15083_s26, 5  ;;  %s13129_s18 = sshll.u32 (%p69_p5), %s373_s16, 7 }
  0x18   : > { %s15217_s21 = scalar_lea.vmem (%p69_p5), %s21289_s1, %s13970_s17  ;;  %s375_s22 = scalar_lea.vmem (%p69_p5), [#allocation3], %s13129_s18 }
  0x19   : > { %v391_v1 = vld [vmem:[%s15217_s21] sm:$0xff] (%p69_p5)  ;;  %v393_v2 = vld [vmem:[%s15217_s21 + $0x8] sm:$0xff] (%p69_p5)  ;;  %v395_v3 = vld [vmem:[%s15217_s21 + $0x10] sm:$0xff] (%p69_p5) }
  0x1a   : > { %392 = vst [vmem:[%s375_s22] sm:$0xff] (%p69_p5), %v391_v1  ;;  %394 = vst [vmem:[%s375_s22 + $0x8] sm:$0xff] (%p69_p5), %v393_v2  ;;  %v397_v4 = vld [vmem:[%s15217_s21 + $0x18] sm:$0xff] (%p69_p5)  ;;  %v399_v5 = vld [vmem:[%s15217_s21 + $0x80] sm:$0xff] (%p69_p5) }
  0x1b   : > { %396 = vst [vmem:[%s375_s22 + $0x10] sm:$0xff] (%p69_p5), %v395_v3  ;;  %v401_v6 = vld [vmem:[%s15217_s21 + $0x88] sm:$0xff] (%p69_p5)  ;;  %398 = vst [vmem:[%s375_s22 + $0x18] sm:$0xff] (%p69_p5), %v397_v4  ;;  %v403_v7 = vld [vmem:[%s15217_s21 + $0x90] sm:$0xff] (%p69_p5) }
  0x1c   : > { %400 = vst [vmem:[%s375_s22 + $0x20] sm:$0xff] (%p69_p5), %v399_v5  ;;  %402 = vst [vmem:[%s375_s22 + $0x28] sm:$0xff] (%p69_p5), %v401_v6  ;;  %v405_v8 = vld [vmem:[%s15217_s21 + $0x98] sm:$0xff] (%p69_p5)  ;;  %v407_v9 = vld [vmem:[%s15217_s21 + $0x100] sm:$0xff] (%p69_p5) }
  0x1d   : > { %404 = vst [vmem:[%s375_s22 + $0x30] sm:$0xff] %v403_v7  ;;  %406 = vst [vmem:[%s375_s22 + $0x38] sm:$0xff] %v405_v8  ;;  %v409_v10 = vld [vmem:[%s15217_s21 + $0x108] sm:$0xff]  ;;  %v411_v11 = vld [vmem:[%s15217_s21 + $0x110] sm:$0xff] }
  0x1e   : > { %408 = vst [vmem:[%s375_s22 + $0x40] sm:$0xff] %v407_v9  ;;  %v413_v12 = vld [vmem:[%s15217_s21 + $0x118] sm:$0xff]  ;;  %410 = vst [vmem:[%s375_s22 + $0x48] sm:$0xff] %v409_v10  ;;  %v415_v13 = vld [vmem:[%s15217_s21 + $0x180] sm:$0xff] }
  0x1f   : > { %412 = vst [vmem:[%s375_s22 + $0x50] sm:$0xff] %v411_v11  ;;  %414 = vst [vmem:[%s375_s22 + $0x58] sm:$0xff] %v413_v12  ;;  %v417_v14 = vld [vmem:[%s15217_s21 + $0x188] sm:$0xff]  ;;  %v419_v15 = vld [vmem:[%s15217_s21 + $0x190] sm:$0xff] }
  0x20   : > { %416 = vst [vmem:[%s375_s22 + $0x60] sm:$0xff] %v415_v13  ;;  %418 = vst [vmem:[%s375_s22 + $0x68] sm:$0xff] %v417_v14  ;;  %v421_v16 = vld [vmem:[%s15217_s21 + $0x198] sm:$0xff] }
  0x21   : > { %420 = vst [vmem:[%s375_s22 + $0x70] sm:$0xff] %v419_v15  ;;  %422 = vst [vmem:[%s375_s22 + $0x78] sm:$0xff] %v421_v16 }
  0x22 PF: > { %p13132_p10 = scmp.ge.s32.totalorder %s15083_s26, 1  ;;  %p427_p11 = scmp.lt.s32.totalorder %s15083_s26, 5 }
  0x24   : > { %p428_p12 = pnand %p13132_p10, %p427_p11 }
  0x26   : > { %431 = sbr.rel (%p428_p12) target bundleno = 2554 (0x9fa), region = 87 }
  0x2d   : > { %v488_v17 = vld [vmem:[%s21290_s2] sm:$0xff]  ;;  %v15085_v18 = vmov 0   ;;  %v489_v19 = vld [vmem:[%s21290_s2 + $0x8] sm:$0x3]  ;;  %v7622_v21 = vld [vmem:[%s21295_s7 + $0x10] sm:$0xff]  ;;  %s13135_s17 = sshll.u32 %s15185_s11, 2  ;;  %v21301_v47 = vlaneseq }
  0x2e   : > { %14917 = vset.pattern.permute.xlu0 %v15085_v18  ;;  %14918 = vset.pattern.permute.xlu1 %v15085_v18  ;;  %v7756_v20 = vld [vmem:[%s21297_s9] sm:$0xff]  ;;  %v7758_v22 = vld [vmem:[%s21297_s9 + $0x10] sm:$0xff]  ;;  %p481_p13 = scmp.lt.s32.totalorder %s13135_s17, 15  ;;  %s21380_s0 = sld [smem:[#allocation28_spill]] }
  0x2f   : > { %493 = vperm.xlu0 %14917, %v488_v17   ;;  %v7624_v23 = vld [vmem:[%s21295_s7 + $0x20] sm:$0xff]  ;;  %v7626_v25 = vld [vmem:[%s21295_s7 + $0x30] sm:$0xff]  ;;  %v15329_v49 = vshrl.u32 %v21301_v47, 7 }
  0x30   : > { %v7760_v24 = vld [vmem:[%s21297_s9 + $0x20] sm:$0xff]  ;;  %v7762_v26 = vld [vmem:[%s21297_s9 + $0x30] sm:$0xff]  ;;  %s21710_s17 = smov (!%p481_p13, %s13135_s17), 15 }
  0x31   : > { %v13519_v27 = vld [vmem:[%s21295_s7 + $0x40] sm:$0xff]  ;;  %v13521_v29 = vld [vmem:[%s21295_s7 + $0x50] sm:$0xff]  ;;  %s13136_s29 = sshll.u32 %s21710_s17, 2  ;;  %21379 = vst [vmem:[#allocation7_spill] sm:$0xff] %v15329_v49  ;;  %v15340_v51 = vsub.s32 1, %v15329_v49  ;;  %v15343_v52 = vsub.s32 3, %v15329_v49 }
  0x32   : > { %v13551_v28 = vld [vmem:[%s21297_s9 + $0x40] sm:$0xff]  ;;  %v13553_v30 = vld [vmem:[%s21297_s9 + $0x50] sm:$0xff]  ;;  %s18632_s17 = sand.u32 1, %s15075_s24  }
  0x33   : > { %498 = vperm.xlu0 %14917, %v489_v19   ;;  %v13523_v31 = vld [vmem:[%s21295_s7 + $0x60] sm:$0xff]  ;;  %v13525_v33 = vld [vmem:[%s21295_s7 + $0x70] sm:$0xff]  ;;  %21381 = vst [vmem:[#allocation8_spill] sm:$0xff] %v15340_v51  ;;  %21382 = vst [vmem:[#allocation9_spill] sm:$0xff] %v15343_v52  ;;  %s13133_s30 = sshll.u32 %s18632_s17, 7  ;;  %s13035_s21 = scalar_lea.sflag [#allocation5], %s18632_s17 }
  0x34   : > { %v13555_v32 = vld [vmem:[%s21297_s9 + $0x60] sm:$0xff]  ;;  %v13557_v34 = vld [vmem:[%s21297_s9 + $0x70] sm:$0xff]  ;;  %s15337_s20 = scalar_lea.vmem %s21380_s0, %s13136_s29  ;;  %s18678_s22 = scalar_lea.vmem [#allocation3], %s13133_s30 }
  0x35   : > { %v13583_v35 = vld [vmem:[%s21295_s7 + $0x80] sm:$0xff]  ;;  %v13585_v37 = vld [vmem:[%s21295_s7 + $0x90] sm:$0xff]  ;;  %s13971_s29 = sshll.u32 %s15185_s11, 6  ;;  %s15095_s11 = smov [#allocation4]  }
  0x36   : > { %v13615_v36 = vld [vmem:[%s21297_s9 + $0x80] sm:$0xff]  ;;  %v13617_v38 = vld [vmem:[%s21297_s9 + $0x90] sm:$0xff]  ;;  %s21245_s19 = scalar_lea.hbm %s21300_s12, %s13971_s29 }
  0x37   : > { %7766 = vperm.xlu0 %14917, %v7756_v20   ;;  %v13587_v39 = vld [vmem:[%s21295_s7 + $0xa0] sm:$0xff]  ;;  %v13589_v41 = vld [vmem:[%s21295_s7 + $0xb0] sm:$0xff] }
  0x38   : > { %v13619_v40 = vld [vmem:[%s21297_s9 + $0xa0] sm:$0xff]  ;;  %v13621_v42 = vld [vmem:[%s21297_s9 + $0xb0] sm:$0xff] }
  0x39   : > { %v13859_v43 = vld [vmem:[%s21295_s7 + $0xc0] sm:$0xff]  ;;  %v13861_v45 = vld [vmem:[%s21295_s7 + $0xd0] sm:$0xff] }
  0x3a   : > { %v13875_v44 = vld [vmem:[%s21297_s9 + $0xc0] sm:$0xff]  ;;  %v13877_v46 = vld [vmem:[%s21297_s9 + $0xd0] sm:$0xff] }
  0x3b   : > { %7640 = vperm.xlu0 %14917, %v7622_v21   ;;  %v13863_v48 = vld [vmem:[%s21295_s7 + $0xe0] sm:$0xff]  ;;  %v13865_v53 = vld [vmem:[%s21295_s7 + $0xf0] sm:$0xff] }
  0x3c   : > { %v13879_v50 = vld [vmem:[%s21297_s9 + $0xe0] sm:$0xff]  ;;  %v13881_v57 = vld [vmem:[%s21297_s9 + $0xf0] sm:$0xff] }
  0x3d   : > { %v15349_v54 = vld [vmem:[%s15337_s20] ss:$4 sm:$0xf]  ;;  %v13909_v12 = vld [vmem:[%s21295_s7 + $0x110] sm:$0xff] }
  0x3e   : > { %v509_v55 = vrot.slane %v15349_v54, %v15340_v51  ;;  %v15355_v56 = vrot.slane %v15349_v54, %v15343_v52  ;;  %v13907_v61 = vld [vmem:[%s21295_s7 + $0x100] sm:$0xff]  ;;  %v13941_v19 = vld [vmem:[%s21297_s9 + $0x110] sm:$0xff] }
  0x3f   : > { %7776 = vperm.xlu0 %14917, %v7758_v22   ;;  %v13939_v4 = vld [vmem:[%s21297_s9 + $0x100] sm:$0xff] }
  0x43   : > { %7650 = vperm.xlu0 %14917, %v7624_v23  }
  0x47   : > { %7786 = vperm.xlu0 %14917, %v7760_v24  }
  0x4b   : > { %7660 = vperm.xlu0 %14917, %v7626_v25  }
  0x4f   : > { %7796 = vperm.xlu0 %14917, %v7762_v26   ;;  %v21310_v26 = vmov 683565275  }
  0x53   : > { %8106 = vperm.xlu0 %14917, %v13519_v27  }
  0x57   : > { %8447 = vperm.xlu0 %14917, %v13551_v28  }
  0x5b   : > { %8116 = vperm.xlu0 %14917, %v13521_v29   ;;  %v21318_v29 = vmov 2475754826  }
  0x5f   : > { %8457 = vperm.xlu0 %14917, %v13553_v30  }
  0x63   : > { %8126 = vperm.xlu0 %14917, %v13523_v31   ;;  %v21315_v31 = vmov 2131351028  }
  0x67   : > { %8467 = vperm.xlu0 %14917, %v13555_v32  }
  0x6b   : > { %8136 = vperm.xlu0 %14917, %v13525_v33   ;;  %v21306_v33 = vmov 2102212464  }
  0x6f   : > { %8477 = vperm.xlu0 %14917, %v13557_v34  }
  0x73   : > { %8787 = vperm.xlu0 %14917, %v13583_v35   ;;  %v21304_v35 = vmov 920167782  }
  0x77   : > { %9127 = vperm.xlu0 %14917, %v13615_v36  }
  0x7b   : > { %8797 = vperm.xlu0 %14917, %v13585_v37  }
  0x7f   : > { %9137 = vperm.xlu0 %14917, %v13617_v38  }
  0x83   : > { %8807 = vperm.xlu0 %14917, %v13587_v39  }
  0x87   : > { %9147 = vperm.xlu0 %14917, %v13619_v40   ;;  %v13911_v40 = vld [vmem:[%s21295_s7 + $0x120] sm:$0xff] }
  0x8b   : > { %8817 = vperm.xlu0 %14917, %v13589_v41  }
  0x8f   : > { %9157 = vperm.xlu0 %14917, %v13621_v42  }
  0x93   : > { %11722 = vperm.xlu0 %14917, %v13859_v43   ;;  %v21302_v43 = vmov 1326507024  }
  0x97   : > { %11844 = vperm.xlu0 %14917, %v13875_v44  }
  0x9b   : > { %11732 = vperm.xlu0 %14917, %v13861_v45  }
  0x9f   : > { %11854 = vperm.xlu0 %14917, %v13877_v46  }
  0xa3   : > { %11742 = vperm.xlu0 %14917, %v13863_v48  }
  0xa7   : > { %11864 = vperm.xlu0 %14917, %v13879_v50  }
  0xab   : > { %11752 = vperm.xlu0 %14917, %v13865_v53  }
  0xae   : > { %v15360_v58 = vpop.permute.xlu0 %493 }
  0xaf   : > { %11874 = vperm.xlu0 %14917, %v13881_v57   ;;  %v15363_v59 = vmul.f32 %v509_v55, %v15360_v58  ;;  %v15367_v60 = vmul.f32 %v15355_v56, %v15360_v58 }
  0xb1   : > { %v634_v62 = vand.u32 2147483647, %v15363_v59  ;;  %v637_v63 = vand.u32 2139095040, %v15363_v59  ;;  %v845_v1 = vand.u32 2139095040, %v15367_v60  ;;  %v842_v24 = vand.u32 2147483647, %v15367_v60 }
  0xb2   : > { %v15374_v0 = vpop.permute.xlu0 %498  ;;  %vm636_vm13 = vcmp.lt.s32.totalorder %v15363_v59, 0 }
  0xb3   : > { %21383 = vst [vmem:[#allocation10_spill] sm:$0xff] %v15374_v0  ;;  %12184 = vperm.xlu0 %14917, %v13907_v61   ;;  %v15378_v2 = vmul.f32 %v509_v55, %v15374_v0  ;;  %v638_v3 = vshrl.u32 %v637_v63, 23  ;;  %v641_v5 = vand.u32 8388607, %v634_v62  ;;  %v846_v6 = vshrl.u32 %v845_v1, 23 }
  0xb4   : > { %vm15525_vm14 = vcmp.le.f32.partialorder %v634_v62, 0.7853982 }
  0xb5   : > { %v13141_v7 = vadd.s32 4294967169, %v638_v3  ;;  %v1050_v8 = vand.u32 2147483647, %v15378_v2  ;;  %v1053_v9 = vand.u32 2139095040, %v15378_v2  ;;  %v13149_v10 = vadd.s32 4294967169, %v846_v6  ;;  %v13943_v3 = vld [vmem:[%s21297_s9 + $0x120] sm:$0xff] }
  0xb6   : > { %v642_v13 = vor.u32 8388608, %v641_v5 }
  0xb7   : > { %12524 = vperm.xlu0 %14917, %v13939_v4   ;;  %v644_v11 = vadd.s32 1, %v13141_v7  ;;  %v1054_v14 = vshrl.u32 %v1053_v9, 23  ;;  %v15392_v15 = vand.u32 8388607, %v1050_v8  ;;  %v852_v16 = vadd.s32 1, %v13149_v10 }
  0xb8   : > { %v15397_v22 = vshll.u32 %v642_v13, 8 }
  0xb9   : > { %vm645_vm0 = vcmp.gt.s32.totalorder %v644_v11, 0  ;;  %v13157_v18 = vadd.s32 4294967169, %v1054_v14  ;;  %v1058_v23 = vor.u32 8388608, %v15392_v15  ;;  %vm853_vm1 = vcmp.gt.s32.totalorder %v852_v16, 0 }
  0xba   : > { %v646_v17 = vsel %vm645_vm0, %v644_v11, 0  ;;  %v15423_v7 = vsel %vm853_vm1, %v852_v16, 0  ;;  %v15429_v15 = vand.u32 8388607, %v842_v24  ;;  %vm1052_vm1 = vcmp.lt.s32.totalorder %v15378_v2, 0 }
  0xbb   : > { %12194 = vperm.xlu0 %14917, %v13909_v12   ;;  %v647_v20 = vshrl.u32 %v646_v17, 5  ;;  %v648_v21 = vand.u32 31, %v646_v17  ;;  %v1060_v28 = vadd.s32 1, %v13157_v18 }
  0xbd   : > { %v649_v25 = vsub.s32 32, %v648_v21  ;;  %v651_v27 = vshll.u32 %v21310_v26, %v648_v21  ;;  %v654_v30 = vshll.u32 %v21318_v29, %v648_v21  ;;  %v657_v32 = vshll.u32 %v21315_v31, %v648_v21 }
  0xbe   : > { %v660_v34 = vshll.u32 %v21306_v33, %v648_v21  ;;  %v663_v36 = vshll.u32 %v21304_v35, %v648_v21  ;;  %vm666_vm2 = vcmp.lt.s32.totalorder %v647_v20, 1  ;;  %vm668_vm3 = vcmp.lt.s32.totalorder %v647_v20, 3 }
  0xbf   : > { %12534 = vperm.xlu0 %14917, %v13941_v19   ;;  %v652_v37 = vshrl.u32 %v21318_v29, %v649_v25  ;;  %v655_v38 = vshrl.u32 %v21315_v31, %v649_v25  ;;  %v658_v39 = vshrl.u32 %v21306_v33, %v649_v25  ;;  %v650_v41 = vshrl.u32 %v21310_v26, %v649_v25 }
  0xc0   : > { %v661_v42 = vshrl.u32 %v21304_v35, %v649_v25  ;;  %v664_v44 = vshrl.u32 %v21302_v43, %v649_v25  ;;  %vm1061_vm4 = vcmp.gt.s32.totalorder %v1060_v28, 0  ;;  %vm669_vm5 = vcmp.lt.s32.totalorder %v647_v20, 4 }
  0xc1   : > { %v653_v45 = vor.u32 %v652_v37, %v651_v27  ;;  %v656_v46 = vor.u32 %v655_v38, %v654_v30  ;;  %v659_v48 = vor.u32 %v658_v39, %v657_v32  ;;  %v1062_v55 = vsel %vm1061_vm4, %v1060_v28, 0 }
  0xc2   : > { %v662_v50 = vor.u32 %v661_v42, %v660_v34  ;;  %v665_v53 = vor.u32 %v664_v44, %v663_v36  ;;  %vm667_vm6 = vcmp.lt.s32.totalorder %v647_v20, 2  ;;  %v1064_v11 = vand.u32 31, %v1062_v55  ;;  %v13913_v20 = vld [vmem:[%s21295_s7 + $0x130] sm:$0xff] }
  0xc3   : > { %12204 = vperm.xlu0 %14917, %v13911_v40   ;;  %v670_v57 = vsel %vm666_vm2, %v650_v41, %v653_v45  ;;  %v671_v61 = vsel %vm669_vm5, %v659_v48, 2102212464  ;;  %v674_v63 = vsel %vm666_vm2, %v653_v45, %v656_v46  ;;  %v678_v1 = vsel %vm666_vm2, %v656_v46, %v659_v48  ;;  %v13945_v42 = vld [vmem:[%s21297_s9 + $0x130] sm:$0xff] }
  0xc4   : > { %v672_v4 = vsel %vm668_vm3, %v656_v46, %v671_v61  ;;  %v675_v5 = vsel %vm669_vm5, %v662_v50, 920167782  ;;  %v679_v6 = vsel %vm669_vm5, %v665_v53, 1326507024  ;;  %v1063_v21 = vshrl.u32 %v1062_v55, 5 }
  0xc5   : > { %v676_v9 = vsel %vm668_vm3, %v659_v48, %v675_v5  ;;  %v680_v10 = vsel %vm668_vm3, %v662_v50, %v679_v6  ;;  %v673_v12 = vsel %vm667_vm6, %v670_v57, %v672_v4  ;;  %v1065_v25 = vsub.s32 32, %v1064_v11  ;;  %v12845_v5 = vld [vmem:[#allocation2] sm:$0x1] }
  0xc6   : > { %v677_v13 = vsel %vm667_vm6, %v674_v63, %v676_v9  ;;  %v681_v14 = vsel %vm667_vm6, %v678_v1, %v680_v10  ;;  %v15443_v27 = vshll.u32 %v1058_v23, 8  ;;  %v15446_v28 = vand.u32 31, %v15423_v7 }
  0xc7   : > { %12544 = vperm.xlu0 %14917, %v13943_v3   ;;  %v15432_v17 = vmul.u32.u64.low %v15397_v22, %v681_v14  ;;  %v15433_v18 = vmul.u32.u64.high %v15397_v22, %v681_v14, %v15432_v17  ;;  %v15436_v16 = vmul.u32.u64.low %v15397_v22, %v677_v13  ;;  %v15437_v19 = vmul.u32.u64.high %v15397_v22, %v677_v13, %v15436_v16 }
  0xc8   : > { %v689_v30 = vmul.u32 %v15397_v22, %v673_v12  ;;  %v1067_v32 = vshll.u32 %v21310_v26, %v1064_v11  ;;  %v1070_v34 = vshll.u32 %v21318_v29, %v1064_v11  ;;  %v1073_v36 = vshll.u32 %v21315_v31, %v1064_v11 }
  0xc9   : > { %v1068_v37 = vshrl.u32 %v21318_v29, %v1065_v25  ;;  %v1071_v38 = vshrl.u32 %v21315_v31, %v1065_v25  ;;  %v1074_v39 = vshrl.u32 %v21306_v33, %v1065_v25  ;;  %v1076_v23 = vshll.u32 %v21306_v33, %v1064_v11 }
  0xca   : > { %vm691_vm7 = vc.u32 %v15433_v18, %v15436_v16  ;;  %v692_v22 = vadd.s32 1, %v15437_v19  ;;  %v1077_v40 = vshrl.u32 %v21304_v35, %v1065_v25  ;;  %v1079_v41 = vshll.u32 %v21304_v35, %v1064_v11 }
  0xcb   : > { %12214 = vperm.xlu0 %14917, %v13913_v20   ;;  %v1069_v44 = vor.u32 %v1068_v37, %v1067_v32  ;;  %v1072_v45 = vor.u32 %v1071_v38, %v1070_v34  ;;  %v1075_v46 = vor.u32 %v1074_v39, %v1073_v36  ;;  %v1080_v48 = vshrl.u32 %v21302_v43, %v1065_v25 }
  0xcc   : > { %v693_v50 = vsel %vm691_vm7, %v692_v22, %v15437_v19  ;;  %v1078_v53 = vor.u32 %v1077_v40, %v1076_v23  ;;  %vm1082_vm8 = vcmp.lt.s32.totalorder %v1063_v21, 1  ;;  %vm1085_vm9 = vcmp.lt.s32.totalorder %v1063_v21, 4 }
  0xcd   : > { %v694_v55 = vadd.s32 %v693_v50, %v689_v30  ;;  %v1081_v57 = vor.u32 %v1080_v48, %v1079_v41  ;;  %vm1084_vm10 = vcmp.lt.s32.totalorder %v1063_v21, 3  ;;  %v1087_v61 = vsel %vm1085_vm9, %v1075_v46, 2102212464 }
  0xce   : > { %v1066_v63 = vshrl.u32 %v21310_v26, %v1065_v25  ;;  %v1090_v1 = vsel %vm1082_vm8, %v1069_v44, %v1072_v45  ;;  %v1091_v3 = vsel %vm1085_vm9, %v1078_v53, 920167782  ;;  %v1094_v4 = vsel %vm1082_vm8, %v1072_v45, %v1075_v46 }
  0xcf   : > { %12554 = vperm.xlu0 %14917, %v13945_v42   ;;  %v695_v6 = vadd.s32 536870912, %v694_v55  ;;  %vm1083_vm11 = vcmp.lt.s32.totalorder %v1063_v21, 2  ;;  %v1092_v9 = vsel %vm1084_vm10, %v1075_v46, %v1091_v3  ;;  %v1095_v10 = vsel %vm1085_vm9, %v1081_v57, 1326507024 }
  0xd0   : > { %v1086_v11 = vsel %vm1082_vm8, %v1066_v63, %v1069_v44  ;;  %v1088_v12 = vsel %vm1084_vm10, %v1072_v45, %v1087_v61  ;;  %v1093_v13 = vsel %vm1083_vm11, %v1090_v1, %v1092_v9  ;;  %v1096_v14 = vsel %vm1084_vm10, %v1078_v53, %v1095_v10 }
  0xd1   : > { %v696_v17 = vshrl.u32 %v695_v6, 30  ;;  %v1097_v19 = vsel %vm1083_vm11, %v1094_v4, %v1096_v14  ;;  %v15471_v20 = vmul.u32.u64.low %v15443_v27, %v1093_v13  ;;  %v15472_v25 = vmul.u32.u64.high %v15443_v27, %v1093_v13, %v15471_v20 }
  0xd2   : > { %v15476_v30 = vmul.u32.u64.low %v15443_v27, %v1097_v19  ;;  %v15477_v32 = vmul.u32.u64.high %v15443_v27, %v1097_v19, %v15476_v30  ;;  %v1089_v36 = vsel %vm1083_vm11, %v1086_v11, %v1088_v12  ;;  %v857_v21 = vsub.s32 32, %v15446_v28 }
  0xd3   : > { %12848 = vperm.xlu0 %14917, %v12845_v5   ;;  %v697_v34 = vshll.u32 %v696_v17, 30  ;;  %v15481_v37 = vsub.s32 0, %v15329_v49  ;;  %v15485_v38 = vmul.f32 %v15355_v56, %v15374_v0  ;;  %v850_v39 = vor.u32 8388608, %v15429_v15 }
  0xd4   : > { %v1108_v22 = vadd.s32 1, %v15472_v25  ;;  %v1105_v40 = vmul.u32 %v15443_v27, %v1089_v36  ;;  %vm1107_vm12 = vc.u32 %v15477_v32, %v15471_v20  ;;  %v869_v44 = vshrl.u32 %v21304_v35, %v857_v21 }
  0xd5   : > { %21384 = vst [vmem:[#allocation11_spill] sm:$0xff] %v15481_v37  ;;  %v15488_v23 = vsub.s32 %v694_v55, %v697_v34  ;;  %v15499_v56 = vrot.slane %v15349_v54, %v15481_v37  ;;  %v15502_v45 = vshll.u32 %v850_v39, 8  ;;  %v1261_v27 = vand.u32 2139095040, %v15485_v38 }
  0xd6   : > { %v1109_v42 = vsel %vm1107_vm12, %v1108_v22, %v15472_v25  ;;  %v860_v48 = vshrl.u32 %v21318_v29, %v857_v21  ;;  %v863_v50 = vshrl.u32 %v21315_v31, %v857_v21  ;;  %v868_v53 = vshll.u32 %v21306_v33, %v15446_v28 }
  0xd7   : > { %v700_v41 = vsub.s32 0, %v15488_v23  ;;  %v1110_v15 = vadd.s32 %v1109_v42, %v1105_v40  ;;  %v15511_v57 = vshrl.u32 %v15423_v7, 5  ;;  %v866_v61 = vshrl.u32 %v21306_v33, %v857_v21 }
  0xd8   : > { %v872_v63 = vshrl.u32 %v21302_v43, %v857_v21  ;;  %v859_v3 = vshll.u32 %v21310_v26, %v15446_v28  ;;  %v862_v4 = vshll.u32 %v21318_v29, %v15446_v28  ;;  %v870_v5 = vor.u32 %v869_v44, %v868_v53 }
  0xd9   : > { %v13142_v46 = vmin.u32 %v700_v41, %v15488_v23  ;;  %v1111_v55 = vadd.s32 536870912, %v1110_v15  ;;  %v720_v6 = vsub.s32 4, %v696_v17  ;;  %v865_v10 = vshll.u32 %v21315_v31, %v15446_v28 }
  0xda   : > { %v871_v7 = vshll.u32 %v21304_v35, %v15446_v28  ;;  %v861_v13 = vor.u32 %v860_v48, %v859_v3  ;;  %v864_v14 = vor.u32 %v863_v50, %v862_v4  ;;  %v1262_v19 = vshrl.u32 %v1261_v27, 23 }
  0xdb   : > { %v702_v1 = vclz %v13142_v46  ;;  %v1112_v9 = vshrl.u32 %v1111_v55, 30  ;;  %v867_v30 = vor.u32 %v866_v61, %v865_v10  ;;  %vm877_vm15 = vcmp.lt.s32.totalorder %v15511_v57, 4 }
  0xdc   : > { %v873_v34 = vor.u32 %v872_v63, %v871_v7  ;;  %v690_v36 = vadd.s32 %v15436_v16, %v15433_v18  ;;  %v858_v28 = vshrl.u32 %v21310_v26, %v857_v21  ;;  %v883_v62 = vsel %vm877_vm15, %v870_v5, 920167782 }
  0xdd   : > { %v13143_v12 = vadd.s32 4294967294, %v702_v1  ;;  %v1113_v25 = vshll.u32 %v1112_v9, 30  ;;  %v721_v22 = vsel %vm636_vm13, %v720_v6, %v696_v17  ;;  %vm874_vm2 = vcmp.lt.s32.totalorder %v15511_v57, 1 }
  0xde   : > { %vm876_vm3 = vcmp.lt.s32.totalorder %v15511_v57, 3  ;;  %v882_v18 = vsel %vm874_vm2, %v861_v13, %v864_v14  ;;  %v886_v17 = vsel %vm874_vm2, %v864_v14, %v867_v30  ;;  %v887_v44 = vsel %vm877_vm15, %v873_v34, 1326507024 }
  0xdf   : > { %vm13144_vm0 = vcmp.lt.s32.totalorder %v13143_v12, 0  ;;  %v15538_v40 = vsub.s32 %v1110_v15, %v1113_v25  ;;  %v884_v21 = vsel %vm876_vm3, %v867_v30, %v883_v62  ;;  %v888_v48 = vsel %vm876_vm3, %v870_v5, %v887_v44 }
  0xe0   : > { %v705_v39 = vsel %vm13144_vm0, 0, %v13143_v12  ;;  %v1136_v53 = vsub.s32 4, %v1112_v9  ;;  %vm875_vm4 = vcmp.lt.s32.totalorder %v15511_v57, 2  ;;  %v879_v55 = vsel %vm877_vm15, %v867_v30, 2102212464 }
  0xe1   : > { %v706_v41 = vsub.s32 32, %v705_v39  ;;  %v710_v42 = vsub.s32 4294967266, %v705_v39  ;;  %v1116_v16 = vsub.s32 0, %v15538_v40  ;;  %v707_v15 = vshll.u32 %v15488_v23, %v705_v39 }
  0xe2   : > { %v885_v1 = vsel %vm875_vm4, %v882_v18, %v884_v21  ;;  %v889_v23 = vsel %vm875_vm4, %v886_v17, %v888_v48  ;;  %v723_v3 = vsel %vm15525_vm14, 0, %v721_v22  ;;  %vm15566_vm5 = vcmp.le.f32.partialorder %v1050_v8, 0.7853982 }
  0xe3   : > { %v708_v27 = vshrl.u32 %v690_v36, %v706_v41  ;;  %v711_v46 = vadd.s32 127, %v710_v42  ;;  %v13158_v50 = vmin.u32 %v1116_v16, %v15538_v40  ;;  %v878_v6 = vsel %vm874_vm2, %v858_v28, %v861_v13 }
  0xe4   : > { %v880_v7 = vsel %vm876_vm3, %v864_v14, %v879_v55  ;;  %v15575_v12 = vmul.u32.u64.low %v15502_v45, %v889_v23  ;;  %v15576_v25 = vmul.u32.u64.high %v15502_v45, %v889_v23, %v15575_v12  ;;  %v13165_v8 = vadd.s32 4294967169, %v1262_v19 }
  0xe5   : > { %v709_v61 = vor.u32 %v708_v27, %v707_v15  ;;  %v712_v63 = vshll.u32 %v711_v46, 23  ;;  %v1118_v5 = vclz %v13158_v50  ;;  %v1137_v22 = vsel %vm1052_vm1, %v1136_v53, %v1112_v9 }
  0xe6   : > { %v15579_v34 = vmul.u32.u64.low %v15502_v45, %v885_v1  ;;  %v15580_v36 = vmul.u32.u64.high %v15502_v45, %v885_v1, %v15579_v34  ;;  %v1258_v13 = vand.u32 2147483647, %v15485_v38  ;;  %v1106_v14 = vadd.s32 %v15471_v20, %v15477_v32 }
  0xe7   : > { %v713_v10 = vor.u32 4788187, %v712_v63  ;;  %v13159_v30 = vadd.s32 4294967294, %v1118_v5  ;;  %v716_v39 = vcvt.s32.f32 %v709_v61  ;;  %v881_v28 = vsel %vm875_vm4, %v878_v6, %v880_v7 }
  0xe8   : > { %v1268_v41 = vadd.s32 1, %v13165_v8  ;;  %v727_v18 = vadd.s32 3, %v723_v3  ;;  %vm899_vm7 = vc.u32 %v15576_v25, %v15579_v34  ;;  %v1139_v9 = vsel %vm15566_vm5, 0, %v1137_v22 }
  0xe9   : > { %v714_v62 = vand.u32 2147483647, %v713_v10  ;;  %vm13160_vm6 = vcmp.lt.s32.totalorder %v13159_v30, 0  ;;  %v900_v17 = vadd.s32 1, %v15580_v36  ;;  %v897_v32 = vmul.u32 %v15502_v45, %v881_v28 }
  0xea   : > { %v1121_v16 = vsel %vm13160_vm6, 0, %v13159_v30  ;;  %vm1269_vm8 = vcmp.gt.s32.totalorder %v1268_v41, 0  ;;  %v15598_v50 = vand.u32 3, %v723_v3  ;;  %v1265_v45 = vand.u32 8388607, %v1258_v13 }
  0xeb   : > { %v717_v42 = vmul.f32 %v716_v39, %v714_v62  ;;  %v1122_v19 = vsub.s32 32, %v1121_v16  ;;  %v1126_v21 = vsub.s32 4294967266, %v1121_v16  ;;  %v1123_v20 = vshll.u32 %v15538_v40, %v1121_v16 }
  0xec   : > { %v901_v27 = vsel %vm899_vm7, %v900_v17, %v15580_v36  ;;  %v1270_v46 = vsel %vm1269_vm8, %v1268_v41, 0  ;;  %v1143_v1 = vadd.s32 3, %v1139_v9  ;;  %v15605_v10 = vand.u32 3, %v727_v18 }
  0xed   : > { %v718_v44 = vxor.u32 2147483648, %v717_v42  ;;  %v1124_v57 = vshrl.u32 %v1106_v14, %v1122_v19  ;;  %v1127_v15 = vadd.s32 127, %v1126_v21  ;;  %v902_v53 = vadd.s32 %v901_v27, %v897_v32 }
  0xee   : > { %v1272_v55 = vand.u32 31, %v1270_v46  ;;  %v15611_v7 = vmul.f32 %v15499_v56, %v15360_v58  ;;  %v15613_v30 = vand.u32 3, %v1139_v9  ;;  %v1266_v36 = vor.u32 8388608, %v1265_v45 }
  0xef   : > { %v719_v48 = vsel %vm636_vm13, %v718_v44, %v717_v42  ;;  %v1125_v40 = vor.u32 %v1124_v57, %v1123_v20  ;;  %v1128_v63 = vshll.u32 %v1127_v15, 23  ;;  %v903_v23 = vadd.s32 536870912, %v902_v53 }
  0xf0   : > { %v722_v61 = vsel %vm15525_vm14, %v15363_v59, %v719_v48  ;;  %v1273_v5 = vsub.s32 32, %v1272_v55  ;;  %v15615_v8 = vand.u32 3, %v1143_v1  ;;  %vm1563_vm9 = vcmp.eq.s32.totalorder %v15598_v50, 2 }
  0xf1   : > { %14921 = vcosq.f32 %v722_v61  ;;  %v1129_v6 = vor.u32 4788187, %v1128_v63  ;;  %v15607_v3 = vshrl.u32 %v903_v23, 30  ;;  %v1132_v12 = vcvt.s32.f32 %v1125_v40 }
  0xf2   : > { %14923 = vsinq.f32 %v722_v61  ;;  %v15619_v62 = vadd.s32 %v15579_v34, %v15576_v25  ;;  %v1276_v22 = vshrl.u32 %v21318_v29, %v1273_v5  ;;  %vm1560_vm10 = vcmp.eq.s32.totalorder %v15598_v50, 0 }
  0xf3   : > { %v1130_v11 = vand.u32 2147483647, %v1129_v6  ;;  %v905_v39 = vshll.u32 %v15607_v3, 30  ;;  %v1279_v28 = vshrl.u32 %v21315_v31, %v1273_v5  ;;  %v1282_v41 = vshrl.u32 %v21306_v33, %v1273_v5 }
  0xf4   : > { %v1285_v42 = vshrl.u32 %v21304_v35, %v1273_v5  ;;  %vm730_vm11 = vcmp.eq.s32.totalorder %v15605_v10, 0  ;;  %vm733_vm12 = vcmp.eq.s32.totalorder %v15605_v10, 2  ;;  %vm1559_vm13 = vcmp.lt.s32.totalorder %v15598_v50, 2 }
  0xf5   : > { %v1133_v14 = vmul.f32 %v1132_v12, %v1130_v11  ;;  %v15630_v25 = vsub.s32 %v902_v53, %v905_v39  ;;  %v15632_v34 = vshrl.u32 %v1270_v46, 5  ;;  %v1275_v18 = vshll.u32 %v21310_v26, %v1272_v55 }
  0xf6   : > { %v1284_v16 = vshll.u32 %v21306_v33, %v1272_v55  ;;  %vm726_vm14 = vweird.f32 %v15363_v59  ;;  %v1278_v21 = vshll.u32 %v21318_v29, %v1272_v55  ;;  %v1281_v9 = vshll.u32 %v21315_v31, %v1272_v55 }
  0xf7   : > { %v1134_v19 = vxor.u32 2147483648, %v1133_v14  ;;  %v15639_v17 = vshll.u32 %v1266_v36, 8  ;;  %v908_v44 = vsub.s32 0, %v15630_v25  ;;  %v1274_v20 = vshrl.u32 %v21310_v26, %v1273_v5 }
  0xf8   : > { %v1277_v32 = vor.u32 %v1276_v22, %v1275_v18  ;;  %v1286_v57 = vor.u32 %v1285_v42, %v1284_v16  ;;  %v1280_v27 = vor.u32 %v1279_v28, %v1278_v21  ;;  %v1283_v46 = vor.u32 %v1282_v41, %v1281_v9 }
  0xf9   : > { %v1135_v15 = vsel %vm1052_vm1, %v1134_v19, %v1133_v14  ;;  %v1288_v48 = vshrl.u32 %v21302_v43, %v1273_v5  ;;  %vm729_vm15 = vcmp.lt.s32.totalorder %v15605_v10, 2  ;;  %v13150_v40 = vmin.u32 %v908_v44, %v15630_v25 }
  0xfa   : > { %v1138_v61 = vsel %vm15566_vm5, %v15378_v2, %v1135_v15  ;;  %v1287_v63 = vshll.u32 %v21304_v35, %v1272_v55  ;;  %vm1290_vm0 = vcmp.lt.s32.totalorder %v15632_v34, 1  ;;  %vm1291_vm1 = vcmp.lt.s32.totalorder %v15632_v34, 2 }
  0xfb   : > { %v14922_v53 = vpop.eup %14921  ;;  %14925 = vcosq.f32 %v1138_v61  ;;  %vm1293_vm2 = vcmp.lt.s32.totalorder %v15632_v34, 4  ;;  %v910_v5 = vclz %v13150_v40  ;;  %vm1292_vm3 = vcmp.lt.s32.totalorder %v15632_v34, 3 }
  0xfc   : > { %v14924_v45 = vpop.eup %14923  ;;  %v734_v1 = vxor.u32 2147483648, %v14922_v53  ;;  %14927 = vsinq.f32 %v1138_v61  ;;  %v1299_v4 = vsel %vm1293_vm2, %v1286_v57, 920167782  ;;  %v1289_v11 = vor.u32 %v1288_v48, %v1287_v63 }
  0xfd   : > { %v731_v23 = vxor.u32 2147483648, %v14924_v45  ;;  %v1298_v55 = vsel %vm1290_vm0, %v1277_v32, %v1280_v27  ;;  %v13151_v36 = vadd.s32 4294967294, %v910_v5  ;;  %v1294_v39 = vsel %vm1290_vm0, %v1274_v20, %v1277_v32 }
  0xfe   : > { %v1565_v6 = vsel %vm1563_vm9, %v734_v1, %v14924_v45  ;;  %v1295_v22 = vsel %vm1293_vm2, %v1283_v46, 2102212464  ;;  %v735_v28 = vsel %vm733_vm12, %v734_v1, %v14924_v45  ;;  %vm1975_vm4 = vcmp.eq.s32.totalorder %v15613_v30, 2 }
  0xff   : > { %v1562_v12 = vsel %vm1560_vm10, %v14922_v53, %v731_v23  ;;  %v732_v14 = vsel %vm730_vm11, %v14922_v53, %v731_v23  ;;  %v1300_v42 = vsel %vm1292_vm3, %v1283_v46, %v1299_v4  ;;  %vm1146_vm5 = vcmp.eq.s32.totalorder %v15615_v8, 0 }
 0x100   : > { %v1566_v41 = vsel %vm1559_vm13, %v1562_v12, %v1565_v6  ;;  %vm1972_vm6 = vcmp.eq.s32.totalorder %v15613_v30, 0  ;;  %vm5603_vm7 = vcmask 1041408   ;;  %vm13152_vm8 = vcmp.lt.s32.totalorder %v13151_v36, 0 }
 0x101   : > { %v1567_v18 = vsel %vm726_vm14, nan, %v1566_v41  ;;  %v1301_v16 = vsel %vm1291_vm1, %v1298_v55, %v1300_v42  ;;  %v1302_v50 = vsel %vm1290_vm0, %v1280_v27, %v1283_v46  ;;  %vm1145_vm9 = vcmp.lt.s32.totalorder %v15615_v8, 2 }
 0x102   : > { %vm1971_vm10 = vcmp.lt.s32.totalorder %v15613_v30, 2  ;;  %v913_v19 = vsel %vm13152_vm8, 0, %v13151_v36  ;;  %v1303_v21 = vsel %vm1293_vm2, %v1289_v11, 1326507024  ;;  %vm1142_vm11 = vweird.f32 %v15378_v2 }
 0x103   : > { %v15690_v9 = vmul.u32.u64.low %v15639_v17, %v1301_v16  ;;  %v15691_v44 = vmul.u32.u64.high %v15639_v17, %v1301_v16, %v15690_v9  ;;  %v914_v20 = vsub.s32 32, %v913_v19  ;;  %v918_v32 = vsub.s32 4294967266, %v913_v19 }
 0x104   : > { %v1296_v15 = vsel %vm1292_vm3, %v1280_v27, %v1295_v22  ;;  %v1304_v46 = vsel %vm1292_vm3, %v1286_v57, %v1303_v21  ;;  %v736_v48 = vsel %vm729_vm15, %v732_v14, %v735_v28  ;;  %vm844_vm12 = vcmp.lt.s32.totalorder %v15367_v60, 0 }
 0x105   : > { %v915_v53 = vshll.u32 %v15630_v25, %v913_v19  ;;  %v1305_v61 = vsel %vm1291_vm1, %v1302_v50, %v1304_v46  ;;  %v533_v40 = vand.u32 2139095040, %v15611_v7  ;;  %v916_v63 = vshrl.u32 %v15619_v62, %v914_v20  ;;  %v14926_v57 = vpop.eup %14925  ;;  %v20488_v20 = vld [vmem:[%s21293_s5 + $0x168] sm:$0xff] }
 0x106   : > { %v919_v45 = vadd.s32 127, %v918_v32  ;;  %v15708_v27 = vmul.u32.u64.low %v15639_v17, %v1305_v61  ;;  %v15709_v1 = vmul.u32.u64.high %v15639_v17, %v1305_v61, %v15708_v27  ;;  %vm1149_vm13 = vcmp.eq.s32.totalorder %v15615_v8, 2  ;;  %v14928_v5 = vpop.eup %14927 }
 0x107   : > { %v1297_v10 = vsel %vm1291_vm1, %v1294_v39, %v1296_v15  ;;  %v15716_v25 = vmul.f32 %v15499_v56, %v15374_v0  ;;  %v530_v23 = vand.u32 2147483647, %v15611_v7  ;;  %v1150_v4 = vxor.u32 2147483648, %v14926_v57 }
 0x108   : > { %v917_v62 = vor.u32 %v916_v63, %v915_v53  ;;  %v920_v6 = vshll.u32 %v919_v45, 23  ;;  %v1316_v11 = vadd.s32 1, %v15691_v44  ;;  %v737_v55 = vsel %vm726_vm14, nan, %v736_v48 }
 0x109   : > { %v1147_v12 = vxor.u32 2147483648, %v14928_v5  ;;  %v928_v36 = vsub.s32 4, %v15607_v3  ;;  %v534_v34 = vshrl.u32 %v533_v40, 23  ;;  %v1151_v39 = vsel %vm1149_vm13, %v1150_v4, %v14928_v5 }
 0x10a   : > { %v1977_v56 = vsel %vm1975_vm4, %v1150_v4, %v14928_v5  ;;  %v921_v22 = vor.u32 4788187, %v920_v6  ;;  %v1313_v14 = vmul.u32 %v15639_v17, %v1297_v10  ;;  %v924_v42 = vcvt.s32.f32 %v917_v62 }
 0x10b   : > { %v1148_v28 = vsel %vm1146_vm5, %v14926_v57, %v1147_v12  ;;  %v1974_v41 = vsel %vm1972_vm6, %v14926_v57, %v1147_v12  ;;  %vm1315_vm14 = vc.u32 %v15709_v1, %v15690_v9  ;;  %vm15092_vm15 = vmmov 1  }
 0x10c   : > { %v1152_v59 = vsel %vm1145_vm9, %v1148_v28, %v1151_v39  ;;  %v1978_v16 = vsel %vm1971_vm10, %v1974_v41, %v1977_v56  ;;  %v922_v50 = vand.u32 2147483647, %v921_v22  ;;  %v1317_v19 = vsel %vm1315_vm14, %v1316_v11, %v15691_v44  ;;  %vm15742_vm0 = vmpackc.low %vm5603_vm7, %vm15092_vm15 }
 0x10d   : > { %v1153_v17 = vsel %vm1142_vm11, nan, %v1152_v59  ;;  %v1979_v21 = vsel %vm1142_vm11, nan, %v1978_v16  ;;  %v1318_v8 = vadd.s32 %v1317_v19, %v1313_v14  ;;  %v13137_v32 = vadd.s32 4294967169, %v534_v34 }
 0x10e   : > { %v15746_v15 = vpack.c.bf16 %v1153_v17, %v737_v55  ;;  %v15748_v30 = vpack.c.bf16 %v1979_v21, %v1567_v18  ;;  %v925_v46 = vmul.f32 %v924_v42, %v922_v50  ;;  %v929_v44 = vsel %vm844_vm12, %v928_v36, %v15607_v3 }
 0x10f   : > { %v1319_v48 = vadd.s32 536870912, %v1318_v8  ;;  %v540_v2 = vadd.s32 1, %v13137_v32  ;;  %vm843_vm1 = vcmp.le.f32.partialorder %v842_v24, 0.7853982  ;;  %v537_v63 = vand.u32 8388607, %v530_v23 }
 0x110   : > { %21391 = vst [vmem:[#allocation12_spill] sm:$0xff] %v15746_v15  ;;  %21392 = vst [vmem:[#allocation13_spill] sm:$0xff] %v15748_v30  ;;  %13974 = vmatprep.subr.msk.bf16.mxu0 %vm15742_vm0, %v15746_v15  ;;  %v926_v53 = vxor.u32 2147483648, %v925_v46  ;;  %v931_v61 = vsel %vm843_vm1, 0, %v929_v44  ;;  %v949_v45 = vand.u32 2139095040, %v15716_v25  ;;  %v15765_v10 = vsub.s32 2, %v15329_v49 }
 0x111   : > { %v1320_v40 = vshrl.u32 %v1319_v48, 30  ;;  %vm541_vm2 = vcmp.gt.s32.totalorder %v540_v2, 0  ;;  %v935_v24 = vadd.s32 3, %v931_v61  ;;  %v15769_v6 = vand.u32 3, %v931_v61 }
 0x112   : > { %v927_v18 = vsel %vm844_vm12, %v926_v53, %v925_v46  ;;  %v542_v3 = vsel %vm541_vm2, %v540_v2, 0  ;;  %21393 = vst [vmem:[#allocation14_spill] sm:$0xff] %v15765_v10  ;;  %v538_v11 = vor.u32 8388608, %v537_v63  ;;  %v946_v12 = vand.u32 2147483647, %v15716_v25 }
 0x113   : > { %v930_v27 = vsel %vm843_vm1, %v15367_v60, %v927_v18  ;;  %v1321_v57 = vshll.u32 %v1320_v40, 30  ;;  %v544_v5 = vand.u32 31, %v542_v3  ;;  %v1344_v62 = vsub.s32 4, %v1320_v40 }
 0x114   : > { %14929 = vcosq.f32 %v930_v27  ;;  %v950_v36 = vshrl.u32 %v949_v45, 23  ;;  %v15773_v39 = vshrl.u32 %v542_v3, 5  ;;  %v15777_v56 = vrot.slane %v15349_v54, %v15765_v10 }
 0x115   : > { %14931 = vsinq.f32 %v930_v27  ;;  %v15767_v4 = vsub.s32 %v1318_v8, %v1321_v57  ;;  %v545_v55 = vsub.s32 32, %v544_v5  ;;  %v15779_v22 = vand.u32 3, %v935_v24 }
 0x116   : > { %vm15783_vm3 = vcmp.le.f32.partialorder %v1258_v13, 0.7853982  ;;  %vm1260_vm4 = vcmp.lt.s32.totalorder %v15485_v38, 0  ;;  %v1314_v28 = vadd.s32 %v15690_v9, %v15709_v1  ;;  %vm1766_vm5 = vcmp.eq.s32.totalorder %v15769_v6, 0 }
 0x117   : > { %v1324_v34 = vsub.s32 0, %v15767_v4  ;;  %v1345_v42 = vsel %vm1260_vm4, %v1344_v62, %v1320_v40  ;;  %vm1769_vm6 = vcmp.eq.s32.totalorder %v15769_v6, 2  ;;  %v548_v54 = vshrl.u32 %v21318_v29, %v545_v55 }
 0x118   : > { %v551_v13 = vshrl.u32 %v21315_v31, %v545_v55  ;;  %vm1765_vm7 = vcmp.lt.s32.totalorder %v15769_v6, 2  ;;  %v554_v59 = vshrl.u32 %v21306_v33, %v545_v55  ;;  %v15799_v16 = vshll.u32 %v538_v11, 8 }
 0x119   : > { %v13166_v41 = vmin.u32 %v1324_v34, %v15767_v4  ;;  %v13153_v9 = vadd.s32 4294967169, %v950_v36  ;;  %v15803_v1 = vand.u32 8388607, %v946_v12  ;;  %vm934_vm8 = vweird.f32 %v15367_v60 }
 0x11a   : > { %v547_v19 = vshll.u32 %v21310_v26, %v544_v5  ;;  %v550_v17 = vshll.u32 %v21318_v29, %v544_v5  ;;  %vm562_vm9 = vcmp.lt.s32.totalorder %v15773_v39, 1  ;;  %v15811_v21 = vsel %vm15783_vm3, 0, %v1345_v42 }
 0x11b   : > { %v1326_v50 = vclz %v13166_v41  ;;  %v553_v8 = vshll.u32 %v21315_v31, %v544_v5  ;;  %v556_v32 = vshll.u32 %v21306_v33, %v544_v5  ;;  %v557_v46 = vshrl.u32 %v21304_v35, %v545_v55 }
 0x11c   : > { %v549_v48 = vor.u32 %v548_v54, %v547_v19  ;;  %v552_v2 = vor.u32 %v551_v13, %v550_v17  ;;  %v560_v53 = vshrl.u32 %v21302_v43, %v545_v55  ;;  %v546_v40 = vshrl.u32 %v21310_v26, %v545_v55 }
 0x11d   : > { %v13167_v44 = vadd.s32 4294967294, %v1326_v50  ;;  %v555_v18 = vor.u32 %v554_v59, %v553_v8  ;;  %v558_v63 = vor.u32 %v557_v46, %v556_v32  ;;  %v559_v3 = vshll.u32 %v21304_v35, %v544_v5 }
 0x11e   : > { %v15817_v61 = vpop.eup %14929  ;;  %vm563_vm11 = vcmp.lt.s32.totalorder %v15773_v39, 2  ;;  %vm565_vm12 = vcmp.lt.s32.totalorder %v15773_v39, 4  ;;  %vm564_vm13 = vcmp.lt.s32.totalorder %v15773_v39, 3  ;;  %v570_v36 = vsel %vm562_vm9, %v549_v48, %v552_v2 }
 0x11f   : > { %v15821_v45 = vpop.eup %14931  ;;  %v942_v27 = vxor.u32 2147483648, %v15817_v61  ;;  %vm13168_vm10 = vcmp.lt.s32.totalorder %v13167_v44, 0  ;;  %v571_v62 = vsel %vm565_vm12, %v558_v63, 920167782  ;;  %v561_v5 = vor.u32 %v560_v53, %v559_v3 }
 0x120   : > { %v939_v57 = vxor.u32 2147483648, %v15821_v45  ;;  %v1329_v24 = vsel %vm13168_vm10, 0, %v13167_v44  ;;  %v567_v42 = vsel %vm565_vm12, %v555_v18, 2102212464  ;;  %v572_v54 = vsel %vm564_vm13, %v555_v18, %v571_v62 }
 0x121   : > { %v1330_v11 = vsub.s32 32, %v1329_v24  ;;  %v1334_v55 = vsub.s32 4294967266, %v1329_v24  ;;  %v1771_v41 = vsel %vm1769_vm6, %v942_v27, %v15821_v45  ;;  %v1331_v13 = vshll.u32 %v15767_v4, %v1329_v24 }
 0x122   : > { %v1768_v34 = vsel %vm1766_vm5, %v15817_v61, %v939_v57  ;;  %v566_v8 = vsel %vm562_vm9, %v546_v40, %v549_v48  ;;  %v573_v32 = vsel %vm563_vm11, %v570_v36, %v572_v54  ;;  %v574_v46 = vsel %vm562_vm9, %v552_v2, %v555_v18 }
 0x123   : > { %v1332_v59 = vshrl.u32 %v1314_v28, %v1330_v11  ;;  %v1335_v50 = vadd.s32 127, %v1334_v55  ;;  %v1772_v19 = vsel %vm1765_vm7, %v1768_v34, %v1771_v41  ;;  %v568_v28 = vsel %vm564_vm13, %v552_v2, %v567_v42 }
 0x124   : > { %v15851_v17 = vsel %vm934_vm8, nan, %v1772_v19  ;;  %v575_v6 = vsel %vm565_vm12, %v561_v5, 1326507024  ;;  %v15866_v3 = vmul.u32.u64.low %v15799_v16, %v573_v32  ;;  %v15867_v48 = vmul.u32.u64.high %v15799_v16, %v573_v32, %v15866_v3 }
 0x125   : > { %v1333_v44 = vor.u32 %v1332_v59, %v1331_v13  ;;  %v1336_v4 = vshll.u32 %v1335_v50, 23  ;;  %v576_v53 = vsel %vm564_vm13, %v558_v63, %v575_v6  ;;  %v956_v40 = vadd.s32 1, %v13153_v9 }
 0x126   : > { %v1351_v18 = vadd.s32 3, %v15811_v21  ;;  %v577_v62 = vsel %vm563_vm11, %v574_v46, %v576_v53  ;;  %v954_v2 = vor.u32 8388608, %v15803_v1  ;;  %v15880_v63 = vmul.f32 %v15777_v56, %v15360_v58 }
 0x127   : > { %v1337_v24 = vor.u32 4788187, %v1336_v4  ;;  %v15875_v11 = vmul.u32.u64.low %v15799_v16, %v577_v62  ;;  %v15876_v55 = vmul.u32.u64.high %v15799_v16, %v577_v62, %v15875_v11  ;;  %vm957_vm14 = vcmp.gt.s32.totalorder %v956_v40, 0 }
 0x128   : > { %v1340_v36 = vcvt.s32.f32 %v1333_v44  ;;  %v569_v9 = vsel %vm563_vm11, %v566_v8, %v568_v28  ;;  %v958_v34 = vsel %vm957_vm14, %v956_v40, 0  ;;  %vm938_vm15 = vcmp.eq.s32.totalorder %v15779_v22, 0 }
 0x129   : > { %v1338_v5 = vand.u32 2147483647, %v1337_v24  ;;  %vm941_vm1 = vcmp.eq.s32.totalorder %v15779_v22, 2  ;;  %v588_v1 = vadd.s32 1, %v15867_v48  ;;  %v960_v41 = vand.u32 31, %v958_v34 }
 0x12a   : > { %v15887_v54 = vand.u32 3, %v1351_v18  ;;  %v15890_v13 = vand.u32 3, %v15811_v21  ;;  %v15892_v59 = vshll.u32 %v954_v2, 8  ;;  %v585_v50 = vmul.u32 %v15799_v16, %v569_v9 }
 0x12b   : > { %v1341_v42 = vmul.f32 %v1340_v36, %v1338_v5  ;;  %vm587_vm2 = vc.u32 %v15876_v55, %v15866_v3  ;;  %v961_v39 = vsub.s32 32, %v960_v41  ;;  %v741_v19 = vand.u32 2139095040, %v15880_v63 }
 0x12c   : > { %v589_v32 = vsel %vm587_vm2, %v588_v1, %v15867_v48  ;;  %v963_v46 = vshll.u32 %v21310_v26, %v960_v41  ;;  %v966_v44 = vshll.u32 %v21318_v29, %v960_v41  ;;  %vm937_vm5 = vcmp.lt.s32.totalorder %v15779_v22, 2 }
 0x12d   : > { %v1342_v8 = vxor.u32 2147483648, %v1341_v42  ;;  %v590_v21 = vadd.s32 %v589_v32, %v585_v50  ;;  %v964_v4 = vshrl.u32 %v21318_v29, %v961_v39  ;;  %v967_v16 = vshrl.u32 %v21315_v31, %v961_v39 }
 0x12e   : > { %v969_v28 = vshll.u32 %v21315_v31, %v960_v41  ;;  %v970_v53 = vshrl.u32 %v21306_v33, %v961_v39  ;;  %v972_v48 = vshll.u32 %v21306_v33, %v960_v41  ;;  %v973_v40 = vshrl.u32 %v21304_v35, %v961_v39 }
 0x12f   : > { %v1343_v6 = vsel %vm1260_vm4, %v1342_v8, %v1341_v42  ;;  %v591_v18 = vadd.s32 536870912, %v590_v21  ;;  %v959_v62 = vshrl.u32 %v958_v34, 5  ;;  %v965_v2 = vor.u32 %v964_v4, %v963_v46 }
 0x130   : > { %v1346_v24 = vsel %vm15783_vm3, %v15485_v38, %v1343_v6  ;;  %v968_v11 = vor.u32 %v967_v16, %v966_v44  ;;  %v971_v5 = vor.u32 %v970_v53, %v969_v28  ;;  %v974_v36 = vor.u32 %v973_v40, %v972_v48 }
 0x131   : > { %14933 = vcosq.f32 %v1346_v24  ;;  %v15913_v9 = vshrl.u32 %v591_v18, 30  ;;  %v975_v1 = vshll.u32 %v21304_v35, %v960_v41  ;;  %v976_v42 = vshrl.u32 %v21302_v43, %v961_v39 }
 0x132   : > { %14935 = vsinq.f32 %v1346_v24  ;;  %v940_v14 = vsel %vm938_vm15, %v15817_v61, %v939_v57  ;;  %v943_v34 = vsel %vm941_vm1, %v942_v27, %v15821_v45  ;;  %v962_v50 = vshrl.u32 %v21310_v26, %v961_v39 }
 0x133   : > { %v742_v8 = vshrl.u32 %v741_v19, 23  ;;  %v593_v32 = vshll.u32 %v15913_v9, 30  ;;  %v977_v41 = vor.u32 %v976_v42, %v975_v1  ;;  %vm978_vm3 = vcmp.lt.s32.totalorder %v959_v62, 1 }
 0x134   : > { %vm981_vm4 = vcmp.lt.s32.totalorder %v959_v62, 4  ;;  %vm980_vm6 = vcmp.lt.s32.totalorder %v959_v62, 3  ;;  %v986_v44 = vsel %vm978_vm3, %v965_v2, %v968_v11  ;;  %vm979_vm7 = vcmp.lt.s32.totalorder %v959_v62, 2 }
 0x135   : > { %v983_v46 = vsel %vm981_vm4, %v971_v5, 2102212464  ;;  %v987_v4 = vsel %vm981_vm4, %v974_v36, 920167782  ;;  %v15930_v57 = vsub.s32 %v590_v21, %v593_v32  ;;  %v990_v45 = vsel %vm978_vm3, %v968_v11, %v971_v5 }
 0x136   : > { %v988_v61 = vsel %vm980_vm6, %v971_v5, %v987_v4  ;;  %v944_v27 = vsel %vm937_vm5, %v940_v14, %v943_v34  ;;  %vm2177_vm9 = vcmp.lt.s32.totalorder %v15890_v13, 2  ;;  %v991_v19 = vsel %vm981_vm4, %v977_v41, 1326507024 }
 0x137   : > { %v989_v39 = vsel %vm979_vm7, %v986_v44, %v988_v61  ;;  %vm1350_vm10 = vweird.f32 %v15485_v38  ;;  %v596_v16 = vsub.s32 0, %v15930_v57  ;;  %v982_v21 = vsel %vm978_vm3, %v962_v50, %v965_v2 }
 0x138   : > { %v984_v28 = vsel %vm980_vm6, %v968_v11, %v983_v46  ;;  %v992_v6 = vsel %vm980_vm6, %v974_v36, %v991_v19  ;;  %v15945_v22 = vmul.u32.u64.low %v15892_v59, %v989_v39  ;;  %v15946_v48 = vmul.u32.u64.high %v15892_v59, %v989_v39, %v15945_v22 }
 0x139   : > { %v993_v53 = vsel %vm979_vm7, %v990_v45, %v992_v6  ;;  %v13145_v40 = vadd.s32 4294967169, %v742_v8  ;;  %vm2178_vm11 = vcmp.eq.s32.totalorder %v15890_v13, 0  ;;  %v13138_v24 = vmin.u32 %v596_v16, %v15930_v57 }
 0x13a   : > { %v15952_v18 = vmul.u32.u64.low %v15892_v59, %v993_v53  ;;  %v15953_v5 = vmul.u32.u64.high %v15892_v59, %v993_v53, %v15952_v18  ;;  %vm1353_vm12 = vcmp.lt.s32.totalorder %v15887_v54, 2  ;;  %vm1354_vm13 = vcmp.eq.s32.totalorder %v15887_v54, 0 }
 0x13b   : > { %v14934_v2 = vpop.eup %14933  ;;  %vm2181_vm14 = vcmp.eq.s32.totalorder %v15890_v13, 2  ;;  %v985_v11 = vsel %vm979_vm7, %v982_v21, %v984_v28  ;;  %v945_v1 = vsel %vm934_vm8, nan, %v944_v27  ;;  %vm1357_vm15 = vcmp.eq.s32.totalorder %v15887_v54, 2 }
 0x13c   : > { %v14936_v36 = vpop.eup %14935  ;;  %v1358_v42 = vxor.u32 2147483648, %v14934_v2  ;;  %v598_v14 = vclz %v13138_v24  ;;  %v1004_v50 = vadd.s32 1, %v15946_v48  ;;  %v738_v8 = vand.u32 2147483647, %v15880_v63 }
 0x13d   : > { %v1355_v34 = vxor.u32 2147483648, %v14936_v36  ;;  %v748_v32 = vadd.s32 1, %v13145_v40  ;;  %v1001_v62 = vmul.u32 %v15892_v59, %v985_v11  ;;  %vm1003_vm8 = vc.u32 %v15953_v5, %v15945_v22 }
 0x13e   : > { %v1359_v41 = vsel %vm1357_vm15, %v1358_v42, %v14936_v36  ;;  %v2183_v46 = vsel %vm2181_vm14, %v1358_v42, %v14936_v36  ;;  %v13139_v44 = vadd.s32 4294967294, %v598_v14  ;;  %v1005_v27 = vsel %vm1003_vm8, %v1004_v50, %v15946_v48 }
 0x13f   : > { %v1356_v4 = vsel %vm1354_vm13, %v14934_v2, %v1355_v34  ;;  %v2180_v60 = vsel %vm2178_vm11, %v14934_v2, %v1355_v34  ;;  %vm749_vm1 = vcmp.gt.s32.totalorder %v748_v32, 0  ;;  %v1006_v16 = vadd.s32 %v1005_v27, %v1001_v62 }
 0x140   : > { %v1360_v61 = vsel %vm1353_vm12, %v1356_v4, %v1359_v41  ;;  %v2184_v45 = vsel %vm2177_vm9, %v2180_v60, %v2183_v46  ;;  %vm13140_vm2 = vcmp.lt.s32.totalorder %v13139_v44, 0  ;;  %v586_v54 = vadd.s32 %v15866_v3, %v15876_v55 }
 0x141   : > { %v1361_v59 = vsel %vm1350_vm10, nan, %v1360_v61  ;;  %v2185_v39 = vsel %vm1350_vm10, nan, %v2184_v45  ;;  %v601_v19 = vsel %vm13140_vm2, 0, %v13139_v44  ;;  %v1007_v53 = vadd.s32 536870912, %v1006_v16 }
 0x142   : > { %v15980_v21 = vpack.c.bf16 %v1361_v59, %v945_v1  ;;  %v15983_v28 = vpack.c.bf16 %v2185_v39, %v15851_v17  ;;  %v602_v13 = vsub.s32 32, %v601_v19  ;;  %v606_v6 = vsub.s32 4294967266, %v601_v19 }
 0x143   : > { %v750_v48 = vsel %vm749_vm1, %v748_v32, 0  ;;  %v603_v24 = vshll.u32 %v15930_v57, %v601_v19  ;;  %v15991_v2 = vshrl.u32 %v1007_v53, 30  ;;  %v745_v17 = vand.u32 8388607, %v738_v8 }
 0x144   : > { %21396 = vst [vmem:[#allocation15_spill] sm:$0xff] %v15980_v21  ;;  %21397 = vst [vmem:[#allocation16_spill] sm:$0xff] %v15983_v28  ;;  %13980 = vmatprep.subr.msk.bf16.mxu1 %vm15742_vm0, %v15980_v21  ;;  %v604_v38 = vshrl.u32 %v586_v54, %v602_v13  ;;  %v752_v40 = vand.u32 31, %v750_v48  ;;  %v607_v18 = vadd.s32 127, %v606_v6  ;;  %vm532_vm5 = vcmp.lt.s32.totalorder %v15611_v7, 0 }
 0x145   : > { %v1009_v36 = vshll.u32 %v15991_v2, 30  ;;  %v616_v1 = vsub.s32 4, %v15913_v9  ;;  %v16000_v42 = vmul.f32 %v15777_v56, %v15374_v0  ;;  %vm16004_vm3 = vcmp.le.f32.partialorder %v530_v23, 0.7853982 }
 0x146   : > { %v753_v11 = vsub.s32 32, %v752_v40  ;;  %v605_v3 = vor.u32 %v604_v38, %v603_v24  ;;  %v608_v55 = vshll.u32 %v607_v18, 23  ;;  %v746_v50 = vor.u32 8388608, %v745_v17 }
 0x147   : > { %v16008_v34 = vsub.s32 %v1006_v16, %v1009_v36  ;;  %v16011_v41 = vshrl.u32 %v750_v48, 5  ;;  %v755_v46 = vshll.u32 %v21310_v26, %v752_v40  ;;  %v758_v60 = vshll.u32 %v21318_v29, %v752_v40 }
 0x148   : > { %v609_v14 = vor.u32 4788187, %v608_v55  ;;  %v756_v32 = vshrl.u32 %v21318_v29, %v753_v11  ;;  %v759_v44 = vshrl.u32 %v21315_v31, %v753_v11  ;;  %v762_v56 = vshrl.u32 %v21306_v33, %v753_v11 }
 0x149   : > { %v612_v4 = vcvt.s32.f32 %v605_v3  ;;  %v1012_v23 = vsub.s32 0, %v16008_v34  ;;  %v761_v61 = vshll.u32 %v21315_v31, %v752_v40  ;;  %v764_v45 = vshll.u32 %v21306_v33, %v752_v40 }
 0x14a   : > { %v610_v62 = vand.u32 2147483647, %v609_v14  ;;  %v765_v27 = vshrl.u32 %v21304_v35, %v753_v11  ;;  %v768_v59 = vshrl.u32 %v21302_v43, %v753_v11  ;;  %v617_v19 = vsel %vm532_vm5, %v616_v1, %v15913_v9 }
 0x14b   : > { %v13154_v16 = vmin.u32 %v1012_v23, %v16008_v34  ;;  %v757_v54 = vor.u32 %v756_v32, %v755_v46  ;;  %v760_v13 = vor.u32 %v759_v44, %v758_v60  ;;  %v763_v6 = vor.u32 %v762_v56, %v761_v61 }
 0x14c   : > { %v613_v39 = vmul.f32 %v612_v4, %v610_v62  ;;  %v766_v53 = vor.u32 %v765_v27, %v764_v45  ;;  %v767_v48 = vshll.u32 %v21304_v35, %v752_v40  ;;  %vm948_vm4 = vcmp.lt.s32.totalorder %v15716_v25, 0 }
 0x14d   : > { %v1002_v24 = vadd.s32 %v15945_v22, %v15953_v5  ;;  %v1014_v18 = vclz %v13154_v16  ;;  %v16030_v17 = vshll.u32 %v746_v50, 8  ;;  %v754_v3 = vshrl.u32 %v21310_v26, %v753_v11 }
 0x14e   : > { %v614_v38 = vxor.u32 2147483648, %v613_v39  ;;  %v769_v9 = vor.u32 %v768_v59, %v767_v48  ;;  %vm770_vm6 = vcmp.lt.s32.totalorder %v16011_v41, 1  ;;  %v1157_v55 = vand.u32 2139095040, %v16000_v42 }
 0x14f   : > { %v13155_v40 = vadd.s32 4294967294, %v1014_v18  ;;  %vm772_vm7 = vcmp.lt.s32.totalorder %v16011_v41, 3  ;;  %vm773_vm9 = vcmp.lt.s32.totalorder %v16011_v41, 4  ;;  %v778_v11 = vsel %vm770_vm6, %v757_v54, %v760_v13 }
 0x150   : > { %v615_v36 = vsel %vm532_vm5, %v614_v38, %v613_v39  ;;  %v775_v5 = vsel %vm773_vm9, %v763_v6, 2102212464  ;;  %v779_v1 = vsel %vm773_vm9, %v766_v53, 920167782  ;;  %v1032_v14 = vsub.s32 4, %v15991_v2 }
 0x151   : > { %v618_v22 = vsel %vm16004_vm3, %v15611_v7, %v615_v36  ;;  %vm13156_vm10 = vcmp.lt.s32.totalorder %v13155_v40, 0  ;;  %vm771_vm11 = vcmp.lt.s32.totalorder %v16011_v41, 2  ;;  %v780_v50 = vsel %vm772_vm7, %v763_v6, %v779_v1 }
 0x152   : > { %14937 = vcosq.f32 %v618_v22  ;;  %v1017_v32 = vsel %vm13156_vm10, 0, %v13155_v40  ;;  %v774_v46 = vsel %vm770_vm6, %v754_v3, %v757_v54  ;;  %v781_v44 = vsel %vm771_vm11, %v778_v11, %v780_v50 }
 0x153   : > { %v1018_v56 = vsub.s32 32, %v1017_v32  ;;  %v1022_v62 = vsub.s32 4294967266, %v1017_v32  ;;  %v776_v4 = vsel %vm772_vm7, %v760_v13, %v775_v5  ;;  %v782_v23 = vsel %vm770_vm6, %v760_v13, %v763_v6 }
 0x154   : > { %v1019_v60 = vshll.u32 %v16008_v34, %v1017_v32  ;;  %v783_v61 = vsel %vm773_vm9, %v769_v9, 1326507024  ;;  %v16064_v45 = vmul.u32.u64.low %v16030_v17, %v781_v44  ;;  %v16065_v27 = vmul.u32.u64.high %v16030_v17, %v781_v44, %v16064_v45 }
 0x155   : > { %v1020_v59 = vshrl.u32 %v1002_v24, %v1018_v56  ;;  %v1023_v39 = vadd.s32 127, %v1022_v62  ;;  %v784_v16 = vsel %vm772_vm7, %v766_v53, %v783_v61  ;;  %v1158_v54 = vshrl.u32 %v1157_v55, 23 }
 0x156   : > { %v16072_v48 = vsel %vm16004_vm3, 0, %v617_v19  ;;  %v1033_v34 = vsel %vm948_vm4, %v1032_v14, %v15991_v2  ;;  %v785_v13 = vsel %vm771_vm11, %v782_v23, %v784_v16  ;;  %v21312_v3 = vmov 0.0  }
 0x157   : > { %v1021_v6 = vor.u32 %v1020_v59, %v1019_v60  ;;  %v1024_v38 = vshll.u32 %v1023_v39, 23  ;;  %v16080_v24 = vmul.u32.u64.low %v16030_v17, %v785_v13  ;;  %v16081_v18 = vmul.u32.u64.high %v16030_v17, %v785_v13, %v16080_v24  ;;  %5680 = vmatprep.mubr.f32.mxu0 %v21312_v3  ;;  %5793 = vmatprep.mubr.f32.mxu1 %v21312_v3 }
 0x158   : > { %v777_v57 = vsel %vm771_vm11, %v774_v46, %v776_v4  ;;  %v796_v19 = vadd.s32 1, %v16065_v27  ;;  %v13161_v2 = vadd.s32 4294967169, %v1158_v54  ;;  %vm16090_vm12 = vcmp.le.f32.partialorder %v946_v12, 0.7853982 }
 0x159   : > { %v1025_v9 = vor.u32 4788187, %v1024_v38  ;;  %v1154_v55 = vand.u32 2147483647, %v16000_v42  ;;  %14939 = vsinq.f32 %v618_v22  ;;  %v623_v36 = vadd.s32 3, %v16072_v48 }
 0x15a   : > { %v16098_v40 = vsel %vm16090_vm12, 0, %v1033_v34  ;;  %v1164_v41 = vadd.s32 1, %v13161_v2  ;;  %v1028_v11 = vcvt.s32.f32 %v1021_v6  ;;  %v793_v1 = vmul.u32 %v16030_v17, %v777_v57 }
 0x15b   : > { %v1026_v5 = vand.u32 2147483647, %v1025_v9  ;;  %vm795_vm13 = vc.u32 %v16081_v18, %v16064_v45  ;;  %v1039_v50 = vadd.s32 3, %v16098_v40  ;;  %v16107_v44 = vand.u32 3, %v623_v36  ;;  %v16135_v36 = vld [vmem:[%s15337_s20] sm:$0x77] }
 0x15c   : > { %v16103_v12 = vpop.eup %14937  ;;  %v797_v14 = vsel %vm795_vm13, %v796_v19, %v16065_v27  ;;  %vm1165_vm14 = vcmp.gt.s32.totalorder %v1164_v41, 0  ;;  %v1161_v56 = vand.u32 8388607, %v1154_v55  ;;  %vm622_vm7 = vweird.f32 %v15611_v7 }
 0x15d   : > { %v1029_v22 = vmul.f32 %v1028_v11, %v1026_v5  ;;  %v798_v32 = vadd.s32 %v797_v14, %v793_v1  ;;  %v1166_v46 = vsel %vm1165_vm14, %v1164_v41, 0  ;;  %v16113_v61 = vand.u32 3, %v1039_v50 }
 0x15e   : > { %v1168_v62 = vand.u32 31, %v1166_v46  ;;  %vm626_vm15 = vcmp.eq.s32.totalorder %v16107_v44, 0  ;;  %v630_v59 = vxor.u32 2147483648, %v16103_v12  ;;  %v1162_v16 = vor.u32 8388608, %v1161_v56 }
 0x15f   : > { %v1030_v17 = vxor.u32 2147483648, %v1029_v22  ;;  %v799_v4 = vadd.s32 536870912, %v798_v32  ;;  %vm629_vm8 = vcmp.eq.s32.totalorder %v16107_v44, 2  ;;  %v1167_v53 = vshrl.u32 %v1166_v46, 5 }
 0x160   : > { %v1169_v23 = vsub.s32 32, %v1168_v62  ;;  %v1171_v13 = vshll.u32 %v21310_v26, %v1168_v62  ;;  %v1174_v24 = vshll.u32 %v21318_v29, %v1168_v62  ;;  %v1177_v57 = vshll.u32 %v21315_v31, %v1168_v62 }
 0x161   : > { %v1031_v60 = vsel %vm948_vm4, %v1030_v17, %v1029_v22  ;;  %v16115_v27 = vshrl.u32 %v799_v4, 30  ;;  %v1180_v11 = vshll.u32 %v21306_v33, %v1168_v62  ;;  %vm625_vm1 = vcmp.lt.s32.totalorder %v16107_v44, 2 }
 0x162   : > { %v1034_v39 = vsel %vm16090_vm12, %v15716_v25, %v1031_v60  ;;  %v1172_v54 = vshrl.u32 %v21318_v29, %v1169_v23  ;;  %v1175_v6 = vshrl.u32 %v21315_v31, %v1169_v23  ;;  %v1178_v19 = vshrl.u32 %v21306_v33, %v1169_v23 }
 0x163   : > { %14941 = vcosq.f32 %v1034_v39  ;;  %v801_v34 = vshll.u32 %v16115_v27, 30  ;;  %v16126_v38 = vpop.eup %14939  ;;  %v1181_v1 = vshrl.u32 %v21304_v35, %v1169_v23  ;;  %vm1045_vm2 = vcmp.eq.s32.totalorder %v16113_v61, 2 }
 0x164   : > { %14943 = vsinq.f32 %v1034_v39  ;;  %v1173_v9 = vor.u32 %v1172_v54, %v1171_v13  ;;  %v1176_v41 = vor.u32 %v1175_v6, %v1174_v24  ;;  %v1179_v5 = vor.u32 %v1178_v19, %v1177_v57 }
 0x165   : > { %v16132_v2 = vsub.s32 %v798_v32, %v801_v34  ;;  %v627_v14 = vxor.u32 2147483648, %v16126_v38  ;;  %v1183_v50 = vshll.u32 %v21304_v35, %v1168_v62  ;;  %v1184_v32 = vshrl.u32 %v21302_v43, %v1169_v23 }
 0x166   : > { %v631_v46 = vsel %vm629_vm8, %v630_v59, %v16126_v38  ;;  %vm1042_vm5 = vcmp.eq.s32.totalorder %v16113_v61, 0  ;;  %v1182_v56 = vor.u32 %v1181_v1, %v1180_v11  ;;  %v16149_v17 = vshll.u32 %v1162_v16, 8 }
 0x167   : > { %v804_v22 = vsub.s32 0, %v16132_v2  ;;  %v16153_v4 = vcombine.high %v16135_v36, %v16135_v36  ;;  %vm1041_vm3 = vcmp.lt.s32.totalorder %v16113_v61, 2  ;;  %v1185_v62 = vor.u32 %v1184_v32, %v1183_v50 }
 0x168   : > { %vm1186_vm4 = vcmp.lt.s32.totalorder %v1167_v53, 1  ;;  %vm1189_vm6 = vcmp.lt.s32.totalorder %v1167_v53, 4  ;;  %vm1038_vm9 = vweird.f32 %v15716_v25  ;;  %v1170_v39 = vshrl.u32 %v21310_v26, %v1169_v23 }
 0x169   : > { %21402 = vst [vmem:[#allocation17_spill] sm:$0xff] %v16153_v4  ;;  %v13146_v60 = vmin.u32 %v804_v22, %v16132_v2  ;;  %v1191_v54 = vsel %vm1189_vm6, %v1179_v5, 2102212464  ;;  %v1194_v16 = vsel %vm1186_vm4, %v1173_v9, %v1176_v41  ;;  %v1195_v34 = vsel %vm1189_vm6, %v1182_v56, 920167782 }
 0x16a   : > { %v628_v13 = vsel %vm626_vm15, %v16103_v12, %v627_v14  ;;  %vm1188_vm10 = vcmp.lt.s32.totalorder %v1167_v53, 3  ;;  %v1198_v24 = vsel %vm1186_vm4, %v1176_v41, %v1179_v5  ;;  %vm1187_vm11 = vcmp.lt.s32.totalorder %v1167_v53, 2 }
 0x16b   : > { %v806_v6 = vclz %v13146_v60  ;;  %v1190_v57 = vsel %vm1186_vm4, %v1170_v39, %v1173_v9  ;;  %v1196_v19 = vsel %vm1188_vm10, %v1179_v5, %v1195_v34  ;;  %v1199_v11 = vsel %vm1189_vm6, %v1185_v62, 1326507024  ;;  %v16183_v62 = vld [vmem:[%s15337_s20 + $0x1] ss:$4 sm:$0xf] }
 0x16c   : > { %v1192_v22 = vsel %vm1188_vm10, %v1176_v41, %v1191_v54  ;;  %v1197_v50 = vsel %vm1187_vm11, %v1194_v16, %v1196_v19  ;;  %v1200_v32 = vsel %vm1188_vm10, %v1182_v56, %v1199_v11  ;;  %v632_v56 = vsel %vm625_vm1, %v628_v13, %v631_v46 }
 0x16d   : > { %v16165_v1 = vpop.eup %14941  ;;  %v13147_v23 = vadd.s32 4294967294, %v806_v6  ;;  %v1201_v60 = vsel %vm1187_vm11, %v1198_v24, %v1200_v32  ;;  %v16173_v35 = vmul.u32.u64.low %v16149_v17, %v1197_v50  ;;  %v16174_v33 = vmul.u32.u64.high %v16149_v17, %v1197_v50, %v16173_v35 }
 0x16e   : > { %v16168_v47 = vpop.eup %14943  ;;  %v1046_v43 = vxor.u32 2147483648, %v16165_v1  ;;  %v16179_v5 = vmul.u32.u64.low %v16149_v17, %v1201_v60  ;;  %v16180_v41 = vmul.u32.u64.high %v16149_v17, %v1201_v60, %v16179_v5  ;;  %v1193_v16 = vsel %vm1187_vm11, %v1190_v57, %v1192_v22 }
 0x16f   : > { %v1043_v9 = vxor.u32 2147483648, %v16168_v47  ;;  %vm13148_vm12 = vcmp.lt.s32.totalorder %v13147_v23, 0  ;;  %v794_v6 = vadd.s32 %v16064_v45, %v16081_v18  ;;  %vm21343_vm13 = vcmask 1042432  }
 0x170   : > { %v1047_v39 = vsel %vm1045_vm2, %v1046_v43, %v16168_v47  ;;  %v809_v54 = vsel %vm13148_vm12, 0, %v13147_v23  ;;  %v1212_v24 = vadd.s32 1, %v16174_v33  ;;  %v2196_v53 = vrot.slane %v16183_v62, %v15340_v51 }
 0x171   : > { %v1044_v34 = vsel %vm1042_vm5, %v16165_v1, %v1043_v9  ;;  %v810_v44 = vsub.s32 32, %v809_v54  ;;  %v814_v13 = vsub.s32 4294967266, %v809_v54  ;;  %v633_v57 = vsel %vm622_vm7, nan, %v632_v56 }
 0x172   : > { %v1048_v46 = vsel %vm1041_vm3, %v1044_v34, %v1047_v39  ;;  %v1209_v45 = vmul.u32 %v16149_v17, %v1193_v16  ;;  %v811_v61 = vshll.u32 %v16132_v2, %v809_v54  ;;  %vm1211_vm14 = vc.u32 %v16180_v41, %v16173_v35  ;;  %v16223_v2 = vld [vmem:[%s21292_s4] sm:$0xff] }
 0x173   : > { %v1049_v19 = vsel %vm1038_vm9, nan, %v1048_v46  ;;  %v812_v11 = vshrl.u32 %v794_v6, %v810_v44  ;;  %v815_v23 = vadd.s32 127, %v814_v13  ;;  %v1455_v22 = vand.u32 3, %v16072_v48  ;;  %v16348_v16 = vld [vmem:[%s21292_s4 + $0x20] sm:$0xff] }
 0x174   : > { %v16210_v18 = vpack.c.bf16 %v1049_v19, %v633_v57  ;;  %v1213_v50 = vsel %vm1211_vm14, %v1212_v24, %v16174_v33  ;;  %vm21359_vm15 = vcmask 80896   ;;  %v16226_v5 = vmul.f32 %v2196_v53, %v15360_v58 }
 0x175   : > { %v813_v32 = vor.u32 %v812_v11, %v811_v61  ;;  %v816_v60 = vshll.u32 %v815_v23, 23  ;;  %v1214_v17 = vadd.s32 %v1213_v50, %v1209_v45  ;;  %v1867_v48 = vand.u32 3, %v16098_v40 }
 0x176   : > { %21403 = vst [vmem:[#allocation18_spill] sm:$0xff] %v16210_v18  ;;  %13977 = vmatpush1.bf16.msk.msra.mxu0 %vm15742_vm0, %v16210_v18  ;;  %v824_v33 = vsub.s32 4, %v16115_v27  ;;  %vm740_vm8 = vcmp.lt.s32.totalorder %v15880_v63, 0  ;;  %v16234_v54 = vmul.f32 %v2196_v53, %v15374_v0  ;;  %vm1456_vm1 = vcmp.lt.s32.totalorder %v1455_v22, 2 }
 0x177   : > { %13351 = vmatprep.subr.msk.mxu0 %vm21343_vm13, %v16153_v4  ;;  %v817_v56 = vor.u32 4788187, %v816_v60  ;;  %v1215_v39 = vadd.s32 536870912, %v1214_v17  ;;  %vm1457_vm2 = vcmp.eq.s32.totalorder %v1455_v22, 0  ;;  %vm16238_vm5 = vcmp.le.f32.partialorder %v738_v8, 0.7853982 }
 0x178   : > { %v2324_v40 = vand.u32 2139095040, %v16226_v5  ;;  %vm1460_vm3 = vcmp.eq.s32.totalorder %v1455_v22, 2  ;;  %v820_v6 = vcvt.s32.f32 %v813_v32  ;;  %v16251_v8 = vld [vmem:[%s21292_s4 + $0x8] sm:$0xff]  ;;  %vm1869_vm4 = vcmp.eq.s32.totalorder %v1867_v48, 0  ;;  %v16318_v22 = vld [vmem:[%s21292_s4 + $0x18] sm:$0xff] }
 0x179   : > { %13333 = vmatmul.mubr.msk.f32.vlgmr.msra.gmra.mrb[0].mxu0 %vm21359_vm15, %v16223_v2  ;;  %v818_v34 = vand.u32 2147483647, %v817_v56  ;;  %v1216_v44 = vshrl.u32 %v1215_v39, 30  ;;  %v825_v46 = vsel %vm740_vm8, %v824_v33, %v16115_v27  ;;  %v21309_v13 = vand.u32 2147483647, %v16226_v5 }
 0x17a   : > { %13352 = vmatpush1.msk.msra.mxu0 %vm21343_vm13, %v16135_v36  ;;  %5686 = vmatprep.mubr.f32.mxu0 %v21312_v3  ;;  %v2325_v24 = vshrl.u32 %v2324_v40, 23  ;;  %vm1872_vm6 = vcmp.eq.s32.totalorder %v1867_v48, 2  ;;  %v2740_v57 = vand.u32 2139095040, %v16234_v54  ;;  %v1462_v19 = vsel %vm1460_vm3, %v630_v59, %v16126_v38 }
 0x17b   : > { %13986 = vmatprep.subr.msk.bf16.mxu0 %vm15742_vm0, %v15748_v30  ;;  %v821_v36 = vmul.f32 %v820_v6, %v818_v34  ;;  %v1217_v53 = vshll.u32 %v1216_v44, 30  ;;  %v1871_v27 = vsel %vm1869_vm4, %v16165_v1, %v1043_v9  ;;  %v1874_v11 = vsel %vm1872_vm6, %v1046_v43, %v16168_v47  ;;  %v16291_v43 = vld [vmem:[%s21292_s4 + $0x10] sm:$0xff] }
 0x17c   : > { %v13206_v45 = vadd.s32 4294967169, %v2325_v24  ;;  %v1459_v61 = vsel %vm1457_vm2, %v16103_v12, %v627_v14  ;;  %v827_v59 = vsel %vm16238_vm5, 0, %v825_v46  ;;  %vm16281_vm10 = vcmp.le.f32.partialorder %v1154_v55, 0.7853982  ;;  %v16294_v12 = vld [vmem:[%s15337_s20 + $0x8] sm:$0x77] }
 0x17d   : > { %13334 = vmatmul.mubr.msk.f32.gmra.mrb[2].mxu0 %vm21359_vm15, %v16251_v8  ;;  %v822_v23 = vxor.u32 2147483648, %v821_v36  ;;  %v16285_v47 = vsub.s32 %v1214_v17, %v1217_v53  ;;  %vm1868_vm11 = vcmp.lt.s32.totalorder %v1867_v48, 2  ;;  %v2328_v38 = vand.u32 8388607, %v21309_v13 }
 0x17e   : > { %5692 = vmatprep.mubr.f32.mxu0 %v21312_v3  ;;  %v2331_v14 = vadd.s32 1, %v13206_v45  ;;  %v16300_v55 = vrot.slane %v16183_v62, %v15343_v52  ;;  %v1875_v1 = vsel %vm1868_vm11, %v1871_v27, %v1874_v11  ;;  %v1240_v32 = vsub.s32 4, %v1216_v44 }
 0x17f   : > { %v1220_v50 = vsub.s32 0, %v16285_v47  ;;  %v2741_v60 = vshrl.u32 %v2740_v57, 23  ;;  %v1463_v17 = vsel %vm1456_vm1, %v1459_v61, %v1462_v19  ;;  %v831_v33 = vadd.s32 3, %v827_v59 }
 0x180   : > { %vm1156_vm12 = vcmp.lt.s32.totalorder %v16000_v42, 0  ;;  %vm2332_vm14 = vcmp.gt.s32.totalorder %v2331_v14, 0  ;;  %v823_v48 = vsel %vm740_vm8, %v822_v23, %v821_v36  ;;  %v16312_v39 = vcombine.high %v16294_v12, %v16294_v12 }
 0x181   : > { %13335 = vmatmul.mubr.msk.f32.gmra.mrb[4].mxu0 %vm21359_vm15, %v16291_v43  ;;  %v13162_v56 = vmin.u32 %v1220_v50, %v16285_v47  ;;  %v21308_v40 = vand.u32 2147483647, %v16234_v54  ;;  %v1876_v34 = vsel %vm1038_vm9, nan, %v1875_v1  ;;  %v2329_v6 = vor.u32 8388608, %v2328_v38 }
 0x182   : > { %21408 = vst [vmem:[#allocation19_spill] sm:$0xff] %v16312_v39  ;;  %5698 = vmatprep.mubr.f32.mxu0 %v21312_v3  ;;  %v2333_v46 = vsel %vm2332_vm14, %v2331_v14, 0  ;;  %v16325_v24 = vmul.f32 %v16300_v55, %v15360_v58  ;;  %v1464_v36 = vsel %vm622_vm7, nan, %v1463_v17  ;;  %v1241_v57 = vsel %vm1156_vm12, %v1240_v32, %v1216_v44 }
 0x183   : > { %v1222_v53 = vclz %v13162_v56  ;;  %v13222_v19 = vadd.s32 4294967169, %v2741_v60  ;;  %v826_v27 = vsel %vm16238_vm5, %v15880_v63, %v823_v48  ;;  %v16334_v25 = vand.u32 3, %v831_v33  ;;  %v16372_v56 = vld [vmem:[%s21292_s4 + $0x28] sm:$0xff] }
 0x184   : > { %21409 = vst [vmem:[#allocation20_spill] sm:$0xff] %v16325_v24  ;;  %v16336_v11 = vand.u32 3, %v827_v59  ;;  %v2335_v45 = vand.u32 31, %v2333_v46  ;;  %v16340_v61 = vpack.c.bf16 %v1876_v34, %v1464_v36  ;;  %v1210_v7 = vadd.s32 %v16173_v35, %v16180_v41 }
 0x185   : > { %13336 = vmatmul.mubr.msk.f32.gmra.mrb[6].mxu0 %vm21359_vm15, %v16318_v22  ;;  %v13163_v23 = vadd.s32 4294967294, %v1222_v53  ;;  %v16352_v44 = vand.u32 8388607, %v21308_v40  ;;  %v16356_v59 = vsel %vm16281_vm10, 0, %v1241_v57  ;;  %v16358_v14 = vshll.u32 %v2329_v6, 8 }
 0x186   : > { %21410 = vst [vmem:[#allocation21_spill] sm:$0xff] %v16340_v61  ;;  %5704 = vmatprep.mubr.f32.mxu0 %v21312_v3  ;;  %v2336_v38 = vsub.s32 32, %v2335_v45  ;;  %14945 = vcosq.f32 %v826_v27  ;;  %v16361_v41 = vshrl.u32 %v2333_v46, 5  ;;  %v2747_v1 = vadd.s32 1, %v13222_v19 }
 0x187   : > { %vm13164_vm7 = vcmp.lt.s32.totalorder %v13163_v23, 0  ;;  %v2338_v32 = vshll.u32 %v21310_v26, %v2335_v45  ;;  %v2344_v34 = vshll.u32 %v21315_v31, %v2335_v45  ;;  %v21411_v6 = vmov 2102212464  }
 0x188   : > { %v1225_v50 = vsel %vm13164_vm7, 0, %v13163_v23  ;;  %v2339_v60 = vshrl.u32 %v21318_v29, %v2336_v38  ;;  %v2342_v17 = vshrl.u32 %v21315_v31, %v2336_v38  ;;  %v2345_v46 = vshrl.u32 %v21411_v6, %v2336_v38 }
 0x189   : > { %13337 = vmatmul.mubr.msk.f32.gmra.mrb[8].mxu0 %vm21359_vm15, %v16348_v16  ;;  %v1226_v33 = vsub.s32 32, %v1225_v50  ;;  %v1230_v48 = vsub.s32 4294967266, %v1225_v50  ;;  %v1227_v36 = vshll.u32 %v16285_v47, %v1225_v50  ;;  %v2341_v53 = vshll.u32 %v21318_v29, %v2335_v45 }
 0x18a   : > { %5710 = vmatprep.mubr.f32.mxu0 %v21312_v3  ;;  %v21412_v57 = vmov 920167782   ;;  %v21413_v23 = vmov 1326507024   ;;  %v2340_v26 = vor.u32 %v2339_v60, %v2338_v32  ;;  %v2346_v3 = vor.u32 %v2345_v46, %v2344_v34  ;;  %v16413_v46 = vld [vmem:[%s21292_s4 + $0x38] sm:$0xff] }
 0x18b   : > { %v2348_v19 = vshrl.u32 %v21412_v57, %v2336_v38  ;;  %v2351_v40 = vshrl.u32 %v21413_v23, %v2336_v38  ;;  %v1228_v13 = vshrl.u32 %v1210_v7, %v1226_v33  ;;  %v1231_v35 = vadd.s32 127, %v1230_v48  ;;  %v16388_v7 = vld [vmem:[%s21292_s4 + $0x30] sm:$0xff] }
 0x18c   : > { %v2343_v49 = vor.u32 %v2342_v17, %v2341_v53  ;;  %v2347_v31 = vshll.u32 %v21411_v6, %v2335_v45  ;;  %v2350_v30 = vshll.u32 %v21412_v57, %v2335_v45  ;;  %vm2748_vm9 = vcmp.gt.s32.totalorder %v2747_v1, 0 }
 0x18d   : > { %13338 = vmatmul.mubr.msk.f32.gmra.mrb[10].mxu0 %vm21359_vm15, %v16372_v56  ;;  %v1229_v47 = vor.u32 %v1228_v13, %v1227_v36  ;;  %v1232_v50 = vshll.u32 %v1231_v35, 23  ;;  %v21414_v29 = vmov 0.0   ;;  %vm21357_vm8 = vcmask 23552  }
 0x18e   : > { %5716 = vmatprep.mubr.f32.mxu0 %v21414_v29  ;;  %v21415_v32 = vmov 683565275   ;;  %vm2356_vm1 = vcmp.lt.s32.totalorder %v16361_v41, 4  ;;  %v2349_v17 = vor.u32 %v2348_v19, %v2347_v31  ;;  %v2352_v33 = vor.u32 %v2351_v40, %v2350_v30 }
 0x18f   : > { %v2337_v60 = vshrl.u32 %v21415_v32, %v2336_v38  ;;  %vm2353_vm2 = vcmp.lt.s32.totalorder %v16361_v41, 1  ;;  %v2358_v13 = vsel %vm2356_vm1, %v2346_v3, 2102212464  ;;  %14947 = vsinq.f32 %v826_v27 }
 0x190   : > { %v1233_v45 = vor.u32 4788187, %v1232_v50  ;;  %vm2355_vm5 = vcmp.lt.s32.totalorder %v16361_v41, 3  ;;  %v16399_v48 = vadd.s32 3, %v16356_v59  ;;  %v2745_v30 = vor.u32 8388608, %v16352_v44  ;;  %v16407_v27 = vpop.eup %14945 }
 0x191   : > { %v2357_v35 = vsel %vm2353_vm2, %v2337_v60, %v2340_v26  ;;  %13339 = vmatmul.mubr.msk.f32.gmra.mrb[12].mxu0 %vm21359_vm15, %v16388_v7  ;;  %v2359_v31 = vsel %vm2355_vm5, %v2343_v49, %v2358_v13  ;;  %v2749_v40 = vsel %vm2748_vm9, %v2747_v1, 0  ;;  %v1236_v34 = vcvt.s32.f32 %v1229_v47 }
 0x192   : > { %v1234_v38 = vand.u32 2147483647, %v1233_v45  ;;  %5722 = vmatprep.mubr.f32.mxu0 %v21414_v29  ;;  %vm2354_vm3 = vcmp.lt.s32.totalorder %v16361_v41, 2  ;;  %v2361_v36 = vsel %vm2353_vm2, %v2340_v26, %v2343_v49  ;;  %v2362_v44 = vsel %vm2356_vm1, %v2349_v17, 920167782 }
 0x193   : > { %v2360_v53 = vsel %vm2354_vm3, %v2357_v35, %v2359_v31  ;;  %v2365_v1 = vsel %vm2353_vm2, %v2343_v49, %v2346_v3  ;;  %v2366_v19 = vsel %vm2356_vm1, %v2352_v33, 1326507024  ;;  %v2363_v50 = vsel %vm2355_vm5, %v2346_v3, %v2362_v44  ;;  %v16437_v3 = vld [vmem:[%s21291_s3] sm:$0xff] }
 0x194   : > { %v1237_v47 = vmul.f32 %v1236_v34, %v1234_v38  ;;  %v2367_v60 = vsel %vm2355_vm5, %v2349_v17, %v2366_v19  ;;  %v2532_v13 = vand.u32 2139095040, %v16325_v24  ;;  %v2364_v26 = vsel %vm2354_vm3, %v2361_v36, %v2363_v50 }
 0x195   : > { %13340 = vmatmul.mubr.msk.f32.gmra.mrb[14].mxu0 %vm21359_vm15, %v16413_v46  ;;  %v2368_v45 = vsel %vm2354_vm3, %v2365_v1, %v2367_v60  ;;  %v2751_v35 = vand.u32 31, %v2749_v40  ;;  %v16431_v31 = vshll.u32 %v2745_v30, 8  ;;  %v2376_v33 = vmul.u32 %v16358_v14, %v2360_v53 }
 0x196   : > { %v1238_v49 = vxor.u32 2147483648, %v1237_v47  ;;  %5944 = vmatprep.mubr.f32.mxu0 %v21414_v29  ;;  %v16440_v41 = vmul.u32.u64.low %v16358_v14, %v2368_v45  ;;  %v16441_v17 = vmul.u32.u64.high %v16358_v14, %v2368_v45, %v16440_v41  ;;  %v16449_v30 = vshrl.u32 %v2749_v40, 5 }
 0x197   : > { %v16445_v38 = vmul.u32.u64.low %v16358_v14, %v2364_v26  ;;  %v16446_v34 = vmul.u32.u64.high %v16358_v14, %v2364_v26, %v16445_v38  ;;  %v2752_v36 = vsub.s32 32, %v2751_v35  ;;  %v2754_v1 = vshll.u32 %v21415_v32, %v2751_v35 }
 0x198   : > { %v1239_v44 = vsel %vm1156_vm12, %v1238_v49, %v1237_v47  ;;  %v21416_v19 = vmov 2475754826   ;;  %v2533_v60 = vshrl.u32 %v2532_v13, 23  ;;  %v21417_v40 = vmov 2131351028   ;;  %v16476_v13 = vld [vmem:[%s21291_s3 + $0x8] sm:$0xff] }
 0x199   : > { %v2757_v50 = vshll.u32 %v21416_v19, %v2751_v35  ;;  %v1242_v53 = vsel %vm16281_vm10, %v16000_v42, %v1239_v44  ;;  %13353 = vmatmul.mubr.msk.f32.vlgmr.msra.gmra.mrb[0].mxu0 %vm21357_vm8, %v16437_v3  ;;  %v2755_v14 = vshrl.u32 %v21416_v19, %v2752_v36  ;;  %v2758_v26 = vshrl.u32 %v21417_v40, %v2752_v36  ;;  %v16463_v41 = vpop.eup %14947 }
 0x19a   : > { %v2760_v45 = vshll.u32 %v21417_v40, %v2751_v35  ;;  %14949 = vcosq.f32 %v1242_v53  ;;  %13989 = vmatpush1.bf16.msk.msra.mxu0 %vm15742_vm0, %v16340_v61  ;;  %vm2378_vm4 = vc.u32 %v16441_v17, %v16445_v38  ;;  %v2761_v9 = vshrl.u32 %v21411_v6, %v2752_v36  ;;  %5950 = vmatprep.mubr.f32.mxu0 %v21414_v29 }
 0x19b   : > { %v2763_v47 = vshll.u32 %v21411_v6, %v2751_v35  ;;  %vm834_vm6 = vcmp.eq.s32.totalorder %v16334_v25, 0  ;;  %vm837_vm10 = vcmp.eq.s32.totalorder %v16334_v25, 2  ;;  %14951 = vsinq.f32 %v1242_v53 }
 0x19c   : > { %v2379_v49 = vadd.s32 1, %v16446_v34  ;;  %v2756_v44 = vor.u32 %v2755_v14, %v2754_v1  ;;  %v2759_v61 = vor.u32 %v2758_v26, %v2757_v50  ;;  %v2762_v21 = vor.u32 %v2761_v9, %v2760_v45 }
 0x19d   : > { %v2764_v4 = vshrl.u32 %v21412_v57, %v2752_v36  ;;  %v2766_v18 = vshll.u32 %v21412_v57, %v2751_v35  ;;  %v2767_v15 = vshrl.u32 %v21413_v23, %v2752_v36  ;;  %v21329_v52 = vxor.u32 2147483648, %v16463_v41  ;;  %13354 = vmatmul.mubr.msk.f32.gmra.mrb[2].mxu0 %vm21357_vm8, %v16476_v13 }
 0x19e   : > { %v838_v51 = vxor.u32 2147483648, %v16407_v27  ;;  %v16487_v10 = vand.u32 3, %v16399_v48  ;;  %v2380_v1 = vsel %vm2378_vm4, %v2379_v49, %v16446_v34  ;;  %vm833_vm11 = vcmp.lt.s32.totalorder %v16334_v25, 2  ;;  %5956 = vmatprep.mubr.f32.mxu0 %v21414_v29  ;;  %v16502_v48 = vld [vmem:[%s21291_s3 + $0x10] sm:$0xff] }
 0x19f   : > { %vm1666_vm12 = vcmp.eq.s32.totalorder %v16336_v11, 2  ;;  %v2381_v35 = vadd.s32 %v2380_v1, %v2376_v33  ;;  %v2765_v50 = vor.u32 %v2764_v4, %v2763_v47  ;;  %v2768_v53 = vor.u32 %v2767_v15, %v2766_v18  ;;  %21418 = vst [vmem:[#allocation22_spill] sm:$0xff] %v16502_v48  ;;  %v16537_v1 = vld [vmem:[%s21291_s3 + $0x18] sm:$0xff] }
 0x1a0   : > { %vm2769_vm14 = vcmp.lt.s32.totalorder %v16449_v30, 1  ;;  %vm2771_vm7 = vcmp.lt.s32.totalorder %v16449_v30, 3  ;;  %vm2772_vm9 = vcmp.lt.s32.totalorder %v16449_v30, 4  ;;  %vm1663_vm1 = vcmp.eq.s32.totalorder %v16336_v11, 0 }
 0x1a1   : > { %v2777_v34 = vsel %vm2769_vm14, %v2756_v44, %v2759_v61  ;;  %v2781_v4 = vsel %vm2769_vm14, %v2759_v61, %v2762_v21  ;;  %v2382_v15 = vadd.s32 536870912, %v2381_v35  ;;  %v2778_v18 = vsel %vm2772_vm9, %v2765_v50, 920167782  ;;  %13355 = vmatmul.mubr.msk.f32.gmra.mrb[4].mxu0 %vm21357_vm8, %v16502_v48 }
 0x1a2   : > { %v2782_v33 = vsel %vm2772_vm9, %v2768_v53, 1326507024  ;;  %v13214_v14 = vadd.s32 4294967169, %v2533_v60  ;;  %vm830_vm2 = vweird.f32 %v15880_v63  ;;  %vm1246_vm5 = vweird.f32 %v16000_v42  ;;  %5962 = vmatprep.mubr.f32.mxu0 %v21414_v29 }
 0x1a3   : > { %v2753_v26 = vshrl.u32 %v21415_v32, %v2752_v36  ;;  %vm2770_vm3 = vcmp.lt.s32.totalorder %v16449_v30, 2  ;;  %v2779_v45 = vsel %vm2771_vm7, %v2762_v21, %v2778_v18  ;;  %v2783_v9 = vsel %vm2771_vm7, %v2765_v50, %v2782_v33 }
 0x1a4   : > { %v16525_v47 = vshrl.u32 %v2382_v15, 30  ;;  %v2774_v60 = vsel %vm2772_vm9, %v2762_v21, 2102212464  ;;  %v2780_v49 = vsel %vm2770_vm3, %v2777_v34, %v2779_v45  ;;  %v2784_v36 = vsel %vm2770_vm3, %v2781_v4, %v2783_v9  ;;  %v16548_v34 = vpop.eup %14949 }
 0x1a5   : > { %v16540_v50 = vmul.u32.u64.low %v16431_v31, %v2784_v36  ;;  %v16541_v53 = vmul.u32.u64.high %v16431_v31, %v2784_v36, %v16540_v50  ;;  %v16544_v15 = vmul.u32.u64.low %v16431_v31, %v2780_v49  ;;  %v16545_v21 = vmul.u32.u64.high %v16431_v31, %v2780_v49, %v16544_v15  ;;  %v16559_v9 = vpop.eup %14951  ;;  %13356 = vmatmul.mubr.msk.f32.gmra.mrb[6].mxu0 %vm21357_vm8, %v16537_v1 }
 0x1a6   : > { %v836_v4 = vsel %vm834_vm6, %v16407_v27, %v21329_v52  ;;  %v839_v18 = vsel %vm837_vm10, %v838_v51, %v16463_v41  ;;  %v2384_v33 = vshll.u32 %v16525_v47, 30  ;;  %v2539_v45 = vadd.s32 1, %v13214_v14  ;;  %5968 = vmatprep.mubr.f32.mxu0 %v21414_v29 }
 0x1a7   : > { %v21332_v49 = vxor.u32 2147483648, %v16548_v34  ;;  %v16563_v36 = vand.u32 3, %v16356_v59  ;;  %v2773_v50 = vsel %vm2769_vm14, %v2753_v26, %v2756_v44  ;;  %v2775_v52 = vsel %vm2771_vm7, %v2759_v61, %v2774_v60  ;;  %v16580_v59 = vld [vmem:[%s21291_s3 + $0x20] sm:$0xff] }
 0x1a8   : > { %vm1249_vm4 = vcmp.lt.s32.totalorder %v16487_v10, 2  ;;  %v21331_v14 = vxor.u32 2147483648, %v16559_v9  ;;  %vm1253_vm6 = vcmp.eq.s32.totalorder %v16487_v10, 2  ;;  %v16574_v48 = vsub.s32 %v2381_v35, %v2384_v33  ;;  %21419 = vst [vmem:[#allocation23_spill] sm:$0xff] %v16580_v59 }
 0x1a9   : > { %v840_v61 = vsel %vm833_vm11, %v836_v4, %v839_v18  ;;  %vm1250_vm10 = vcmp.eq.s32.totalorder %v16487_v10, 0  ;;  %v1255_v44 = vsel %vm1253_vm6, %v21332_v49, %v16559_v9  ;;  %v1668_v35 = vsel %vm1666_vm12, %v838_v51, %v16463_v41  ;;  %13357 = vmatmul.mubr.msk.f32.gmra.mrb[8].mxu0 %vm21357_vm8, %v16580_v59 }
 0x1aa   : > { %v1252_v26 = vsel %vm1250_vm10, %v16548_v34, %v21331_v14  ;;  %v2387_v60 = vsub.s32 0, %v16574_v48  ;;  %v2776_v25 = vsel %vm2770_vm3, %v2773_v50, %v2775_v52  ;;  %vm2540_vm11 = vcmp.gt.s32.totalorder %v2539_v45, 0  ;;  %5974 = vmatprep.mubr.f32.mxu0 %v21414_v29 }
 0x1ab   : > { %v1256_v4 = vsel %vm1249_vm4, %v1252_v26, %v1255_v44  ;;  %v21420_v10 = vxor.u32 2147483648, %v16463_v41  ;;  %vm2794_vm12 = vc.u32 %v16541_v53, %v16544_v15  ;;  %v2795_v51 = vadd.s32 1, %v16545_v21 }
 0x1ac   : > { %v841_v30 = vsel %vm830_vm2, nan, %v840_v61  ;;  %v1257_v52 = vsel %vm1246_vm5, nan, %v1256_v4  ;;  %v13207_v41 = vmin.u32 %v2387_v60, %v16574_v48  ;;  %v21421_v33 = vand.u32 2147483647, %v16325_v24 }
 0x1ad   : > { %v1665_v18 = vsel %vm1663_vm1, %v16407_v27, %v21420_v10  ;;  %v16620_v27 = vld [vmem:[%s21291_s3 + $0x28] sm:$0xff]  ;;  %v16622_v44 = vpack.c.bf16 %v1257_v52, %v841_v30  ;;  %v2792_v61 = vmul.u32 %v16431_v31, %v2776_v25  ;;  %v2796_v26 = vsel %vm2794_vm12, %v2795_v51, %v16545_v21 }
 0x1ae   : > { %v16614_v50 = vand.u32 8388607, %v21421_v33  ;;  %21422 = vst [vmem:[#allocation24_spill] sm:$0xff] %v16620_v27  ;;  %v2541_v4 = vsel %vm2540_vm11, %v2539_v45, 0  ;;  %v2389_v10 = vclz %v13207_v41  ;;  %v16628_v60 = vmul.f32 %v16300_v55, %v15374_v0  ;;  %13358 = vmatmul.mubr.msk.f32.gmra.mrb[10].mxu0 %vm21357_vm8, %v16620_v27 }
 0x1af   : > { %21423 = vst [vmem:[#allocation25_spill] sm:$0xff] %v16622_v44  ;;  %vm1662_vm14 = vcmp.lt.s32.totalorder %v16336_v11, 2  ;;  %13983 = vmatpush1.bf16.msk.msra.mxu1 %vm15742_vm0, %v16622_v44  ;;  %v2797_v33 = vadd.s32 %v2796_v26, %v2792_v61  ;;  %v2543_v14 = vand.u32 31, %v2541_v4  ;;  %vm2078_vm7 = vcmp.eq.s32.totalorder %v16563_v36, 2  ;;  %5980 = vmatprep.mubr.f32.mxu0 %v21414_v29 }
 0x1b0   : > { %v16636_v31 = vsel %vm1662_vm14, %v1665_v18, %v1668_v35  ;;  %13361 = vmatprep.subr.msk.mxu1 %vm21343_vm13, %v16312_v39  ;;  %vm2323_vm9 = vcmp.lt.s32.totalorder %v16226_v5, 0  ;;  %v2377_v55 = vadd.s32 %v16445_v38, %v16441_v17  ;;  %v13208_v11 = vadd.s32 4294967294, %v2389_v10  ;;  %v16650_v18 = vld [vmem:[%s21291_s3 + $0x30] sm:$0xff]  ;;  %v16680_v38 = vld [vmem:[%s21291_s3 + $0x38] sm:$0xff] }
 0x1b1   : > { %v2407_v21 = vsub.s32 4, %v16525_v47  ;;  %v2798_v45 = vadd.s32 536870912, %v2797_v33  ;;  %v2537_v25 = vor.u32 8388608, %v16614_v50  ;;  %v2544_v35 = vsub.s32 32, %v2543_v14  ;;  %21424 = vst [vmem:[#allocation26_spill] sm:$0xff] %v16650_v18 }
 0x1b2   : > { %13343 = vmatmul.mubr.msk.f32.vlgmr.msra.gmra.mrb[0].mxu1 %vm21359_vm15, %v16223_v2  ;;  %vm13209_vm1 = vcmp.lt.s32.totalorder %v13208_v11, 0  ;;  %v16654_v51 = vshrl.u32 %v2541_v4, 5  ;;  %v2546_v17 = vshll.u32 %v21415_v32, %v2543_v14  ;;  %v2549_v50 = vshll.u32 %v21416_v19, %v2543_v14  ;;  %13359 = vmatmul.mubr.msk.f32.gmra.mrb[12].mxu0 %vm21357_vm8, %v16650_v18 }
 0x1b3   : > { %13362 = vmatpush1.msk.msra.mxu1 %vm21343_vm13, %v16294_v12  ;;  %5799 = vmatprep.mubr.f32.mxu1 %v21414_v29  ;;  %v2392_v30 = vsel %vm13209_vm1, 0, %v13208_v11  ;;  %v16661_v52 = vshrl.u32 %v2798_v45, 30  ;;  %v2547_v41 = vshrl.u32 %v21416_v19, %v2544_v35  ;;  %v2550_v26 = vshrl.u32 %v21417_v40, %v2544_v35 }
 0x1b4   : > { %13992 = vmatprep.subr.msk.bf16.mxu1 %vm15742_vm0, %v15983_v28  ;;  %v2393_v2 = vsub.s32 32, %v2392_v30  ;;  %v2397_v61 = vsub.s32 4294967266, %v2392_v30  ;;  %v2552_v4 = vshll.u32 %v21417_v40, %v2543_v14  ;;  %v2553_v10 = vshrl.u32 %v21411_v6, %v2544_v35  ;;  %5986 = vmatprep.mubr.f32.mxu0 %v21414_v29 }
 0x1b5   : > { %v2800_v12 = vshll.u32 %v16661_v52, 30  ;;  %v2555_v11 = vshll.u32 %v21411_v6, %v2543_v14  ;;  %v2558_v45 = vshll.u32 %v21412_v57, %v2543_v14  ;;  %v2394_v49 = vshll.u32 %v16574_v48, %v2392_v30 }
 0x1b6   : > { %13344 = vmatmul.mubr.msk.f32.gmra.mrb[2].mxu1 %vm21359_vm15, %v16251_v8  ;;  %v2395_v28 = vshrl.u32 %v2377_v55, %v2393_v2  ;;  %v2398_v39 = vadd.s32 127, %v2397_v61  ;;  %v2556_v44 = vshrl.u32 %v21412_v57, %v2544_v35  ;;  %v2548_v14 = vor.u32 %v2547_v41, %v2546_v17  ;;  %13360 = vmatmul.mubr.msk.f32.gmra.mrb[14].mxu0 %vm21357_vm8, %v16680_v38 }
 0x1b7   : > { %5805 = vmatprep.mubr.f32.mxu1 %v21414_v29  ;;  %v16687_v18 = vsub.s32 %v2797_v33, %v2800_v12  ;;  %v2551_v0 = vor.u32 %v2550_v26, %v2549_v50  ;;  %v2559_v24 = vshrl.u32 %v21413_v23, %v2544_v35  ;;  %v21425_v27 = vand.u32 2147483647, %v16226_v5  ;;  %6214 = vmatprep.mubr.f32.mxu0 %v21414_v29 }
 0x1b8   : > { %v2396_v8 = vor.u32 %v2395_v28, %v2394_v49  ;;  %v2399_v48 = vshll.u32 %v2398_v39, 23  ;;  %v2554_v55 = vor.u32 %v2553_v10, %v2552_v4  ;;  %v2557_v30 = vor.u32 %v2556_v44, %v2555_v11  ;;  %v16715_v39 = vld [vmem:[%s21293_s5] sm:$0xff] }
 0x1b9   : > { %vm16692_vm3 = vcmp.le.f32.partialorder %v21425_v27, 0.7853982  ;;  %v21428_v33 = vxor.u32 2147483648, %v16548_v34  ;;  %v2408_v27 = vsel %vm2323_vm9, %v2407_v21, %v16525_v47  ;;  %v2803_v41 = vsub.s32 0, %v16687_v18 }
 0x1ba   : > { %v16709_v28 = vshll.u32 %v2537_v25, 8  ;;  %13345 = vmatmul.mubr.msk.f32.gmra.mrb[4].mxu1 %vm21359_vm15, %v16291_v43  ;;  %v2400_v49 = vor.u32 4788187, %v2399_v48  ;;  %v2545_v44 = vshrl.u32 %v21415_v32, %v2544_v35  ;;  %v2560_v50 = vor.u32 %v2559_v24, %v2558_v45  ;;  %13373 = vmatmul.mubr.msk.f32.vlgmr.msra.gmra.mrb[0].mxu0 %vm21359_vm15, %v16715_v39 }
 0x1bb   : > { %v16703_v17 = vsel %vm2078_vm7, %v21428_v33, %v16559_v9  ;;  %v2948_v47 = vand.u32 2139095040, %v16628_v60  ;;  %vm2075_vm4 = vcmp.eq.s32.totalorder %v16563_v36, 0  ;;  %5811 = vmatprep.mubr.f32.mxu1 %v21414_v29  ;;  %v2403_v21 = vcvt.s32.f32 %v2396_v8  ;;  %6220 = vmatprep.mubr.f32.mxu0 %v21414_v29 }
 0x1bc   : > { %vm2739_vm6 = vcmp.lt.s32.totalorder %v16234_v54, 0  ;;  %v13223_v25 = vmin.u32 %v2803_v41, %v16687_v18  ;;  %vm2561_vm10 = vcmp.lt.s32.totalorder %v16654_v51, 1  ;;  %vm2564_vm11 = vcmp.lt.s32.totalorder %v16654_v51, 4 }
 0x1bd   : > { %v2401_v43 = vand.u32 2147483647, %v2400_v49  ;;  %v2566_v35 = vsel %vm2564_vm11, %v2554_v55, 2102212464  ;;  %v2569_v24 = vsel %vm2561_vm10, %v2548_v14, %v2551_v0  ;;  %v2570_v2 = vsel %vm2564_vm11, %v2557_v30, 920167782 }
 0x1be   : > { %v2805_v61 = vclz %v13223_v25  ;;  %v2823_v26 = vsub.s32 4, %v16661_v52  ;;  %vm2562_vm12 = vcmp.lt.s32.totalorder %v16654_v51, 2  ;;  %vm2563_vm14 = vcmp.lt.s32.totalorder %v16654_v51, 3  ;;  %13346 = vmatmul.mubr.msk.f32.gmra.mrb[6].mxu1 %vm21359_vm15, %v16318_v22 }
 0x1bf   : > { %v2404_v4 = vmul.f32 %v2403_v21, %v2401_v43  ;;  %v21429_v12 = vand.u32 2147483647, %v16234_v54  ;;  %v2565_v11 = vsel %vm2561_vm10, %v2545_v44, %v2548_v14  ;;  %v2571_v45 = vsel %vm2563_vm14, %v2554_v55, %v2570_v2  ;;  %5817 = vmatprep.mubr.f32.mxu1 %v21414_v29 }
 0x1c0   : > { %v2573_v8 = vsel %vm2561_vm10, %v2551_v0, %v2554_v55  ;;  %vm2074_vm1 = vcmp.lt.s32.totalorder %v16563_v36, 2  ;;  %v13224_v48 = vadd.s32 4294967294, %v2805_v61  ;;  %v2567_v22 = vsel %vm2563_vm14, %v2551_v0, %v2566_v35 }
 0x1c1   : > { %vm16743_vm7 = vcmp.le.f32.partialorder %v21429_v12, 0.7853982  ;;  %v2572_v33 = vsel %vm2562_vm12, %v2569_v24, %v2571_v45  ;;  %v2574_v41 = vsel %vm2564_vm11, %v2560_v50, 1326507024  ;;  %v2405_v49 = vxor.u32 2147483648, %v2404_v4 }
 0x1c2   : > { %v2575_v21 = vsel %vm2563_vm14, %v2557_v30, %v2574_v41  ;;  %v16758_v14 = vmul.u32.u64.low %v16709_v28, %v2572_v33  ;;  %v16759_v44 = vmul.u32.u64.high %v16709_v28, %v2572_v33, %v16758_v14  ;;  %v16764_v55 = vsel %vm16692_vm3, 0, %v2408_v27  ;;  %13347 = vmatmul.mubr.msk.f32.gmra.mrb[8].mxu1 %vm21359_vm15, %v16348_v16 }
 0x1c3   : > { %vm13225_vm10 = vcmp.lt.s32.totalorder %v13224_v48, 0  ;;  %v2576_v0 = vsel %vm2562_vm12, %v2573_v8, %v2575_v21  ;;  %v2949_v25 = vshrl.u32 %v2948_v47, 23  ;;  %v2406_v30 = vsel %vm2323_vm9, %v2405_v49, %v2404_v4  ;;  %5823 = vmatprep.mubr.f32.mxu1 %v21414_v29 }
 0x1c4   : > { %v2808_v50 = vsel %vm13225_vm10, 0, %v13224_v48  ;;  %v16773_v43 = vmul.u32.u64.low %v16709_v28, %v2576_v0  ;;  %v16774_v35 = vmul.u32.u64.high %v16709_v28, %v2576_v0, %v16773_v43  ;;  %v2793_v27 = vadd.s32 %v16544_v15, %v16541_v53 }
 0x1c5   : > { %v2809_v24 = vsub.s32 32, %v2808_v50  ;;  %v2813_v2 = vsub.s32 4294967266, %v2808_v50  ;;  %v2568_v47 = vsel %vm2562_vm12, %v2565_v11, %v2567_v22  ;;  %v21432_v16 = vxor.u32 2147483648, %v16559_v9 }
 0x1c6   : > { %v2824_v4 = vsel %vm2739_vm6, %v2823_v26, %v16661_v52  ;;  %v2587_v12 = vadd.s32 1, %v16759_v44  ;;  %v13230_v45 = vadd.s32 4294967169, %v2949_v25  ;;  %v2409_v53 = vsel %vm16692_vm3, %v16226_v5, %v2406_v30  ;;  %13348 = vmatmul.mubr.msk.f32.gmra.mrb[10].mxu1 %vm21359_vm15, %v16372_v56 }
 0x1c7   : > { %v2077_v61 = vsel %vm2075_vm4, %v16548_v34, %v21432_v16  ;;  %v2810_v15 = vshll.u32 %v16687_v18, %v2808_v50  ;;  %v2811_v51 = vshrl.u32 %v2793_v27, %v2809_v24  ;;  %v2814_v11 = vadd.s32 127, %v2813_v2  ;;  %5829 = vmatprep.mubr.f32.mxu1 %v21414_v29 }
 0x1c8   : > { %v2584_v34 = vmul.u32 %v16709_v28, %v2568_v47  ;;  %vm2586_vm9 = vc.u32 %v16774_v35, %v16758_v14  ;;  %v21433_v9 = vand.u32 2147483647, %v16628_v60  ;;  %v2955_v26 = vadd.s32 1, %v13230_v45 }
 0x1c9   : > { %v2812_v59 = vor.u32 %v2811_v51, %v2810_v15  ;;  %v2815_v8 = vshll.u32 %v2814_v11, 23  ;;  %v16804_v18 = vsel %vm16743_vm7, 0, %v2824_v4  ;;  %v2588_v48 = vsel %vm2586_vm9, %v2587_v12, %v16759_v44 }
 0x1ca   : > { %v2952_v52 = vand.u32 8388607, %v21433_v9  ;;  %v2081_v56 = vsel %vm2074_vm1, %v2077_v61, %v16703_v17  ;;  %14953 = vcosq.f32 %v2409_v53  ;;  %v2589_v28 = vadd.s32 %v2588_v48, %v2584_v34  ;;  %13349 = vmatmul.mubr.msk.f32.gmra.mrb[12].mxu1 %vm21359_vm15, %v16388_v7 }
 0x1cb   : > { %vm2956_vm3 = vcmp.gt.s32.totalorder %v2955_v26, 0  ;;  %14955 = vsinq.f32 %v2409_v53  ;;  %v2816_v22 = vor.u32 4788187, %v2815_v8  ;;  %v16812_v41 = vrot.slane %v16183_v62, %v15481_v37  ;;  %5835 = vmatprep.mubr.f32.mxu1 %v21414_v29 }
 0x1cc   : > { %v2957_v33 = vsel %vm2956_vm3, %v2955_v26, 0  ;;  %v2414_v49 = vadd.s32 3, %v16764_v55  ;;  %v2830_v21 = vadd.s32 3, %v16804_v18  ;;  %v2590_v44 = vadd.s32 536870912, %v2589_v28 }
 0x1cd   : > { %v2959_v36 = vand.u32 31, %v2957_v33  ;;  %v2082_v17 = vsel %vm1246_vm5, nan, %v2081_v56  ;;  %v2817_v0 = vand.u32 2147483647, %v2816_v22  ;;  %v2819_v25 = vcvt.s32.f32 %v2812_v59 }
 0x1ce   : > { %v2953_v30 = vor.u32 8388608, %v2952_v52  ;;  %v16821_v50 = vshrl.u32 %v2590_v44, 30  ;;  %v1670_v7 = vsel %vm830_vm2, nan, %v16636_v31  ;;  %v16828_v27 = vmul.f32 %v16812_v41, %v15360_v58  ;;  %13350 = vmatmul.mubr.msk.f32.gmra.mrb[14].mxu1 %vm21359_vm15, %v16413_v46 }
 0x1cf   : > { %v2960_v62 = vsub.s32 32, %v2959_v36  ;;  %v2820_v43 = vmul.f32 %v2819_v25, %v2817_v0  ;;  %v16830_v24 = vpack.c.bf16 %v2082_v17, %v1670_v7  ;;  %v16834_v42 = vand.u32 3, %v2414_v49  ;;  %6057 = vmatprep.mubr.f32.mxu1 %v21414_v29 }
 0x1d0   : > { %v16836_v2 = vand.u32 3, %v2830_v21  ;;  %v2592_v47 = vshll.u32 %v16821_v50, 30  ;;  %v16842_v31 = vadd.s32 %v16758_v14, %v16774_v35  ;;  %v16845_v61 = vshll.u32 %v2953_v30, 8 }
 0x1d1   : > { %21434 = vst [vmem:[#allocation27_spill] sm:$0xff] %v16830_v24  ;;  %v2821_v63 = vxor.u32 2147483648, %v2820_v43  ;;  %v2963_v16 = vshrl.u32 %v21416_v19, %v2960_v62  ;;  %v16849_v46 = vshrl.u32 %v2957_v33, 5  ;;  %v2966_v12 = vshrl.u32 %v21417_v40, %v2960_v62 }
 0x1d2   : > { %v16847_v4 = vsub.s32 %v2589_v28, %v2592_v47  ;;  %v2969_v45 = vshrl.u32 %v21411_v6, %v2960_v62  ;;  %v2962_v15 = vshll.u32 %v21415_v32, %v2959_v36  ;;  %v21349_v14 = vand.u32 2147483647, %v16828_v27  ;;  %13363 = vmatmul.mubr.msk.f32.vlgmr.msra.gmra.mrb[0].mxu1 %vm21357_vm8, %v16437_v3 }
 0x1d3   : > { %v2822_v53 = vsel %vm2739_vm6, %v2821_v63, %v2820_v43  ;;  %v2220_v35 = vand.u32 2139095040, %v16828_v27  ;;  %v2965_v9 = vshll.u32 %v21416_v19, %v2959_v36  ;;  %v2968_v52 = vshll.u32 %v21417_v40, %v2959_v36  ;;  %13995 = vmatpush1.bf16.msk.msra.mxu1 %vm15742_vm0, %v16830_v24  ;;  %6063 = vmatprep.mubr.f32.mxu1 %v21414_v29 }
 0x1d4   : > { %v16858_v51 = vpop.eup %14953  ;;  %v2825_v11 = vsel %vm16743_vm7, %v16234_v54, %v2822_v53  ;;  %v2595_v34 = vsub.s32 0, %v16847_v4  ;;  %vm2417_vm2 = vcmp.eq.s32.totalorder %v16834_v42, 0  ;;  %vm2420_vm5 = vcmp.eq.s32.totalorder %v16834_v42, 2 }
 0x1d5   : > { %v16868_v26 = vpop.eup %14955  ;;  %14957 = vcosq.f32 %v2825_v11  ;;  %v2964_v3 = vor.u32 %v2963_v16, %v2962_v15  ;;  %v2971_v10 = vshll.u32 %v21411_v6, %v2959_v36  ;;  %v2972_v59 = vshrl.u32 %v21412_v57, %v2960_v62 }
 0x1d6   : > { %14959 = vsinq.f32 %v2825_v11  ;;  %v13215_v8 = vmin.u32 %v2595_v34, %v16847_v4  ;;  %v2967_v48 = vor.u32 %v2966_v12, %v2965_v9  ;;  %v2970_v56 = vor.u32 %v2969_v45, %v2968_v52  ;;  %13364 = vmatmul.mubr.msk.f32.gmra.mrb[2].mxu1 %vm21357_vm8, %v16476_v13  ;;  %v21435_v45 = vld [vmem:[#allocation22_spill] sm:$0xff] }
 0x1d7   : > { %v2961_v28 = vshrl.u32 %v21415_v32, %v2960_v62  ;;  %v2973_v22 = vor.u32 %v2972_v59, %v2971_v10  ;;  %v2974_v33 = vshll.u32 %v21412_v57, %v2959_v36  ;;  %v2975_v49 = vshrl.u32 %v21413_v23, %v2960_v62  ;;  %6069 = vmatprep.mubr.f32.mxu1 %v21414_v29 }
 0x1d8   : > { %vm2416_vm4 = vcmp.lt.s32.totalorder %v16834_v42, 2  ;;  %v21347_v21 = vxor.u32 2147483648, %v16868_v26  ;;  %v21345_v44 = vxor.u32 2147483648, %v16858_v51  ;;  %v2597_v17 = vclz %v13215_v8 }
 0x1d9   : > { %vm2977_vm6 = vcmp.lt.s32.totalorder %v16849_v46, 1  ;;  %vm2836_vm11 = vcmp.eq.s32.totalorder %v16836_v2, 2  ;;  %v2976_v0 = vor.u32 %v2975_v49, %v2974_v33  ;;  %vm2978_vm12 = vcmp.lt.s32.totalorder %v16849_v46, 2 }
 0x1da   : > { %vm2979_vm14 = vcmp.lt.s32.totalorder %v16849_v46, 3  ;;  %vm2980_vm7 = vcmp.lt.s32.totalorder %v16849_v46, 4  ;;  %vm2833_vm1 = vcmp.eq.s32.totalorder %v16836_v2, 0  ;;  %v13216_v36 = vadd.s32 4294967294, %v2597_v17  ;;  %13365 = vmatmul.mubr.msk.f32.gmra.mrb[4].mxu1 %vm21357_vm8, %v21435_v45 }
 0x1db   : > { %v2982_v25 = vsel %vm2980_vm7, %v2970_v56, 2102212464  ;;  %v2985_v30 = vsel %vm2977_vm6, %v2964_v3, %v2967_v48  ;;  %v2986_v62 = vsel %vm2980_vm7, %v2973_v22, 920167782  ;;  %vm2413_vm10 = vweird.f32 %v16226_v5  ;;  %6075 = vmatprep.mubr.f32.mxu1 %v21414_v29  ;;  %v17489_v5 = vld [vmem:[%s21292_s4 + $0x40] sm:$0xff] }
 0x1dc   : > { %vm2832_vm9 = vcmp.lt.s32.totalorder %v16836_v2, 2  ;;  %v2981_v13 = vsel %vm2977_vm6, %v2961_v28, %v2964_v3  ;;  %v2987_v7 = vsel %vm2979_vm14, %v2970_v56, %v2986_v62  ;;  %v2989_v43 = vsel %vm2977_vm6, %v2967_v48, %v2970_v56 }
 0x1dd   : > { %v2990_v47 = vsel %vm2980_vm7, %v2976_v0, 1326507024  ;;  %vm2829_vm3 = vweird.f32 %v16234_v54  ;;  %vm13217_vm13 = vcmp.lt.s32.totalorder %v13216_v36, 0  ;;  %v2983_v63 = vsel %vm2979_vm14, %v2967_v48, %v2982_v25 }
 0x1de   : > { %v2988_v16 = vsel %vm2978_vm12, %v2985_v30, %v2987_v7  ;;  %v2991_v12 = vsel %vm2979_vm14, %v2973_v22, %v2990_v47  ;;  %v2600_v53 = vsel %vm13217_vm13, 0, %v13216_v36  ;;  %v2419_v9 = vsel %vm2417_vm2, %v16858_v51, %v21347_v21  ;;  %13366 = vmatmul.mubr.msk.f32.gmra.mrb[6].mxu1 %vm21357_vm8, %v16537_v1 }
 0x1df   : > { %v2992_v15 = vsel %vm2978_vm12, %v2989_v43, %v2991_v12  ;;  %v16916_v11 = vmul.u32.u64.low %v16845_v61, %v2988_v16  ;;  %v16917_v34 = vmul.u32.u64.high %v16845_v61, %v2988_v16, %v16916_v11  ;;  %v2422_v52 = vsel %vm2420_vm5, %v21345_v44, %v16868_v26  ;;  %v16931_v59 = vpop.eup %14957  ;;  %6081 = vmatprep.mubr.f32.mxu1 %v21414_v29  ;;  %v21436_v16 = vld [vmem:[#allocation23_spill] sm:$0xff] }
 0x1e0   : > { %v2601_v3 = vsub.s32 32, %v2600_v53  ;;  %v2605_v10 = vsub.s32 4294967266, %v2600_v53  ;;  %v2984_v8 = vsel %vm2978_vm12, %v2981_v13, %v2983_v63  ;;  %v2221_v28 = vshrl.u32 %v2220_v35, 23  ;;  %v16941_v22 = vpop.eup %14959 }
 0x1e1   : > { %v16936_v48 = vmul.u32.u64.low %v16845_v61, %v2992_v15  ;;  %v16937_v56 = vmul.u32.u64.high %v16845_v61, %v2992_v15, %v16936_v48  ;;  %v21344_v33 = vxor.u32 2147483648, %v16931_v59  ;;  %v2602_v49 = vshll.u32 %v16847_v4, %v2600_v53 }
 0x1e2   : > { %v2603_v17 = vshrl.u32 %v16842_v31, %v2601_v3  ;;  %v2606_v0 = vadd.s32 127, %v2605_v10  ;;  %v2423_v46 = vsel %vm2416_vm4, %v2419_v9, %v2422_v52  ;;  %v21346_v36 = vxor.u32 2147483648, %v16941_v22  ;;  %13367 = vmatmul.mubr.msk.f32.gmra.mrb[8].mxu1 %vm21357_vm8, %v21436_v16  ;;  %v21438_v10 = vld [vmem:[#allocation24_spill] sm:$0xff] }
 0x1e3   : > { %v3003_v25 = vadd.s32 1, %v16917_v34  ;;  %v13202_v35 = vadd.s32 4294967169, %v2221_v28  ;;  %v2838_v31 = vsel %vm2836_vm11, %v21344_v33, %v16941_v22  ;;  %v2615_v1 = vsub.s32 4, %v16821_v50  ;;  %6087 = vmatprep.mubr.f32.mxu1 %v21414_v29  ;;  %v6109_v33 = vld [vmem:[%s21293_s5 + $0x18] sm:$0xff] }
 0x1e4   : > { %v2604_v4 = vor.u32 %v2603_v17, %v2602_v49  ;;  %v2607_v30 = vshll.u32 %v2606_v0, 23  ;;  %v2835_v42 = vsel %vm2833_vm1, %v16931_v59, %v21346_v36  ;;  %v3000_v62 = vmul.u32 %v16845_v61, %v2984_v8  ;;  %v21439_v8 = vld [vmem:[#allocation20_spill] sm:$0xff] }
 0x1e5   : > { %vm3002_vm13 = vc.u32 %v16937_v56, %v16916_v11  ;;  %v2227_v13 = vadd.s32 1, %v13202_v35  ;;  %v2424_v7 = vsel %vm2413_vm10, nan, %v2423_v46  ;;  %v2839_v43 = vsel %vm2832_vm9, %v2835_v42, %v2838_v31 }
 0x1e6   : > { %v2608_v47 = vor.u32 4788187, %v2607_v30  ;;  %v3004_v63 = vsel %vm3002_vm13, %v3003_v25, %v16917_v34  ;;  %v2840_v12 = vsel %vm2829_vm3, nan, %v2839_v43  ;;  %v2224_v45 = vand.u32 8388607, %v21349_v14  ;;  %13368 = vmatmul.mubr.msk.f32.gmra.mrb[10].mxu1 %vm21357_vm8, %v21438_v10  ;;  %v21443_v25 = vld [vmem:[#allocation10_spill] sm:$0xff] }
 0x1e7   : > { %v3005_v61 = vadd.s32 %v3004_v63, %v3000_v62  ;;  %vm2228_vm2 = vcmp.gt.s32.totalorder %v2227_v13, 0  ;;  %v16979_v53 = vpack.c.bf16 %v2840_v12, %v2424_v7  ;;  %v2611_v15 = vcvt.s32.f32 %v2604_v4  ;;  %6093 = vmatprep.mubr.f32.mxu1 %v21414_v29  ;;  %v21444_v7 = vld [vmem:[#allocation26_spill] sm:$0xff] }
 0x1e8   : > { %v2609_v2 = vand.u32 2147483647, %v2608_v47  ;;  %v2229_v9 = vsel %vm2228_vm2, %v2227_v13, 0  ;;  %v21440_v48 = vand.u32 2147483647, %v21439_v8  ;;  %vm2531_vm4 = vcmp.lt.s32.totalorder %v21439_v8, 0 }
 0x1e9   : > { %21437 = vst [vmem:[#allocation22_spill] sm:$0xff] %v16979_v53  ;;  %v3006_v52 = vadd.s32 536870912, %v3005_v61  ;;  %v2231_v34 = vand.u32 31, %v2229_v9  ;;  %13998 = vmatprep.subr.msk.bf16.mxu0 %vm15742_vm0, %v16979_v53  ;;  %v2616_v46 = vsel %vm2531_vm4, %v2615_v1, %v16821_v50  ;;  %v16999_v35 = vmul.f32 %v16812_v41, %v21443_v25 }
 0x1ea   : > { %v2612_v3 = vmul.f32 %v2611_v15, %v2609_v2  ;;  %vm16988_vm5 = vcmp.le.f32.partialorder %v21440_v48, 0.7853982  ;;  %v2225_v31 = vor.u32 8388608, %v2224_v45  ;;  %13369 = vmatmul.mubr.msk.f32.gmra.mrb[12].mxu1 %vm21357_vm8, %v21444_v7  ;;  %v2230_v47 = vshrl.u32 %v2229_v9, 5 }
 0x1eb   : > { %v16993_v49 = vshrl.u32 %v3006_v52, 30  ;;  %v2232_v17 = vsub.s32 32, %v2231_v34  ;;  %v2234_v30 = vshll.u32 %v21415_v32, %v2231_v34  ;;  %v2237_v62 = vshll.u32 %v21416_v19, %v2231_v34  ;;  %6099 = vmatprep.mubr.f32.mxu1 %v21414_v29 }
 0x1ec   : > { %v2613_v0 = vxor.u32 2147483648, %v2612_v3  ;;  %v2240_v63 = vshll.u32 %v21417_v40, %v2231_v34  ;;  %v2243_v16 = vshll.u32 %v21411_v6, %v2231_v34  ;;  %v17017_v12 = vsel %vm16988_vm5, 0, %v2616_v46 }
 0x1ed   : > { %v3008_v4 = vshll.u32 %v16993_v49, 30  ;;  %v2235_v42 = vshrl.u32 %v21416_v19, %v2232_v17  ;;  %v2238_v43 = vshrl.u32 %v21417_v40, %v2232_v17  ;;  %v2241_v50 = vshrl.u32 %v21411_v6, %v2232_v17 }
 0x1ee   : > { %v2614_v13 = vsel %vm2531_vm4, %v2613_v0, %v2612_v3  ;;  %v2244_v41 = vshrl.u32 %v21412_v57, %v2232_v17  ;;  %v17019_v15 = vshll.u32 %v2225_v31, 8  ;;  %vm2947_vm6 = vcmp.lt.s32.totalorder %v16628_v60, 0  ;;  %13370 = vmatmul.mubr.msk.f32.gmra.mrb[14].mxu1 %vm21357_vm8, %v16680_v38 }
 0x1ef   : > { %v17010_v1 = vsub.s32 %v3005_v61, %v3008_v4  ;;  %v2236_v45 = vor.u32 %v2235_v42, %v2234_v30  ;;  %v2239_v2 = vor.u32 %v2238_v43, %v2237_v62  ;;  %v2617_v61 = vsel %vm16988_vm5, %v21439_v8, %v2614_v13  ;;  %6327 = vmatprep.mubr.f32.mxu1 %v21414_v29 }
 0x1f0   : > { %v2242_v52 = vor.u32 %v2241_v50, %v2240_v63  ;;  %v2245_v3 = vor.u32 %v2244_v41, %v2243_v16  ;;  %v3031_v10 = vsub.s32 4, %v16993_v49  ;;  %v2246_v48 = vshll.u32 %v21412_v57, %v2231_v34 }
 0x1f1   : > { %v3011_v9 = vsub.s32 0, %v17010_v1  ;;  %v2247_v0 = vshrl.u32 %v21413_v23, %v2232_v17  ;;  %v2636_v46 = vand.u32 2139095040, %v16999_v35  ;;  %v2233_v31 = vshrl.u32 %v21415_v32, %v2232_v17 }
 0x1f2   : > { %vm2249_vm11 = vcmp.lt.s32.totalorder %v2230_v47, 1  ;;  %vm2252_vm12 = vcmp.lt.s32.totalorder %v2230_v47, 4  ;;  %14961 = vcosq.f32 %v2617_v61  ;;  %vm2251_vm14 = vcmp.lt.s32.totalorder %v2230_v47, 3  ;;  %13383 = vmatmul.mubr.msk.f32.vlgmr.msra.gmra.mrb[0].mxu1 %vm21359_vm15, %v16715_v39 }
 0x1f3   : > { %v13231_v28 = vmin.u32 %v3011_v9, %v17010_v1  ;;  %v2248_v4 = vor.u32 %v2247_v0, %v2246_v48  ;;  %v2257_v30 = vsel %vm2249_vm11, %v2236_v45, %v2239_v2  ;;  %v2258_v42 = vsel %vm2252_vm12, %v2245_v3, 920167782  ;;  %6333 = vmatprep.mubr.f32.mxu1 %v21414_v29 }
 0x1f4   : > { %14963 = vsinq.f32 %v2617_v61  ;;  %v2254_v34 = vsel %vm2252_vm12, %v2242_v52, 2102212464  ;;  %vm2250_vm7 = vcmp.lt.s32.totalorder %v2230_v47, 2  ;;  %v2259_v62 = vsel %vm2251_vm14, %v2242_v52, %v2258_v42 }
 0x1f5   : > { %v3013_v38 = vclz %v13231_v28  ;;  %v2261_v13 = vsel %vm2249_vm11, %v2239_v2, %v2242_v52  ;;  %v2262_v7 = vsel %vm2252_vm12, %v2248_v4, 1326507024  ;;  %v2253_v43 = vsel %vm2249_vm11, %v2233_v31, %v2236_v45 }
 0x1f6   : > { %v2260_v50 = vsel %vm2250_vm7, %v2257_v30, %v2259_v62  ;;  %v2263_v41 = vsel %vm2251_vm14, %v2245_v3, %v2262_v7  ;;  %v2255_v63 = vsel %vm2251_vm14, %v2239_v2, %v2254_v34  ;;  %v2637_v48 = vshrl.u32 %v2636_v46, 23 }
 0x1f7   : > { %v13232_v17 = vadd.s32 4294967294, %v3013_v38  ;;  %v2264_v16 = vsel %vm2250_vm7, %v2261_v13, %v2263_v41  ;;  %v17044_v61 = vmul.u32.u64.low %v17019_v15, %v2260_v50  ;;  %v17045_v9 = vmul.u32.u64.high %v17019_v15, %v2260_v50, %v17044_v61 }
 0x1f8   : > { %v17049_v39 = vmul.u32.u64.low %v17019_v15, %v2264_v16  ;;  %v17050_v52 = vmul.u32.u64.high %v17019_v15, %v2264_v16, %v17049_v39  ;;  %v2622_v45 = vadd.s32 3, %v17017_v12  ;;  %v3032_v2 = vsel %vm2947_vm6, %v3031_v10, %v16993_v49 }
 0x1f9   : > { %vm13233_vm1 = vcmp.lt.s32.totalorder %v13232_v17, 0  ;;  %v3001_v3 = vadd.s32 %v16916_v11, %v16937_v56  ;;  %v2256_v4 = vsel %vm2250_vm7, %v2253_v43, %v2255_v63  ;;  %v21445_v30 = vand.u32 2147483647, %v16628_v60 }
 0x1fa   : > { %v3016_v0 = vsel %vm13233_vm1, 0, %v13232_v17  ;;  %v2275_v46 = vadd.s32 1, %v17045_v9  ;;  %v21348_v38 = vand.u32 2147483647, %v16999_v35  ;;  %v13218_v34 = vadd.s32 4294967169, %v2637_v48 }
 0x1fb   : > { %v3017_v28 = vsub.s32 32, %v3016_v0  ;;  %v3021_v31 = vsub.s32 4294967266, %v3016_v0  ;;  %vm17061_vm9 = vcmp.le.f32.partialorder %v21445_v30, 0.7853982  ;;  %v3018_v49 = vshll.u32 %v17010_v1, %v3016_v0  ;;  %v21448_v0 = vld [vmem:[#allocation14_spill] sm:$0xff] }
 0x1fc   : > { %v17070_v11 = vsel %vm17061_vm9, 0, %v3032_v2  ;;  %v17072_v56 = vpop.eup %14961  ;;  %v2272_v47 = vmul.u32 %v17019_v15, %v2256_v4  ;;  %vm2274_vm13 = vc.u32 %v17050_v52, %v17044_v61  ;;  %v2643_v13 = vadd.s32 1, %v13218_v34  ;;  %v15017_v48 = vld [vmem:[%s15337_s20 + $0x1] ss:$4 sm:$0xf] }
 0x1fd   : > { %v3019_v10 = vshrl.u32 %v3001_v3, %v3017_v28  ;;  %v3022_v62 = vadd.s32 127, %v3021_v31  ;;  %v17079_v17 = vand.u32 3, %v2622_v45  ;;  %v2276_v50 = vsel %vm2274_vm13, %v2275_v46, %v17045_v9  ;;  %v6107_v28 = vld [vmem:[%s21293_s5 + $0x8] sm:$0xff] }
 0x1fe   : > { %v17077_v7 = vpop.eup %14963  ;;  %v3038_v41 = vadd.s32 3, %v17070_v11  ;;  %v2277_v63 = vadd.s32 %v2276_v50, %v2272_v47  ;;  %v2640_v16 = vand.u32 8388607, %v21348_v38  ;;  %vm2644_vm2 = vcmp.gt.s32.totalorder %v2643_v13, 0  ;;  %13374 = vmatmul.mubr.msk.f32.gmra.mrb[2].mxu0 %vm21359_vm15, %v6107_v28  ;;  %13384 = vmatmul.mubr.msk.f32.gmra.mrb[2].mxu1 %vm21359_vm15, %v6107_v28 }
 0x1ff   : > { %v3020_v1 = vor.u32 %v3019_v10, %v3018_v49  ;;  %v3023_v43 = vshll.u32 %v3022_v62, 23  ;;  %v2645_v39 = vsel %vm2644_vm2, %v2643_v13, 0  ;;  %v17087_v2 = vrot.slane %v15017_v48, %v21448_v0  ;;  %6226 = vmatprep.mubr.f32.mxu0 %v21414_v29  ;;  %6339 = vmatprep.mubr.f32.mxu1 %v21414_v29  ;;  %v6108_v49 = vld [vmem:[%s21293_s5 + $0x10] sm:$0xff] }
 0x200   : > { %v2278_v3 = vadd.s32 536870912, %v2277_v63  ;;  %v2647_v45 = vand.u32 31, %v2645_v39  ;;  %vm2628_vm5 = vcmp.eq.s32.totalorder %v17079_v17, 2  ;;  %v17095_v4 = vand.u32 3, %v3038_v41 }
 0x201   : > { %v3024_v15 = vor.u32 4788187, %v3023_v43  ;;  %v3027_v31 = vcvt.s32.f32 %v3020_v1  ;;  %v2641_v46 = vor.u32 8388608, %v2640_v16  ;;  %v17108_v13 = vmul.f32 %v17087_v2, %v15360_v58 }
 0x202   : > { %v17097_v30 = vshrl.u32 %v2278_v3, 30  ;;  %v2648_v34 = vsub.s32 32, %v2647_v45  ;;  %v17111_v43 = vshrl.u32 %v2645_v39, 5  ;;  %v2650_v50 = vshll.u32 %v21415_v32, %v2647_v45  ;;  %13375 = vmatmul.mubr.msk.f32.gmra.mrb[4].mxu0 %vm21359_vm15, %v6108_v49  ;;  %13385 = vmatmul.mubr.msk.f32.gmra.mrb[4].mxu1 %vm21359_vm15, %v6108_v49 }
 0x203   : > { %v3025_v9 = vand.u32 2147483647, %v3024_v15  ;;  %vm2625_vm4 = vcmp.eq.s32.totalorder %v17079_v17, 0  ;;  %v2653_v39 = vshll.u32 %v21416_v19, %v2647_v45  ;;  %6232 = vmatprep.mubr.f32.mxu0 %v21414_v29  ;;  %v2659_v36 = vshll.u32 %v21411_v6, %v2647_v45  ;;  %6345 = vmatprep.mubr.f32.mxu1 %v21414_v29 }
 0x204   : > { %v2280_v1 = vshll.u32 %v17097_v30, 30  ;;  %v2651_v41 = vshrl.u32 %v21416_v19, %v2648_v34  ;;  %v2654_v15 = vshrl.u32 %v21417_v40, %v2648_v34  ;;  %v2657_v48 = vshrl.u32 %v21411_v6, %v2648_v34 }
 0x205   : > { %v3028_v47 = vmul.f32 %v3027_v31, %v3025_v9  ;;  %v2660_v3 = vshrl.u32 %v21412_v57, %v2648_v34  ;;  %v2656_v9 = vshll.u32 %v21417_v40, %v2647_v45  ;;  %v2663_v31 = vshrl.u32 %v21413_v23, %v2648_v34 }
 0x206   : > { %v17121_v28 = vsub.s32 %v2277_v63, %v2280_v1  ;;  %v2652_v49 = vor.u32 %v2651_v41, %v2650_v50  ;;  %v2662_v63 = vshll.u32 %v21412_v57, %v2647_v45  ;;  %v2655_v38 = vor.u32 %v2654_v15, %v2653_v39  ;;  %13376 = vmatmul.mubr.msk.f32.gmra.mrb[6].mxu0 %vm21359_vm15, %v6109_v33 }
 0x207   : > { %v3029_v16 = vxor.u32 2147483648, %v3028_v47  ;;  %v2658_v14 = vor.u32 %v2657_v48, %v2656_v9  ;;  %v2661_v10 = vor.u32 %v2660_v3, %v2659_v36  ;;  %v17139_v24 = vshll.u32 %v2641_v46, 8  ;;  %13386 = vmatmul.mubr.msk.f32.gmra.mrb[6].mxu1 %vm21359_vm15, %v6109_v33  ;;  %6238 = vmatprep.mubr.f32.mxu0 %v21414_v29  ;;  %v6110_v33 = vld [vmem:[%s21293_s5 + $0x20] sm:$0xff] }
 0x208   : > { %v2283_v21 = vsub.s32 0, %v17121_v28  ;;  %v2664_v62 = vor.u32 %v2663_v31, %v2662_v63  ;;  %v21449_v45 = vxor.u32 2147483648, %v17072_v56  ;;  %v2428_v36 = vand.u32 2139095040, %v17108_v13  ;;  %6351 = vmatprep.mubr.f32.mxu1 %v21414_v29  ;;  %v6111_v31 = vld [vmem:[%s21293_s5 + $0x28] sm:$0xff] }
 0x209   : > { %v3030_v44 = vsel %vm2947_vm6, %v3029_v16, %v3028_v47  ;;  %vm2624_vm6 = vcmp.lt.s32.totalorder %v17079_v17, 2  ;;  %v2649_v46 = vshrl.u32 %v21415_v32, %v2648_v34  ;;  %vm2665_vm11 = vcmp.lt.s32.totalorder %v17111_v43, 1 }
 0x20a   : > { %v3033_v1 = vsel %vm17061_vm9, %v16628_v60, %v3030_v44  ;;  %v2630_v44 = vsel %vm2628_vm5, %v21449_v45, %v17077_v7  ;;  %v13203_v42 = vmin.u32 %v2283_v21, %v17121_v28  ;;  %vm2666_vm12 = vcmp.lt.s32.totalorder %v17111_v43, 2  ;;  %13377 = vmatmul.mubr.msk.f32.gmra.mrb[8].mxu0 %vm21359_vm15, %v6110_v33 }
 0x20b   : > { %14965 = vcosq.f32 %v3033_v1  ;;  %vm2667_vm14 = vcmp.lt.s32.totalorder %v17111_v43, 3  ;;  %vm2668_vm7 = vcmp.lt.s32.totalorder %v17111_v43, 4  ;;  %v2673_v21 = vsel %vm2665_vm11, %v2652_v49, %v2655_v38  ;;  %13387 = vmatmul.mubr.msk.f32.gmra.mrb[8].mxu1 %vm21359_vm15, %v6110_v33  ;;  %6244 = vmatprep.mubr.f32.mxu0 %v21414_v29 }
 0x20c   : > { %14967 = vsinq.f32 %v3033_v1  ;;  %v2285_v47 = vclz %v13203_v42  ;;  %v2677_v50 = vsel %vm2665_vm11, %v2655_v38, %v2658_v14  ;;  %v2669_v41 = vsel %vm2665_vm11, %v2649_v46, %v2652_v49  ;;  %6357 = vmatprep.mubr.f32.mxu1 %v21414_v29 }
 0x20d   : > { %v2670_v16 = vsel %vm2668_vm7, %v2658_v14, 2102212464  ;;  %v2674_v15 = vsel %vm2668_vm7, %v2661_v10, 920167782  ;;  %v2678_v48 = vsel %vm2668_vm7, %v2664_v62, 1326507024  ;;  %vm21358_vm9 = vweird.f32 %v21439_v8 }
 0x20e   : > { %v13204_v34 = vadd.s32 4294967294, %v2285_v47  ;;  %v2671_v3 = vsel %vm2667_vm14, %v2655_v38, %v2670_v16  ;;  %v2675_v39 = vsel %vm2667_vm14, %v2658_v14, %v2674_v15  ;;  %v2679_v9 = vsel %vm2667_vm14, %v2661_v10, %v2678_v48  ;;  %13378 = vmatmul.mubr.msk.f32.gmra.mrb[10].mxu0 %vm21359_vm15, %v6111_v31 }
 0x20f   : > { %v21450_v49 = vxor.u32 2147483648, %v17077_v7  ;;  %vm3040_vm1 = vcmp.lt.s32.totalorder %v17095_v4, 2  ;;  %v2676_v14 = vsel %vm2666_vm12, %v2673_v21, %v2675_v39  ;;  %v2680_v38 = vsel %vm2666_vm12, %v2677_v50, %v2679_v9  ;;  %13388 = vmatmul.mubr.msk.f32.gmra.mrb[10].mxu1 %vm21359_vm15, %v6111_v31  ;;  %6250 = vmatprep.mubr.f32.mxu0 %v21414_v29  ;;  %v6112_v50 = vld [vmem:[%s21293_s5 + $0x30] sm:$0xff] }
 0x210   : > { %v2429_v10 = vshrl.u32 %v2428_v36, 23  ;;  %vm3037_vm13 = vweird.f32 %v16628_v60  ;;  %vm13205_vm2 = vcmp.lt.s32.totalorder %v13204_v34, 0  ;;  %v2672_v63 = vsel %vm2666_vm12, %v2669_v41, %v2671_v3  ;;  %6363 = vmatprep.mubr.f32.mxu1 %v21414_v29 }
 0x211   : > { %v2627_v62 = vsel %vm2625_vm4, %v17072_v56, %v21450_v49  ;;  %v17183_v1 = vmul.u32.u64.low %v17139_v24, %v2680_v38  ;;  %v17184_v45 = vmul.u32.u64.high %v17139_v24, %v2680_v38, %v17183_v1  ;;  %v2288_v42 = vsel %vm13205_vm2, 0, %v13204_v34  ;;  %v6113_v49 = vld [vmem:[%s21293_s5 + $0x38] sm:$0xff] }
 0x212   : > { %v17187_v33 = vmul.u32.u64.low %v17139_v24, %v2676_v14  ;;  %v17188_v46 = vmul.u32.u64.high %v17139_v24, %v2676_v14, %v17187_v33  ;;  %v13210_v47 = vadd.s32 4294967169, %v2429_v10  ;;  %vm3041_vm5 = vcmp.eq.s32.totalorder %v17095_v4, 0  ;;  %13379 = vmatmul.mubr.msk.f32.gmra.mrb[12].mxu0 %vm21359_vm15, %v6112_v50 }
 0x213   : > { %v2273_v43 = vadd.s32 %v17044_v61, %v17050_v52  ;;  %v2289_v36 = vsub.s32 32, %v2288_v42  ;;  %v2293_v21 = vsub.s32 4294967266, %v2288_v42  ;;  %v2631_v16 = vsel %vm2624_vm6, %v2627_v62, %v2630_v44  ;;  %13389 = vmatmul.mubr.msk.f32.gmra.mrb[12].mxu1 %vm21359_vm15, %v6112_v50  ;;  %6256 = vmatprep.mubr.f32.mxu0 %v21414_v29 }
 0x214   : > { %vm3044_vm4 = vcmp.eq.s32.totalorder %v17095_v4, 2  ;;  %v2688_v15 = vmul.u32 %v17139_v24, %v2672_v63  ;;  %v2435_v61 = vadd.s32 1, %v13210_v47  ;;  %vm2219_vm11 = vcmp.lt.s32.totalorder %v16828_v27, 0  ;;  %6369 = vmatprep.mubr.f32.mxu1 %v21414_v29 }
 0x215   : > { %v17201_v41 = vpop.eup %14965  ;;  %v2290_v34 = vshll.u32 %v17121_v28, %v2288_v42  ;;  %v2291_v3 = vshrl.u32 %v2273_v43, %v2289_v36  ;;  %v2294_v39 = vadd.s32 127, %v2293_v21  ;;  %vm2690_vm6 = vc.u32 %v17184_v45, %v17187_v33 }
 0x216   : > { %v17207_v52 = vpop.eup %14967  ;;  %v21351_v48 = vxor.u32 2147483648, %v17201_v41  ;;  %v2691_v17 = vadd.s32 1, %v17188_v46  ;;  %vm2436_vm12 = vcmp.gt.s32.totalorder %v2435_v61, 0  ;;  %v21451_v14 = vand.u32 2147483647, %v16828_v27  ;;  %13380 = vmatmul.mubr.msk.f32.gmra.mrb[14].mxu0 %vm21359_vm15, %v6113_v49 }
 0x217   : > { %v21352_v9 = vxor.u32 2147483648, %v17207_v52  ;;  %v2292_v28 = vor.u32 %v2291_v3, %v2290_v34  ;;  %v2295_v44 = vshll.u32 %v2294_v39, 23  ;;  %v2437_v31 = vsel %vm2436_vm12, %v2435_v61, 0  ;;  %13390 = vmatmul.mubr.msk.f32.gmra.mrb[14].mxu1 %vm21359_vm15, %v6113_v49  ;;  %6517 = vmatprep.mubr.f32.mxu0 %v21414_v29 }
 0x218   : > { %v3046_v24 = vsel %vm3044_vm4, %v21351_v48, %v17207_v52  ;;  %vm17235_vm14 = vcmp.le.f32.partialorder %v21451_v14, 0.7853982  ;;  %v2692_v10 = vsel %vm2690_vm6, %v2691_v17, %v17188_v46  ;;  %v21353_v63 = vand.u32 2147483647, %v17108_v13  ;;  %6630 = vmatprep.mubr.f32.mxu1 %v21414_v29 }
 0x219   : > { %v3043_v62 = vsel %vm3041_vm5, %v17201_v41, %v21352_v9  ;;  %v2439_v1 = vand.u32 31, %v2437_v31  ;;  %v2296_v47 = vor.u32 4788187, %v2295_v44  ;;  %v2693_v43 = vadd.s32 %v2692_v10, %v2688_v15 }
 0x21a   : > { %v3047_v42 = vsel %vm3040_vm1, %v3043_v62, %v3046_v24  ;;  %v17245_v36 = vmul.f32 %v17087_v2, %v21443_v25  ;;  %v2632_v21 = vsel %vm21358_vm9, nan, %v2631_v16  ;;  %v2303_v46 = vsub.s32 4, %v17097_v30 }
 0x21b   : > { %v3048_v50 = vsel %vm3037_vm13, nan, %v3047_v42  ;;  %v2440_v61 = vsub.s32 32, %v2439_v1  ;;  %v2297_v15 = vand.u32 2147483647, %v2296_v47  ;;  %v2299_v34 = vcvt.s32.f32 %v2292_v28 }
 0x21c   : > { %v17254_v4 = vpack.c.bf16 %v3048_v50, %v2632_v21  ;;  %v2694_v3 = vadd.s32 536870912, %v2693_v43  ;;  %v2432_v2 = vand.u32 8388607, %v21353_v63  ;;  %v2442_v16 = vshll.u32 %v21415_v32, %v2439_v1 }
 0x21d   : > { %v2443_v39 = vshrl.u32 %v21416_v19, %v2440_v61  ;;  %v2446_v17 = vshrl.u32 %v21417_v40, %v2440_v61  ;;  %v2300_v24 = vmul.f32 %v2299_v34, %v2297_v15  ;;  %v2449_v44 = vshrl.u32 %v21411_v6, %v2440_v61 }
 0x21e   : > { %21454 = vst [vmem:[#allocation23_spill] sm:$0xff] %v17254_v4  ;;  %14004 = vmatprep.subr.msk.bf16.mxu1 %vm15742_vm0, %v17254_v4  ;;  %v2695_v28 = vshrl.u32 %v2694_v3, 30  ;;  %v2452_v49 = vshrl.u32 %v21412_v57, %v2440_v61  ;;  %v2304_v62 = vsel %vm2219_vm11, %v2303_v46, %v17097_v30  ;;  %vm2635_vm7 = vcmp.lt.s32.totalorder %v16999_v35, 0 }
 0x21f   : > { %v2438_v14 = vshrl.u32 %v2437_v31, 5  ;;  %v2445_v10 = vshll.u32 %v21416_v19, %v2439_v1  ;;  %v2451_v42 = vshll.u32 %v21411_v6, %v2439_v1  ;;  %v2301_v47 = vxor.u32 2147483648, %v2300_v24 }
 0x220   : > { %v2696_v21 = vshll.u32 %v2695_v28, 30  ;;  %v2444_v50 = vor.u32 %v2443_v39, %v2442_v16  ;;  %v2448_v15 = vshll.u32 %v21417_v40, %v2439_v1  ;;  %v2454_v48 = vshll.u32 %v21412_v57, %v2439_v1 }
 0x221   : > { %v2447_v34 = vor.u32 %v2446_v17, %v2445_v10  ;;  %v2453_v3 = vor.u32 %v2452_v49, %v2451_v42  ;;  %v2455_v9 = vshrl.u32 %v21413_v23, %v2440_v61  ;;  %v2302_v30 = vsel %vm2219_vm11, %v2301_v47, %v2300_v24 }
 0x222   : > { %v17281_v31 = vsel %vm17235_vm14, 0, %v2304_v62  ;;  %v2697_v46 = vsub.s32 %v2693_v43, %v2696_v21  ;;  %v2450_v63 = vor.u32 %v2449_v44, %v2448_v15  ;;  %v2433_v4 = vor.u32 8388608, %v2432_v2 }
 0x223   : > { %v2441_v16 = vshrl.u32 %v21415_v32, %v2440_v61  ;;  %v2456_v39 = vor.u32 %v2455_v9, %v2454_v48  ;;  %v2844_v17 = vand.u32 2139095040, %v17245_v36  ;;  %v2719_v10 = vsub.s32 4, %v2695_v28 }
 0x224   : > { %v2699_v49 = vsub.s32 0, %v2697_v46  ;;  %vm2457_vm1 = vcmp.lt.s32.totalorder %v2438_v14, 1  ;;  %vm2460_vm2 = vcmp.lt.s32.totalorder %v2438_v14, 4  ;;  %v2305_v1 = vsel %vm17235_vm14, %v16828_v27, %v2302_v30 }
 0x225   : > { %vm2459_vm5 = vcmp.lt.s32.totalorder %v2438_v14, 3  ;;  %v2465_v24 = vsel %vm2457_vm1, %v2444_v50, %v2447_v34  ;;  %v2466_v62 = vsel %vm2460_vm2, %v2453_v3, 920167782  ;;  %vm2458_vm4 = vcmp.lt.s32.totalorder %v2438_v14, 2 }
 0x226   : > { %v13219_v43 = vmin.u32 %v2699_v49, %v2697_v46  ;;  %v2462_v2 = vsel %vm2460_vm2, %v2450_v63, 2102212464  ;;  %v2467_v61 = vsel %vm2459_vm5, %v2450_v63, %v2466_v62  ;;  %v2469_v9 = vsel %vm2457_vm1, %v2447_v34, %v2450_v63 }
 0x227   : > { %v2468_v48 = vsel %vm2458_vm4, %v2465_v24, %v2467_v61  ;;  %v2470_v44 = vsel %vm2460_vm2, %v2456_v39, 1326507024  ;;  %v2473_v42 = vshll.u32 %v2433_v4, 8  ;;  %14969 = vcosq.f32 %v2305_v1 }
 0x228   : > { %v2701_v47 = vclz %v13219_v43  ;;  %v2720_v38 = vsel %vm2635_vm7, %v2719_v10, %v2695_v28  ;;  %v2461_v21 = vsel %vm2457_vm1, %v2441_v16, %v2444_v50  ;;  %v2463_v15 = vsel %vm2459_vm5, %v2447_v34, %v2462_v2 }
 0x229   : > { %v2471_v30 = vsel %vm2459_vm5, %v2453_v3, %v2470_v44  ;;  %v17297_v49 = vmul.u32.u64.low %v2473_v42, %v2468_v48  ;;  %v17298_v53 = vmul.u32.u64.high %v2473_v42, %v2468_v48, %v17297_v49  ;;  %v21356_v63 = vand.u32 2147483647, %v17245_v36 }
 0x22a   : > { %v13220_v62 = vadd.s32 4294967294, %v2701_v47  ;;  %v2472_v24 = vsel %vm2458_vm4, %v2469_v9, %v2471_v30  ;;  %v2845_v4 = vshrl.u32 %v2844_v17, 23  ;;  %v2310_v39 = vadd.s32 3, %v17281_v31 }
 0x22b   : > { %v21455_v43 = vand.u32 2147483647, %v16999_v35  ;;  %v17309_v50 = vmul.u32.u64.low %v2473_v42, %v2472_v24  ;;  %v17310_v34 = vmul.u32.u64.high %v2473_v42, %v2472_v24, %v17309_v50  ;;  %v2464_v16 = vsel %vm2458_vm4, %v2461_v21, %v2463_v15 }
 0x22c   : > { %vm13221_vm6 = vcmp.lt.s32.totalorder %v13220_v62, 0  ;;  %v13226_v10 = vadd.s32 4294967169, %v2845_v4  ;;  %14971 = vsinq.f32 %v2305_v1  ;;  %v2689_v17 = vadd.s32 %v17187_v33, %v17184_v45 }
 0x22d   : > { %vm17305_vm11 = vcmp.le.f32.partialorder %v21455_v43, 0.7853982  ;;  %v2704_v2 = vsel %vm13221_vm6, 0, %v13220_v62  ;;  %v2483_v61 = vadd.s32 1, %v17298_v53  ;;  %v2848_v44 = vand.u32 8388607, %v21356_v63 }
 0x22e   : > { %v17314_v3 = vsel %vm17305_vm11, 0, %v2720_v38  ;;  %v2705_v48 = vsub.s32 32, %v2704_v2  ;;  %v2709_v9 = vsub.s32 4294967266, %v2704_v2  ;;  %v2851_v47 = vadd.s32 1, %v13226_v10 }
 0x22f   : > { %v17322_v30 = vand.u32 3, %v2310_v39  ;;  %v2726_v38 = vadd.s32 3, %v17314_v3  ;;  %v2480_v14 = vmul.u32 %v2473_v42, %v2464_v16  ;;  %vm2482_vm12 = vc.u32 %v17310_v34, %v17297_v49 }
 0x230   : > { %v2706_v1 = vshll.u32 %v2697_v46, %v2704_v2  ;;  %v2707_v21 = vshrl.u32 %v2689_v17, %v2705_v48  ;;  %v2710_v15 = vadd.s32 127, %v2709_v9  ;;  %v2484_v45 = vsel %vm2482_vm12, %v2483_v61, %v17298_v53 }
 0x231   : > { %v2485_v33 = vadd.s32 %v2484_v45, %v2480_v14  ;;  %vm2852_vm14 = vcmp.gt.s32.totalorder %v2851_v47, 0  ;;  %v17327_v62 = vpop.eup %14969  ;;  %v2849_v43 = vor.u32 8388608, %v2848_v44  ;;  %vm2316_vm1 = vcmp.eq.s32.totalorder %v17322_v30, 2 }
 0x232   : > { %v2708_v24 = vor.u32 %v2707_v21, %v2706_v1  ;;  %v2711_v4 = vshll.u32 %v2710_v15, 23  ;;  %v2853_v50 = vsel %vm2852_vm14, %v2851_v47, 0  ;;  %v17330_v16 = vand.u32 3, %v2726_v38 }
 0x233   : > { %v2486_v39 = vadd.s32 536870912, %v2485_v33  ;;  %v2855_v10 = vand.u32 31, %v2853_v50  ;;  %v17333_v46 = vand.u32 3, %v16764_v55  ;;  %v17339_v61 = vand.u32 3, %v16804_v18 }
 0x234   : > { %v2712_v42 = vor.u32 4788187, %v2711_v4  ;;  %v2715_v9 = vcvt.s32.f32 %v2708_v24  ;;  %v17342_v44 = vadd.s32 %v17297_v49, %v17310_v34  ;;  %v17344_v47 = vshll.u32 %v2849_v43, 8 }
 0x235   : > { %v17336_v17 = vshrl.u32 %v2486_v39, 30  ;;  %v2856_v2 = vsub.s32 32, %v2855_v10  ;;  %v2854_v14 = vshrl.u32 %v2853_v50, 5  ;;  %v2864_v21 = vshll.u32 %v21417_v40, %v2855_v10 }
 0x236   : > { %v2713_v48 = vand.u32 2147483647, %v2712_v42  ;;  %v17346_v38 = vpop.eup %14971  ;;  %vm2313_vm2 = vcmp.eq.s32.totalorder %v17322_v30, 0  ;;  %v2858_v34 = vshll.u32 %v21415_v32, %v2855_v10  ;;  %v2861_v4 = vshll.u32 %v21416_v19, %v2855_v10 }
 0x237   : > { %v2488_v55 = vshll.u32 %v17336_v17, 30  ;;  %v2859_v1 = vshrl.u32 %v21416_v19, %v2856_v2  ;;  %v2862_v18 = vshrl.u32 %v21417_v40, %v2856_v2  ;;  %v2865_v45 = vshrl.u32 %v21411_v6, %v2856_v2 }
 0x238   : > { %v2716_v15 = vmul.f32 %v2715_v9, %v2713_v48  ;;  %v2868_v24 = vshrl.u32 %v21412_v57, %v2856_v2  ;;  %v2871_v43 = vshrl.u32 %v21413_v23, %v2856_v2  ;;  %v2867_v48 = vshll.u32 %v21411_v6, %v2855_v10 }
 0x239   : > { %v17355_v49 = vsub.s32 %v2485_v33, %v2488_v55  ;;  %v2866_v42 = vor.u32 %v2865_v45, %v2864_v21  ;;  %v2860_v63 = vor.u32 %v2859_v1, %v2858_v34  ;;  %v2863_v53 = vor.u32 %v2862_v18, %v2861_v4 }
 0x23a   : > { %v2717_v39 = vxor.u32 2147483648, %v2716_v15  ;;  %v2870_v0 = vshll.u32 %v21412_v57, %v2855_v10  ;;  %v21458_v33 = vxor.u32 2147483648, %v17327_v62  ;;  %v2857_v21 = vshrl.u32 %v21415_v32, %v2856_v2 }
 0x23b   : > { %v2491_v9 = vsub.s32 0, %v17355_v49  ;;  %v2869_v45 = vor.u32 %v2868_v24, %v2867_v48  ;;  %vm2876_vm5 = vcmp.lt.s32.totalorder %v2854_v14, 4  ;;  %vm2873_vm4 = vcmp.lt.s32.totalorder %v2854_v14, 1 }
 0x23c   : > { %v17369_v55 = vsel %vm2316_vm1, %v21458_v33, %v17346_v38  ;;  %v2718_v50 = vsel %vm2635_vm7, %v2717_v39, %v2716_v15  ;;  %v2872_v10 = vor.u32 %v2871_v43, %v2870_v0  ;;  %vm2875_vm6 = vcmp.lt.s32.totalorder %v2854_v14, 3 }
 0x23d   : > { %v2721_v1 = vsel %vm17305_vm11, %v16999_v35, %v2718_v50  ;;  %v13211_v18 = vmin.u32 %v2491_v9, %v17355_v49  ;;  %v2878_v34 = vsel %vm2876_vm5, %v2866_v42, 2102212464  ;;  %v2877_v33 = vsel %vm2873_vm4, %v2857_v21, %v2860_v63 }
 0x23e   : > { %14973 = vcosq.f32 %v2721_v1  ;;  %v2881_v15 = vsel %vm2873_vm4, %v2860_v63, %v2863_v53  ;;  %v2879_v2 = vsel %vm2875_vm6, %v2863_v53, %v2878_v34  ;;  %v2882_v24 = vsel %vm2876_vm5, %v2869_v45, 920167782 }
 0x23f   : > { %14975 = vsinq.f32 %v2721_v1  ;;  %v2493_v4 = vclz %v13211_v18  ;;  %v2885_v39 = vsel %vm2873_vm4, %v2863_v53, %v2866_v42  ;;  %vm3247_vm7 = vcmp.eq.s32.totalorder %v17333_v46, 0 }
 0x240   : > { %vm2874_vm11 = vcmp.lt.s32.totalorder %v2854_v14, 2  ;;  %v2883_v0 = vsel %vm2875_vm6, %v2866_v42, %v2882_v24  ;;  %v2886_v43 = vsel %vm2876_vm5, %v2872_v10, 1326507024  ;;  %vm2312_vm12 = vcmp.lt.s32.totalorder %v17322_v30, 2 }
 0x241   : > { %v13212_v28 = vadd.s32 4294967294, %v2493_v4  ;;  %v21459_v50 = vxor.u32 2147483648, %v17346_v38  ;;  %vm2732_vm14 = vcmp.eq.s32.totalorder %v17330_v16, 2  ;;  %vm2427_vm1 = vcmp.lt.s32.totalorder %v17108_v13, 0 }
 0x242   : > { %v2880_v53 = vsel %vm2874_vm11, %v2877_v33, %v2879_v2  ;;  %v2884_v48 = vsel %vm2874_vm11, %v2881_v15, %v2883_v0  ;;  %v2887_v9 = vsel %vm2875_vm6, %v2869_v45, %v2886_v43  ;;  %vm2729_vm4 = vcmp.eq.s32.totalorder %v17330_v16, 0 }
 0x243   : > { %v2315_v63 = vsel %vm2313_vm2, %v17327_v62, %v21459_v50  ;;  %vm13213_vm8 = vcmp.lt.s32.totalorder %v13212_v28, 0  ;;  %v2888_v42 = vsel %vm2874_vm11, %v2885_v39, %v2887_v9  ;;  %vm2728_vm5 = vcmp.lt.s32.totalorder %v17330_v16, 2 }
 0x244   : > { %v17395_v21 = vmul.u32.u64.low %v17344_v47, %v2884_v48  ;;  %v17396_v1 = vmul.u32.u64.high %v17344_v47, %v2884_v48, %v17395_v21  ;;  %v2496_v18 = vsel %vm13213_vm8, 0, %v13212_v28  ;;  %v21460_v4 = vxor.u32 2147483648, %v16868_v26 }
 0x245   : > { %v17401_v10 = vmul.u32.u64.low %v17344_v47, %v2888_v42  ;;  %v17402_v34 = vmul.u32.u64.high %v17344_v47, %v2888_v42, %v17401_v10  ;;  %vm2309_vm2 = vweird.f32 %v16828_v27  ;;  %vm2725_vm6 = vweird.f32 %v16999_v35 }
 0x246   : > { %v3249_v14 = vsel %vm3247_vm7, %v16858_v51, %v21460_v4  ;;  %v2497_v45 = vsub.s32 32, %v2496_v18  ;;  %v2501_v33 = vsub.s32 4294967266, %v2496_v18  ;;  %v2511_v15 = vsub.s32 4, %v17336_v17 }
 0x247   : > { %v2896_v2 = vmul.u32 %v17344_v47, %v2880_v53  ;;  %v2498_v24 = vshll.u32 %v17355_v49, %v2496_v18  ;;  %vm3250_vm8 = vcmp.eq.s32.totalorder %v17333_v46, 2  ;;  %vm3659_vm11 = vcmp.eq.s32.totalorder %v17339_v61, 0 }
 0x248   : > { %vm3662_vm9 = vcmp.eq.s32.totalorder %v17339_v61, 2  ;;  %v2499_v39 = vshrl.u32 %v17342_v44, %v2497_v45  ;;  %v2502_v28 = vadd.s32 127, %v2501_v33  ;;  %v2899_v0 = vadd.s32 1, %v17396_v1  ;;  %v17422_v48 = vpop.eup %14973 }
 0x249   : > { %v21461_v43 = vxor.u32 2147483648, %v16941_v22  ;;  %vm2898_vm7 = vc.u32 %v17402_v34, %v17395_v21  ;;  %v21462_v47 = vxor.u32 2147483648, %v16858_v51  ;;  %vm3658_vm15 = vcmp.lt.s32.totalorder %v17339_v61, 2  ;;  %v17433_v9 = vpop.eup %14975 }
 0x24a   : > { %v21463_v44 = vxor.u32 2147483648, %v16931_v59  ;;  %v2733_v42 = vxor.u32 2147483648, %v17422_v48  ;;  %v2500_v18 = vor.u32 %v2499_v39, %v2498_v24  ;;  %v2503_v10 = vshll.u32 %v2502_v28, 23 }
 0x24b   : > { %v3661_v50 = vsel %vm3659_vm11, %v16931_v59, %v21461_v43  ;;  %v3252_v49 = vsel %vm3250_vm8, %v21462_v47, %v16868_v26  ;;  %v2900_v4 = vsel %vm2898_vm7, %v2899_v0, %v17396_v1  ;;  %v2730_v45 = vxor.u32 2147483648, %v17433_v9 }
 0x24c   : > { %v3664_v53 = vsel %vm3662_vm9, %v21463_v44, %v16941_v22  ;;  %v2901_v33 = vadd.s32 %v2900_v4, %v2896_v2  ;;  %vm3246_vm11 = vcmp.lt.s32.totalorder %v17333_v46, 2  ;;  %v2319_v26 = vsel %vm2312_vm12, %v2315_v63, %v17369_v55 }
 0x24d   : > { %v3665_v51 = vsel %vm3658_vm15, %v3661_v50, %v3664_v53  ;;  %v2734_v59 = vsel %vm2732_vm14, %v2733_v42, %v17433_v9  ;;  %v2504_v22 = vor.u32 4788187, %v2503_v10  ;;  %v2512_v61 = vsel %vm2427_vm1, %v2511_v15, %v17336_v17 }
 0x24e   : > { %v2731_v46 = vsel %vm2729_vm4, %v17422_v48, %v2730_v45  ;;  %v2507_v1 = vcvt.s32.f32 %v2500_v18  ;;  %v2902_v30 = vadd.s32 536870912, %v2901_v33  ;;  %v3253_v55 = vsel %vm3246_vm11, %v3249_v14, %v3252_v49 }
 0x24f   : > { %v2735_v63 = vsel %vm2728_vm5, %v2731_v46, %v2734_v59  ;;  %v2505_v2 = vand.u32 2147483647, %v2504_v22  ;;  %v3666_v24 = vsel %vm2829_vm3, nan, %v3665_v51  ;;  %v3863_v39 = vand.u32 3, %v17070_v11 }
 0x250   : > { %v2320_v17 = vsel %vm2309_vm2, nan, %v2319_v26  ;;  %v2736_v15 = vsel %vm2725_vm6, nan, %v2735_v63  ;;  %v2903_v28 = vshrl.u32 %v2902_v30, 30  ;;  %v21464_v14 = vand.u32 2147483647, %v17108_v13 }
 0x251   : > { %v17464_v0 = vpack.c.bf16 %v2736_v15, %v2320_v17  ;;  %v2508_v43 = vmul.f32 %v2507_v1, %v2505_v2  ;;  %v3254_v54 = vsel %vm2413_vm10, nan, %v3253_v55  ;;  %vm3865_vm3 = vcmp.eq.s32.totalorder %v3863_v39, 0  ;;  %v17501_v26 = vld [vmem:[%s15337_s20 + $0x2] ss:$4 sm:$0xf] }
 0x252   : > { %vm17468_vm15 = vcmp.le.f32.partialorder %v21464_v14, 0.7853982  ;;  %v2904_v50 = vshll.u32 %v2903_v28, 30  ;;  %v17478_v47 = vpack.c.bf16 %v3666_v24, %v3254_v54  ;;  %v21467_v44 = vxor.u32 2147483648, %v17207_v52 }
 0x253   : > { %v17476_v11 = vsel %vm17468_vm15, 0, %v2512_v61  ;;  %14001 = vmatpush1.bf16.msk.msra.mxu0 %vm15742_vm0, %v17464_v0  ;;  %v2509_v49 = vxor.u32 2147483648, %v2508_v43  ;;  %vm3868_vm9 = vcmp.eq.s32.totalorder %v3863_v39, 2  ;;  %v3142_v18 = vand.u32 3, %v17281_v31 }
 0x254   : > { %v3867_v53 = vsel %vm3865_vm3, %v17201_v41, %v21467_v44  ;;  %v17492_v10 = vsub.s32 %v2901_v33, %v2904_v50  ;;  %14010 = vmatprep.subr.msk.bf16.mxu0 %vm15742_vm0, %v17478_v47  ;;  %vm3864_vm10 = vcmp.lt.s32.totalorder %v3863_v39, 2  ;;  %v21468_v4 = vxor.u32 2147483648, %v17201_v41 }
 0x255   : > { %v2510_v59 = vsel %vm2427_vm1, %v2509_v49, %v2508_v43  ;;  %v2518_v22 = vadd.s32 3, %v17476_v11  ;;  %v3451_v31 = vand.u32 3, %v17017_v12  ;;  %vm21469_vm12 = vcmask 80896   ;;  %v21470_v12 = vld [vmem:[#allocation8_spill] sm:$0xff] }
 0x256   : > { %v3870_v51 = vsel %vm3868_vm9, %v21468_v4, %v17207_v52  ;;  %v2513_v61 = vsel %vm17468_vm15, %v17108_v13, %v2510_v59  ;;  %v2907_v46 = vsub.s32 0, %v17492_v10  ;;  %13401 = vmatmul.mubr.msk.f32.vlgmr.msra.gmra.mrb[0].mxu0 %vm21469_vm12, %v17489_v5  ;;  %v3554_v52 = vand.u32 3, %v17314_v3 }
 0x257   : > { %v3871_v33 = vsel %vm3864_vm10, %v3867_v53, %v3870_v51  ;;  %14977 = vcosq.f32 %v2513_v61  ;;  %vm2843_vm14 = vcmp.lt.s32.totalorder %v17245_v36, 0  ;;  %vm3144_vm1 = vcmp.eq.s32.totalorder %v3142_v18, 0  ;;  %6523 = vmatprep.mubr.f32.mxu0 %v21414_v29 }
 0x258   : > { %v17513_v41 = vsel %vm3037_vm13, nan, %v3871_v33  ;;  %v3883_v1 = vrot.slane %v17501_v26, %v21470_v12  ;;  %14979 = vsinq.f32 %v2513_v61  ;;  %v13227_v30 = vmin.u32 %v2907_v46, %v17492_v10 }
 0x259   : > { %v21471_v60 = vxor.u32 2147483648, %v17346_v38  ;;  %vm3147_vm13 = vcmp.eq.s32.totalorder %v3142_v18, 2  ;;  %v17526_v63 = vand.u32 3, %v2518_v22  ;;  %v2927_v3 = vsub.s32 4, %v2903_v28 }
 0x25a   : > { %vm3453_vm4 = vcmp.eq.s32.totalorder %v3451_v31, 0  ;;  %v21472_v2 = vxor.u32 2147483648, %v17327_v62  ;;  %v2909_v39 = vclz %v13227_v30  ;;  %vm3143_vm5 = vcmp.lt.s32.totalorder %v3142_v18, 2 }
 0x25b   : > { %v3146_v55 = vsel %vm3144_vm1, %v17327_v62, %v21471_v60  ;;  %vm3556_vm8 = vcmp.eq.s32.totalorder %v3554_v52, 0  ;;  %vm3559_vm7 = vcmp.eq.s32.totalorder %v3554_v52, 2  ;;  %vm3555_vm11 = vcmp.lt.s32.totalorder %v3554_v52, 2 }
 0x25c   : > { %v3149_v24 = vsel %vm3147_vm13, %v21472_v2, %v17346_v38  ;;  %v3558_v15 = vsel %vm3556_vm8, %v17422_v48, %v2730_v45  ;;  %v3561_v14 = vsel %vm3559_vm7, %v2733_v42, %v17433_v9  ;;  %v13228_v16 = vadd.s32 4294967294, %v2909_v39 }
 0x25d   : > { %v3150_v17 = vsel %vm3143_vm5, %v3146_v55, %v3149_v24  ;;  %v21473_v43 = vxor.u32 2147483648, %v17077_v7  ;;  %vm3456_vm15 = vcmp.eq.s32.totalorder %v3451_v31, 2  ;;  %v3562_v38 = vsel %vm3555_vm11, %v3558_v15, %v3561_v14 }
 0x25e   : > { %v2928_v54 = vsel %vm2843_vm14, %v2927_v3, %v2903_v28  ;;  %v21474_v50 = vxor.u32 2147483648, %v17072_v56  ;;  %v3151_v45 = vsel %vm2309_vm2, nan, %v3150_v17  ;;  %v3563_v48 = vsel %vm2725_vm6, nan, %v3562_v38  ;;  %v21480_v17 = vld [vmem:[#allocation9_spill] sm:$0xff] }
 0x25f   : > { %v3455_v62 = vsel %vm3453_vm4, %v17072_v56, %v21473_v43  ;;  %vm2521_vm3 = vcmp.eq.s32.totalorder %v17526_v63, 0  ;;  %v21475_v9 = vand.u32 2147483647, %v17245_v36  ;;  %vm13229_vm10 = vcmp.lt.s32.totalorder %v13228_v16, 0 }
 0x260   : > { %v3458_v49 = vsel %vm3456_vm15, %v21474_v50, %v17077_v7  ;;  %v17556_v28 = vpack.c.bf16 %v3563_v48, %v3151_v45  ;;  %v2897_v56 = vadd.s32 %v17395_v21, %v17402_v34  ;;  %v2912_v7 = vsel %vm13229_vm10, 0, %v13228_v16 }
 0x261   : > { %vm17552_vm9 = vcmp.le.f32.partialorder %v21475_v9, 0.7853982  ;;  %vm3452_vm12 = vcmp.lt.s32.totalorder %v3451_v31, 2  ;;  %v17561_v27 = vmul.f32 %v3883_v1, %v15360_v58  ;;  %v2913_v35 = vsub.s32 32, %v2912_v7  ;;  %v14978_v4 = vpop.eup %14977 }
 0x262   : > { %v2917_v44 = vsub.s32 4294967266, %v2912_v7  ;;  %v2930_v53 = vsel %vm17552_vm9, 0, %v2928_v54  ;;  %v3459_v18 = vsel %vm3452_vm12, %v3455_v62, %v3458_v49  ;;  %14013 = vmatpush1.bf16.msk.msra.mxu0 %vm15742_vm0, %v17556_v28  ;;  %vm2520_vm2 = vcmp.lt.s32.totalorder %v17526_v63, 2  ;;  %v14980_v22 = vpop.eup %14979 }
 0x263   : > { %v3348_v21 = vand.u32 3, %v17476_v11  ;;  %v17571_v34 = vmul.f32 %v3883_v1, %v21443_v25  ;;  %v4008_v51 = vand.u32 2147483647, %v17561_v27  ;;  %v4011_v59 = vand.u32 2139095040, %v17561_v27 }
 0x264   : > { %v2525_v31 = vxor.u32 2147483648, %v14978_v4  ;;  %v2914_v33 = vshll.u32 %v17492_v10, %v2912_v7  ;;  %v2915_v61 = vshrl.u32 %v2897_v56, %v2913_v35  ;;  %v2918_v46 = vadd.s32 127, %v2917_v44 }
 0x265   : > { %v2522_v52 = vxor.u32 2147483648, %v14980_v22  ;;  %vm2524_vm6 = vcmp.eq.s32.totalorder %v17526_v63, 2  ;;  %v4012_v12 = vshrl.u32 %v4011_v59, 23  ;;  %v4015_v11 = vand.u32 8388607, %v4008_v51 }
 0x266   : > { %v2916_v30 = vor.u32 %v2915_v61, %v2914_v33  ;;  %v2919_v1 = vshll.u32 %v2918_v46, 23  ;;  %v2934_v60 = vadd.s32 3, %v2930_v53  ;;  %vm21478_vm1 = vweird.f32 %v21439_v8 }
 0x267   : > { %v3460_v55 = vsel %vm21478_vm1, nan, %v3459_v18  ;;  %vm3350_vm13 = vcmp.eq.s32.totalorder %v3348_v21, 0  ;;  %vm3353_vm4 = vcmp.eq.s32.totalorder %v3348_v21, 2  ;;  %v13271_v10 = vadd.s32 4294967169, %v4012_v12 }
 0x268   : > { %v17582_v3 = vpack.c.bf16 %v17513_v41, %v3460_v55  ;;  %v2526_v2 = vsel %vm2524_vm6, %v2525_v31, %v14980_v22  ;;  %v2920_v24 = vor.u32 4788187, %v2919_v1  ;;  %v4424_v39 = vand.u32 2147483647, %v17571_v34 }
 0x269   : > { %v17587_v15 = vrot.slane %v17501_v26, %v21480_v17  ;;  %v2523_v14 = vsel %vm2521_vm3, %v14978_v4, %v2522_v52  ;;  %v3355_v16 = vsel %vm3353_vm4, %v2525_v31, %v14980_v22  ;;  %v4016_v8 = vor.u32 8388608, %v4015_v11 }
 0x26a   : > { %21479 = vst [vmem:[#allocation24_spill] sm:$0xff] %v17582_v3  ;;  %v4018_v43 = vadd.s32 1, %v13271_v10  ;;  %v2921_v62 = vand.u32 2147483647, %v2920_v24  ;;  %v2923_v41 = vcvt.s32.f32 %v2916_v30  ;;  %v3352_v38 = vsel %vm3350_vm13, %v14978_v4, %v2522_v52 }
 0x26b   : > { %v4427_v54 = vand.u32 2139095040, %v17571_v34  ;;  %v17592_v50 = vand.u32 3, %v2934_v60  ;;  %vm3349_vm5 = vcmp.lt.s32.totalorder %v3348_v21, 2  ;;  %v17594_v49 = vand.u32 3, %v2930_v53 }
 0x26c   : > { %vm4019_vm8 = vcmp.gt.s32.totalorder %v4018_v43, 0  ;;  %v2527_v45 = vsel %vm2520_vm2, %v2523_v14, %v2526_v2  ;;  %v2924_v48 = vmul.f32 %v2923_v41, %v2921_v62  ;;  %v3356_v7 = vsel %vm3349_vm5, %v3352_v38, %v3355_v16 }
 0x26d   : > { %v4020_v9 = vsel %vm4019_vm8, %v4018_v43, 0  ;;  %v4428_v56 = vshrl.u32 %v4427_v54, 23  ;;  %v17598_v18 = vshll.u32 %v4016_v8, 8  ;;  %v17602_v22 = vand.u32 8388607, %v4424_v39 }
 0x26e   : > { %v4021_v35 = vshrl.u32 %v4020_v9, 5  ;;  %v4022_v44 = vand.u32 31, %v4020_v9  ;;  %v2925_v4 = vxor.u32 2147483648, %v2924_v48  ;;  %v17606_v53 = vmul.f32 %v17587_v15, %v15360_v58 }
 0x26f   : > { %v13287_v59 = vadd.s32 4294967169, %v4428_v56  ;;  %vm2517_vm11 = vweird.f32 %v17108_v13  ;;  %vm2936_vm10 = vcmp.lt.s32.totalorder %v17592_v50, 2  ;;  %vm2933_vm12 = vweird.f32 %v17245_v36  ;;  %v17665_v13 = vld [vmem:[%s21292_s4 + $0x50] sm:$0xff] }
 0x270   : > { %v4023_v63 = vsub.s32 32, %v4022_v44  ;;  %v4025_v21 = vshll.u32 %v21415_v32, %v4022_v44  ;;  %v4028_v31 = vshll.u32 %v21416_v19, %v4022_v44  ;;  %v4031_v33 = vshll.u32 %v21417_v40, %v4022_v44 }
 0x271   : > { %v2926_v61 = vsel %vm2843_vm14, %v2925_v4, %v2924_v48  ;;  %v4034_v46 = vshll.u32 %v21411_v6, %v4022_v44  ;;  %v4037_v52 = vshll.u32 %v21412_v57, %v4022_v44  ;;  %vm4040_vm7 = vcmp.lt.s32.totalorder %v4021_v35, 1 }
 0x272   : > { %v2929_v12 = vsel %vm17552_vm9, %v17245_v36, %v2926_v61  ;;  %v4024_v11 = vshrl.u32 %v21415_v32, %v4023_v63  ;;  %v4026_v30 = vshrl.u32 %v21416_v19, %v4023_v63  ;;  %v4029_v1 = vshrl.u32 %v21417_v40, %v4023_v63 }
 0x273   : > { %14981 = vcosq.f32 %v2929_v12  ;;  %v4032_v60 = vshrl.u32 %v21411_v6, %v4023_v63  ;;  %v4035_v55 = vshrl.u32 %v21412_v57, %v4023_v63  ;;  %v4038_v10 = vshrl.u32 %v21413_v23, %v4023_v63 }
 0x274   : > { %14983 = vsinq.f32 %v2929_v12  ;;  %v4027_v2 = vor.u32 %v4026_v30, %v4025_v21  ;;  %v4030_v24 = vor.u32 %v4029_v1, %v4028_v31  ;;  %vm4041_vm14 = vcmp.lt.s32.totalorder %v4021_v35, 2 }
 0x275   : > { %v4033_v42 = vor.u32 %v4032_v60, %v4031_v33  ;;  %v4036_v17 = vor.u32 %v4035_v55, %v4034_v46  ;;  %v4039_v14 = vor.u32 %v4038_v10, %v4037_v52  ;;  %vm4042_vm15 = vcmp.lt.s32.totalorder %v4021_v35, 3  ;;  %v17648_v46 = vld [vmem:[%s21292_s4 + $0x48] sm:$0xff] }
 0x276   : > { %vm4043_vm3 = vcmp.lt.s32.totalorder %v4021_v35, 4  ;;  %v4044_v16 = vsel %vm4040_vm7, %v4024_v11, %v4027_v2  ;;  %v4048_v8 = vsel %vm4040_vm7, %v4027_v2, %v4030_v24  ;;  %v4434_v43 = vadd.s32 1, %v13287_v59 }
 0x277   : > { %v4045_v62 = vsel %vm4043_vm3, %v4033_v42, 2102212464  ;;  %v4049_v41 = vsel %vm4043_vm3, %v4036_v17, 920167782  ;;  %v4052_v38 = vsel %vm4040_vm7, %v4030_v24, %v4033_v42  ;;  %v4053_v54 = vsel %vm4043_vm3, %v4039_v14, 1326507024 }
 0x278   : > { %v4046_v48 = vsel %vm4042_vm15, %v4030_v24, %v4045_v62  ;;  %v4050_v9 = vsel %vm4042_vm15, %v4033_v42, %v4049_v41  ;;  %v4054_v56 = vsel %vm4042_vm15, %v4036_v17, %v4053_v54  ;;  %vm4435_vm9 = vcmp.gt.s32.totalorder %v4434_v43, 0 }
 0x279   : > { %v4047_v44 = vsel %vm4041_vm14, %v4044_v16, %v4046_v48  ;;  %v4051_v4 = vsel %vm4041_vm14, %v4048_v8, %v4050_v9  ;;  %v4055_v63 = vsel %vm4041_vm14, %v4052_v38, %v4054_v56  ;;  %v4436_v21 = vsel %vm4435_vm9, %v4434_v43, 0  ;;  %v17692_v48 = vld [vmem:[%s21292_s4 + $0x58] sm:$0xff] }
 0x27a   : > { %v17634_v59 = vmul.u32.u64.low %v17598_v18, %v4055_v63  ;;  %v17635_v31 = vmul.u32.u64.high %v17598_v18, %v4055_v63, %v17634_v59  ;;  %v17638_v33 = vmul.u32.u64.low %v17598_v18, %v4051_v4  ;;  %v17639_v61 = vmul.u32.u64.high %v17598_v18, %v4051_v4, %v17638_v33 }
 0x27b   : > { %vm2937_vm2 = vcmp.eq.s32.totalorder %v17592_v50, 0  ;;  %vm2940_vm6 = vcmp.eq.s32.totalorder %v17592_v50, 2  ;;  %vm3761_vm1 = vcmp.lt.s32.totalorder %v17594_v49, 2  ;;  %v4438_v35 = vand.u32 31, %v4436_v21 }
 0x27c   : > { %v2528_v52 = vsel %vm2517_vm11, nan, %v2527_v45  ;;  %v3357_v12 = vsel %vm2517_vm11, nan, %v3356_v7  ;;  %vm3762_vm13 = vcmp.eq.s32.totalorder %v17594_v49, 0  ;;  %vm3765_vm4 = vcmp.eq.s32.totalorder %v17594_v49, 2 }
 0x27d   : > { %vm21481_vm5 = vcmask 80896   ;;  %v14982_v11 = vpop.eup %14981  ;;  %v4063_v30 = vmul.u32 %v17598_v18, %v4047_v44  ;;  %v4432_v1 = vor.u32 8388608, %v17602_v22  ;;  %v4439_v60 = vsub.s32 32, %v4438_v35 }
 0x27e   : > { %13402 = vmatmul.mubr.msk.f32.gmra.mrb[2].mxu0 %vm21481_vm5, %v17648_v46  ;;  %v4219_v55 = vand.u32 2139095040, %v17606_v53  ;;  %v14984_v45 = vpop.eup %14983  ;;  %v2941_v7 = vxor.u32 2147483648, %v14982_v11  ;;  %vm4065_vm8 = vc.u32 %v17635_v31, %v17638_v33  ;;  %v4066_v10 = vadd.s32 1, %v17639_v61  ;;  %vm21482_vm7 = vmmov %vm21481_vm5 }
 0x27f   : > { %6529 = vmatprep.mubr.f32.mxu0 %v21414_v29  ;;  %v17670_v18 = vshrl.u32 %v4436_v21, 5  ;;  %v2938_v2 = vxor.u32 2147483648, %v14984_v45  ;;  %v4441_v24 = vshll.u32 %v21415_v32, %v4438_v35  ;;  %v4442_v42 = vshrl.u32 %v21416_v19, %v4439_v60  ;;  %vm21484_vm14 = vmmov %vm21481_vm5 }
 0x280   : > { %v4445_v17 = vshrl.u32 %v21417_v40, %v4439_v60  ;;  %v2942_v14 = vsel %vm2940_vm6, %v2941_v7, %v14984_v45  ;;  %v3767_v16 = vsel %vm3765_vm4, %v2941_v7, %v14984_v45  ;;  %v4067_v8 = vsel %vm4065_vm8, %v4066_v10, %v17639_v61 }
 0x281   : > { %v4448_v43 = vshrl.u32 %v21411_v6, %v4439_v60  ;;  %v2939_v62 = vsel %vm2937_vm2, %v14982_v11, %v2938_v2  ;;  %v3764_v41 = vsel %vm3762_vm13, %v14982_v11, %v2938_v2  ;;  %v4068_v38 = vadd.s32 %v4067_v8, %v4063_v30  ;;  %vm21487_vm2 = vmmov %vm21481_vm5 }
 0x282   : > { %13403 = vmatmul.mubr.msk.f32.gmra.mrb[4].mxu0 %vm21482_vm7, %v17665_v13  ;;  %v4444_v54 = vshll.u32 %v21416_v19, %v4438_v35  ;;  %v2943_v9 = vsel %vm2936_vm10, %v2939_v62, %v2942_v14  ;;  %v3768_v56 = vsel %vm3761_vm1, %v3764_v41, %v3767_v16  ;;  %v4443_v44 = vor.u32 %v4442_v42, %v4441_v24  ;;  %v17746_v62 = vld [vmem:[%s21292_s4 + $0x68] sm:$0xff]  ;;  %vm21488_vm6 = vmmov %vm21487_vm2 }
 0x283   : > { %6535 = vmatprep.mubr.f32.mxu0 %v21414_v29  ;;  %v4447_v4 = vshll.u32 %v21417_v40, %v4438_v35  ;;  %v2944_v63 = vsel %vm2933_vm12, nan, %v2943_v9  ;;  %v3769_v21 = vsel %vm2933_vm12, nan, %v3768_v56  ;;  %v4069_v59 = vadd.s32 536870912, %v4068_v38  ;;  %vm21486_vm12 = vmmov %vm21481_vm5 }
 0x284   : > { %v4446_v61 = vor.u32 %v4445_v17, %v4444_v54  ;;  %v17703_v11 = vpack.c.bf16 %v2944_v63, %v2528_v52  ;;  %vm4010_vm11 = vcmp.lt.s32.totalorder %v17561_v27, 0  ;;  %v4450_v30 = vshll.u32 %v21411_v6, %v4438_v35  ;;  %v17716_v52 = vld [vmem:[%s21292_s4 + $0x60] sm:$0xff]  ;;  %vm21489_vm1 = vmmov %vm21487_vm2 }
 0x285   : > { %v4449_v50 = vor.u32 %v4448_v43, %v4447_v4  ;;  %v4451_v49 = vshrl.u32 %v21412_v57, %v4439_v60  ;;  %v4070_v45 = vshrl.u32 %v4069_v59, 30  ;;  %v4453_v7 = vshll.u32 %v21412_v57, %v4438_v35  ;;  %vm21492_vm5 = vmmov %vm21489_vm1 }
 0x286   : > { %21483 = vst [vmem:[#allocation20_spill] sm:$0xff] %v17703_v11  ;;  %13404 = vmatmul.mubr.msk.f32.gmra.mrb[6].mxu0 %vm21484_vm14, %v17692_v48  ;;  %v4454_v36 = vshrl.u32 %v21413_v23, %v4439_v60  ;;  %v4220_v10 = vshrl.u32 %v4219_v55, 23  ;;  %14007 = vmatpush1.bf16.msk.msra.mxu1 %vm15742_vm0, %v17703_v11  ;;  %v17721_v2 = vpack.c.bf16 %v3769_v21, %v3357_v12  ;;  %vm4456_vm15 = vcmp.lt.s32.totalorder %v17670_v18, 1  ;;  %vm21493_vm7 = vmmov %vm21489_vm1 }
 0x287   : > { %6541 = vmatprep.mubr.f32.mxu0 %v21414_v29  ;;  %v4440_v24 = vshrl.u32 %v21415_v32, %v4439_v60  ;;  %v4452_v42 = vor.u32 %v4451_v49, %v4450_v30  ;;  %14016 = vmatprep.subr.msk.bf16.mxu1 %vm15742_vm0, %v17582_v3  ;;  %v4071_v35 = vshll.u32 %v4070_v45, 30  ;;  %vm4457_vm3 = vcmp.lt.s32.totalorder %v17670_v18, 2  ;;  %v17785_v49 = vld [vmem:[%s21292_s4 + $0x70] sm:$0xff] }
 0x288   : > { %21485 = vst [vmem:[#allocation10_spill] sm:$0xff] %v17721_v2  ;;  %v4455_v55 = vor.u32 %v4454_v36, %v4453_v7  ;;  %vm4459_vm9 = vcmp.lt.s32.totalorder %v17670_v18, 4  ;;  %vm4458_vm10 = vcmp.lt.s32.totalorder %v17670_v18, 3  ;;  %v4464_v12 = vsel %vm4456_vm15, %v4443_v44, %v4446_v61 }
 0x289   : > { %v4461_v17 = vsel %vm4459_vm9, %v4449_v50, 2102212464  ;;  %v4465_v60 = vsel %vm4459_vm9, %v4452_v42, 920167782  ;;  %13411 = vmatmul.mubr.msk.f32.vlgmr.msra.gmra.mrb[0].mxu1 %vm21487_vm2, %v17489_v5  ;;  %v17737_v14 = vsub.s32 %v4068_v38, %v4071_v35  ;;  %v4094_v16 = vsub.s32 4, %v4070_v45 }
 0x28a   : > { %13405 = vmatmul.mubr.msk.f32.gmra.mrb[8].mxu0 %vm21486_vm12, %v17716_v52  ;;  %v4466_v8 = vsel %vm4458_vm10, %v4449_v50, %v4465_v60  ;;  %v4468_v43 = vsel %vm4456_vm15, %v4446_v61, %v4449_v50  ;;  %14019 = vmatpush1.bf16.msk.msra.mxu1 %vm15742_vm0, %v17721_v2  ;;  %v4460_v5 = vsel %vm4456_vm15, %v4440_v24, %v4443_v44  ;;  %v4469_v38 = vsel %vm4459_vm9, %v4455_v55, 1326507024  ;;  %v17813_v55 = vld [vmem:[%s21292_s4 + $0x78] sm:$0xff]  ;;  %vm21494_vm15 = vmmov %vm21489_vm1 }
 0x28b   : > { %v4467_v41 = vsel %vm4457_vm3, %v4464_v12, %v4466_v8  ;;  %v4472_v54 = vshll.u32 %v4432_v1, 8  ;;  %6636 = vmatprep.mubr.f32.mxu1 %v21414_v29  ;;  %v4074_v9 = vsub.s32 0, %v17737_v14  ;;  %v4462_v56 = vsel %vm4458_vm10, %v4446_v61, %v4461_v17  ;;  %6547 = vmatprep.mubr.f32.mxu0 %v21414_v29  ;;  %vm21495_vm9 = vmmov %vm21489_vm1 }
 0x28c   : > { %v4470_v4 = vsel %vm4458_vm10, %v4452_v42, %v4469_v38  ;;  %v13279_v63 = vadd.s32 4294967169, %v4220_v10  ;;  %v21360_v22 = vand.u32 2147483647, %v17606_v53  ;;  %v4095_v61 = vsel %vm4010_vm11, %v4094_v16, %v4070_v45  ;;  %vm21496_vm10 = vmmov %vm21489_vm1 }
 0x28d   : > { %v4471_v44 = vsel %vm4457_vm3, %v4468_v43, %v4470_v4  ;;  %v17766_v21 = vmul.u32.u64.low %v4472_v54, %v4467_v41  ;;  %v17767_v59 = vmul.u32.u64.high %v4472_v54, %v4467_v41, %v17766_v21  ;;  %v13272_v1 = vmin.u32 %v4074_v9, %v17737_v14  ;;  %13412 = vmatmul.mubr.msk.f32.gmra.mrb[2].mxu1 %vm21489_vm1, %v17648_v46  ;;  %vm21497_vm12 = vmmov %vm21489_vm1 }
 0x28e   : > { %13406 = vmatmul.mubr.msk.f32.gmra.mrb[10].mxu0 %vm21488_vm6, %v17746_v62  ;;  %v17776_v50 = vmul.u32.u64.low %v4472_v54, %v4471_v44  ;;  %v17777_v30 = vmul.u32.u64.high %v4472_v54, %v4471_v44, %v17776_v50  ;;  %v4463_v7 = vsel %vm4457_vm3, %v4460_v5, %v4462_v56  ;;  %v4226_v36 = vadd.s32 1, %v13279_v63  ;;  %6642 = vmatprep.mubr.f32.mxu1 %v21414_v29  ;;  %vm21500_vm6 = vmmov %vm21489_vm1 }
 0x28f   : > { %6553 = vmatprep.mubr.f32.mxu0 %v21414_v29  ;;  %vm17792_vm13 = vcmp.le.f32.partialorder %v4008_v51, 0.7853982  ;;  %v4076_v46 = vclz %v13272_v1  ;;  %v4482_v24 = vadd.s32 1, %v17767_v59  ;;  %v4223_v18 = vand.u32 8388607, %v21360_v22 }
 0x290   : > { %v17798_v10 = vsel %vm17792_vm13, 0, %v4095_v61  ;;  %vm4227_vm4 = vcmp.gt.s32.totalorder %v4226_v36, 0  ;;  %v4479_v35 = vmul.u32 %v4472_v54, %v4463_v7  ;;  %vm4481_vm8 = vc.u32 %v17777_v30, %v17766_v21 }
 0x291   : > { %v13273_v42 = vadd.s32 4294967294, %v4076_v46  ;;  %v4228_v51 = vsel %vm4227_vm4, %v4226_v36, 0  ;;  %13413 = vmatmul.mubr.msk.f32.gmra.mrb[4].mxu1 %vm21493_vm7, %v17665_v13  ;;  %v4483_v17 = vsel %vm4481_vm8, %v4482_v24, %v17767_v59  ;;  %v17818_v12 = vmul.f32 %v17587_v15, %v21443_v25  ;;  %vm21501_vm7 = vmmov %vm21500_vm6 }
 0x292   : > { %13407 = vmatmul.mubr.msk.f32.gmra.mrb[12].mxu0 %vm21492_vm5, %v17785_v49  ;;  %v4230_v60 = vand.u32 31, %v4228_v51  ;;  %6648 = vmatprep.mubr.f32.mxu1 %v21414_v29  ;;  %v4484_v16 = vadd.s32 %v4483_v17, %v4479_v35  ;;  %v4064_v13 = vadd.s32 %v17638_v33, %v17635_v31  ;;  %v17824_v43 = vadd.s32 3, %v17798_v10  ;;  %v17835_v31 = vld [vmem:[%s21293_s5 + $0x40] sm:$0xff] }
 0x293   : > { %6559 = vmatprep.mubr.f32.mxu0 %v21414_v29  ;;  %vm13274_vm14 = vcmp.lt.s32.totalorder %v13273_v42, 0  ;;  %vm4426_vm3 = vcmp.lt.s32.totalorder %v17571_v34, 0  ;;  %v4224_v54 = vor.u32 8388608, %v4223_v18  ;;  %v17838_v9 = vshrl.u32 %v4228_v51, 5 }
 0x294   : > { %v4079_v8 = vsel %vm13274_vm14, 0, %v13273_v42  ;;  %v4231_v5 = vsub.s32 32, %v4230_v60  ;;  %v4485_v15 = vadd.s32 536870912, %v4484_v16  ;;  %v4233_v56 = vshll.u32 %v21415_v32, %v4230_v60  ;;  %vm21502_vm14 = vmmov %vm21500_vm6 }
 0x295   : > { %v4080_v41 = vsub.s32 32, %v4079_v8  ;;  %v4084_v38 = vsub.s32 4294967266, %v4079_v8  ;;  %13414 = vmatmul.mubr.msk.f32.gmra.mrb[6].mxu1 %vm21495_vm9, %v17692_v48  ;;  %v4081_v33 = vshll.u32 %v17737_v14, %v4079_v8  ;;  %v4635_v4 = vand.u32 2139095040, %v17818_v12  ;;  %vm21503_vm9 = vmmov %vm21500_vm6 }
 0x296   : > { %13408 = vmatmul.mubr.msk.f32.gmra.mrb[14].mxu0 %vm21494_vm15, %v17813_v55  ;;  %6654 = vmatprep.mubr.f32.mxu1 %v21414_v29  ;;  %v4486_v48 = vshrl.u32 %v4485_v15, 30  ;;  %v4234_v59 = vshrl.u32 %v21416_v19, %v4231_v5  ;;  %v4236_v1 = vshll.u32 %v21416_v19, %v4230_v60  ;;  %v4237_v61 = vshrl.u32 %v21417_v40, %v4231_v5 }
 0x297   : > { %6820 = vmatprep.mubr.f32.mxu0 %v21414_v29  ;;  %v4082_v63 = vshrl.u32 %v4064_v13, %v4080_v41  ;;  %v4085_v44 = vadd.s32 127, %v4084_v38  ;;  %v4240_v50 = vshrl.u32 %v21411_v6, %v4231_v5  ;;  %v4243_v14 = vshrl.u32 %v21412_v57, %v4231_v5 }
 0x298   : > { %v4487_v46 = vshll.u32 %v4486_v48, 30  ;;  %v4239_v24 = vshll.u32 %v21417_v40, %v4230_v60  ;;  %v4510_v18 = vsub.s32 4, %v4486_v48  ;;  %v4242_v42 = vshll.u32 %v21411_v6, %v4230_v60 }
 0x299   : > { %v4083_v7 = vor.u32 %v4082_v63, %v4081_v33  ;;  %v4086_v36 = vshll.u32 %v4085_v44, 23  ;;  %13415 = vmatmul.mubr.msk.f32.gmra.mrb[8].mxu1 %vm21497_vm12, %v17716_v52  ;;  %v4245_v35 = vshll.u32 %v21412_v57, %v4230_v60  ;;  %v4246_v51 = vshrl.u32 %v21413_v23, %v4231_v5 }
 0x29a   : > { %13429 = vmatmul.mubr.msk.f32.vlgmr.msra.gmra.mrb[0].mxu0 %vm21496_vm10, %v17835_v31  ;;  %6660 = vmatprep.mubr.f32.mxu1 %v21414_v29  ;;  %v17858_v13 = vsub.s32 %v4484_v16, %v4487_v46  ;;  %v4235_v8 = vor.u32 %v4234_v59, %v4233_v56  ;;  %v17860_v41 = vshll.u32 %v4224_v54, 8  ;;  %v4238_v38 = vor.u32 %v4237_v61, %v4236_v1 }
 0x29b   : > { %6826 = vmatprep.mubr.f32.mxu0 %v21414_v29  ;;  %v4087_v17 = vor.u32 4788187, %v4086_v36  ;;  %v4241_v15 = vor.u32 %v4240_v50, %v4239_v24  ;;  %v4244_v52 = vor.u32 %v4243_v14, %v4242_v42  ;;  %v4247_v33 = vor.u32 %v4246_v51, %v4245_v35 }
 0x29c   : > { %v4090_v44 = vcvt.s32.f32 %v4083_v7  ;;  %vm17864_vm2 = vcmp.le.f32.partialorder %v4424_v39, 0.7853982  ;;  %v4490_v22 = vsub.s32 0, %v17858_v13  ;;  %v4632_v16 = vand.u32 2147483647, %v17818_v12 }
 0x29d   : > { %v4088_v63 = vand.u32 2147483647, %v4087_v17  ;;  %13416 = vmatmul.mubr.msk.f32.gmra.mrb[10].mxu1 %vm21500_vm6, %v17746_v62  ;;  %v4511_v54 = vsel %vm4426_vm3, %v4510_v18, %v4486_v48  ;;  %v4232_v56 = vshrl.u32 %v21415_v32, %v4231_v5  ;;  %vm4248_vm1 = vcmp.lt.s32.totalorder %v17838_v9, 1 }
 0x29e   : > { %v4636_v59 = vshrl.u32 %v4635_v4, 23  ;;  %6666 = vmatprep.mubr.f32.mxu1 %v21414_v29  ;;  %v13288_v1 = vmin.u32 %v4490_v22, %v17858_v13  ;;  %vm4249_vm4 = vcmp.lt.s32.totalorder %v17838_v9, 2  ;;  %vm4251_vm5 = vcmp.lt.s32.totalorder %v17838_v9, 4 }
 0x29f   : > { %v4091_v39 = vmul.f32 %v4090_v44, %v4088_v63  ;;  %v4256_v62 = vsel %vm4248_vm1, %v4235_v8, %v4238_v38  ;;  %v4257_v61 = vsel %vm4251_vm5, %v4244_v52, 920167782  ;;  %v4260_v48 = vsel %vm4248_vm1, %v4238_v38, %v4241_v15 }
 0x2a0   : > { %v4261_v5 = vsel %vm4251_vm5, %v4247_v33, 1326507024  ;;  %v4492_v14 = vclz %v13288_v1  ;;  %vm4250_vm8 = vcmp.lt.s32.totalorder %v17838_v9, 3  ;;  %v4253_v4 = vsel %vm4251_vm5, %v4241_v15, 2102212464 }
 0x2a1   : > { %v4092_v50 = vxor.u32 2147483648, %v4091_v39  ;;  %13417 = vmatmul.mubr.msk.f32.gmra.mrb[12].mxu1 %vm21501_vm7, %v17785_v49  ;;  %v4252_v22 = vsel %vm4248_vm1, %v4232_v56, %v4235_v8  ;;  %v4258_v7 = vsel %vm4250_vm8, %v4241_v15, %v4257_v61  ;;  %v4262_v36 = vsel %vm4250_vm8, %v4244_v52, %v4261_v5 }
 0x2a2   : > { %v13295_v46 = vadd.s32 4294967169, %v4636_v59  ;;  %6672 = vmatprep.mubr.f32.mxu1 %v21414_v29  ;;  %v13289_v18 = vadd.s32 4294967294, %v4492_v14  ;;  %v4259_v42 = vsel %vm4249_vm4, %v4256_v62, %v4258_v7  ;;  %v4263_v35 = vsel %vm4249_vm4, %v4260_v48, %v4262_v36 }
 0x2a3   : > { %v4093_v24 = vsel %vm4010_vm11, %v4092_v50, %v4091_v39  ;;  %v4254_v51 = vsel %vm4250_vm8, %v4238_v38, %v4253_v4  ;;  %v17900_v17 = vmul.u32.u64.low %v17860_v41, %v4263_v35  ;;  %v17901_v8 = vmul.u32.u64.high %v17860_v41, %v4263_v35, %v17900_v17 }
 0x2a4   : > { %v4096_v49 = vsel %vm17792_vm13, %v17561_v27, %v4093_v24  ;;  %v4480_v15 = vadd.s32 %v17766_v21, %v17777_v30  ;;  %vm13290_vm11 = vcmp.lt.s32.totalorder %v13289_v18, 0  ;;  %v17914_v45 = vsel %vm17864_vm2, 0, %v4511_v54 }
 0x2a5   : > { %v17906_v52 = vmul.u32.u64.low %v17860_v41, %v4259_v42  ;;  %v17907_v33 = vmul.u32.u64.high %v17860_v41, %v4259_v42, %v17906_v52  ;;  %13418 = vmatmul.mubr.msk.f32.gmra.mrb[14].mxu1 %vm21502_vm14, %v17813_v55  ;;  %v4495_v63 = vsel %vm13290_vm11, 0, %v13289_v18  ;;  %v4639_v38 = vand.u32 8388607, %v4632_v16 }
 0x2a6   : > { %v4642_v44 = vadd.s32 1, %v13295_v46  ;;  %6933 = vmatprep.mubr.f32.mxu1 %v21414_v29  ;;  %14985 = vcosq.f32 %v4096_v49  ;;  %v4496_v21 = vsub.s32 32, %v4495_v63  ;;  %v4500_v30 = vsub.s32 4294967266, %v4495_v63 }
 0x2a7   : > { %v4255_v56 = vsel %vm4249_vm4, %v4252_v22, %v4254_v51  ;;  %14987 = vsinq.f32 %v4096_v49  ;;  %v4497_v55 = vshll.u32 %v17858_v13, %v4495_v63  ;;  %vm4273_vm13 = vc.u32 %v17901_v8, %v17906_v52 }
 0x2a8   : > { %vm4643_vm15 = vcmp.gt.s32.totalorder %v4642_v44, 0  ;;  %v4498_v54 = vshrl.u32 %v4480_v15, %v4496_v21  ;;  %v4501_v59 = vadd.s32 127, %v4500_v30  ;;  %v4274_v39 = vadd.s32 1, %v17907_v33 }
 0x2a9   : > { %v4644_v1 = vsel %vm4643_vm15, %v4642_v44, 0  ;;  %13439 = vmatmul.mubr.msk.f32.vlgmr.msra.gmra.mrb[0].mxu1 %vm21503_vm9, %v17835_v31  ;;  %v4517_v62 = vadd.s32 3, %v17914_v45  ;;  %v4271_v9 = vmul.u32 %v17860_v41, %v4255_v56  ;;  %v4640_v14 = vor.u32 8388608, %v4639_v38 }
 0x2aa   : > { %v4646_v61 = vand.u32 31, %v4644_v1  ;;  %6939 = vmatprep.mubr.f32.mxu1 %v21414_v29  ;;  %v4499_v13 = vor.u32 %v4498_v54, %v4497_v55  ;;  %v4502_v48 = vshll.u32 %v4501_v59, 23  ;;  %v4275_v5 = vsel %vm4273_vm13, %v4274_v39, %v17907_v33 }
 0x2ab   : > { %v4276_v50 = vadd.s32 %v4275_v5, %v4271_v9  ;;  %v17932_v22 = vand.u32 3, %v17824_v43  ;;  %v17934_v36 = vand.u32 3, %v4517_v62  ;;  %v17939_v18 = vrot.slane %v17501_v26, %v15481_v37 }
 0x2ac   : > { %v4647_v4 = vsub.s32 32, %v4646_v61  ;;  %v4503_v7 = vor.u32 4788187, %v4502_v48  ;;  %v4506_v24 = vcvt.s32.f32 %v4499_v13  ;;  %v17945_v43 = vshll.u32 %v4640_v14, 8 }
 0x2ad   : > { %v4277_v31 = vadd.s32 536870912, %v4276_v50  ;;  %vm4107_vm10 = vcmp.eq.s32.totalorder %v17932_v22, 2  ;;  %v4645_v15 = vshrl.u32 %v4644_v1, 5  ;;  %v4655_v33 = vshll.u32 %v21417_v40, %v4646_v61 }
 0x2ae   : > { %v4504_v46 = vand.u32 2147483647, %v4503_v7  ;;  %v4656_v41 = vshrl.u32 %v21411_v6, %v4647_v4  ;;  %v4650_v35 = vshrl.u32 %v21416_v19, %v4647_v4  ;;  %v4653_v49 = vshrl.u32 %v21417_v40, %v4647_v4 }
 0x2af   : > { %v17941_v42 = vshrl.u32 %v4277_v31, 30  ;;  %v4659_v63 = vshrl.u32 %v21412_v57, %v4647_v4  ;;  %vm4104_vm12 = vcmp.eq.s32.totalorder %v17932_v22, 0  ;;  %v4649_v44 = vshll.u32 %v21415_v32, %v4646_v61 }
 0x2b0   : > { %v17947_v51 = vpop.eup %14985  ;;  %v4507_v17 = vmul.f32 %v4506_v24, %v4504_v46  ;;  %v4652_v21 = vshll.u32 %v21416_v19, %v4646_v61  ;;  %v4662_v30 = vshrl.u32 %v21413_v23, %v4647_v4  ;;  %v4657_v55 = vor.u32 %v4656_v41, %v4655_v33 }
 0x2b1   : > { %v17952_v26 = vpop.eup %14987  ;;  %v4279_v38 = vshll.u32 %v17941_v42, 30  ;;  %v4658_v54 = vshll.u32 %v21411_v6, %v4646_v61  ;;  %v4661_v59 = vshll.u32 %v21412_v57, %v4646_v61  ;;  %v4648_v1 = vshrl.u32 %v21415_v32, %v4647_v4 }
 0x2b2   : > { %v4508_v56 = vxor.u32 2147483648, %v4507_v17  ;;  %v4651_v62 = vor.u32 %v4650_v35, %v4649_v44  ;;  %v4654_v9 = vor.u32 %v4653_v49, %v4652_v21  ;;  %v21361_v13 = vxor.u32 2147483648, %v17947_v51 }
 0x2b3   : > { %v17961_v39 = vsub.s32 %v4276_v50, %v4279_v38  ;;  %v4660_v5 = vor.u32 %v4659_v63, %v4658_v54  ;;  %v4663_v14 = vor.u32 %v4662_v30, %v4661_v59  ;;  %vm4103_vm6 = vcmp.lt.s32.totalorder %v17932_v22, 2 }
 0x2b4   : > { %v4509_v48 = vsel %vm4426_vm3, %v4508_v56, %v4507_v17  ;;  %v21364_v7 = vxor.u32 2147483648, %v17952_v26  ;;  %vm4218_vm1 = vcmp.lt.s32.totalorder %v17606_v53, 0  ;;  %vm4667_vm4 = vcmp.lt.s32.totalorder %v4645_v15, 4 }
 0x2b5   : > { %v4512_v61 = vsel %vm17864_vm2, %v17571_v34, %v4509_v48  ;;  %v4282_v50 = vsub.s32 0, %v17961_v39  ;;  %vm4664_vm5 = vcmp.lt.s32.totalorder %v4645_v15, 1  ;;  %vm4666_vm8 = vcmp.lt.s32.totalorder %v4645_v15, 3 }
 0x2b6   : > { %14989 = vcosq.f32 %v4512_v61  ;;  %v4669_v4 = vsel %vm4667_vm4, %v4657_v55, 2102212464  ;;  %v4668_v46 = vsel %vm4664_vm5, %v4648_v1, %v4651_v62  ;;  %v4672_v24 = vsel %vm4664_vm5, %v4651_v62, %v4654_v9 }
 0x2b7   : > { %14991 = vsinq.f32 %v4512_v61  ;;  %v13280_v31 = vmin.u32 %v4282_v50, %v17961_v39  ;;  %v4670_v41 = vsel %vm4666_vm8, %v4654_v9, %v4669_v4  ;;  %v4673_v35 = vsel %vm4667_vm4, %v4660_v5, 920167782 }
 0x2b8   : > { %v4676_v49 = vsel %vm4664_vm5, %v4654_v9, %v4657_v55  ;;  %v4677_v60 = vsel %vm4667_vm4, %v4663_v14, 1326507024  ;;  %v4109_v17 = vsel %vm4107_vm10, %v21361_v13, %v17952_v26  ;;  %v4302_v63 = vsub.s32 4, %v17941_v42 }
 0x2b9   : > { %v4284_v33 = vclz %v13280_v31  ;;  %v17984_v38 = vmul.f32 %v17939_v18, %v15360_v58  ;;  %v4106_v44 = vsel %vm4104_vm12, %v17947_v51, %v21364_v7  ;;  %vm4665_vm3 = vcmp.lt.s32.totalorder %v4645_v15, 2 }
 0x2ba   : > { %v4674_v21 = vsel %vm4666_vm8, %v4657_v55, %v4673_v35  ;;  %v4678_v30 = vsel %vm4666_vm8, %v4660_v5, %v4677_v60  ;;  %vm4100_vm2 = vweird.f32 %v17561_v27  ;;  %v21504_v56 = vand.u32 2147483647, %v17606_v53 }
 0x2bb   : > { %v13281_v59 = vadd.s32 4294967294, %v4284_v33  ;;  %v4671_v1 = vsel %vm4665_vm3, %v4668_v46, %v4670_v41  ;;  %v4675_v62 = vsel %vm4665_vm3, %v4672_v24, %v4674_v21  ;;  %v4679_v9 = vsel %vm4665_vm3, %v4676_v49, %v4678_v30 }
 0x2bc   : > { %vm17996_vm7 = vcmp.le.f32.partialorder %v21504_v56, 0.7853982  ;;  %v18001_v48 = vmul.u32.u64.low %v17945_v43, %v4679_v9  ;;  %v18002_v14 = vmul.u32.u64.high %v17945_v43, %v4679_v9, %v18001_v48  ;;  %vm4516_vm11 = vweird.f32 %v17571_v34 }
 0x2bd   : > { %v18005_v55 = vmul.u32.u64.low %v17945_v43, %v4675_v62  ;;  %v18006_v15 = vmul.u32.u64.high %v17945_v43, %v4675_v62, %v18005_v55  ;;  %vm4519_vm14 = vcmp.lt.s32.totalorder %v17934_v36, 2  ;;  %vm4520_vm13 = vcmp.eq.s32.totalorder %v17934_v36, 0 }
 0x2be   : > { %vm13282_vm15 = vcmp.lt.s32.totalorder %v13281_v59, 0  ;;  %v3907_v5 = vand.u32 2139095040, %v17984_v38  ;;  %v4110_v61 = vsel %vm4103_vm6, %v4106_v44, %v4109_v17  ;;  %v4272_v50 = vadd.s32 %v17906_v52, %v17901_v8 }
 0x2bf   : > { %v4287_v4 = vsel %vm13282_vm15, 0, %v13281_v59  ;;  %v4303_v31 = vsel %vm4218_vm1, %v4302_v63, %v17941_v42  ;;  %v4687_v41 = vmul.u32 %v17945_v43, %v4671_v1  ;;  %vm4689_vm9 = vc.u32 %v18002_v14, %v18005_v55 }
 0x2c0   : > { %v4288_v46 = vsub.s32 32, %v4287_v4  ;;  %v4292_v24 = vsub.s32 4294967266, %v4287_v4  ;;  %v3908_v35 = vshrl.u32 %v3907_v5, 23  ;;  %v18020_v49 = vpop.eup %14989  ;;  %v4289_v60 = vshll.u32 %v17961_v39, %v4287_v4 }
 0x2c1   : > { %v4690_v22 = vadd.s32 1, %v18006_v15  ;;  %v21365_v8 = vand.u32 2147483647, %v17984_v38  ;;  %v18026_v52 = vpop.eup %14991  ;;  %v21362_v17 = vxor.u32 2147483648, %v18020_v49  ;;  %vm4523_vm10 = vcmp.eq.s32.totalorder %v17934_v36, 2 }
 0x2c2   : > { %v4290_v42 = vshrl.u32 %v4272_v50, %v4288_v46  ;;  %v4293_v33 = vadd.s32 127, %v4292_v24  ;;  %v13267_v63 = vadd.s32 4294967169, %v3908_v35  ;;  %v21363_v43 = vxor.u32 2147483648, %v18026_v52 }
 0x2c3   : > { %v4691_v44 = vsel %vm4689_vm9, %v4690_v22, %v18006_v15  ;;  %v18034_v39 = vmul.f32 %v17939_v18, %v21443_v25  ;;  %v4525_v21 = vsel %vm4523_vm10, %v21362_v17, %v18026_v52  ;;  %v4111_v1 = vsel %vm4100_vm2, nan, %v4110_v61 }
 0x2c4   : > { %v4291_v30 = vor.u32 %v4290_v42, %v4289_v60  ;;  %v4294_v56 = vshll.u32 %v4293_v33, 23  ;;  %v4692_v59 = vadd.s32 %v4691_v44, %v4687_v41  ;;  %v4522_v62 = vsel %vm4520_vm13, %v18020_v49, %v21363_v43 }
 0x2c5   : > { %v18048_v18 = vsel %vm17996_vm7, 0, %v4303_v31  ;;  %v3914_v9 = vadd.s32 1, %v13267_v63  ;;  %v4526_v48 = vsel %vm4519_vm14, %v4522_v62, %v4525_v21  ;;  %v3911_v50 = vand.u32 8388607, %v21365_v8 }
 0x2c6   : > { %v4295_v15 = vor.u32 4788187, %v4294_v56  ;;  %v4693_v5 = vadd.s32 536870912, %v4692_v59  ;;  %v4527_v61 = vsel %vm4516_vm11, nan, %v4526_v48  ;;  %v4298_v4 = vcvt.s32.f32 %v4291_v30 }
 0x2c7   : > { %vm3915_vm12 = vcmp.gt.s32.totalorder %v3914_v9, 0  ;;  %v4323_v46 = vand.u32 2139095040, %v18034_v39  ;;  %v18057_v24 = vpack.c.bf16 %v4527_v61, %v4111_v1  ;;  %v18063_v22 = vadd.s32 3, %v18048_v18 }
 0x2c8   : > { %v4296_v31 = vand.u32 2147483647, %v4295_v15  ;;  %v4694_v41 = vshrl.u32 %v4693_v5, 30  ;;  %v3916_v35 = vsel %vm3915_vm12, %v3914_v9, 0  ;;  %vm4634_vm6 = vcmp.lt.s32.totalorder %v17818_v12, 0 }
 0x2c9   : > { %21507 = vst [vmem:[#allocation26_spill] sm:$0xff] %v18057_v24  ;;  %v3918_v60 = vand.u32 31, %v3916_v35  ;;  %14022 = vmatprep.subr.msk.bf16.mxu0 %vm15742_vm0, %v18057_v24  ;;  %v4688_v33 = vadd.s32 %v18005_v55, %v18002_v14  ;;  %v3912_v63 = vor.u32 8388608, %v3911_v50  ;;  %v3917_v1 = vshrl.u32 %v3916_v35, 5  ;;  %v13423_v14 = vld [vmem:[%s21293_s5 + $0x60] sm:$0xff] }
 0x2ca   : > { %v4299_v36 = vmul.f32 %v4298_v4, %v4296_v31  ;;  %v4695_v42 = vshll.u32 %v4694_v41, 30  ;;  %v4324_v62 = vshrl.u32 %v4323_v46, 23  ;;  %v4718_v9 = vsub.s32 4, %v4694_v41 }
 0x2cb   : > { %v3919_v44 = vsub.s32 32, %v3918_v60  ;;  %v3921_v48 = vshll.u32 %v21415_v32, %v3918_v60  ;;  %vm18077_vm4 = vcmp.le.f32.partialorder %v4632_v16, 0.7853982  ;;  %v3927_v46 = vshll.u32 %v21417_v40, %v3918_v60 }
 0x2cc   : > { %v4300_v30 = vxor.u32 2147483648, %v4299_v36  ;;  %v18068_v56 = vsub.s32 %v4692_v59, %v4695_v42  ;;  %v3924_v59 = vshll.u32 %v21416_v19, %v3918_v60  ;;  %v3930_v31 = vshll.u32 %v21411_v6, %v3918_v60 }
 0x2cd   : > { %v3922_v15 = vshrl.u32 %v21416_v19, %v3919_v44  ;;  %v3925_v5 = vshrl.u32 %v21417_v40, %v3919_v44  ;;  %v3928_v50 = vshrl.u32 %v21411_v6, %v3919_v44  ;;  %v3931_v35 = vshrl.u32 %v21412_v57, %v3919_v44 }
 0x2ce   : > { %v4301_v61 = vsel %vm4218_vm1, %v4300_v30, %v4299_v36  ;;  %v4698_v55 = vsub.s32 0, %v18068_v56  ;;  %v18091_v30 = vshll.u32 %v3912_v63, 8  ;;  %v3933_v43 = vshll.u32 %v21412_v57, %v3918_v60 }
 0x2cf   : > { %v4304_v4 = vsel %vm17996_vm7, %v17606_v53, %v4301_v61  ;;  %v3923_v36 = vor.u32 %v3922_v15, %v3921_v48  ;;  %v3926_v42 = vor.u32 %v3925_v5, %v3924_v59  ;;  %v3929_v13 = vor.u32 %v3928_v50, %v3927_v46 }
 0x2d0   : > { %v13296_v16 = vmin.u32 %v4698_v55, %v18068_v56  ;;  %v3932_v17 = vor.u32 %v3931_v35, %v3930_v31  ;;  %v3934_v7 = vshrl.u32 %v21413_v23, %v3919_v44  ;;  %14993 = vcosq.f32 %v4304_v4 }
 0x2d1   : > { %v4719_v61 = vsel %vm4634_vm6, %v4718_v9, %v4694_v41  ;;  %v13283_v8 = vadd.s32 4294967169, %v4324_v62  ;;  %14995 = vsinq.f32 %v4304_v4  ;;  %v3920_v21 = vshrl.u32 %v21415_v32, %v3919_v44 }
 0x2d2   : > { %v4700_v54 = vclz %v13296_v16  ;;  %v3935_v55 = vor.u32 %v3934_v7, %v3933_v43  ;;  %vm3936_vm1 = vcmp.lt.s32.totalorder %v3917_v1, 1  ;;  %vm3938_vm5 = vcmp.lt.s32.totalorder %v3917_v1, 3 }
 0x2d3   : > { %vm3939_vm8 = vcmp.lt.s32.totalorder %v3917_v1, 4  ;;  %v3944_v63 = vsel %vm3936_vm1, %v3923_v36, %v3926_v42  ;;  %v3948_v5 = vsel %vm3936_vm1, %v3926_v42, %v3929_v13  ;;  %vm3937_vm7 = vcmp.lt.s32.totalorder %v3917_v1, 2 }
 0x2d4   : > { %v13297_v48 = vadd.s32 4294967294, %v4700_v54  ;;  %v3941_v15 = vsel %vm3939_vm8, %v3929_v13, 2102212464  ;;  %v3945_v60 = vsel %vm3939_vm8, %v3932_v17, 920167782  ;;  %v18104_v7 = vsel %vm18077_vm4, 0, %v4719_v61 }
 0x2d5   : > { %v3949_v59 = vsel %vm3939_vm8, %v3935_v55, 1326507024  ;;  %v3946_v41 = vsel %vm3938_vm5, %v3929_v13, %v3945_v60  ;;  %v3940_v46 = vsel %vm3936_vm1, %v3920_v21, %v3923_v36  ;;  %v3942_v31 = vsel %vm3938_vm5, %v3926_v42, %v3941_v15 }
 0x2d6   : > { %vm13298_vm3 = vcmp.lt.s32.totalorder %v13297_v48, 0  ;;  %v3950_v62 = vsel %vm3938_vm5, %v3932_v17, %v3949_v59  ;;  %v3947_v43 = vsel %vm3937_vm7, %v3944_v63, %v3946_v41  ;;  %v3943_v63 = vsel %vm3937_vm7, %v3940_v46, %v3942_v31  ;;  %v13420_v41 = vld [vmem:[%s21293_s5 + $0x48] sm:$0xff] }
 0x2d7   : > { %v4703_v9 = vsel %vm13298_vm3, 0, %v13297_v48  ;;  %v3951_v44 = vsel %vm3937_vm7, %v3948_v5, %v3950_v62  ;;  %v18115_v17 = vmul.u32.u64.low %v18091_v30, %v3947_v43  ;;  %v18116_v16 = vmul.u32.u64.high %v18091_v30, %v3947_v43, %v18115_v17  ;;  %v15018_v43 = vld [vmem:[%s15337_s20 + $0x2] ss:$4 sm:$0xf] }
 0x2d8   : > { %v4704_v50 = vsub.s32 32, %v4703_v9  ;;  %v4708_v4 = vsub.s32 4294967266, %v4703_v9  ;;  %v18111_v35 = vmul.u32.u64.low %v18091_v30, %v3951_v44  ;;  %v18112_v13 = vmul.u32.u64.high %v18091_v30, %v3951_v44, %v18111_v35  ;;  %v21511_v44 = vld [vmem:[#allocation14_spill] sm:$0xff] }
 0x2d9   : > { %v4705_v54 = vshll.u32 %v18068_v56, %v4703_v9  ;;  %v4330_v48 = vadd.s32 1, %v13283_v8  ;;  %v18124_v21 = vand.u32 3, %v18063_v22  ;;  %v4725_v5 = vadd.s32 3, %v18104_v7  ;;  %v13421_v35 = vld [vmem:[%s21293_s5 + $0x50] sm:$0xff] }
 0x2da   : > { %v4706_v61 = vshrl.u32 %v4688_v33, %v4704_v50  ;;  %v4709_v55 = vadd.s32 127, %v4708_v4  ;;  %v18121_v60 = vpop.eup %14993  ;;  %vm3961_vm13 = vc.u32 %v18112_v13, %v18115_v17  ;;  %v3962_v8 = vadd.s32 1, %v18116_v16 }
 0x2db   : > { %vm4331_vm14 = vcmp.gt.s32.totalorder %v4330_v48, 0  ;;  %v18126_v15 = vpop.eup %14995  ;;  %v21510_v33 = vand.u32 2147483647, %v18034_v39  ;;  %v3959_v22 = vmul.u32 %v18091_v30, %v3943_v63  ;;  %v18143_v50 = vrot.slane %v15018_v43, %v21511_v44  ;;  %v7620_v30 = vld [vmem:[%s21295_s7] sm:$0xff] }
 0x2dc   : > { %v4707_v36 = vor.u32 %v4706_v61, %v4705_v54  ;;  %v4710_v42 = vshll.u32 %v4709_v55, 23  ;;  %v4332_v59 = vsel %vm4331_vm14, %v4330_v48, 0  ;;  %v3963_v62 = vsel %vm3961_vm13, %v3962_v8, %v18116_v16  ;;  %7630 = vperm.xlu1 %14918, %v7620_v30   ;;  %v7621_v8 = vld [vmem:[%s21295_s7 + $0x8] sm:$0xff]  ;;  %v13422_v30 = vld [vmem:[%s21293_s5 + $0x58] sm:$0xff] }
 0x2dd   : > { %v18134_v56 = vand.u32 8388607, %v21510_v33  ;;  %v4334_v9 = vand.u32 31, %v4332_v59  ;;  %vm21512_vm15 = vcmask 80896   ;;  %vm4312_vm10 = vcmp.eq.s32.totalorder %v18124_v21, 0 }
 0x2de   : > { %v4711_v1 = vor.u32 4788187, %v4710_v42  ;;  %13430 = vmatmul.mubr.msk.f32.gmra.mrb[2].mxu0 %vm21512_vm15, %v13420_v41  ;;  %vm21513_vm9 = vmmov %vm21512_vm15  ;;  %vm4315_vm12 = vcmp.eq.s32.totalorder %v18124_v21, 2  ;;  %v4714_v46 = vcvt.s32.f32 %v4707_v36  ;;  %v3964_v31 = vadd.s32 %v3963_v62, %v3959_v22 }
 0x2df   : > { %13440 = vmatmul.mubr.msk.f32.gmra.mrb[2].mxu1 %vm21513_vm9, %v13420_v41  ;;  %6832 = vmatprep.mubr.f32.mxu0 %v21414_v29  ;;  %v18158_v54 = vand.u32 3, %v4725_v5  ;;  %v4335_v55 = vsub.s32 32, %v4334_v9  ;;  %v4337_v42 = vshll.u32 %v21415_v32, %v4334_v9  ;;  %vm21514_vm1 = vmmov %vm21513_vm9  ;;  %v4346_v61 = vshll.u32 %v21411_v6, %v4334_v9 }
 0x2e0   : > { %v4712_v4 = vand.u32 2147483647, %v4711_v1  ;;  %6945 = vmatprep.mubr.f32.mxu1 %v21414_v29  ;;  %v3965_v36 = vadd.s32 536870912, %v3964_v31  ;;  %v4340_v1 = vshll.u32 %v21416_v19, %v4334_v9  ;;  %vm21515_vm5 = vmmov %vm21514_vm1  ;;  %7635 = vperm.xlu1 %14918, %v7621_v8  }
 0x2e1   : > { %v4338_v33 = vshrl.u32 %v21416_v19, %v4335_v55  ;;  %v4341_v5 = vshrl.u32 %v21417_v40, %v4335_v55  ;;  %v4344_v22 = vshrl.u32 %v21411_v6, %v4335_v55  ;;  %v4347_v43 = vshrl.u32 %v21412_v57, %v4335_v55  ;;  %vm21516_vm8 = vmmov %vm21514_vm1 }
 0x2e2   : > { %v4715_v63 = vmul.f32 %v4714_v46, %v4712_v4  ;;  %13431 = vmatmul.mubr.msk.f32.gmra.mrb[4].mxu0 %vm21514_vm1, %v13421_v35  ;;  %v18171_v62 = vshrl.u32 %v3965_v36, 30  ;;  %v4350_v44 = vshrl.u32 %v21413_v23, %v4335_v55  ;;  %v18180_v4 = vshrl.u32 %v4332_v59, 5  ;;  %v7757_v59 = vld [vmem:[%s21297_s9 + $0x8] sm:$0xff]  ;;  %vm21520_vm13 = vmmov %vm21514_vm1 }
 0x2e3   : > { %13441 = vmatmul.mubr.msk.f32.gmra.mrb[4].mxu1 %vm21515_vm5, %v13421_v35  ;;  %6838 = vmatprep.mubr.f32.mxu0 %v21414_v29  ;;  %v4343_v46 = vshll.u32 %v21417_v40, %v4334_v9  ;;  %v4349_v36 = vshll.u32 %v21412_v57, %v4334_v9  ;;  %v4339_v16 = vor.u32 %v4338_v33, %v4337_v42  ;;  %vm21521_vm9 = vmmov %vm21514_vm1  ;;  %vm4727_vm5 = vcmp.lt.s32.totalorder %v18158_v54, 2 }
 0x2e4   : > { %v4716_v41 = vxor.u32 2147483648, %v4715_v63  ;;  %6951 = vmatprep.mubr.f32.mxu1 %v21414_v29  ;;  %v3967_v48 = vshll.u32 %v18171_v62, 30  ;;  %v4342_v37 = vor.u32 %v4341_v5, %v4340_v1  ;;  %v4348_v9 = vor.u32 %v4347_v43, %v4346_v61  ;;  %7771 = vperm.xlu1 %14918, %v7757_v59  }
 0x2e5   : > { %v4345_v3 = vor.u32 %v4344_v22, %v4343_v46  ;;  %v4351_v11 = vor.u32 %v4350_v44, %v4349_v36  ;;  %v18205_v33 = vmul.f32 %v18143_v50, %v15360_v58  ;;  %v21519_v61 = vxor.u32 2147483648, %v18126_v15 }
 0x2e6   : > { %v4717_v35 = vsel %vm4634_vm6, %v4716_v41, %v4715_v63  ;;  %13432 = vmatmul.mubr.msk.f32.gmra.mrb[6].mxu0 %vm21516_vm8, %v13422_v30  ;;  %v21517_v63 = vxor.u32 2147483648, %v18121_v60  ;;  %v18201_v8 = vsub.s32 %v3964_v31, %v3967_v48  ;;  %vm21518_vm6 = vmmov %vm21514_vm1  ;;  %v4336_v58 = vshrl.u32 %v21415_v32, %v4335_v55 }
 0x2e7   : > { %v4720_v2 = vsel %vm18077_vm4, %v17818_v12, %v4717_v35  ;;  %13442 = vmatmul.mubr.msk.f32.gmra.mrb[6].mxu1 %vm21518_vm6, %v13422_v30  ;;  %6844 = vmatprep.mubr.f32.mxu0 %v21414_v29  ;;  %vm21375_vm4 = vweird.f32 %v17606_v53  ;;  %v4314_v31 = vsel %vm4312_vm10, %v18121_v60, %v21519_v61  ;;  %vm4352_vm3 = vcmp.lt.s32.totalorder %v18180_v4, 1  ;;  %vm21523_vm6 = vmmov %vm21514_vm1 }
 0x2e8   : > { %v4317_v42 = vsel %vm4315_vm12, %v21517_v63, %v18126_v15  ;;  %14997 = vcosq.f32 %v4720_v2  ;;  %6957 = vmatprep.mubr.f32.mxu1 %v21414_v29  ;;  %v3970_v48 = vsub.s32 0, %v18201_v8  ;;  %vm4354_vm7 = vcmp.lt.s32.totalorder %v18180_v4, 3 }
 0x2e9   : > { %14999 = vsinq.f32 %v4720_v2  ;;  %vm4355_vm14 = vcmp.lt.s32.totalorder %v18180_v4, 4  ;;  %v4360_v1 = vsel %vm4352_vm3, %v4339_v16, %v4342_v37  ;;  %v7623_v2 = vld [vmem:[%s21295_s7 + $0x18] sm:$0xff]  ;;  %v4364_v22 = vsel %vm4352_vm3, %v4342_v37, %v4345_v3 }
 0x2ea   : > { %v4357_v5 = vsel %vm4355_vm14, %v4345_v3, 2102212464  ;;  %v4361_v55 = vsel %vm4355_vm14, %v4348_v9, 920167782  ;;  %v4365_v41 = vsel %vm4355_vm14, %v4351_v11, 1326507024  ;;  %13433 = vmatmul.mubr.msk.f32.gmra.mrb[8].mxu0 %vm21520_vm13, %v13423_v14  ;;  %v13268_v43 = vmin.u32 %v3970_v48, %v18201_v8  ;;  %7645 = vperm.xlu1 %14918, %v7623_v2   ;;  %vm21524_vm13 = vmmov %vm21514_vm1 }
 0x2eb   : > { %vm4353_vm15 = vcmp.lt.s32.totalorder %v18180_v4, 2  ;;  %v4362_v44 = vsel %vm4354_vm7, %v4345_v3, %v4361_v55  ;;  %v4366_v30 = vsel %vm4354_vm7, %v4348_v9, %v4365_v41  ;;  %13443 = vmatmul.mubr.msk.f32.gmra.mrb[8].mxu1 %vm21521_vm9, %v13423_v14  ;;  %6850 = vmatprep.mubr.f32.mxu0 %v21414_v29  ;;  %v13424_v11 = vld [vmem:[%s21293_s5 + $0x68] sm:$0xff]  ;;  %vm4311_vm10 = vcmp.lt.s32.totalorder %v18124_v21, 2  ;;  %v7759_v14 = vld [vmem:[%s21297_s9 + $0x18] sm:$0xff]  ;;  %vm21525_vm9 = vmmov %vm21514_vm1 }
 0x2ec   : > { %v4363_v46 = vsel %vm4353_vm15, %v4360_v1, %v4362_v44  ;;  %v4367_v36 = vsel %vm4353_vm15, %v4364_v22, %v4366_v30  ;;  %v21522_v3 = vor.u32 8388608, %v18134_v56  ;;  %6963 = vmatprep.mubr.f32.mxu1 %v21414_v29  ;;  %v4318_v59 = vsel %vm4311_vm10, %v4314_v31, %v4317_v42  ;;  %v13425_v31 = vld [vmem:[%s21293_s5 + $0x70] sm:$0xff]  ;;  %vm21526_vm10 = vmmov %vm21514_vm1 }
 0x2ed   : > { %v3972_v9 = vclz %v13268_v43  ;;  %v4356_v63 = vsel %vm4352_vm3, %v4336_v58, %v4339_v16  ;;  %v4358_v21 = vsel %vm4354_vm7, %v4342_v37, %v4357_v5  ;;  %vm4724_vm12 = vweird.f32 %v17818_v12  ;;  %v18649_v12 = vld [vmem:[%s21292_s4 + $0x88] sm:$0xff] }
 0x2ee   : > { %v18250_v35 = vshll.u32 %v21522_v3, 8  ;;  %13434 = vmatmul.mubr.msk.f32.gmra.mrb[10].mxu0 %vm21514_vm1, %v13424_v11  ;;  %vm3906_vm8 = vcmp.lt.s32.totalorder %v17984_v38, 0  ;;  %v4115_v16 = vand.u32 2139095040, %v18205_v33  ;;  %vm4728_vm3 = vcmp.eq.s32.totalorder %v18158_v54, 0  ;;  %7781 = vperm.xlu1 %14918, %v7759_v14  }
 0x2ef   : > { %v13269_v37 = vadd.s32 4294967294, %v3972_v9  ;;  %13444 = vmatmul.mubr.msk.f32.gmra.mrb[10].mxu1 %vm21523_vm6, %v13424_v11  ;;  %6856 = vmatprep.mubr.f32.mxu0 %v21414_v29  ;;  %vm4731_vm7 = vcmp.eq.s32.totalorder %v18158_v54, 2  ;;  %v3960_v58 = vadd.s32 %v18115_v17, %v18112_v13  ;;  %v18285_v1 = vmul.f32 %v18143_v50, %v21443_v25  ;;  %v7625_v13 = vld [vmem:[%s21295_s7 + $0x28] sm:$0xff]  ;;  %v13426_v11 = vld [vmem:[%s21293_s5 + $0x78] sm:$0xff] }
 0x2f0   : > { %v18262_v56 = vmul.u32.u64.low %v18250_v35, %v4367_v36  ;;  %v18263_v61 = vmul.u32.u64.high %v18250_v35, %v4367_v36, %v18262_v56  ;;  %v18266_v48 = vmul.u32.u64.low %v18250_v35, %v4363_v46  ;;  %v18267_v42 = vmul.u32.u64.high %v18250_v35, %v4363_v46, %v18266_v48  ;;  %6969 = vmatprep.mubr.f32.mxu1 %v21414_v29 }
 0x2f1   : > { %v4319_v5 = vsel %vm21375_vm4, nan, %v4318_v59  ;;  %vm13270_vm14 = vcmp.lt.s32.totalorder %v13269_v37, 0  ;;  %v4359_v55 = vsel %vm4353_vm15, %v4356_v63, %v4358_v21  ;;  %v4116_v22 = vshrl.u32 %v4115_v16, 23 }
 0x2f2   : > { %v18288_v2 = vpop.eup %14997  ;;  %v3975_v50 = vsel %vm13270_vm14, 0, %v13269_v37  ;;  %v3990_v41 = vsub.s32 4, %v18171_v62  ;;  %v21370_v43 = vand.u32 2147483647, %v18205_v33  ;;  %13435 = vmatmul.mubr.msk.f32.gmra.mrb[12].mxu0 %vm21524_vm13, %v13425_v31  ;;  %vm4377_vm15 = vc.u32 %v18263_v61, %v18266_v48  ;;  %7655 = vperm.xlu1 %14918, %v7625_v13   ;;  %v7627_v13 = vld [vmem:[%s21295_s7 + $0x38] sm:$0xff] }
 0x2f3   : > { %v18297_v17 = vpop.eup %14999  ;;  %v21371_v25 = vxor.u32 2147483648, %v18288_v2  ;;  %v3976_v4 = vsub.s32 32, %v3975_v50  ;;  %v3980_v30 = vsub.s32 4294967266, %v3975_v50  ;;  %13445 = vmatmul.mubr.msk.f32.gmra.mrb[12].mxu1 %vm21525_vm9, %v13425_v31  ;;  %6862 = vmatprep.mubr.f32.mxu0 %v21414_v29  ;;  %v4375_v36 = vmul.u32 %v18250_v35, %v4359_v55  ;;  %v7761_v35 = vld [vmem:[%s21297_s9 + $0x28] sm:$0xff] }
 0x2f4   : > { %v21372_v44 = vxor.u32 2147483648, %v18297_v17  ;;  %v4378_v3 = vadd.s32 1, %v18267_v42  ;;  %v13275_v59 = vadd.s32 4294967169, %v4116_v22  ;;  %6975 = vmatprep.mubr.f32.mxu1 %v21414_v29  ;;  %v3977_v63 = vshll.u32 %v18201_v8, %v3975_v50 }
 0x2f5   : > { %v4733_v46 = vsel %vm4731_vm7, %v21371_v25, %v18297_v17  ;;  %v3978_v21 = vshrl.u32 %v3960_v58, %v3976_v4  ;;  %v3981_v14 = vadd.s32 127, %v3980_v30  ;;  %v4531_v31 = vand.u32 2139095040, %v18285_v1 }
 0x2f6   : > { %v4730_v9 = vsel %vm4728_vm3, %v18288_v2, %v21372_v44  ;;  %v4379_v37 = vsel %vm4377_vm15, %v4378_v3, %v18267_v42  ;;  %v4122_v16 = vadd.s32 1, %v13275_v59  ;;  %13436 = vmatmul.mubr.msk.f32.gmra.mrb[14].mxu0 %vm21526_vm10, %v13426_v11  ;;  %v3991_v42 = vsel %vm3906_vm8, %v3990_v41, %v18171_v62  ;;  %7791 = vperm.xlu1 %14918, %v7761_v35  }
 0x2f7   : > { %v4734_v56 = vsel %vm4727_vm5, %v4730_v9, %v4733_v46  ;;  %v3979_v58 = vor.u32 %v3978_v21, %v3977_v63  ;;  %v3982_v55 = vshll.u32 %v3981_v14, 23  ;;  %v4380_v22 = vadd.s32 %v4379_v37, %v4375_v36  ;;  %13446 = vmatmul.mubr.msk.f32.gmra.mrb[14].mxu1 %vm21514_vm1, %v13426_v11  ;;  %7123 = vmatprep.mubr.f32.mxu0 %v21414_v29  ;;  %v7763_v37 = vld [vmem:[%s21297_s9 + $0x38] sm:$0xff] }
 0x2f8   : > { %v4735_v8 = vsel %vm4724_vm12, nan, %v4734_v56  ;;  %vm4123_vm5 = vcmp.gt.s32.totalorder %v4122_v16, 0  ;;  %7236 = vmatprep.mubr.f32.mxu1 %v21414_v29  ;;  %v4119_v30 = vand.u32 8388607, %v21370_v43  ;;  %v4532_v62 = vshrl.u32 %v4531_v31, 23 }
 0x2f9   : > { %v18340_v54 = vpack.c.bf16 %v4735_v8, %v4319_v5  ;;  %v3983_v50 = vor.u32 4788187, %v3982_v55  ;;  %v4381_v4 = vadd.s32 536870912, %v4380_v22  ;;  %v4124_v11 = vsel %vm4123_vm5, %v4122_v16, 0 }
 0x2fa   : > { %v4126_v5 = vand.u32 31, %v4124_v11  ;;  %v21528_v41 = vand.u32 2147483647, %v17984_v38  ;;  %v3986_v3 = vcvt.s32.f32 %v3979_v58  ;;  %vm4322_vm3 = vcmp.lt.s32.totalorder %v18034_v39, 0  ;;  %7665 = vperm.xlu1 %14918, %v7627_v13  }
 0x2fb   : > { %21527 = vst [vmem:[#allocation8_spill] sm:$0xff] %v18340_v54  ;;  %14028 = vmatprep.subr.msk.bf16.mxu1 %vm15742_vm0, %v18340_v54  ;;  %v3984_v36 = vand.u32 2147483647, %v3983_v50  ;;  %v4382_v59 = vshrl.u32 %v4381_v4, 30  ;;  %v4120_v35 = vor.u32 8388608, %v4119_v30  ;;  %v13291_v58 = vadd.s32 4294967169, %v4532_v62 }
 0x2fc   : > { %vm18356_vm6 = vcmp.le.f32.partialorder %v21528_v41, 0.7853982  ;;  %v4127_v63 = vsub.s32 32, %v4126_v5  ;;  %v4132_v13 = vshll.u32 %v21416_v19, %v4126_v5  ;;  %v4135_v41 = vshll.u32 %v21417_v40, %v4126_v5 }
 0x2fd   : > { %v18362_v9 = vsel %vm18356_vm6, 0, %v3991_v42  ;;  %v3987_v21 = vmul.f32 %v3986_v3, %v3984_v36  ;;  %v4383_v14 = vshll.u32 %v4382_v59, 30  ;;  %v4129_v42 = vshll.u32 %v21415_v32, %v4126_v5 }
 0x2fe   : > { %v4130_v16 = vshrl.u32 %v21416_v19, %v4127_v63  ;;  %v4133_v31 = vshrl.u32 %v21417_v40, %v4127_v63  ;;  %v4136_v8 = vshrl.u32 %v21411_v6, %v4127_v63  ;;  %v4139_v50 = vshrl.u32 %v21412_v57, %v4127_v63  ;;  %7801 = vperm.xlu1 %14918, %v7763_v37  }
 0x2ff   : > { %v18372_v55 = vsub.s32 %v4380_v22, %v4383_v14  ;;  %v3988_v4 = vxor.u32 2147483648, %v3987_v21  ;;  %v4406_v30 = vsub.s32 4, %v4382_v59  ;;  %v4138_v36 = vshll.u32 %v21411_v6, %v4126_v5  ;;  %v13520_v22 = vld [vmem:[%s21295_s7 + $0x48] sm:$0xff] }
 0x300   : > { %v4125_v43 = vshrl.u32 %v4124_v11, 5  ;;  %v4131_v25 = vor.u32 %v4130_v16, %v4129_v42  ;;  %v4134_v62 = vor.u32 %v4133_v31, %v4132_v13  ;;  %v21531_v14 = vand.u32 2147483647, %v18034_v39 }
 0x301   : > { %v4386_v3 = vsub.s32 0, %v18372_v55  ;;  %v4137_v56 = vor.u32 %v4136_v8, %v4135_v41  ;;  %v4140_v54 = vor.u32 %v4139_v50, %v4138_v36  ;;  %v4141_v24 = vshll.u32 %v21412_v57, %v4126_v5 }
 0x302   : > { %vm18385_vm7 = vcmp.le.f32.partialorder %v21531_v14, 0.7853982  ;;  %v4142_v37 = vshrl.u32 %v21413_v23, %v4127_v63  ;;  %v4376_v11 = vadd.s32 %v18266_v48, %v18263_v61  ;;  %v18394_v31 = vshll.u32 %v4120_v35, 8  ;;  %8111 = vperm.xlu1 %14918, %v13520_v22   ;;  %v13552_v61 = vld [vmem:[%s21297_s9 + $0x48] sm:$0xff] }
 0x303   : > { %v13284_v16 = vmin.u32 %v4386_v3, %v18372_v55  ;;  %v4538_v42 = vadd.s32 1, %v13291_v58  ;;  %v3989_v13 = vsel %vm3906_vm8, %v3988_v4, %v3987_v21  ;;  %v4407_v14 = vsel %vm4322_vm3, %v4406_v30, %v4382_v59 }
 0x304   : > { %v4128_v8 = vshrl.u32 %v21415_v32, %v4127_v63  ;;  %v4143_v50 = vor.u32 %v4142_v37, %v4141_v24  ;;  %vm4144_vm14 = vcmp.lt.s32.totalorder %v4125_v43, 1  ;;  %vm4145_vm13 = vcmp.lt.s32.totalorder %v4125_v43, 2  ;;  %v13522_v37 = vld [vmem:[%s21295_s7 + $0x58] sm:$0xff] }
 0x305   : > { %v4388_v5 = vclz %v13284_v16  ;;  %vm4147_vm15 = vcmp.lt.s32.totalorder %v4125_v43, 4  ;;  %vm4146_vm9 = vcmp.lt.s32.totalorder %v4125_v43, 3  ;;  %v4152_v35 = vsel %vm4144_vm14, %v4131_v25, %v4134_v62 }
 0x306   : > { %v4149_v48 = vsel %vm4147_vm15, %v4137_v56, 2102212464  ;;  %v4153_v58 = vsel %vm4147_vm15, %v4140_v54, 920167782  ;;  %v4148_v4 = vsel %vm4144_vm14, %v4128_v8, %v4131_v25  ;;  %v4156_v59 = vsel %vm4144_vm14, %v4134_v62, %v4137_v56  ;;  %8452 = vperm.xlu1 %14918, %v13552_v61  }
 0x307   : > { %v13285_v21 = vadd.s32 4294967294, %v4388_v5  ;;  %v4154_v41 = vsel %vm4146_vm9, %v4137_v56, %v4153_v58  ;;  %v4150_v30 = vsel %vm4146_vm9, %v4134_v62, %v4149_v48  ;;  %v4157_v63 = vsel %vm4147_vm15, %v4143_v50, 1326507024 }
 0x308   : > { %v4155_v24 = vsel %vm4145_vm13, %v4152_v35, %v4154_v41  ;;  %vm4539_vm8 = vcmp.gt.s32.totalorder %v4538_v42, 0  ;;  %v4158_v36 = vsel %vm4146_vm9, %v4140_v54, %v4157_v63  ;;  %v21534_v62 = vand.u32 2147483647, %v18285_v1 }
 0x309   : > { %vm13286_vm10 = vcmp.lt.s32.totalorder %v13285_v21, 0  ;;  %v18406_v3 = vmul.u32.u64.low %v18394_v31, %v4155_v24  ;;  %v18407_v22 = vmul.u32.u64.high %v18394_v31, %v4155_v24, %v18406_v3  ;;  %v4159_v56 = vsel %vm4145_vm13, %v4156_v59, %v4158_v36 }
 0x30a   : > { %v4391_v25 = vsel %vm13286_vm10, 0, %v13285_v21  ;;  %v4535_v16 = vand.u32 8388607, %v21534_v62  ;;  %v4540_v8 = vsel %vm4539_vm8, %v4538_v42, 0  ;;  %v3992_v54 = vsel %vm18356_vm6, %v17984_v38, %v3989_v13  ;;  %8121 = vperm.xlu1 %14918, %v13522_v37   ;;  %v13554_v13 = vld [vmem:[%s21297_s9 + $0x58] sm:$0xff]  ;;  %v13524_v62 = vld [vmem:[%s21295_s7 + $0x68] sm:$0xff] }
 0x30b   : > { %v4392_v50 = vsub.s32 32, %v4391_v25  ;;  %v4396_v5 = vsub.s32 4294967266, %v4391_v25  ;;  %v18421_v61 = vsel %vm18385_vm7, 0, %v4407_v14  ;;  %v4151_v48 = vsel %vm4145_vm13, %v4148_v4, %v4150_v30 }
 0x30c   : > { %v18425_v35 = vmul.u32.u64.low %v18394_v31, %v4159_v56  ;;  %v18426_v58 = vmul.u32.u64.high %v18394_v31, %v4159_v56, %v18425_v35  ;;  %v4542_v21 = vand.u32 31, %v4540_v8  ;;  %v4393_v42 = vshll.u32 %v18372_v55, %v4391_v25 }
 0x30d   : > { %v4394_v41 = vshrl.u32 %v4376_v11, %v4392_v50  ;;  %v4397_v59 = vadd.s32 127, %v4396_v5  ;;  %v4170_v46 = vadd.s32 1, %v18407_v22  ;;  %v3997_v14 = vadd.s32 3, %v18362_v9 }
 0x30e   : > { %v4536_v43 = vor.u32 8388608, %v4535_v16  ;;  %v4543_v4 = vsub.s32 32, %v4542_v21  ;;  %v18435_v30 = vand.u32 3, %v17798_v10  ;;  %15001 = vcosq.f32 %v3992_v54  ;;  %8462 = vperm.xlu1 %14918, %v13554_v13  }
 0x30f   : > { %v4395_v24 = vor.u32 %v4394_v41, %v4393_v42  ;;  %v4398_v63 = vshll.u32 %v4397_v59, 23  ;;  %v4413_v55 = vadd.s32 3, %v18421_v61  ;;  %15003 = vsinq.f32 %v3992_v54 }
 0x310   : > { %v4167_v11 = vmul.u32 %v18394_v31, %v4151_v48  ;;  %vm4169_vm1 = vc.u32 %v18426_v58, %v18406_v3  ;;  %v18441_v36 = vshrl.u32 %v4540_v8, 5  ;;  %v4545_v10 = vshll.u32 %v21415_v32, %v4542_v21 }
 0x311   : > { %v4399_v37 = vor.u32 4788187, %v4398_v63  ;;  %v4171_v25 = vsel %vm4169_vm1, %v4170_v46, %v18407_v22  ;;  %v4548_v56 = vshll.u32 %v21416_v19, %v4542_v21  ;;  %v4546_v31 = vshrl.u32 %v21416_v19, %v4543_v4 }
 0x312   : > { %v4172_v16 = vadd.s32 %v4171_v25, %v4167_v11  ;;  %v4549_v54 = vshrl.u32 %v21417_v40, %v4543_v4  ;;  %v4551_v8 = vshll.u32 %v21417_v40, %v4542_v21  ;;  %v4402_v5 = vcvt.s32.f32 %v4395_v24  ;;  %8131 = vperm.xlu1 %14918, %v13524_v62   ;;  %v13556_v40 = vld [vmem:[%s21297_s9 + $0x68] sm:$0xff] }
 0x313   : > { %v4400_v50 = vand.u32 2147483647, %v4399_v37  ;;  %v4552_v48 = vshrl.u32 %v21411_v6, %v4543_v4  ;;  %v4554_v22 = vshll.u32 %v21411_v6, %v4542_v21  ;;  %v4547_v42 = vor.u32 %v4546_v31, %v4545_v10 }
 0x314   : > { %v4173_v35 = vadd.s32 536870912, %v4172_v16  ;;  %v4550_v41 = vor.u32 %v4549_v54, %v4548_v56  ;;  %v4555_v59 = vshrl.u32 %v21412_v57, %v4543_v4  ;;  %v4557_v19 = vshll.u32 %v21412_v57, %v4542_v21 }
 0x315   : > { %v4403_v46 = vmul.f32 %v4402_v5, %v4400_v50  ;;  %v4553_v13 = vor.u32 %v4552_v48, %v4551_v8  ;;  %v4558_v63 = vshrl.u32 %v21413_v23, %v4543_v4  ;;  %v18460_v24 = vand.u32 3, %v3997_v14 }
 0x316   : > { %v18462_v11 = vand.u32 3, %v4413_v55  ;;  %v18464_v6 = vshrl.u32 %v4173_v35, 30  ;;  %v4556_v37 = vor.u32 %v4555_v59, %v4554_v22  ;;  %vm4560_vm5 = vcmp.lt.s32.totalorder %v18441_v36, 1  ;;  %8472 = vperm.xlu1 %14918, %v13556_v40  }
 0x317   : > { %v4404_v25 = vxor.u32 2147483648, %v4403_v46  ;;  %v4559_v10 = vor.u32 %v4558_v63, %v4557_v19  ;;  %v18467_v56 = vshll.u32 %v4536_v43, 8  ;;  %v4544_v23 = vshrl.u32 %v21415_v32, %v4543_v4  ;;  %v13526_v32 = vld [vmem:[%s21295_s7 + $0x78] sm:$0xff] }
 0x318   : > { %v4175_v57 = vshll.u32 %v18464_v6, 30  ;;  %vm4561_vm6 = vcmp.lt.s32.totalorder %v18441_v36, 2  ;;  %vm4563_vm14 = vcmp.lt.s32.totalorder %v18441_v36, 4  ;;  %v18473_v21 = vpop.eup %15001  ;;  %v4568_v43 = vsel %vm4560_vm5, %v4547_v42, %v4550_v41 }
 0x319   : > { %v4405_v14 = vsel %vm4322_vm3, %v4404_v25, %v4403_v46  ;;  %v4565_v55 = vsel %vm4563_vm14, %v4553_v13, 2102212464  ;;  %v4569_v62 = vsel %vm4563_vm14, %v4556_v37, 920167782  ;;  %v18486_v4 = vpop.eup %15003  ;;  %vm4562_vm3 = vcmp.lt.s32.totalorder %v18441_v36, 3 }
 0x31a   : > { %v4408_v31 = vsel %vm18385_vm7, %v18034_v39, %v4405_v14  ;;  %v18491_v54 = vsub.s32 %v4172_v16, %v4175_v57  ;;  %v4564_v8 = vsel %vm4560_vm5, %v4544_v23, %v4547_v42  ;;  %v4570_v50 = vsel %vm4562_vm3, %v4553_v13, %v4569_v62  ;;  %8141 = vperm.xlu1 %14918, %v13526_v32   ;;  %v13584_v23 = vld [vmem:[%s21295_s7 + $0x88] sm:$0xff] }
 0x31b   : > { %15005 = vcosq.f32 %v4408_v31  ;;  %v4572_v5 = vsel %vm4560_vm5, %v4550_v41, %v4553_v13  ;;  %v4573_v48 = vsel %vm4563_vm14, %v4559_v10, 1326507024  ;;  %v4566_v44 = vsel %vm4562_vm3, %v4550_v41, %v4565_v55  ;;  %v13558_v13 = vld [vmem:[%s21297_s9 + $0x78] sm:$0xff] }
 0x31c   : > { %15007 = vsinq.f32 %v4408_v31  ;;  %v4178_v22 = vsub.s32 0, %v18491_v54  ;;  %v4571_v16 = vsel %vm4561_vm6, %v4568_v43, %v4570_v50  ;;  %v4004_v35 = vxor.u32 2147483648, %v18473_v21 }
 0x31d   : > { %v4574_v59 = vsel %vm4562_vm3, %v4556_v37, %v4573_v48  ;;  %v18505_v42 = vmul.u32.u64.low %v18467_v56, %v4571_v16  ;;  %v18506_v46 = vmul.u32.u64.high %v18467_v56, %v4571_v16, %v18505_v42  ;;  %v4001_v19 = vxor.u32 2147483648, %v18486_v4 }
 0x31e   : > { %v13276_v41 = vmin.u32 %v4178_v22, %v18491_v54  ;;  %v4575_v63 = vsel %vm4561_vm6, %v4572_v5, %v4574_v59  ;;  %v5344_v40 = vand.u32 3, %v17914_v45  ;;  %vm3999_vm7 = vcmp.lt.s32.totalorder %v18460_v24, 2  ;;  %8482 = vperm.xlu1 %14918, %v13558_v13  }
 0x31f   : > { %vm4000_vm13 = vcmp.eq.s32.totalorder %v18460_v24, 0  ;;  %v4567_v37 = vsel %vm4561_vm6, %v4564_v8, %v4566_v44  ;;  %v18522_v25 = vmul.u32.u64.low %v18467_v56, %v4575_v63  ;;  %v18523_v10 = vmul.u32.u64.high %v18467_v56, %v4575_v63, %v18522_v25  ;;  %v13616_v44 = vld [vmem:[%s21297_s9 + $0x88] sm:$0xff] }
 0x320   : > { %vm4003_vm15 = vcmp.eq.s32.totalorder %v18460_v24, 2  ;;  %v4180_v57 = vclz %v13276_v41  ;;  %vm4933_vm9 = vcmp.lt.s32.totalorder %v18435_v30, 2  ;;  %vm4934_vm8 = vcmp.eq.s32.totalorder %v18435_v30, 0 }
 0x321   : > { %v4005_v45 = vsel %vm4003_vm15, %v4004_v35, %v18486_v4  ;;  %vm4415_vm10 = vcmp.lt.s32.totalorder %v18462_v11, 2  ;;  %vm4416_vm1 = vcmp.eq.s32.totalorder %v18462_v11, 0  ;;  %v4586_v36 = vadd.s32 1, %v18506_v46 }
 0x322   : > { %vm3996_vm5 = vweird.f32 %v17984_v38  ;;  %v4002_v14 = vsel %vm4000_vm13, %v18473_v21, %v4001_v19  ;;  %vm4412_vm6 = vweird.f32 %v18034_v39  ;;  %v4168_v55 = vadd.s32 %v18406_v3, %v18426_v58  ;;  %8792 = vperm.xlu1 %14918, %v13584_v23  }
 0x323   : > { %v13277_v43 = vadd.s32 4294967294, %v4180_v57  ;;  %v4583_v62 = vmul.u32 %v18467_v56, %v4567_v37  ;;  %vm4585_vm14 = vc.u32 %v18523_v10, %v18505_v42  ;;  %v21535_v32 = vxor.u32 2147483648, %v17952_v26 }
 0x324   : > { %vm5346_vm3 = vcmp.eq.s32.totalorder %v5344_v40, 0  ;;  %vm5349_vm15 = vcmp.eq.s32.totalorder %v5344_v40, 2  ;;  %v4587_v8 = vsel %vm4585_vm14, %v4586_v36, %v18506_v46  ;;  %v21536_v50 = vxor.u32 2147483648, %v18026_v52 }
 0x325   : > { %v4936_v31 = vsel %vm4934_vm8, %v17947_v51, %v21535_v32  ;;  %vm13278_vm4 = vcmp.lt.s32.totalorder %v13277_v43, 0  ;;  %v21537_v3 = vxor.u32 2147483648, %v18020_v49  ;;  %v18559_v56 = vpop.eup %15005  ;;  %v4588_v22 = vadd.s32 %v4587_v8, %v4583_v62 }
 0x326   : > { %v5348_v5 = vsel %vm5346_vm3, %v18020_v49, %v21536_v50  ;;  %v4183_v48 = vsel %vm13278_vm4, 0, %v13277_v43  ;;  %vm4937_vm13 = vcmp.eq.s32.totalorder %v18435_v30, 2  ;;  %vm5345_vm8 = vcmp.lt.s32.totalorder %v5344_v40, 2  ;;  %v18565_v16 = vpop.eup %15007  ;;  %9132 = vperm.xlu1 %14918, %v13616_v44   ;;  %v18624_v44 = vld [vmem:[%s21292_s4 + $0x80] sm:$0xff] }
 0x327   : > { %v5351_v58 = vsel %vm5349_vm15, %v21537_v3, %v18026_v52  ;;  %v4420_v59 = vxor.u32 2147483648, %v18559_v56  ;;  %v4184_v46 = vsub.s32 32, %v4183_v48  ;;  %v4188_v13 = vsub.s32 4294967266, %v4183_v48 }
 0x328   : > { %v21538_v49 = vxor.u32 2147483648, %v17947_v51  ;;  %v4417_v41 = vxor.u32 2147483648, %v18565_v16  ;;  %vm4419_vm4 = vcmp.eq.s32.totalorder %v18462_v11, 2  ;;  %v4589_v63 = vadd.s32 536870912, %v4588_v22 }
 0x329   : > { %v5352_v40 = vsel %vm5345_vm8, %v5348_v5, %v5351_v58  ;;  %v4006_v37 = vsel %vm3999_vm7, %v4002_v14, %v4005_v45  ;;  %v4421_v25 = vsel %vm4419_vm4, %v4420_v59, %v18565_v16  ;;  %v4186_v57 = vshrl.u32 %v4168_v55, %v4184_v46  ;;  %v13586_v45 = vld [vmem:[%s21295_s7 + $0x98] sm:$0xff] }
 0x32a   : > { %v4939_v52 = vsel %vm4937_vm13, %v21538_v49, %v17952_v26  ;;  %v4189_v36 = vadd.s32 127, %v4188_v13  ;;  %v4418_v51 = vsel %vm4416_vm1, %v18559_v56, %v4417_v41  ;;  %v18583_v26 = vshrl.u32 %v4589_v63, 30  ;;  %8802 = vperm.xlu1 %14918, %v13586_v45   ;;  %v13618_v5 = vld [vmem:[%s21297_s9 + $0x98] sm:$0xff]  ;;  %v7741_v45 = vld [vmem:[%s18678_s22 + $0x8] sm:$0xff] }
 0x32b   : > { %v4940_v23 = vsel %vm4933_vm9, %v4936_v31, %v4939_v52  ;;  %v5550_v24 = vand.u32 3, %v18104_v7  ;;  %v4422_v14 = vsel %vm4415_vm10, %v4418_v51, %v4421_v25  ;;  %v4185_v55 = vshll.u32 %v18491_v54, %v4183_v48  ;;  %v13620_v51 = vld [vmem:[%s21297_s9 + $0xa8] sm:$0xff] }
 0x32c   : > { %v4190_v43 = vshll.u32 %v4189_v36, 23  ;;  %v5353_v62 = vsel %vm4516_vm11, nan, %v5352_v40  ;;  %v4007_v32 = vsel %vm3996_vm5, nan, %v4006_v37  ;;  %v4423_v30 = vsel %vm4412_vm6, nan, %v4422_v14  ;;  %v7745_v14 = vld [vmem:[%s18678_s22 + $0x28] sm:$0xff] }
 0x32d   : > { %v4591_v7 = vshll.u32 %v18583_v26, 30  ;;  %v18601_v31 = vpack.c.bf16 %v4423_v30, %v4007_v32  ;;  %v4187_v8 = vor.u32 %v4186_v57, %v4185_v55  ;;  %v4941_v11 = vsel %vm4100_vm2, nan, %v4940_v23  ;;  %v13590_v30 = vld [vmem:[%s21295_s7 + $0xb8] sm:$0xff] }
 0x32e   : > { %v4191_v50 = vor.u32 4788187, %v4190_v43  ;;  %v18607_v34 = vpack.c.bf16 %v5353_v62, %v4941_v11  ;;  %vm5552_vm11 = vcmp.eq.s32.totalorder %v5550_v24, 0  ;;  %vm5555_vm7 = vcmp.eq.s32.totalorder %v5550_v24, 2  ;;  %9142 = vperm.xlu1 %14918, %v13618_v5   ;;  %v18723_v5 = vld [vmem:[%s21292_s4 + $0xa0] sm:$0xff] }
 0x32f   : > { %v18605_v54 = vsub.s32 %v4588_v22, %v4591_v7  ;;  %14025 = vmatpush1.bf16.msk.msra.mxu0 %vm15742_vm0, %v18601_v31  ;;  %vm5551_vm9 = vcmp.lt.s32.totalorder %v5550_v24, 2  ;;  %v21539_v27 = vxor.u32 2147483648, %v18297_v17  ;;  %v21540_v48 = vxor.u32 2147483648, %v18288_v2 }
 0x330   : > { %v4192_v3 = vand.u32 2147483647, %v4191_v50  ;;  %14034 = vmatprep.subr.msk.bf16.mxu0 %vm15742_vm0, %v18607_v34  ;;  %v4829_v49 = vand.u32 3, %v18362_v9  ;;  %v4194_v52 = vcvt.s32.f32 %v4187_v8  ;;  %vm21541_vm2 = vcmask 80896   ;;  %v13588_v9 = vld [vmem:[%s21295_s7 + $0xa8] sm:$0xff] }
 0x331   : > { %v5554_v58 = vsel %vm5552_vm11, %v18288_v2, %v21539_v27  ;;  %v5557_v22 = vsel %vm5555_vm7, %v21540_v48, %v18297_v17  ;;  %v4594_v46 = vsub.s32 0, %v18605_v54  ;;  %v5241_v17 = vand.u32 3, %v18421_v61  ;;  %vm21542_vm3 = vmmov %vm21541_vm2 }
 0x332   : > { %v5558_v13 = vsel %vm5551_vm9, %v5554_v58, %v5557_v22  ;;  %13457 = vmatmul.mubr.msk.f32.vlgmr.msra.gmra.mrb[0].mxu0 %vm21541_vm2, %v18624_v44  ;;  %v4195_v40 = vmul.f32 %v4194_v52, %v4192_v3  ;;  %vm4834_vm10 = vcmp.eq.s32.totalorder %v4829_v49, 2  ;;  %8812 = vperm.xlu1 %14918, %v13588_v9   ;;  %vm4830_vm14 = vcmp.lt.s32.totalorder %v4829_v49, 2  ;;  %vm21543_vm11 = vmmov %vm21541_vm2  ;;  %v13622_v58 = vld [vmem:[%s21297_s9 + $0xb8] sm:$0xff] }
 0x333   : > { %v18636_v2 = vsel %vm4724_vm12, nan, %v5558_v13  ;;  %v13292_v63 = vmin.u32 %v4594_v46, %v18605_v54  ;;  %7129 = vmatprep.mubr.f32.mxu0 %v21414_v29  ;;  %vm4831_vm12 = vcmp.eq.s32.totalorder %v4829_v49, 0  ;;  %v4836_v25 = vsel %vm4834_vm10, %v4004_v35, %v18486_v4  ;;  %vm21548_vm7 = vmmov %vm21541_vm2  ;;  %v18736_v13 = vld [vmem:[%s21292_s4 + $0xa8] sm:$0xff] }
 0x334   : > { %v4833_v37 = vsel %vm4831_vm12, %v18473_v21, %v4001_v19  ;;  %vm5243_vm1 = vcmp.eq.s32.totalorder %v5241_v17, 0  ;;  %v4196_v19 = vxor.u32 2147483648, %v4195_v40  ;;  %vm5246_vm15 = vcmp.eq.s32.totalorder %v5241_v17, 2  ;;  %v18670_v21 = vld [vmem:[%s21292_s4 + $0x90] sm:$0xff]  ;;  %vm21550_vm10 = vmmov %vm21541_vm2 }
 0x335   : > { %v4596_v61 = vclz %v13292_v63  ;;  %v5245_v36 = vsel %vm5243_vm1, %v18559_v56, %v4417_v41  ;;  %v4837_v23 = vsel %vm4830_vm14, %v4833_v37, %v4836_v25  ;;  %vm5242_vm8 = vcmp.lt.s32.totalorder %v5241_v17, 2  ;;  %v13860_v17 = vld [vmem:[%s21295_s7 + $0xc8] sm:$0xff]  ;;  %vm21551_vm1 = vmmov %vm21541_vm2 }
 0x336   : > { %13458 = vmatmul.mubr.msk.f32.gmra.mrb[2].mxu0 %vm21542_vm3, %v18649_v12  ;;  %v5248_v4 = vsel %vm5246_vm15, %v4420_v59, %v18565_v16  ;;  %vm4114_vm4 = vcmp.lt.s32.totalorder %v18205_v33, 0  ;;  %v4584_v35 = vadd.s32 %v18505_v42, %v18523_v10  ;;  %9152 = vperm.xlu1 %14918, %v13620_v51   ;;  %v4838_v56 = vsel %vm3996_vm5, nan, %v4837_v23  ;;  %v18696_v59 = vld [vmem:[%s21292_s4 + $0x98] sm:$0xff]  ;;  %v13876_v37 = vld [vmem:[%s21297_s9 + $0xc8] sm:$0xff] }
 0x337   : > { %v13293_v57 = vadd.s32 4294967294, %v4596_v61  ;;  %7135 = vmatprep.mubr.f32.mxu0 %v21414_v29  ;;  %v5249_v24 = vsel %vm5242_vm8, %v5245_v36, %v5248_v4  ;;  %v4197_v42 = vsel %vm4114_vm4, %v4196_v19, %v4195_v40  ;;  %v18699_v32 = vpack.c.bf16 %v7745_v14, %v7741_v45  ;;  %v18769_v19 = vld [vmem:[%s21292_s4 + $0xb8] sm:$0xff]  ;;  %v7753_v14 = vld [vmem:[%s18678_s22 + $0x68] sm:$0xff] }
 0x338   : > { %v5250_v16 = vsel %vm4412_vm6, nan, %v5249_v24  ;;  %v21544_v7 = vand.u32 2147483647, %v18205_v33  ;;  %vm21547_vm6 = vmmov %vm21541_vm2  ;;  %v4198_v3 = vsub.s32 4, %v18464_v6  ;;  %v4614_v46 = vsub.s32 4, %v18583_v26  ;;  %v13862_v24 = vld [vmem:[%s21295_s7 + $0xd8] sm:$0xff] }
 0x339   : > { %vm13294_vm13 = vcmp.lt.s32.totalorder %v13293_v57, 0  ;;  %v18690_v10 = vpack.c.bf16 %v5250_v16, %v4838_v56  ;;  %vm4530_vm9 = vcmp.lt.s32.totalorder %v18285_v1, 0  ;;  %v21549_v61 = vand.u32 2147483647, %v18285_v1 }
 0x33a   : > { %v4599_v41 = vsel %vm13294_vm13, 0, %v13293_v57  ;;  %13459 = vmatmul.mubr.msk.f32.gmra.mrb[4].mxu0 %vm21543_vm11, %v18670_v21  ;;  %vm18709_vm5 = vcmp.le.f32.partialorder %v21544_v7, 0.7853982  ;;  %8822 = vperm.xlu1 %14918, %v13590_v30   ;;  %v4199_v49 = vsel %vm4114_vm4, %v4198_v3, %v18464_v6  ;;  %v4615_v9 = vsel %vm4530_vm9, %v4614_v46, %v18583_v26  ;;  %v18754_v6 = vld [vmem:[%s21292_s4 + $0xb0] sm:$0xff]  ;;  %v7752_v30 = vld [vmem:[%s18678_s22 + $0x60] sm:$0xff]  ;;  %v13878_v3 = vld [vmem:[%s21297_s9 + $0xd8] sm:$0xff] }
 0x33b   : > { %v4600_v55 = vsub.s32 32, %v4599_v41  ;;  %v4604_v43 = vsub.s32 4294967266, %v4599_v41  ;;  %7141 = vmatprep.mubr.f32.mxu0 %v21414_v29  ;;  %v4601_v38 = vshll.u32 %v18605_v54, %v4599_v41  ;;  %14037 = vmatpush1.bf16.msk.msra.mxu0 %vm15742_vm0, %v18690_v10  ;;  %v4200_v54 = vsel %vm18709_vm5, %v18205_v33, %v4197_v42  ;;  %v7744_v41 = vld [vmem:[%s18678_s22 + $0x20] sm:$0xff]  ;;  %vm21554_vm13 = vmmov %vm21551_vm1 }
 0x33c   : > { %14045 = vmatprep.subr.bf16.mxu0 %v18699_v32  ;;  %15009 = vcosq.f32 %v4200_v54  ;;  %v4201_v40 = vsel %vm18709_vm5, 0, %v4199_v49  ;;  %vm4529_vm12 = vcmp.le.f32.partialorder %v21549_v61, 0.7853982  ;;  %v5138_v51 = vand.u32 3, %v18048_v18  ;;  %v7749_v18 = vld [vmem:[%s18678_s22 + $0x48] sm:$0xff] }
 0x33d   : > { %v4602_v62 = vshrl.u32 %v4584_v35, %v4600_v55  ;;  %v4605_v39 = vadd.s32 127, %v4604_v43  ;;  %15011 = vsinq.f32 %v4200_v54  ;;  %v4617_v57 = vsel %vm4529_vm12, 0, %v4615_v9  ;;  %v7740_v35 = vld [vmem:[%s18678_s22] sm:$0xff] }
 0x33e   : > { %13460 = vmatmul.mubr.msk.f32.gmra.mrb[6].mxu0 %vm21547_vm6, %v18696_v59  ;;  %9162 = vperm.xlu1 %14918, %v13622_v58   ;;  %v4205_v36 = vadd.s32 3, %v4201_v40  ;;  %v4621_v4 = vadd.s32 3, %v4617_v57  ;;  %vm5140_vm14 = vcmp.eq.s32.totalorder %v5138_v51, 0  ;;  %vm5143_vm3 = vcmp.eq.s32.totalorder %v5138_v51, 2  ;;  %v18786_v43 = vld [vmem:[%s21293_s5 + $0x80] sm:$0xff] }
 0x33f   : > { %v4603_v50 = vor.u32 %v4602_v62, %v4601_v38  ;;  %v4606_v11 = vshll.u32 %v4605_v39, 23  ;;  %7147 = vmatprep.mubr.f32.mxu0 %v21414_v29  ;;  %v18788_v56 = vpack.c.bf16 %v7744_v41, %v7740_v35  ;;  %v18791_v62 = vpack.c.bf16 %v7753_v14, %v7749_v18  ;;  %v7748_v39 = vld [vmem:[%s18678_s22 + $0x40] sm:$0xff]  ;;  %v7743_v14 = vld [vmem:[%s18678_s22 + $0x18] sm:$0xff] }
 0x340   : > { %v4206_v55 = vand.u32 3, %v4205_v36  ;;  %v4622_v38 = vand.u32 3, %v4621_v4  ;;  %v21552_v7 = vxor.u32 2147483648, %v18126_v15  ;;  %v5035_v54 = vand.u32 3, %v4201_v40  ;;  %v13880_v35 = vld [vmem:[%s21297_s9 + $0xe8] sm:$0xff] }
 0x341   : > { %v4607_v27 = vor.u32 4788187, %v4606_v11  ;;  %v4610_v22 = vcvt.s32.f32 %v4603_v50  ;;  %v21553_v50 = vxor.u32 2147483648, %v18121_v60  ;;  %vm5139_vm11 = vcmp.lt.s32.totalorder %v5138_v51, 2 }
 0x342   : > { %13461 = vmatmul.mubr.msk.f32.gmra.mrb[8].mxu0 %vm21548_vm7, %v18723_v5  ;;  %11727 = vperm.xlu1 %14918, %v13860_v17   ;;  %v5142_v8 = vsel %vm5140_vm14, %v18121_v60, %v21552_v7  ;;  %vm4207_vm15 = vcmp.lt.s32.totalorder %v4206_v55, 2  ;;  %vm4208_vm8 = vcmp.eq.s32.totalorder %v4206_v55, 0  ;;  %vm4211_vm4 = vcmp.eq.s32.totalorder %v4206_v55, 2  ;;  %v18810_v60 = vld [vmem:[%s21293_s5 + $0x88] sm:$0xff]  ;;  %v7747_v55 = vld [vmem:[%s18678_s22 + $0x38] sm:$0xff] }
 0x343   : > { %v4608_v48 = vand.u32 2147483647, %v4607_v27  ;;  %7153 = vmatprep.mubr.f32.mxu0 %v21414_v29  ;;  %v5145_v11 = vsel %vm5143_vm3, %v21553_v50, %v18126_v15  ;;  %v5447_v27 = vand.u32 3, %v4617_v57  ;;  %v18813_v15 = vpack.c.bf16 %v7752_v30, %v7748_v39  ;;  %v13864_v17 = vld [vmem:[%s21295_s7 + $0xe8] sm:$0xff]  ;;  %v18883_v30 = vld [vmem:[%s21293_s5 + $0xa0] sm:$0xff]  ;;  %v18929_v50 = vld [vmem:[%s21293_s5 + $0xb8] sm:$0xff] }
 0x344   : > { %vm4623_vm5 = vcmp.lt.s32.totalorder %v4622_v38, 2  ;;  %v5146_v46 = vsel %vm5139_vm11, %v5142_v8, %v5145_v11  ;;  %vm4624_vm6 = vcmp.eq.s32.totalorder %v4622_v38, 0  ;;  %vm4627_vm7 = vcmp.eq.s32.totalorder %v4622_v38, 2  ;;  %vm21557_vm11 = vmmov %vm21551_vm1  ;;  %v13908_v7 = vld [vmem:[%s21295_s7 + $0x108] sm:$0xff]  ;;  %v18915_v8 = vld [vmem:[%s21293_s5 + $0xb0] sm:$0xff] }
 0x345   : > { %v4611_v52 = vmul.f32 %v4610_v22, %v4608_v48  ;;  %vm5449_vm14 = vcmp.eq.s32.totalorder %v5447_v27, 0  ;;  %vm4204_vm3 = vweird.f32 %v18205_v33  ;;  %v18873_v39 = vpack.c.bf16 %v7747_v55, %v7743_v14  ;;  %v13882_v33 = vld [vmem:[%s21297_s9 + $0xf8] sm:$0xff]  ;;  %v18943_v11 = vld [vmem:[%s21296_s8] sm:$0xff]  ;;  %v19074_v14 = vpop.permute.xlu0 %7766 }
 0x346   : > { %13462 = vmatmul.mubr.msk.f32.gmra.mrb[10].mxu0 %vm21541_vm2, %v18736_v13  ;;  %11849 = vperm.xlu1 %14918, %v13876_v37   ;;  %v18771_v23 = vpop.eup %15009  ;;  %vm5040_vm2 = vcmp.eq.s32.totalorder %v5035_v54, 2 }
 0x347   : > { %v4612_v63 = vxor.u32 2147483648, %v4611_v52  ;;  %7159 = vmatprep.mubr.f32.mxu0 %v21414_v29  ;;  %v15012_v45 = vpop.eup %15011  ;;  %v4212_v42 = vxor.u32 2147483648, %v18771_v23 }
 0x348   : > { %v4209_v16 = vxor.u32 2147483648, %v15012_v45 }
 0x349   : > { %v4613_v26 = vsel %vm4530_vm9, %v4612_v63, %v4611_v52  ;;  %v4213_v22 = vsel %vm4211_vm4, %v4212_v42, %v15012_v45  ;;  %vm5037_vm9 = vcmp.eq.s32.totalorder %v5035_v54, 0  ;;  %v5042_v57 = vsel %vm5040_vm2, %v4212_v42, %v15012_v45  ;;  %vm21562_vm2 = vmmov %vm21551_vm1 }
 0x34a   : > { %v4616_v25 = vsel %vm4529_vm12, %v18285_v1, %v4613_v26  ;;  %13463 = vmatmul.mubr.msk.f32.gmra.mrb[12].mxu0 %vm21550_vm10, %v18754_v6  ;;  %11737 = vperm.xlu1 %14918, %v13862_v24   ;;  %v4210_v48 = vsel %vm4208_vm8, %v18771_v23, %v4209_v16  ;;  %vm5448_vm12 = vcmp.lt.s32.totalorder %v5447_v27, 2  ;;  %vm5452_vm10 = vcmp.eq.s32.totalorder %v5447_v27, 2  ;;  %v18827_v26 = vld [vmem:[%s21293_s5 + $0x90] sm:$0xff]  ;;  %vm21555_vm8 = vmmov %vm21551_vm1 }
 0x34b   : > { %15013 = vcosq.f32 %v4616_v25  ;;  %7165 = vmatprep.mubr.f32.mxu0 %v21414_v29  ;;  %v4214_v9 = vsel %vm4207_vm15, %v4210_v48, %v4213_v22  ;;  %vm4620_vm15 = vweird.f32 %v18285_v1  ;;  %vm21556_vm4 = vweird.f32 %v17606_v53  ;;  %v13866_v53 = vld [vmem:[%s21295_s7 + $0xf8] sm:$0xff] }
 0x34c   : > { %15015 = vsinq.f32 %v4616_v25  ;;  %v5039_v25 = vsel %vm5037_vm9, %v18771_v23, %v4209_v16  ;;  %v4215_v23 = vsel %vm4204_vm3, nan, %v4214_v9  ;;  %v5147_v45 = vsel %vm21556_vm4, nan, %v5146_v46  ;;  %v18855_v16 = vld [vmem:[%s21293_s5 + $0x98] sm:$0xff]  ;;  %vm21561_vm9 = vmmov %vm21551_vm1 }
 0x34d   : > { %v18858_v42 = vpack.c.bf16 %v18636_v2, %v5147_v45  ;;  %v7742_v27 = vld [vmem:[%s18678_s22 + $0x10] sm:$0xff]  ;;  %v7751_v48 = vld [vmem:[%s18678_s22 + $0x58] sm:$0xff]  ;;  %vm21569_vm4 = vmmov %vm21551_vm1 }
 0x34e   : > { %13464 = vmatmul.mubr.msk.f32.gmra.mrb[14].mxu0 %vm21551_vm1, %v18769_v19  ;;  %11859 = vperm.xlu1 %14918, %v13878_v3   ;;  %v7734_v3 = vld [vmem:[%s21296_s8 + $0x10] sm:$0xff]  ;;  %v7755_v22 = vld [vmem:[%s18678_s22 + $0x78] sm:$0xff] }
 0x34f   : > { %7426 = vmatprep.mubr.f32.mxu0 %v21414_v29 }
 0x352   : > { %13485 = vmatmul.mubr.msk.f32.vlgmr.msra.gmra.mrb[0].mxu0 %vm21554_vm13, %v18786_v43  ;;  %11747 = vperm.xlu1 %14918, %v13864_v17   ;;  %vm5036_vm13 = vcmp.lt.s32.totalorder %v5035_v54, 2  ;;  %v18957_v54 = vld [vmem:[%s21296_s8 + $0x8] sm:$0xff]  ;;  %v7750_v17 = vld [vmem:[%s18678_s22 + $0x50] sm:$0xff] }
 0x353   : > { %7432 = vmatprep.mubr.f32.mxu0 %v21414_v29  ;;  %14047 = vmatpush1.bf16.msra.mxu0 %v18788_v56  ;;  %v5043_v18 = vsel %vm5036_vm13, %v5039_v25, %v5042_v57  ;;  %vm21567_vm13 = vmmov %vm21551_vm1 }
 0x354   : > { %14049 = vmatprep.subr.bf16.mxu0 %v18791_v62  ;;  %v5044_v2 = vsel %vm4204_vm3, nan, %v5043_v18  ;;  %vm21565_vm3 = vmmov %vm21551_vm1 }
 0x355   : > { %v15014_v58 = vpop.eup %15013 }
 0x356   : > { %v15016_v49 = vpop.eup %15015  ;;  %v4628_v52 = vxor.u32 2147483648, %v15014_v58  ;;  %13486 = vmatmul.mubr.msk.f32.gmra.mrb[2].mxu0 %vm21551_vm1, %v18810_v60  ;;  %11869 = vperm.xlu1 %14918, %v13880_v35  }
 0x357   : > { %v4625_v63 = vxor.u32 2147483648, %v15016_v49  ;;  %7438 = vmatprep.mubr.f32.mxu0 %v21414_v29  ;;  %14051 = vmatpush1.bf16.msra.mxu0 %v18813_v15 }
 0x358   : > { %v4629_v40 = vsel %vm4627_vm7, %v4628_v52, %v15016_v49  ;;  %v5454_v61 = vsel %vm5452_vm10, %v4628_v52, %v15016_v49  ;;  %vm21560_vm7 = vmmov %vm21551_vm1  ;;  %v13914_v49 = vld [vmem:[%s21295_s7 + $0x138] sm:$0xff]  ;;  %v18994_v52 = vpack.c.bf16 %v7755_v22, %v7751_v48 }
 0x359   : > { %v4626_v37 = vsel %vm4624_vm6, %v15014_v58, %v4625_v63  ;;  %v5451_v36 = vsel %vm5449_vm14, %v15014_v58, %v4625_v63  ;;  %vm21559_vm6 = vmmov %vm21551_vm1  ;;  %vm7804_vm14 = vcmask 261120   ;;  %v7746_v58 = vld [vmem:[%s18678_s22 + $0x30] sm:$0xff] }
 0x35a   : > { %v4630_v51 = vsel %vm4623_vm5, %v4626_v37, %v4629_v40  ;;  %v5455_v4 = vsel %vm5448_vm12, %v5451_v36, %v5454_v61  ;;  %13487 = vmatmul.mubr.msk.f32.gmra.mrb[4].mxu0 %vm21555_vm8, %v18827_v26  ;;  %vm21558_vm5 = vmmov %vm21551_vm1  ;;  %11757 = vperm.xlu1 %14918, %v13866_v53   ;;  %v18989_v46 = vpack.c.bf16 %v7746_v58, %v7742_v27  ;;  %v7754_v63 = vld [vmem:[%s18678_s22 + $0x70] sm:$0xff]  ;;  %s13134_s22 = sshll.u32 %s18632_s17, 2 }
 0x35b   : > { %v4631_v41 = vsel %vm4620_vm15, nan, %v4630_v51  ;;  %7444 = vmatprep.mubr.f32.mxu0 %v21414_v29  ;;  %v5456_v38 = vsel %vm4620_vm15, nan, %v5455_v4  ;;  %vm21563_vm12 = vmmov %vm21551_vm1  ;;  %v19007_v9 = vpack.c.bf16 %v7754_v63, %v7750_v17  ;;  %v13946_v40 = vld [vmem:[%s21297_s9 + $0x138] sm:$0xff]  ;;  %v7738_v61 = vld [vmem:[%s21296_s8 + $0x30] sm:$0xff]  ;;  %v19070_v4 = vpop.permute.xlu1 %7630  ;;  %s479_s30 = scalar_lea.vmem [#allocation4], %s13134_s22  ;;  %s15025_s22 = sshll.u32 %s15095_s11, 4  ;;  %s15026_s22 = int_to_ptr.vmem [resolvable:$false] %s15025_s22 }
 0x35c   : > { %v18845_v24 = vpack.c.bf16 %v4631_v41, %v4215_v23  ;;  %v18877_v1 = vpack.c.bf16 %v5456_v38, %v5044_v2  ;;  %vm21564_vm10 = vmmov %vm21551_vm1  ;;  %s15027_s0 = scalar_lea.vmem %s15026_s22, 128 }
 0x35d   : > { %vm21566_vm15 = vmmov %vm21551_vm1 }
 0x35e   : > { %14031 = vmatpush1.bf16.msk.msra.mxu1 %vm15742_vm0, %v18845_v24  ;;  %13488 = vmatmul.mubr.msk.f32.gmra.mrb[6].mxu0 %vm21557_vm11, %v18855_v16  ;;  %vm21568_vm8 = vmmov %vm21551_vm1 }
 0x35f   : > { %14040 = vmatprep.subr.msk.bf16.mxu1 %vm15742_vm0, %v18858_v42  ;;  %7450 = vmatprep.mubr.f32.mxu0 %v21414_v29  ;;  %vm21570_vm11 = vmmov %vm21551_vm1  ;;  %v19072_v18 = vpop.permute.xlu1 %7635 }
 0x360   : > { %11879 = vperm.xlu1 %14918, %v13882_v33  }
 0x361   : > { %13467 = vmatmul.mubr.msk.f32.vlgmr.msra.gmra.mrb[0].mxu1 %vm21558_vm5, %v18624_v44  ;;  %v18901_v44 = vld [vmem:[%s21293_s5 + $0xa8] sm:$0xff]  ;;  %vm21571_vm5 = vmmov %vm21551_vm1 }
 0x362   : > { %14043 = vmatpush1.bf16.msk.msra.mxu1 %vm15742_vm0, %v18877_v1  ;;  %7242 = vmatprep.mubr.f32.mxu1 %v21414_v29 }
 0x363   : > { %14053 = vmatprep.subr.bf16.mxu1 %v18873_v39  ;;  %13489 = vmatmul.mubr.msk.f32.gmra.mrb[8].mxu0 %vm21559_vm6, %v18883_v30  ;;  %vm21572_vm6 = vmmov %vm21551_vm1  ;;  %v19080_v38 = vpop.permute.xlu1 %7771 }
 0x364   : > { %7456 = vmatprep.mubr.f32.mxu0 %v21414_v29  ;;  %12189 = vperm.xlu1 %14918, %v13908_v7  }
 0x365   : > { %13468 = vmatmul.mubr.msk.f32.gmra.mrb[2].mxu1 %vm21560_vm7, %v18649_v12  ;;  %v13940_v12 = vld [vmem:[%s21297_s9 + $0x108] sm:$0xff]  ;;  %vm21573_vm7 = vmmov %vm21551_vm1 }
 0x366   : > { %7248 = vmatprep.mubr.f32.mxu1 %v21414_v29 }
 0x367   : > { %13490 = vmatmul.mubr.msk.f32.gmra.mrb[10].mxu0 %vm21561_vm9, %v18901_v44  ;;  %vm21574_vm9 = vmmov %vm21551_vm1 }
 0x368   : > { %7462 = vmatprep.mubr.f32.mxu0 %v21414_v29  ;;  %12529 = vperm.xlu1 %14918, %v13940_v12  }
 0x369   : > { %13469 = vmatmul.mubr.msk.f32.gmra.mrb[4].mxu1 %vm21562_vm2, %v18670_v21  ;;  %v13910_v21 = vld [vmem:[%s21295_s7 + $0x118] sm:$0xff]  ;;  %vm21575_vm2 = vmmov %vm21551_vm1 }
 0x36a   : > { %7254 = vmatprep.mubr.f32.mxu1 %v21414_v29 }
 0x36b   : > { %13491 = vmatmul.mubr.msk.f32.gmra.mrb[12].mxu0 %vm21563_vm12, %v18915_v8  ;;  %vm21576_vm12 = vmmov %vm21551_vm1 }
 0x36c   : > { %7468 = vmatprep.mubr.f32.mxu0 %v21414_v29  ;;  %12199 = vperm.xlu1 %14918, %v13910_v21  }
 0x36d   : > { %13470 = vmatmul.mubr.msk.f32.gmra.mrb[6].mxu1 %vm21564_vm10, %v18696_v59  ;;  %v13942_v59 = vld [vmem:[%s21297_s9 + $0x118] sm:$0xff]  ;;  %vm8144_vm10 = vcmask 523264  }
 0x36e   : > { %7260 = vmatprep.mubr.f32.mxu1 %v21414_v29 }
 0x36f   : > { %13492 = vmatmul.mubr.msk.f32.gmra.mrb[14].mxu0 %vm21551_vm1, %v18929_v50  ;;  %vm21580_vm1 = vcmask 1042432  }
 0x370   : > { %7893 = vmatprep.mubr.f32.mxu0 %v21414_v29  ;;  %12539 = vperm.xlu1 %14918, %v13942_v59  }
 0x371   : > { %13471 = vmatmul.mubr.msk.f32.gmra.mrb[8].mxu1 %vm21565_vm3, %v18723_v5  ;;  %v13912_v5 = vld [vmem:[%s21295_s7 + $0x128] sm:$0xff]  ;;  %vm21582_vm3 = vmmov %vm21575_vm2 }
 0x372   : > { %7266 = vmatprep.mubr.f32.mxu1 %v21414_v29 }
 0x373   : > { %13503 = vmatmul.mubr.msk.f32.vlgmr.msra.gmra.mrb[16].mxu0 %vm7804_vm14, %v18943_v11 }
 0x374   : > { %7899 = vmatprep.mubr.f32.mxu0 %v21414_v29  ;;  %12209 = vperm.xlu1 %14918, %v13912_v5  }
 0x375   : > { %13472 = vmatmul.mubr.msk.f32.gmra.mrb[10].mxu1 %vm21566_vm15, %v18736_v13  ;;  %v13944_v13 = vld [vmem:[%s21297_s9 + $0x128] sm:$0xff]  ;;  %vm21583_vm15 = vmmov %vm21580_vm1 }
 0x376   : > { %7272 = vmatprep.mubr.f32.mxu1 %v21414_v29 }
 0x377   : > { %13504 = vmatmul.mubr.msk.f32.gmra.mrb[18].mxu0 %vm7804_vm14, %v18957_v54 }
 0x378   : > { %7905 = vmatprep.mubr.f32.mxu0 %v21414_v29  ;;  %12549 = vperm.xlu1 %14918, %v13944_v13  }
 0x379   : > { %13473 = vmatmul.mubr.msk.f32.gmra.mrb[12].mxu1 %vm21567_vm13, %v18754_v6  ;;  %v7735_v6 = vld [vmem:[%s21296_s8 + $0x18] sm:$0xff]  ;;  %vm21585_vm13 = vmmov %vm21575_vm2 }
 0x37a   : > { %7278 = vmatprep.mubr.f32.mxu1 %v21414_v29 }
 0x37b   : > { %13505 = vmatmul.mubr.msk.f32.gmra.mrb[20].mxu0 %vm7804_vm14, %v7734_v3 }
 0x37c   : > { %7911 = vmatprep.mubr.f32.mxu0 %v21414_v29  ;;  %12219 = vperm.xlu1 %14918, %v13914_v49  }
 0x37d   : > { %13474 = vmatmul.mubr.msk.f32.gmra.mrb[14].mxu1 %vm21568_vm8, %v18769_v19  ;;  %v7736_v19 = vld [vmem:[%s21296_s8 + $0x20] sm:$0xff]  ;;  %vm21586_vm8 = vmmov %vm21575_vm2 }
 0x37e   : > { %7539 = vmatprep.mubr.f32.mxu1 %v21414_v29 }
 0x37f   : > { %13506 = vmatmul.mubr.msk.f32.gmra.mrb[22].mxu0 %vm7804_vm14, %v7735_v6 }
 0x380   : > { %7917 = vmatprep.mubr.f32.mxu0 %v21414_v29  ;;  %12559 = vperm.xlu1 %14918, %v13946_v40  }
 0x381   : > { %13495 = vmatmul.mubr.msk.f32.vlgmr.msra.gmra.mrb[0].mxu1 %vm21569_vm4, %v18786_v43  ;;  %v7737_v43 = vld [vmem:[%s21296_s8 + $0x28] sm:$0xff]  ;;  %vm21587_vm4 = vmmov %vm21575_vm2 }
 0x382   : > { %7545 = vmatprep.mubr.f32.mxu1 %v21414_v29  ;;  %14055 = vmatpush1.bf16.msra.mxu1 %v18989_v46 }
 0x383   : > { %14057 = vmatprep.subr.bf16.mxu1 %v18994_v52  ;;  %13507 = vmatmul.mubr.msk.f32.gmra.mrb[24].mxu0 %vm7804_vm14, %v7736_v19 }
 0x384   : > { %7923 = vmatprep.mubr.f32.mxu0 %v21414_v29 }
 0x385   : > { %13496 = vmatmul.mubr.msk.f32.gmra.mrb[2].mxu1 %vm21570_vm11, %v18810_v60  ;;  %v7739_v60 = vld [vmem:[%s21296_s8 + $0x38] sm:$0xff]  ;;  %vm21590_vm11 = vmmov %vm21580_vm1 }
 0x386   : > { %7551 = vmatprep.mubr.f32.mxu1 %v21414_v29  ;;  %14059 = vmatpush1.bf16.msra.mxu1 %v19007_v9 }
 0x387   : > { %13508 = vmatmul.mubr.msk.f32.gmra.mrb[26].mxu0 %vm7804_vm14, %v7737_v43 }
 0x388   : > { %7929 = vmatprep.mubr.f32.mxu0 %v21414_v29 }
 0x389   : > { %13497 = vmatmul.mubr.msk.f32.gmra.mrb[4].mxu1 %vm21571_vm5, %v18827_v26  ;;  %vm21591_vm5 = vmmov %vm21575_vm2 }
 0x38a   : > { %7557 = vmatprep.mubr.f32.mxu1 %v21414_v29 }
 0x38b   : > { %13509 = vmatmul.mubr.msk.f32.gmra.mrb[28].mxu0 %vm7804_vm14, %v7738_v61 }
 0x38c   : > { %7935 = vmatprep.mubr.f32.mxu0 %v21414_v29 }
 0x38d   : > { %13498 = vmatmul.mubr.msk.f32.gmra.mrb[6].mxu1 %vm21572_vm6, %v18855_v16  ;;  %vm21592_vm6 = vmmov %vm21575_vm2 }
 0x38e   : > { %7563 = vmatprep.mubr.f32.mxu1 %v21414_v29 }
 0x38f   : > { %13510 = vmatmul.mubr.msk.f32.gmra.mrb[30].mxu0 %vm7804_vm14, %v7739_v60 }
 0x390   : > { %8233 = vmatprep.mubr.f32.mxu0 %v21414_v29 }
 0x391   : > { %13499 = vmatmul.mubr.msk.f32.gmra.mrb[8].mxu1 %vm21573_vm7, %v18883_v30  ;;  %v19086_v30 = vpop.permute.xlu0 %7640  ;;  %vm21593_vm7 = vmmov %vm21575_vm2 }
 0x392   : > { %7569 = vmatprep.mubr.f32.mxu1 %v21414_v29 }
 0x395   : > { %13500 = vmatmul.mubr.msk.f32.gmra.mrb[10].mxu1 %vm21574_vm9, %v18901_v44  ;;  %vm21594_vm9 = vmmov %vm21575_vm2 }
 0x396   : > { %7575 = vmatprep.mubr.f32.mxu1 %v21414_v29 }
 0x399   : > { %13501 = vmatmul.mubr.msk.f32.gmra.mrb[12].mxu1 %vm21575_vm2, %v18915_v8  ;;  %v19093_v8 = vpop.permute.xlu1 %7645  ;;  %vm21595_vm2 = vcmask 23552  }
 0x39a   : > { %7581 = vmatprep.mubr.f32.mxu1 %v21414_v29 }
 0x39d   : > { %13502 = vmatmul.mubr.msk.f32.gmra.mrb[14].mxu1 %vm21576_vm12, %v18929_v50  ;;  %v19096_v50 = vpop.permute.xlu0 %7776  ;;  %v19102_v48 = vpop.permute.xlu1 %7781  ;;  %vm21598_vm12 = vmmov %vm21595_vm2 }
 0x39e   : > { %8006 = vmatprep.mubr.f32.mxu1 %v21414_v29 }
 0x3a1   : > { %13511 = vmatmul.mubr.msk.f32.vlgmr.msra.gmra.mrb[16].mxu1 %vm7804_vm14, %v18943_v11  ;;  %v19106_v40 = vpop.permute.xlu0 %7650 }
 0x3a2   : > { %8012 = vmatprep.mubr.f32.mxu1 %v21414_v29 }
 0x3a5   : > { %13512 = vmatmul.mubr.msk.f32.gmra.mrb[18].mxu1 %vm7804_vm14, %v18957_v54 }
 0x3a6   : > { %8018 = vmatprep.mubr.f32.mxu1 %v21414_v29 }
 0x3a9   : > { %13513 = vmatmul.mubr.msk.f32.gmra.mrb[20].mxu1 %vm7804_vm14, %v7734_v3 }
 0x3aa   : > { %8024 = vmatprep.mubr.f32.mxu1 %v21414_v29 }
 0x3ad   : > { %13514 = vmatmul.mubr.msk.f32.gmra.mrb[22].mxu1 %vm7804_vm14, %v7735_v6 }
 0x3ae   : > { %8030 = vmatprep.mubr.f32.mxu1 %v21414_v29 }
 0x3b1   : > { %13515 = vmatmul.mubr.msk.f32.gmra.mrb[24].mxu1 %vm7804_vm14, %v7736_v19 }
 0x3b2   : > { %8036 = vmatprep.mubr.f32.mxu1 %v21414_v29 }
 0x3b5   : > { %13516 = vmatmul.mubr.msk.f32.gmra.mrb[26].mxu1 %vm7804_vm14, %v7737_v43 }
 0x3b6   : > { %8042 = vmatprep.mubr.f32.mxu1 %v21414_v29 }
 0x3b9   : > { %13517 = vmatmul.mubr.msk.f32.gmra.mrb[28].mxu1 %vm7804_vm14, %v7738_v61 }
 0x3ba   : > { %8048 = vmatprep.mubr.f32.mxu1 %v21414_v29 }
 0x3bd   : > { %13518 = vmatmul.mubr.msk.f32.gmra.mrb[30].mxu1 %vm7804_vm14, %v7739_v60 }
 0x3be   : > { %8346 = vmatprep.mubr.f32.mxu1 %v21414_v29 }
 0x425   : > { %v7428_v26 = vpop.f32.mrb[0].mxu0 }
 0x426   : > { %v7430_v37 = vpop.f32.mrb[1].mxu0  ;;  %v7668_v44 = vadd.f32 %v19070_v4, %v7428_v26 }
 0x427   : > { %v7669_v12 = vadd.f32 %v19070_v4, %v7430_v37 }
 0x428   : > { %v7700_v11 = vmax.f32 %v7668_v44, 0.0 }
 0x429   : > { %v7434_v25 = vpop.f32.mrb[2].mxu0  ;;  %v7701_v3 = vmax.f32 %v7669_v12, 0.0 }
 0x42a   : > { %v7436_v57 = vpop.f32.mrb[3].mxu0  ;;  %v7672_v59 = vadd.f32 %v19072_v18, %v7434_v25 }
 0x42b   : > { %v7673_v13 = vadd.f32 %v19072_v18, %v7436_v57 }
 0x42c   : > { %v7704_v49 = vmax.f32 %v7672_v59, 0.0 }
 0x42d   : > { %v7440_v36 = vpop.f32.mrb[4].mxu0  ;;  %v7705_v43 = vmax.f32 %v7673_v13, 0.0  ;;  %v19116_v13 = vpop.permute.xlu0 %7786 }
 0x42e   : > { %v7442_v51 = vpop.f32.mrb[5].mxu0  ;;  %v7676_v17 = vadd.f32 %v19086_v30, %v7440_v36 }
 0x42f   : > { %v7677_v61 = vadd.f32 %v19086_v30, %v7442_v51 }
 0x430   : > { %v7708_v57 = vmax.f32 %v7676_v17, 0.0 }
 0x431   : > { %v7446_v35 = vpop.f32.mrb[6].mxu0  ;;  %v7709_v59 = vmax.f32 %v7677_v61, 0.0 }
 0x432   : > { %v7448_v23 = vpop.f32.mrb[7].mxu0  ;;  %v7680_v44 = vadd.f32 %v19093_v8, %v7446_v35 }
 0x436   : > { %v7452_v41 = vpop.f32.mrb[8].mxu0 }
 0x437   : > { %v7454_v45 = vpop.f32.mrb[9].mxu0  ;;  %v7684_v35 = vadd.f32 %v19106_v40, %v7452_v41 }
 0x43a   : > { %v19076_v55 = vpop.f32.mrb[10].mxu0 }
 0x43b   : > { %v19078_v16 = vpop.f32.mrb[11].mxu0 }
 0x43e   : > { %v19082_v53 = vpop.f32.mrb[12].mxu0 }
 0x43f   : > { %v19084_v2 = vpop.f32.mrb[13].mxu0 }
 0x442   : > { %v19088_v33 = vpop.f32.mrb[14].mxu0 }
 0x443   : > { %v19091_v7 = vpop.f32.mrb[15].mxu0 }
 0x446   : > { %v7895_v21 = vpop.f32.mrb[16].mxu0 }
 0x447   : > { %v7896_v54 = vadd.f32 %v7895_v21, %v19074_v14  ;;  %v7897_v5 = vpop.f32.mrb[17].mxu0 }
 0x448   : > { %v7898_v27 = vadd.f32 %v7897_v5, %v19074_v14 }
 0x449   : > { %v8055_v58 = vadd.f32 %v7896_v54, %v7700_v11  ;;  %v19112_v11 = vpop.permute.xlu1 %7655  ;;  %v7681_v54 = vadd.f32 %v19093_v8, %v7448_v23  ;;  %v7685_v23 = vadd.f32 %v19106_v40, %v7454_v45 }
 0x44a   : > { %v8056_v22 = vadd.f32 %v7898_v27, %v7701_v3  ;;  %v7901_v6 = vpop.f32.mrb[18].mxu0  ;;  %v7688_v41 = vadd.f32 %v19112_v11, %v19076_v55 }
 0x44b   : > { %v7902_v63 = vadd.f32 %v7901_v6, %v19080_v38  ;;  %v7903_v19 = vpop.f32.mrb[19].mxu0 }
 0x44c   : > { %v7904_v60 = vadd.f32 %v7903_v19, %v19080_v38  ;;  %v7713_v19 = vmax.f32 %v7681_v54, 0.0 }
 0x44d   : > { %v8059_v26 = vadd.f32 %v7902_v63, %v7704_v49  ;;  %v7712_v49 = vmax.f32 %v7680_v44, 0.0 }
 0x44e   : > { %v8060_v37 = vadd.f32 %v7904_v60, %v7705_v43  ;;  %v7907_v25 = vpop.f32.mrb[20].mxu0  ;;  %v19126_v60 = vpop.permute.xlu1 %7791 }
 0x44f   : > { %v14062_v12 = vpack.c.bf16 %v8059_v26, %v8055_v58  ;;  %v7908_v21 = vadd.f32 %v7907_v25, %v19096_v50  ;;  %v7909_v36 = vpop.f32.mrb[21].mxu0  ;;  %v7716_v25 = vmax.f32 %v7684_v35, 0.0 }
 0x450   : > { %v7910_v5 = vadd.f32 %v7909_v36, %v19096_v50  ;;  %v14060_v51 = vpack.c.bf16 %v8060_v37, %v8056_v22  ;;  %v7717_v36 = vmax.f32 %v7685_v23, 0.0 }
 0x451   : > { %v8063_v3 = vadd.f32 %v7908_v21, %v7708_v57  ;;  %v19131_v21 = vpop.permute.xlu0 %7660 }
 0x452   : > { %v8064_v27 = vadd.f32 %v7910_v5, %v7709_v59  ;;  %v7913_v6 = vpop.f32.mrb[22].mxu0  ;;  %14061 = vmatprep.subr.bf16.mxu0 %v14060_v51  ;;  %v7689_v59 = vadd.f32 %v19112_v11, %v19078_v16  ;;  %v7692_v35 = vadd.f32 %v19131_v21, %v19082_v53 }
 0x453   : > { %v7914_v58 = vadd.f32 %v7913_v6, %v19102_v48  ;;  %v7915_v17 = vpop.f32.mrb[23].mxu0  ;;  %14063 = vmatpush1.bf16.msra.mxu0 %v14062_v12 }
 0x454   : > { %v19120_v63 = vpop.f32.mrb[0].mxu1  ;;  %v7916_v22 = vadd.f32 %v7915_v17, %v19102_v48  ;;  %v7721_v23 = vmax.f32 %v7689_v59, 0.0 }
 0x455   : > { %v19124_v43 = vpop.f32.mrb[1].mxu1  ;;  %v8067_v61 = vadd.f32 %v7914_v58, %v7712_v49 }
 0x456   : > { %v8068_v26 = vadd.f32 %v7916_v22, %v7713_v19  ;;  %v7919_v37 = vpop.f32.mrb[24].mxu0  ;;  %v19143_v19 = vpop.permute.xlu1 %7665 }
 0x457   : > { %v14066_v57 = vpack.c.bf16 %v8067_v61, %v8063_v3  ;;  %v7920_v44 = vadd.f32 %v7919_v37, %v19116_v13  ;;  %v7921_v12 = vpop.f32.mrb[25].mxu0  ;;  %v7720_v3 = vmax.f32 %v7688_v41, 0.0  ;;  %v19152_v37 = vpop.permute.xlu0 %7796  ;;  %v7724_v41 = vmax.f32 %v7692_v35, 0.0 }
 0x458   : > { %v19133_v45 = vpop.f32.mrb[2].mxu1  ;;  %v7922_v54 = vadd.f32 %v7921_v12, %v19116_v13  ;;  %v14064_v5 = vpack.c.bf16 %v8068_v26, %v8064_v27  ;;  %v7693_v27 = vadd.f32 %v19131_v21, %v19084_v2 }
 0x459   : > { %v19138_v51 = vpop.f32.mrb[3].mxu1  ;;  %v8071_v6 = vadd.f32 %v7920_v44, %v7716_v25 }
 0x45a   : > { %v8072_v49 = vadd.f32 %v7922_v54, %v7717_v36  ;;  %v7925_v55 = vpop.f32.mrb[26].mxu0  ;;  %14065 = vmatprep.subr.bf16.mxu0 %v14064_v5  ;;  %v7725_v2 = vmax.f32 %v7693_v27, 0.0  ;;  %v7697_v54 = vadd.f32 %v19143_v19, %v19091_v7  ;;  %v19164_v35 = vpop.permute.xlu1 %7801 }
 0x45b   : > { %v7926_v58 = vadd.f32 %v7925_v55, %v19126_v60  ;;  %v7927_v17 = vpop.f32.mrb[27].mxu0  ;;  %14067 = vmatpush1.bf16.msra.mxu0 %v14066_v57  ;;  %v7696_v57 = vadd.f32 %v19143_v19, %v19088_v33 }
 0x45c   : > { %v19145_v16 = vpop.f32.mrb[4].mxu1  ;;  %v7928_v22 = vadd.f32 %v7927_v17, %v19126_v60 }
 0x45d   : > { %v19150_v61 = vpop.f32.mrb[5].mxu1  ;;  %v8075_v26 = vadd.f32 %v7926_v58, %v7720_v3 }
 0x45e   : > { %v8076_v53 = vadd.f32 %v7928_v22, %v7721_v23  ;;  %v7931_v25 = vpop.f32.mrb[28].mxu0 }
 0x45f   : > { %v14070_v44 = vpack.c.bf16 %v8075_v26, %v8071_v6  ;;  %v7932_v12 = vadd.f32 %v7931_v25, %v19152_v37  ;;  %v7933_v36 = vpop.f32.mrb[29].mxu0  ;;  %v7728_v6 = vmax.f32 %v7696_v57, 0.0  ;;  %v7729_v26 = vmax.f32 %v7697_v54, 0.0  ;;  %v19179_v57 = vld [vmem:[%s21294_s6] sm:$0xff] }
 0x460   : > { %v19157_v59 = vpop.f32.mrb[6].mxu1  ;;  %v7934_v5 = vadd.f32 %v7933_v36, %v19152_v37  ;;  %v14068_v55 = vpack.c.bf16 %v8076_v53, %v8072_v49 }
 0x461   : > { %v19162_v3 = vpop.f32.mrb[7].mxu1  ;;  %v8079_v58 = vadd.f32 %v7932_v12, %v7724_v41 }
 0x462   : > { %v8080_v17 = vadd.f32 %v7934_v5, %v7725_v2  ;;  %v7937_v33 = vpop.f32.mrb[30].mxu0  ;;  %14069 = vmatprep.subr.bf16.mxu0 %v14068_v55  ;;  %v19192_v5 = vld [vmem:[%s21294_s6 + $0x8] sm:$0xff] }
 0x463   : > { %v7938_v23 = vadd.f32 %v7937_v33, %v19164_v35  ;;  %v7939_v22 = vpop.f32.mrb[31].mxu0  ;;  %14071 = vmatpush1.bf16.msra.mxu0 %v14070_v44  ;;  %v7671_v33 = vadd.f32 %v19070_v4, %v19124_v43 }
 0x464   : > { %v19167_v27 = vpop.f32.mrb[8].mxu1  ;;  %v7940_v7 = vadd.f32 %v7939_v22, %v19164_v35 }
 0x465   : > { %v19170_v25 = vpop.f32.mrb[9].mxu1  ;;  %v8083_v49 = vadd.f32 %v7938_v23, %v7728_v6  ;;  %v19210_v6 = vld [vmem:[%s21294_s6 + $0x10] sm:$0xff]  ;;  %v7703_v43 = vmax.f32 %v7671_v33, 0.0  ;;  %v7678_v33 = vadd.f32 %v19086_v30, %v19145_v16 }
 0x466   : > { %v8084_v53 = vadd.f32 %v7940_v7, %v7729_v26  ;;  %v7675_v7 = vadd.f32 %v19072_v18, %v19138_v51 }
 0x467   : > { %v14074_v41 = vpack.c.bf16 %v8083_v49, %v8079_v58  ;;  %v7670_v58 = vadd.f32 %v19070_v4, %v19120_v63  ;;  %v7674_v63 = vadd.f32 %v19072_v18, %v19133_v45 }
 0x468   : > { %v19172_v12 = vpop.f32.mrb[10].mxu1  ;;  %v14072_v36 = vpack.c.bf16 %v8084_v53, %v8080_v17  ;;  %v7707_v51 = vmax.f32 %v7675_v7, 0.0  ;;  %v7682_v7 = vadd.f32 %v19093_v8, %v19157_v59  ;;  %v19253_v59 = vld [vmem:[%s21294_s6 + $0x28] sm:$0xff] }
 0x469   : > { %v19174_v2 = vpop.f32.mrb[11].mxu1  ;;  %v7702_v22 = vmax.f32 %v7670_v58, 0.0  ;;  %v7706_v58 = vmax.f32 %v7674_v63, 0.0  ;;  %v19239_v63 = vld [vmem:[%s21294_s6 + $0x20] sm:$0xff] }
 0x46a   : > { %14073 = vmatprep.subr.bf16.mxu0 %v14072_v36 }
 0x46b   : > { %14075 = vmatpush1.bf16.msra.mxu0 %v14074_v41  ;;  %v19225_v41 = vld [vmem:[%s21294_s6 + $0x18] sm:$0xff] }
 0x46c   : > { %v19181_v44 = vpop.f32.mrb[12].mxu1  ;;  %14093 = vmatprep.subr.bf16.mxu0 %v18699_v32 }
 0x46d   : > { %v19184_v54 = vpop.f32.mrb[13].mxu1 }
 0x46e   : > { %13527 = vmatmul.mubr.msk.f32.vlgmr.msra.gmra.mrb[32].mxu0 %vm8144_vm10, %v19179_v57 }
 0x46f   : > { %8239 = vmatprep.mubr.f32.mxu0 %v21414_v29  ;;  %14095 = vmatpush1.bf16.msra.mxu0 %v18788_v56 }
 0x470   : > { %v19195_v55 = vpop.f32.mrb[14].mxu1  ;;  %14097 = vmatprep.subr.bf16.mxu0 %v18791_v62 }
 0x471   : > { %v19200_v17 = vpop.f32.mrb[15].mxu1 }
 0x472   : > { %13528 = vmatmul.mubr.msk.f32.gmra.mrb[34].mxu0 %vm8144_vm10, %v19192_v5 }
 0x473   : > { %8245 = vmatprep.mubr.f32.mxu0 %v21414_v29  ;;  %14099 = vmatpush1.bf16.msra.mxu0 %v18813_v15 }
 0x474   : > { %v8008_v23 = vpop.f32.mrb[16].mxu1 }
 0x475   : > { %v8009_v26 = vadd.f32 %v8008_v23, %v19074_v14  ;;  %v8010_v4 = vpop.f32.mrb[17].mxu1  ;;  %v7679_v23 = vadd.f32 %v19086_v30, %v19150_v61 }
 0x476   : > { %v8011_v49 = vadd.f32 %v8010_v4, %v19074_v14  ;;  %13529 = vmatmul.mubr.msk.f32.gmra.mrb[36].mxu0 %vm8144_vm10, %v19210_v6 }
 0x477   : > { %v8057_v53 = vadd.f32 %v8009_v26, %v7702_v22  ;;  %8251 = vmatprep.mubr.f32.mxu0 %v21414_v29 }
 0x478   : > { %v8058_v45 = vadd.f32 %v8011_v49, %v7703_v43  ;;  %v8014_v36 = vpop.f32.mrb[18].mxu1  ;;  %v7710_v43 = vmax.f32 %v7678_v33, 0.0  ;;  %v7711_v49 = vmax.f32 %v7679_v23, 0.0  ;;  %v7687_v23 = vadd.f32 %v19106_v40, %v19170_v25 }
 0x479   : > { %v8015_v18 = vadd.f32 %v8014_v36, %v19080_v38  ;;  %v8016_v14 = vpop.f32.mrb[19].mxu1  ;;  %v7683_v36 = vadd.f32 %v19093_v8, %v19162_v3  ;;  %v7686_v8 = vadd.f32 %v19106_v40, %v19167_v27  ;;  %v19267_v27 = vld [vmem:[%s21294_s6 + $0x30] sm:$0xff] }
 0x47a   : > { %v8017_v22 = vadd.f32 %v8016_v14, %v19080_v38  ;;  %13530 = vmatmul.mubr.msk.f32.gmra.mrb[38].mxu0 %vm8144_vm10, %v19225_v41 }
 0x47b   : > { %v8061_v26 = vadd.f32 %v8015_v18, %v7706_v58  ;;  %8257 = vmatprep.mubr.f32.mxu0 %v21414_v29 }
 0x47c   : > { %v8062_v16 = vadd.f32 %v8017_v22, %v7707_v51  ;;  %v8020_v4 = vpop.f32.mrb[20].mxu1  ;;  %v7714_v51 = vmax.f32 %v7682_v7, 0.0  ;;  %v7690_v7 = vadd.f32 %v19112_v11, %v19172_v12  ;;  %v19281_v12 = vld [vmem:[%s21294_s6 + $0x38] sm:$0xff] }
 0x47d   : > { %v14078_v30 = vpack.c.bf16 %v8061_v26, %v8057_v53  ;;  %v8021_v38 = vadd.f32 %v8020_v4, %v19096_v50  ;;  %v8022_v61 = vpop.f32.mrb[21].mxu1 }
 0x47e   : > { %v8023_v58 = vadd.f32 %v8022_v61, %v19096_v50  ;;  %v14076_v18 = vpack.c.bf16 %v8062_v16, %v8058_v45  ;;  %13531 = vmatmul.mubr.msk.f32.gmra.mrb[40].mxu0 %vm8144_vm10, %v19239_v63  ;;  %v7715_v45 = vmax.f32 %v7683_v36, 0.0 }
 0x47f   : > { %v8065_v14 = vadd.f32 %v8021_v38, %v7710_v43  ;;  %8263 = vmatprep.mubr.f32.mxu0 %v21414_v29  ;;  %v7718_v43 = vmax.f32 %v7686_v8, 0.0  ;;  %v7691_v38 = vadd.f32 %v19112_v11, %v19174_v2  ;;  %v7694_v11 = vadd.f32 %v19131_v21, %v19181_v44  ;;  %v19295_v44 = vld [vmem:[%s21296_s8 + $0x40] sm:$0xff] }
 0x480   : > { %v8066_v53 = vadd.f32 %v8023_v58, %v7711_v49  ;;  %v8026_v33 = vpop.f32.mrb[22].mxu1  ;;  %14077 = vmatprep.subr.bf16.mxu1 %v14076_v18 }
 0x481   : > { %v8027_v50 = vadd.f32 %v8026_v33, %v19102_v48  ;;  %v8028_v3 = vpop.f32.mrb[23].mxu1  ;;  %14079 = vmatpush1.bf16.msra.mxu1 %v14078_v30  ;;  %v7719_v30 = vmax.f32 %v7687_v23, 0.0  ;;  %v7695_v33 = vadd.f32 %v19131_v21, %v19184_v54  ;;  %v7698_v23 = vadd.f32 %v19143_v19, %v19195_v55  ;;  %v13544_v55 = vld [vmem:[%s21296_s8 + $0x48] sm:$0xff] }
 0x482   : > { %v8029_v22 = vadd.f32 %v8028_v3, %v19102_v48  ;;  %13532 = vmatmul.mubr.msk.f32.gmra.mrb[42].mxu0 %vm8144_vm10, %v19253_v59 }
 0x483   : > { %v8069_v26 = vadd.f32 %v8027_v50, %v7714_v51  ;;  %8269 = vmatprep.mubr.f32.mxu0 %v21414_v29 }
 0x484   : > { %v8070_v16 = vadd.f32 %v8029_v22, %v7715_v45  ;;  %v8032_v4 = vpop.f32.mrb[24].mxu1  ;;  %v7726_v45 = vmax.f32 %v7694_v11, 0.0  ;;  %v7727_v22 = vmax.f32 %v7695_v33, 0.0  ;;  %v19390_v33 = vpop.permute.xlu1 %8111 }
 0x485   : > { %v14082_v40 = vpack.c.bf16 %v8069_v26, %v8065_v14  ;;  %v8033_v48 = vadd.f32 %v8032_v4, %v19116_v13  ;;  %v8034_v25 = vpop.f32.mrb[25].mxu1  ;;  %v7722_v14 = vmax.f32 %v7690_v7, 0.0  ;;  %v7699_v26 = vadd.f32 %v19143_v19, %v19200_v17 }
 0x486   : > { %v8035_v61 = vadd.f32 %v8034_v25, %v19116_v13  ;;  %v14080_v49 = vpack.c.bf16 %v8070_v16, %v8066_v53  ;;  %13533 = vmatmul.mubr.msk.f32.gmra.mrb[44].mxu0 %vm8144_vm10, %v19267_v27  ;;  %v7723_v53 = vmax.f32 %v7691_v38, 0.0  ;;  %v13545_v38 = vld [vmem:[%s21296_s8 + $0x50] sm:$0xff] }
 0x487   : > { %v8073_v36 = vadd.f32 %v8033_v48, %v7718_v43  ;;  %8275 = vmatprep.mubr.f32.mxu0 %v21414_v29  ;;  %v7730_v48 = vmax.f32 %v7698_v23, 0.0 }
 0x488   : > { %v8074_v58 = vadd.f32 %v8035_v61, %v7719_v30  ;;  %v8038_v18 = vpop.f32.mrb[26].mxu1  ;;  %14081 = vmatprep.subr.bf16.mxu1 %v14080_v49 }
 0x489   : > { %v8039_v13 = vadd.f32 %v8038_v18, %v19126_v60  ;;  %v8040_v2 = vpop.f32.mrb[27].mxu1  ;;  %14083 = vmatpush1.bf16.msra.mxu1 %v14082_v40  ;;  %v13548_v18 = vld [vmem:[%s21296_s8 + $0x68] sm:$0xff] }
 0x48a   : > { %v8041_v51 = vadd.f32 %v8040_v2, %v19126_v60  ;;  %13534 = vmatmul.mubr.msk.f32.gmra.mrb[46].mxu0 %vm8144_vm10, %v19281_v12 }
 0x48b   : > { %v8077_v8 = vadd.f32 %v8039_v13, %v7722_v14  ;;  %8573 = vmatprep.mubr.f32.mxu0 %v21414_v29  ;;  %v19388_v13 = vpop.permute.xlu0 %8106 }
 0x48c   : > { %v8078_v50 = vadd.f32 %v8041_v51, %v7723_v53  ;;  %v8044_v3 = vpop.f32.mrb[28].mxu1 }
 0x48d   : > { %v14086_v21 = vpack.c.bf16 %v8077_v8, %v8073_v36  ;;  %v8045_v60 = vadd.f32 %v8044_v3, %v19152_v37  ;;  %v8046_v54 = vpop.f32.mrb[29].mxu1 }
 0x48e   : > { %v8047_v16 = vadd.f32 %v8046_v54, %v19152_v37  ;;  %v14084_v4 = vpack.c.bf16 %v8078_v50, %v8074_v58  ;;  %13559 = vmatmul.mubr.msk.f32.vlgmr.msra.gmra.mrb[48].mxu0 %vm7804_vm14, %v19295_v44  ;;  %v7731_v37 = vmax.f32 %v7699_v26, 0.0  ;;  %v13547_v58 = vld [vmem:[%s21296_s8 + $0x60] sm:$0xff]  ;;  %v19398_v50 = vpop.permute.xlu1 %8452 }
 0x48f   : > { %v8081_v43 = vadd.f32 %v8045_v60, %v7726_v45  ;;  %8579 = vmatprep.mubr.f32.mxu0 %v21414_v29  ;;  %v19392_v51 = vpop.permute.xlu0 %8447 }
 0x490   : > { %v8082_v7 = vadd.f32 %v8047_v16, %v7727_v22  ;;  %v8050_v40 = vpop.f32.mrb[30].mxu1  ;;  %14085 = vmatprep.subr.bf16.mxu1 %v14084_v4 }
 0x491   : > { %v8051_v25 = vadd.f32 %v8050_v40, %v19164_v35  ;;  %v8052_v19 = vpop.f32.mrb[31].mxu1  ;;  %14087 = vmatpush1.bf16.msra.mxu1 %v14086_v21 }
 0x492   : > { %v8053_v17 = vadd.f32 %v8052_v19, %v19164_v35  ;;  %13560 = vmatmul.mubr.msk.f32.gmra.mrb[50].mxu0 %vm7804_vm14, %v13544_v55  ;;  %v13546_v35 = vld [vmem:[%s21296_s8 + $0x58] sm:$0xff]  ;;  %v19411_v22 = vpop.permute.xlu1 %8121 }
 0x493   : > { %v8085_v30 = vadd.f32 %v8051_v25, %v7730_v48  ;;  %8585 = vmatprep.mubr.f32.mxu0 %v21414_v29  ;;  %v19404_v23 = vpop.permute.xlu0 %8116 }
 0x494   : > { %v8086_v61 = vadd.f32 %v8053_v17, %v7731_v37 }
 0x495   : > { %v14090_v49 = vpack.c.bf16 %v8085_v30, %v8081_v43 }
 0x496   : > { %v14088_v36 = vpack.c.bf16 %v8086_v61, %v8082_v7  ;;  %13561 = vmatmul.mubr.msk.f32.gmra.mrb[52].mxu0 %vm7804_vm14, %v13545_v38  ;;  %v19420_v17 = vpop.permute.xlu1 %8462 }
 0x497   : > { %8591 = vmatprep.mubr.f32.mxu0 %v21414_v29  ;;  %v19414_v16 = vpop.permute.xlu0 %8457 }
 0x498   : > { %14089 = vmatprep.subr.bf16.mxu1 %v14088_v36 }
 0x499   : > { %14091 = vmatpush1.bf16.msra.mxu1 %v14090_v49 }
 0x49a   : > { %14101 = vmatprep.subr.bf16.mxu1 %v18873_v39  ;;  %13562 = vmatmul.mubr.msk.f32.gmra.mrb[54].mxu0 %vm7804_vm14, %v13546_v35 }
 0x49b   : > { %8597 = vmatprep.mubr.f32.mxu0 %v21414_v29 }
 0x49c   : > { %13535 = vmatmul.mubr.msk.f32.vlgmr.msra.gmra.mrb[32].mxu1 %vm8144_vm10, %v19179_v57  ;;  %v13549_v57 = vld [vmem:[%s21296_s8 + $0x70] sm:$0xff] }
 0x49d   : > { %8352 = vmatprep.mubr.f32.mxu1 %v21414_v29  ;;  %14103 = vmatpush1.bf16.msra.mxu1 %v18989_v46 }
 0x49e   : > { %14105 = vmatprep.subr.bf16.mxu1 %v18994_v52  ;;  %13563 = vmatmul.mubr.msk.f32.gmra.mrb[56].mxu0 %vm7804_vm14, %v13547_v58 }
 0x49f   : > { %8603 = vmatprep.mubr.f32.mxu0 %v21414_v29 }
 0x4a0   : > { %13536 = vmatmul.mubr.msk.f32.gmra.mrb[34].mxu1 %vm8144_vm10, %v19192_v5  ;;  %v13550_v5 = vld [vmem:[%s21296_s8 + $0x78] sm:$0xff] }
 0x4a1   : > { %8358 = vmatprep.mubr.f32.mxu1 %v21414_v29  ;;  %14107 = vmatpush1.bf16.msra.mxu1 %v19007_v9 }
 0x4a2   : > { %13564 = vmatmul.mubr.msk.f32.gmra.mrb[58].mxu0 %vm7804_vm14, %v13548_v18 }
 0x4a3   : > { %8609 = vmatprep.mubr.f32.mxu0 %v21414_v29 }
 0x4a4   : > { %13537 = vmatmul.mubr.msk.f32.gmra.mrb[36].mxu1 %vm8144_vm10, %v19210_v6 }
 0x4a5   : > { %8364 = vmatprep.mubr.f32.mxu1 %v21414_v29 }
 0x4a6   : > { %13565 = vmatmul.mubr.msk.f32.gmra.mrb[60].mxu0 %vm7804_vm14, %v13549_v57 }
 0x4a7   : > { %8615 = vmatprep.mubr.f32.mxu0 %v21414_v29 }
 0x4a8   : > { %13538 = vmatmul.mubr.msk.f32.gmra.mrb[38].mxu1 %vm8144_vm10, %v19225_v41 }
 0x4a9   : > { %8370 = vmatprep.mubr.f32.mxu1 %v21414_v29 }
 0x4aa   : > { %13566 = vmatmul.mubr.msk.f32.gmra.mrb[62].mxu0 %vm7804_vm14, %v13550_v5 }
 0x4ab   : > { %8913 = vmatprep.mubr.f32.mxu0 %v21414_v29 }
 0x4ac   : > { %13539 = vmatmul.mubr.msk.f32.gmra.mrb[40].mxu1 %vm8144_vm10, %v19239_v63 }
 0x4ad   : > { %8376 = vmatprep.mubr.f32.mxu1 %v21414_v29 }
 0x4b0   : > { %13540 = vmatmul.mubr.msk.f32.gmra.mrb[42].mxu1 %vm8144_vm10, %v19253_v59 }
 0x4b1   : > { %8382 = vmatprep.mubr.f32.mxu1 %v21414_v29 }
 0x4b4   : > { %13541 = vmatmul.mubr.msk.f32.gmra.mrb[44].mxu1 %vm8144_vm10, %v19267_v27 }
 0x4b5   : > { %8388 = vmatprep.mubr.f32.mxu1 %v21414_v29 }
 0x4b8   : > { %13542 = vmatmul.mubr.msk.f32.gmra.mrb[46].mxu1 %vm8144_vm10, %v19281_v12 }
 0x4b9   : > { %8686 = vmatprep.mubr.f32.mxu1 %v21414_v29 }
 0x4bc   : > { %13567 = vmatmul.mubr.msk.f32.vlgmr.msra.gmra.mrb[48].mxu1 %vm7804_vm14, %v19295_v44 }
 0x4bd   : > { %8692 = vmatprep.mubr.f32.mxu1 %v21414_v29 }
 0x4c0   : > { %13568 = vmatmul.mubr.msk.f32.gmra.mrb[50].mxu1 %vm7804_vm14, %v13544_v55 }
 0x4c1   : > { %8698 = vmatprep.mubr.f32.mxu1 %v21414_v29 }
 0x4c4   : > { %13569 = vmatmul.mubr.msk.f32.gmra.mrb[52].mxu1 %vm7804_vm14, %v13545_v38 }
 0x4c5   : > { %8704 = vmatprep.mubr.f32.mxu1 %v21414_v29 }
 0x4c8   : > { %13570 = vmatmul.mubr.msk.f32.gmra.mrb[54].mxu1 %vm7804_vm14, %v13546_v35 }
 0x4c9   : > { %8710 = vmatprep.mubr.f32.mxu1 %v21414_v29 }
 0x4cc   : > { %13571 = vmatmul.mubr.msk.f32.gmra.mrb[56].mxu1 %vm7804_vm14, %v13547_v58  ;;  %v19424_v58 = vpop.permute.xlu0 %8126 }
 0x4cd   : > { %8716 = vmatprep.mubr.f32.mxu1 %v21414_v29 }
 0x4d0   : > { %13572 = vmatmul.mubr.msk.f32.gmra.mrb[58].mxu1 %vm7804_vm14, %v13548_v18 }
 0x4d1   : > { %8722 = vmatprep.mubr.f32.mxu1 %v21414_v29 }
 0x4d4   : > { %13573 = vmatmul.mubr.msk.f32.gmra.mrb[60].mxu1 %vm7804_vm14, %v13549_v57 }
 0x4d5   : > { %8728 = vmatprep.mubr.f32.mxu1 %v21414_v29 }
 0x4d8   : > { %13574 = vmatmul.mubr.msk.f32.gmra.mrb[62].mxu1 %vm7804_vm14, %v13550_v5 }
 0x4d9   : > { %9026 = vmatprep.mubr.f32.mxu1 %v21414_v29 }
 0x541   : > { %v8235_v6 = vpop.f32.mrb[32].mxu0 }
 0x542   : > { %v8237_v41 = vpop.f32.mrb[33].mxu0  ;;  %v8236_v60 = vadd.f32 %v8235_v6, %v19388_v13 }
 0x543   : > { %v8238_v26 = vadd.f32 %v8237_v41, %v19388_v13 }
 0x544   : > { %v8395_v43 = vmax.f32 %v8236_v60, 0.0 }
 0x545   : > { %v8241_v63 = vpop.f32.mrb[34].mxu0  ;;  %v8396_v48 = vmax.f32 %v8238_v26, 0.0 }
 0x546   : > { %v8243_v59 = vpop.f32.mrb[35].mxu0  ;;  %v8242_v55 = vadd.f32 %v8241_v63, %v19390_v33 }
 0x547   : > { %v8244_v25 = vadd.f32 %v8243_v59, %v19390_v33 }
 0x548   : > { %v8399_v61 = vmax.f32 %v8242_v55, 0.0 }
 0x549   : > { %v8247_v27 = vpop.f32.mrb[36].mxu0  ;;  %v8400_v18 = vmax.f32 %v8244_v25, 0.0  ;;  %v19434_v25 = vpop.permute.xlu0 %8467 }
 0x54a   : > { %v8249_v12 = vpop.f32.mrb[37].mxu0  ;;  %v8248_v49 = vadd.f32 %v8247_v27, %v19404_v23 }
 0x54b   : > { %v8250_v57 = vadd.f32 %v8249_v12, %v19404_v23 }
 0x54c   : > { %v8403_v59 = vmax.f32 %v8248_v49, 0.0 }
 0x54d   : > { %v8253_v14 = vpop.f32.mrb[38].mxu0  ;;  %v8404_v55 = vmax.f32 %v8250_v57, 0.0 }
 0x54e   : > { %v8255_v11 = vpop.f32.mrb[39].mxu0  ;;  %v8254_v60 = vadd.f32 %v8253_v14, %v19411_v22 }
 0x551   : > { %v8259_v2 = vpop.f32.mrb[40].mxu0 }
 0x552   : > { %v8261_v53 = vpop.f32.mrb[41].mxu0  ;;  %v8260_v14 = vadd.f32 %v8259_v2, %v19424_v58 }
 0x555   : > { %v19394_v8 = vpop.f32.mrb[42].mxu0 }
 0x556   : > { %v19396_v44 = vpop.f32.mrb[43].mxu0 }
 0x559   : > { %v19400_v3 = vpop.f32.mrb[44].mxu0 }
 0x55a   : > { %v19402_v45 = vpop.f32.mrb[45].mxu0 }
 0x55d   : > { %v19406_v21 = vpop.f32.mrb[46].mxu0 }
 0x55e   : > { %v19409_v54 = vpop.f32.mrb[47].mxu0 }
 0x561   : > { %v8575_v4 = vpop.f32.mrb[48].mxu0 }
 0x562   : > { %v8576_v7 = vadd.f32 %v8575_v4, %v19392_v51  ;;  %v8577_v40 = vpop.f32.mrb[49].mxu0 }
 0x563   : > { %v8578_v19 = vadd.f32 %v8577_v40, %v19392_v51 }
 0x564   : > { %v8735_v37 = vadd.f32 %v8576_v7, %v8395_v43  ;;  %v19430_v43 = vpop.permute.xlu1 %8131  ;;  %v8256_v7 = vadd.f32 %v8255_v11, %v19411_v22  ;;  %v8262_v11 = vadd.f32 %v8261_v53, %v19424_v58 }
 0x565   : > { %v8736_v30 = vadd.f32 %v8578_v19, %v8396_v48  ;;  %v8581_v38 = vpop.f32.mrb[50].mxu0  ;;  %v8266_v2 = vadd.f32 %v19394_v8, %v19430_v43 }
 0x566   : > { %v8582_v36 = vadd.f32 %v8581_v38, %v19398_v50  ;;  %v8583_v35 = vpop.f32.mrb[51].mxu0 }
 0x567   : > { %v8584_v5 = vadd.f32 %v8583_v35, %v19398_v50  ;;  %v8408_v35 = vmax.f32 %v8256_v7, 0.0 }
 0x568   : > { %v8739_v6 = vadd.f32 %v8582_v36, %v8399_v61  ;;  %v8407_v61 = vmax.f32 %v8254_v60, 0.0 }
 0x569   : > { %v8740_v41 = vadd.f32 %v8584_v5, %v8400_v18  ;;  %v8587_v63 = vpop.f32.mrb[52].mxu0  ;;  %v19444_v5 = vpop.permute.xlu1 %8472 }
 0x56a   : > { %v14110_v26 = vpack.c.bf16 %v8739_v6, %v8735_v37  ;;  %v8588_v4 = vadd.f32 %v8587_v63, %v19414_v16  ;;  %v8589_v27 = vpop.f32.mrb[53].mxu0  ;;  %v8411_v63 = vmax.f32 %v8260_v14, 0.0 }
 0x56b   : > { %v8590_v40 = vadd.f32 %v8589_v27, %v19414_v16  ;;  %v14108_v12 = vpack.c.bf16 %v8740_v41, %v8736_v30  ;;  %v8412_v27 = vmax.f32 %v8262_v11, 0.0 }
 0x56c   : > { %v8743_v48 = vadd.f32 %v8588_v4, %v8403_v59  ;;  %v19449_v4 = vpop.permute.xlu0 %8136 }
 0x56d   : > { %v8744_v19 = vadd.f32 %v8590_v40, %v8404_v55  ;;  %v8593_v38 = vpop.f32.mrb[54].mxu0  ;;  %14109 = vmatprep.subr.bf16.mxu0 %v14108_v12  ;;  %v8268_v55 = vadd.f32 %v19396_v44, %v19430_v43  ;;  %v8272_v14 = vadd.f32 %v19400_v3, %v19449_v4 }
 0x56e   : > { %v8594_v37 = vadd.f32 %v8593_v38, %v19420_v17  ;;  %v8595_v49 = vpop.f32.mrb[55].mxu0  ;;  %14111 = vmatpush1.bf16.msra.mxu0 %v14110_v26 }
 0x56f   : > { %v19438_v36 = vpop.f32.mrb[32].mxu1  ;;  %v8596_v30 = vadd.f32 %v8595_v49, %v19420_v17  ;;  %v8416_v11 = vmax.f32 %v8268_v55, 0.0 }
 0x570   : > { %v19442_v18 = vpop.f32.mrb[33].mxu1  ;;  %v8747_v57 = vadd.f32 %v8594_v37, %v8407_v61 }
 0x571   : > { %v8748_v6 = vadd.f32 %v8596_v30, %v8408_v35  ;;  %v8599_v41 = vpop.f32.mrb[56].mxu0  ;;  %v19461_v35 = vpop.permute.xlu1 %8141 }
 0x572   : > { %v14114_v59 = vpack.c.bf16 %v8747_v57, %v8743_v48  ;;  %v8600_v60 = vadd.f32 %v8599_v41, %v19434_v25  ;;  %v8601_v26 = vpop.f32.mrb[57].mxu0  ;;  %v8415_v48 = vmax.f32 %v8266_v2, 0.0  ;;  %v19470_v41 = vpop.permute.xlu0 %8477  ;;  %v8419_v2 = vmax.f32 %v8272_v14, 0.0 }
 0x573   : > { %v19451_v53 = vpop.f32.mrb[34].mxu1  ;;  %v8602_v7 = vadd.f32 %v8601_v26, %v19434_v25  ;;  %v14112_v40 = vpack.c.bf16 %v8748_v6, %v8744_v19  ;;  %v8274_v19 = vadd.f32 %v19402_v45, %v19449_v4 }
 0x574   : > { %v19456_v12 = vpop.f32.mrb[35].mxu1  ;;  %v8751_v38 = vadd.f32 %v8600_v60, %v8411_v63 }
 0x575   : > { %v8752_v61 = vadd.f32 %v8602_v7, %v8412_v27  ;;  %v8605_v8 = vpop.f32.mrb[58].mxu0  ;;  %14113 = vmatprep.subr.bf16.mxu0 %v14112_v40  ;;  %v8420_v45 = vmax.f32 %v8274_v19, 0.0  ;;  %v8280_v7 = vadd.f32 %v19409_v54, %v19461_v35  ;;  %v19482_v14 = vpop.permute.xlu1 %8482 }
 0x576   : > { %v8606_v37 = vadd.f32 %v8605_v8, %v19444_v5  ;;  %v8607_v49 = vpop.f32.mrb[59].mxu0  ;;  %14115 = vmatpush1.bf16.msra.mxu0 %v14114_v59  ;;  %v8278_v59 = vadd.f32 %v19406_v21, %v19461_v35 }
 0x577   : > { %v19463_v44 = vpop.f32.mrb[36].mxu1  ;;  %v8608_v30 = vadd.f32 %v8607_v49, %v19444_v5 }
 0x578   : > { %v19468_v57 = vpop.f32.mrb[37].mxu1  ;;  %v8755_v6 = vadd.f32 %v8606_v37, %v8415_v48 }
 0x579   : > { %v8756_v3 = vadd.f32 %v8608_v30, %v8416_v11  ;;  %v8611_v63 = vpop.f32.mrb[60].mxu0 }
 0x57a   : > { %v14118_v60 = vpack.c.bf16 %v8755_v6, %v8751_v38  ;;  %v8612_v26 = vadd.f32 %v8611_v63, %v19470_v41  ;;  %v8613_v27 = vpop.f32.mrb[61].mxu0  ;;  %v8423_v38 = vmax.f32 %v8278_v59, 0.0  ;;  %v8424_v6 = vmax.f32 %v8280_v7, 0.0  ;;  %v19497_v59 = vld [vmem:[%s21294_s6 + $0x40] sm:$0xff] }
 0x57b   : > { %v19475_v55 = vpop.f32.mrb[38].mxu1  ;;  %v8614_v40 = vadd.f32 %v8613_v27, %v19470_v41  ;;  %v14116_v8 = vpack.c.bf16 %v8756_v3, %v8752_v61 }
 0x57c   : > { %v19480_v48 = vpop.f32.mrb[39].mxu1  ;;  %v8759_v37 = vadd.f32 %v8612_v26, %v8419_v2 }
 0x57d   : > { %v8760_v49 = vadd.f32 %v8614_v40, %v8420_v45  ;;  %v8617_v21 = vpop.f32.mrb[62].mxu0  ;;  %14117 = vmatprep.subr.bf16.mxu0 %v14116_v8  ;;  %v19511_v40 = vld [vmem:[%s21294_s6 + $0x48] sm:$0xff] }
 0x57e   : > { %v8618_v11 = vadd.f32 %v8617_v21, %v19482_v14  ;;  %v8619_v30 = vpop.f32.mrb[63].mxu0  ;;  %14119 = vmatpush1.bf16.msra.mxu0 %v14118_v60  ;;  %v8351_v21 = vadd.f32 %v19442_v18, %v19388_v13 }
 0x57f   : > { %v19485_v19 = vpop.f32.mrb[40].mxu1  ;;  %v8620_v54 = vadd.f32 %v8619_v30, %v19482_v14  ;;  %v21577_v30 = vld [vmem:[#allocation12_spill] sm:$0xff] }
 0x580   : > { %v19488_v63 = vpop.f32.mrb[41].mxu1  ;;  %v8763_v61 = vadd.f32 %v8618_v11, %v8423_v38  ;;  %v19529_v38 = vld [vmem:[%s21294_s6 + $0x50] sm:$0xff] }
 0x581   : > { %v8764_v3 = vadd.f32 %v8620_v54, %v8424_v6  ;;  %v8398_v54 = vmax.f32 %v8351_v21, 0.0  ;;  %v8361_v21 = vadd.f32 %v19463_v44, %v19404_v23 }
 0x582   : > { %v14122_v2 = vpack.c.bf16 %v8763_v61, %v8759_v37  ;;  %v8349_v37 = vadd.f32 %v19438_v36, %v19388_v13  ;;  %v8355_v13 = vadd.f32 %v19451_v53, %v19390_v33  ;;  %v8357_v61 = vadd.f32 %v19456_v12, %v19390_v33 }
 0x583   : > { %v19490_v26 = vpop.f32.mrb[42].mxu1  ;;  %v14120_v27 = vpack.c.bf16 %v8764_v3, %v8760_v49 }
 0x584   : > { %v19492_v45 = vpop.f32.mrb[43].mxu1  ;;  %v8397_v36 = vmax.f32 %v8349_v37, 0.0  ;;  %v8402_v12 = vmax.f32 %v8357_v61, 0.0  ;;  %v8367_v61 = vadd.f32 %v19475_v55, %v19411_v22  ;;  %v19574_v55 = vld [vmem:[%s21294_s6 + $0x68] sm:$0xff] }
 0x585   : > { %14121 = vmatprep.subr.bf16.mxu0 %v14120_v27  ;;  %v19546_v27 = vld [vmem:[%s21294_s6 + $0x58] sm:$0xff] }
 0x586   : > { %14123 = vmatpush1.bf16.msra.mxu0 %v14122_v2 }
 0x587   : > { %v19499_v60 = vpop.f32.mrb[44].mxu1  ;;  %14141 = vmatprep.subr.bf16.mxu0 %v18699_v32 }
 0x588   : > { %v19502_v7 = vpop.f32.mrb[45].mxu1 }
 0x589   : > { %13591 = vmatmul.mubr.msk.f32.vlgmr.msra.gmra.mrb[64].mxu0 %vm8144_vm10, %v19497_v59 }
 0x58a   : > { %14143 = vmatpush1.bf16.msra.mxu0 %v18788_v56  ;;  %8919 = vmatprep.mubr.f32.mxu0 %v21414_v29 }
 0x58b   : > { %v19513_v8 = vpop.f32.mrb[46].mxu1  ;;  %14145 = vmatprep.subr.bf16.mxu0 %v18791_v62 }
 0x58c   : > { %v19518_v49 = vpop.f32.mrb[47].mxu1 }
 0x58d   : > { %13592 = vmatmul.mubr.msk.f32.gmra.mrb[66].mxu0 %vm8144_vm10, %v19511_v40 }
 0x58e   : > { %14147 = vmatpush1.bf16.msra.mxu0 %v18813_v15  ;;  %8925 = vmatprep.mubr.f32.mxu0 %v21414_v29 }
 0x58f   : > { %v8688_v11 = vpop.f32.mrb[48].mxu1  ;;  %14158 = vmatprep.subr.msk.bf16.mxu0 %vm15742_vm0, %v21577_v30  ;;  %v8363_v30 = vadd.f32 %v19468_v57, %v19404_v23 }
 0x590   : > { %v8689_v18 = vadd.f32 %v8688_v11, %v19392_v51  ;;  %v8690_v6 = vpop.f32.mrb[49].mxu1  ;;  %v8401_v11 = vmax.f32 %v8355_v13, 0.0  ;;  %v19560_v13 = vld [vmem:[%s21294_s6 + $0x60] sm:$0xff] }
 0x591   : > { %v8691_v3 = vadd.f32 %v8690_v6, %v19392_v51  ;;  %13593 = vmatmul.mubr.msk.f32.gmra.mrb[68].mxu0 %vm8144_vm10, %v19529_v38 }
 0x592   : > { %v8737_v2 = vadd.f32 %v8689_v18, %v8397_v36  ;;  %8931 = vmatprep.mubr.f32.mxu0 %v21414_v29 }
 0x593   : > { %v8738_v53 = vadd.f32 %v8691_v3, %v8398_v54  ;;  %v8694_v37 = vpop.f32.mrb[50].mxu1  ;;  %v8405_v54 = vmax.f32 %v8361_v21, 0.0  ;;  %v8406_v3 = vmax.f32 %v8363_v30, 0.0  ;;  %v8375_v30 = vadd.f32 %v19488_v63, %v19424_v58 }
 0x594   : > { %v8695_v33 = vadd.f32 %v8694_v37, %v19398_v50  ;;  %v8696_v51 = vpop.f32.mrb[51].mxu1  ;;  %v8369_v37 = vadd.f32 %v19480_v48, %v19411_v22  ;;  %v8373_v22 = vadd.f32 %v19485_v19, %v19424_v58  ;;  %v19588_v19 = vld [vmem:[%s21294_s6 + $0x70] sm:$0xff] }
 0x595   : > { %v8697_v36 = vadd.f32 %v8696_v51, %v19398_v50  ;;  %13594 = vmatmul.mubr.msk.f32.gmra.mrb[70].mxu0 %vm8144_vm10, %v19546_v27 }
 0x596   : > { %v8741_v18 = vadd.f32 %v8695_v33, %v8401_v11  ;;  %8937 = vmatprep.mubr.f32.mxu0 %v21414_v29 }
 0x597   : > { %v8742_v44 = vadd.f32 %v8697_v36, %v8402_v12  ;;  %v8700_v6 = vpop.f32.mrb[52].mxu1  ;;  %v8409_v12 = vmax.f32 %v8367_v61, 0.0  ;;  %v8379_v61 = vadd.f32 %v19490_v26, %v19430_v43  ;;  %v19602_v26 = vld [vmem:[%s21294_s6 + $0x78] sm:$0xff] }
 0x598   : > { %v14126_v23 = vpack.c.bf16 %v8741_v18, %v8737_v2  ;;  %v8701_v50 = vadd.f32 %v8700_v6, %v19414_v16  ;;  %v8702_v57 = vpop.f32.mrb[53].mxu1 }
 0x599   : > { %v8703_v11 = vadd.f32 %v8702_v57, %v19414_v16  ;;  %v14124_v33 = vpack.c.bf16 %v8742_v44, %v8738_v53  ;;  %13595 = vmatmul.mubr.msk.f32.gmra.mrb[72].mxu0 %vm8144_vm10, %v19560_v13  ;;  %v8410_v53 = vmax.f32 %v8369_v37, 0.0 }
 0x59a   : > { %v8745_v51 = vadd.f32 %v8701_v50, %v8405_v54  ;;  %8943 = vmatprep.mubr.f32.mxu0 %v21414_v29  ;;  %v8413_v54 = vmax.f32 %v8373_v22, 0.0  ;;  %v8381_v50 = vadd.f32 %v19492_v45, %v19430_v43  ;;  %v8385_v43 = vadd.f32 %v19499_v60, %v19449_v4  ;;  %v19616_v60 = vld [vmem:[%s21296_s8 + $0x80] sm:$0xff] }
 0x59b   : > { %v8746_v2 = vadd.f32 %v8703_v11, %v8406_v3  ;;  %v8706_v21 = vpop.f32.mrb[54].mxu1  ;;  %14125 = vmatprep.subr.bf16.mxu1 %v14124_v33 }
 0x59c   : > { %v8707_v16 = vadd.f32 %v8706_v21, %v19420_v17  ;;  %v8708_v48 = vpop.f32.mrb[55].mxu1  ;;  %14127 = vmatpush1.bf16.msra.mxu1 %v14126_v23  ;;  %v8414_v23 = vmax.f32 %v8375_v30, 0.0  ;;  %v8387_v21 = vadd.f32 %v19502_v7, %v19449_v4  ;;  %v8391_v30 = vadd.f32 %v19513_v8, %v19461_v35  ;;  %v19633_v8 = vld [vmem:[%s21296_s8 + $0x88] sm:$0xff] }
 0x59d   : > { %v8709_v36 = vadd.f32 %v8708_v48, %v19420_v17  ;;  %13596 = vmatmul.mubr.msk.f32.gmra.mrb[74].mxu0 %vm8144_vm10, %v19574_v55 }
 0x59e   : > { %v8749_v18 = vadd.f32 %v8707_v16, %v8409_v12  ;;  %8949 = vmatprep.mubr.f32.mxu0 %v21414_v29 }
 0x59f   : > { %v8750_v44 = vadd.f32 %v8709_v36, %v8410_v53  ;;  %v8712_v6 = vpop.f32.mrb[56].mxu1  ;;  %v8421_v53 = vmax.f32 %v8385_v43, 0.0  ;;  %v8422_v36 = vmax.f32 %v8387_v21, 0.0  ;;  %v19675_v43 = vld [vmem:[%s21296_s8 + $0xa8] sm:$0xff]  ;;  %v21588_v21 = vld [vmem:[#allocation25_spill] sm:$0xff] }
 0x5a0   : > { %v14130_v58 = vpack.c.bf16 %v8749_v18, %v8745_v51  ;;  %v8713_v17 = vadd.f32 %v8712_v6, %v19434_v25  ;;  %v8714_v63 = vpop.f32.mrb[57].mxu1  ;;  %v8417_v51 = vmax.f32 %v8379_v61, 0.0  ;;  %v8393_v18 = vadd.f32 %v19518_v49, %v19461_v35  ;;  %v21578_v61 = vld [vmem:[#allocation18_spill] sm:$0xff] }
 0x5a1   : > { %v8715_v57 = vadd.f32 %v8714_v63, %v19434_v25  ;;  %v14128_v3 = vpack.c.bf16 %v8750_v44, %v8746_v2  ;;  %13597 = vmatmul.mubr.msk.f32.gmra.mrb[76].mxu0 %vm8144_vm10, %v19588_v19  ;;  %v8418_v2 = vmax.f32 %v8381_v50, 0.0  ;;  %v8425_v49 = vmax.f32 %v8391_v30, 0.0  ;;  %v21597_v30 = vld [vmem:[#allocation22_spill] sm:$0xff] }
 0x5a2   : > { %v8753_v37 = vadd.f32 %v8713_v17, %v8413_v54  ;;  %8955 = vmatprep.mubr.f32.mxu0 %v21414_v29 }
 0x5a3   : > { %v8754_v11 = vadd.f32 %v8715_v57, %v8414_v23  ;;  %v8718_v33 = vpop.f32.mrb[58].mxu1  ;;  %14129 = vmatprep.subr.bf16.mxu1 %v14128_v3  ;;  %v8426_v23 = vmax.f32 %v8393_v18, 0.0  ;;  %v19645_v3 = vld [vmem:[%s21296_s8 + $0x90] sm:$0xff] }
 0x5a4   : > { %v8719_v25 = vadd.f32 %v8718_v33, %v19444_v5  ;;  %v8720_v45 = vpop.f32.mrb[59].mxu1  ;;  %14131 = vmatpush1.bf16.msra.mxu1 %v14130_v58  ;;  %v21603_v18 = vld [vmem:[#allocation16_spill] sm:$0xff] }
 0x5a5   : > { %v8721_v12 = vadd.f32 %v8720_v45, %v19444_v5  ;;  %13598 = vmatmul.mubr.msk.f32.gmra.mrb[78].mxu0 %vm8144_vm10, %v19602_v26  ;;  %v19725_v45 = vld [vmem:[%s21292_s4 + $0xc8] sm:$0xff] }
 0x5a6   : > { %v8757_v22 = vadd.f32 %v8719_v25, %v8417_v51  ;;  %9253 = vmatprep.mubr.f32.mxu0 %v21414_v29  ;;  %v19662_v51 = vld [vmem:[%s21296_s8 + $0xa0] sm:$0xff]  ;;  %v19690_v25 = vld [vmem:[%s21296_s8 + $0xb0] sm:$0xff] }
 0x5a7   : > { %v8758_v16 = vadd.f32 %v8721_v12, %v8418_v2  ;;  %v8724_v48 = vpop.f32.mrb[60].mxu1  ;;  %v21584_v2 = vld [vmem:[#allocation13_spill] sm:$0xff]  ;;  %v19777_v12 = vld [vmem:[%s21292_s4 + $0xe8] sm:$0xff] }
 0x5a8   : > { %v14134_v4 = vpack.c.bf16 %v8757_v22, %v8753_v37  ;;  %v8725_v5 = vadd.f32 %v8724_v48, %v19470_v41  ;;  %v8726_v7 = vpop.f32.mrb[61].mxu1  ;;  %v19788_v22 = vld [vmem:[%s21292_s4 + $0xf0] sm:$0xff]  ;;  %v21596_v48 = vld [vmem:[#allocation21_spill] sm:$0xff] }
 0x5a9   : > { %v8727_v44 = vadd.f32 %v8726_v7, %v19470_v41  ;;  %v14132_v6 = vpack.c.bf16 %v8758_v16, %v8754_v11  ;;  %13623 = vmatmul.mubr.msk.f32.vlgmr.msra.gmra.mrb[80].mxu0 %vm7804_vm14, %v19616_v60  ;;  %v21579_v41 = vld [vmem:[#allocation17_spill] sm:$0xff] }
 0x5aa   : > { %v8761_v54 = vadd.f32 %v8725_v5, %v8421_v53  ;;  %14161 = vmatpush1.bf16.msk.msra.mxu0 %vm15742_vm0, %v21578_v61  ;;  %9259 = vmatprep.mubr.f32.mxu0 %v21414_v29  ;;  %v19810_v16 = vld [vmem:[%s21291_s3 + $0x40] sm:$0xff]  ;;  %v19824_v53 = vld [vmem:[%s21291_s3 + $0x48] sm:$0xff]  ;;  %v19849_v5 = vld [vmem:[%s21291_s3 + $0x58] sm:$0xff] }
 0x5ab   : > { %v8762_v58 = vadd.f32 %v8727_v44, %v8422_v36  ;;  %v8730_v35 = vpop.f32.mrb[62].mxu1  ;;  %14133 = vmatprep.subr.bf16.mxu1 %v14132_v6  ;;  %13675 = vmatprep.subr.msk.mxu0 %vm21580_vm1, %v21579_v41  ;;  %vm21599_vm1 = vmmov %vm21595_vm2  ;;  %v19860_v7 = vld [vmem:[%s21291_s3 + $0x60] sm:$0xff]  ;;  %v15020_v36 = vld [vmem:[%s15337_s20 + $0x8] sm:$0x77] }
 0x5ac   : > { %v8731_v17 = vadd.f32 %v8730_v35, %v19482_v14  ;;  %v8732_v63 = vpop.f32.mrb[63].mxu1  ;;  %14135 = vmatpush1.bf16.msra.mxu1 %v14134_v4  ;;  %v19838_v4 = vld [vmem:[%s21291_s3 + $0x50] sm:$0xff]  ;;  %v19876_v44 = vld [vmem:[%s21291_s3 + $0x68] sm:$0xff]  ;;  %v19909_v61 = vld [vmem:[%s21293_s5 + $0xc0] sm:$0xff] }
 0x5ad   : > { %v8733_v50 = vadd.f32 %v8732_v63, %v19482_v14  ;;  %13624 = vmatmul.mubr.msk.f32.gmra.mrb[82].mxu0 %vm7804_vm14, %v19633_v8  ;;  %v19653_v14 = vld [vmem:[%s21296_s8 + $0x98] sm:$0xff]  ;;  %v19887_v6 = vld [vmem:[%s21291_s3 + $0x70] sm:$0xff] }
 0x5ae   : > { %v8765_v57 = vadd.f32 %v8731_v17, %v8425_v49  ;;  %9265 = vmatprep.mubr.f32.mxu0 %v21414_v29  ;;  %v21619_v35 = vld [vmem:[#allocation27_spill] sm:$0xff]  ;;  %v19998_v63 = vld [vmem:[%s21293_s5 + $0xf8] sm:$0xff] }
 0x5af   : > { %v8766_v37 = vadd.f32 %v8733_v50, %v8426_v23  ;;  %v21620_v41 = vld [vmem:[#allocation23_spill] sm:$0xff]  ;;  %v20009_v23 = vld [vmem:[%s21292_s4 + $0x100] sm:$0xff] }
 0x5b0   : > { %v14138_v11 = vpack.c.bf16 %v8765_v57, %v8761_v54  ;;  %v19898_v54 = vld [vmem:[%s21291_s3 + $0x78] sm:$0xff]  ;;  %v19976_v49 = vld [vmem:[%s21293_s5 + $0xe8] sm:$0xff]  ;;  %v19987_v17 = vld [vmem:[%s21293_s5 + $0xf0] sm:$0xff] }
 0x5b1   : > { %v14136_v33 = vpack.c.bf16 %v8766_v37, %v8762_v58  ;;  %13625 = vmatmul.mubr.msk.f32.gmra.mrb[84].mxu0 %vm7804_vm14, %v19645_v3  ;;  %v19959_v58 = vld [vmem:[%s21293_s5 + $0xe0] sm:$0xff]  ;;  %v20023_v50 = vld [vmem:[%s21292_s4 + $0x108] sm:$0xff] }
 0x5b2   : > { %9271 = vmatprep.mubr.f32.mxu0 %v21414_v29  ;;  %v21629_v57 = vld [vmem:[#allocation26_spill] sm:$0xff] }
 0x5b3   : > { %14137 = vmatprep.subr.bf16.mxu1 %v14136_v33  ;;  %v20059_v37 = vld [vmem:[%s21292_s4 + $0x120] sm:$0xff]  ;;  %v21637_v33 = vld [vmem:[#allocation24_spill] sm:$0xff] }
 0x5b4   : > { %14139 = vmatpush1.bf16.msra.mxu1 %v14138_v11  ;;  %v21636_v11 = vld [vmem:[#allocation20_spill] sm:$0xff] }
 0x5b5   : > { %14149 = vmatprep.subr.bf16.mxu1 %v18873_v39  ;;  %13626 = vmatmul.mubr.msk.f32.gmra.mrb[86].mxu0 %vm7804_vm14, %v19653_v14 }
 0x5b6   : > { %9277 = vmatprep.mubr.f32.mxu0 %v21414_v29 }
 0x5b7   : > { %13599 = vmatmul.mubr.msk.f32.vlgmr.msra.gmra.mrb[64].mxu1 %vm8144_vm10, %v19497_v59  ;;  %v21581_v59 = vld [vmem:[#allocation15_spill] sm:$0xff] }
 0x5b8   : > { %14151 = vmatpush1.bf16.msra.mxu1 %v18989_v46  ;;  %9032 = vmatprep.mubr.f32.mxu1 %v21414_v29 }
 0x5b9   : > { %14153 = vmatprep.subr.bf16.mxu1 %v18994_v52  ;;  %13627 = vmatmul.mubr.msk.f32.gmra.mrb[88].mxu0 %vm7804_vm14, %v19662_v51 }
 0x5ba   : > { %9283 = vmatprep.mubr.f32.mxu0 %v21414_v29 }
 0x5bb   : > { %13600 = vmatmul.mubr.msk.f32.gmra.mrb[66].mxu1 %vm8144_vm10, %v19511_v40  ;;  %v19701_v40 = vld [vmem:[%s21296_s8 + $0xb8] sm:$0xff] }
 0x5bc   : > { %14155 = vmatpush1.bf16.msra.mxu1 %v19007_v9  ;;  %9038 = vmatprep.mubr.f32.mxu1 %v21414_v29 }
 0x5bd   : > { %14164 = vmatprep.subr.msk.bf16.mxu1 %vm15742_vm0, %v21581_v59  ;;  %13628 = vmatmul.mubr.msk.f32.gmra.mrb[90].mxu0 %vm7804_vm14, %v19675_v43  ;;  %v20109_v59 = vld [vmem:[%s21293_s5 + $0x100] sm:$0xff] }
 0x5be   : > { %9289 = vmatprep.mubr.f32.mxu0 %v21414_v29 }
 0x5bf   : > { %13601 = vmatmul.mubr.msk.f32.gmra.mrb[68].mxu1 %vm8144_vm10, %v19529_v38  ;;  %v19712_v38 = vld [vmem:[%s21292_s4 + $0xc0] sm:$0xff] }
 0x5c0   : > { %9044 = vmatprep.mubr.f32.mxu1 %v21414_v29 }
 0x5c1   : > { %13629 = vmatmul.mubr.msk.f32.gmra.mrb[92].mxu0 %vm7804_vm14, %v19690_v25 }
 0x5c2   : > { %9295 = vmatprep.mubr.f32.mxu0 %v21414_v29 }
 0x5c3   : > { %13602 = vmatmul.mubr.msk.f32.gmra.mrb[70].mxu1 %vm8144_vm10, %v19546_v27  ;;  %v15019_v27 = vld [vmem:[%s15337_s20] sm:$0x77]  ;;  %s13049_s20 = sshll.u32 %s479_s30, 4  ;;  %s21247_s20 = int_to_ptr.vmem [resolvable:$true] %s13049_s20 }
 0x5c4   : > { %9050 = vmatprep.mubr.f32.mxu1 %v21414_v29  ;;  %s15021_s27 = scalar_lea.vmem %s21247_s20, 64  ;;  %p15028_p3 = scmp.lt.s32.totalorder %s21247_s20, %s15026_s22 }
 0x5c5   : > { %13630 = vmatmul.mubr.msk.f32.gmra.mrb[94].mxu0 %vm7804_vm14, %v19701_v40  ;;  %p15022_p0 = scmp.ne.s32.totalorder %s21247_s20, %s15021_s27  ;;  %p15029_p4 = scmp.lt.s32.totalorder %s15027_s0, %s15021_s27 }
 0x5c6   : > { %9553 = vmatprep.mubr.f32.mxu0 %v21414_v29 }
 0x5c7   : > { %13603 = vmatmul.mubr.msk.f32.gmra.mrb[72].mxu1 %vm8144_vm10, %v19560_v13  ;;  %v19739_v13 = vld [vmem:[%s21292_s4 + $0xd0] sm:$0xff]  ;;  %p15023_p1 = pnand %p15022_p0, %p15203_p6  ;;  %p15030_p5 = por %p15029_p4, %p15028_p3 }
 0x5c8   : > { %9056 = vmatprep.mubr.f32.mxu1 %v21414_v29 }
 0x5c9   : > { %13657 = vmatmul.mubr.msk.f32.vlgmr.msra.gmra.mrb[96].mxu0 %vm21582_vm3, %v19712_v38  ;;  %vm21600_vm3 = vmmov %vm21599_vm1  ;;  %p15024_p2 = pneg %p15023_p1 }
 0x5ca   : > { %13676 = vmatpush1.msk.msra.mxu0 %vm21583_vm15, %v15019_v27  ;;  %9559 = vmatprep.mubr.f32.mxu0 %v21414_v29  ;;  %vm21601_vm15 = vmmov %vm21587_vm4  ;;  %v21654_v27 = vld [vmem:[#allocation8_spill] sm:$0xff] }
 0x5cb   : > { %13604 = vmatmul.mubr.msk.f32.gmra.mrb[74].mxu1 %vm8144_vm10, %v19574_v55  ;;  %14170 = vmatprep.subr.msk.bf16.mxu0 %vm15742_vm0, %v21584_v2  ;;  %v19750_v55 = vld [vmem:[%s21292_s4 + $0xd8] sm:$0xff]  ;;  %p15031_p7 = pnand %p15030_p5, %p15024_p2 }
 0x5cc   : > { %9062 = vmatprep.mubr.f32.mxu1 %v21414_v29 }
 0x5cd   : > { %13658 = vmatmul.mubr.msk.f32.gmra.mrb[98].mxu0 %vm21585_vm13, %v19725_v45  ;;  %vm21602_vm13 = vmmov %vm21590_vm11 }
 0x5ce   : > { %9565 = vmatprep.mubr.f32.mxu0 %v21414_v29 }
 0x5cf   : > { %13605 = vmatmul.mubr.msk.f32.gmra.mrb[76].mxu1 %vm8144_vm10, %v19588_v19  ;;  %v19761_v19 = vld [vmem:[%s21292_s4 + $0xe0] sm:$0xff] }
 0x5d0   : > { %9068 = vmatprep.mubr.f32.mxu1 %v21414_v29 }
 0x5d1   : > { %13659 = vmatmul.mubr.msk.f32.gmra.mrb[100].mxu0 %vm21586_vm8, %v19739_v13  ;;  %vm21604_vm8 = vmmov %vm21599_vm1 }
 0x5d2   : > { %9571 = vmatprep.mubr.f32.mxu0 %v21414_v29 }
 0x5d3   : > { %13606 = vmatmul.mubr.msk.f32.gmra.mrb[78].mxu1 %vm8144_vm10, %v19602_v26  ;;  %v21589_v26 = vld [vmem:[#allocation19_spill] sm:$0xff] }
 0x5d4   : > { %9366 = vmatprep.mubr.f32.mxu1 %v21414_v29 }
 0x5d5   : > { %13660 = vmatmul.mubr.msk.f32.gmra.mrb[102].mxu0 %vm21587_vm4, %v19750_v55 }
 0x5d6   : > { %9577 = vmatprep.mubr.f32.mxu0 %v21414_v29 }
 0x5d7   : > { %13631 = vmatmul.mubr.msk.f32.vlgmr.msra.gmra.mrb[80].mxu1 %vm7804_vm14, %v19616_v60  ;;  %v19799_v60 = vld [vmem:[%s21292_s4 + $0xf8] sm:$0xff] }
 0x5d8   : > { %14167 = vmatpush1.bf16.msk.msra.mxu1 %vm15742_vm0, %v21588_v21  ;;  %9372 = vmatprep.mubr.f32.mxu1 %v21414_v29 }
 0x5d9   : > { %13685 = vmatprep.subr.msk.mxu1 %vm21590_vm11, %v21589_v26  ;;  %13661 = vmatmul.mubr.msk.f32.gmra.mrb[104].mxu0 %vm21591_vm5, %v19761_v19  ;;  %vm21605_vm11 = vmmov %vm21599_vm1  ;;  %v20202_v26 = vld [vmem:[%s21293_s5 + $0x138] sm:$0xff] }
 0x5da   : > { %9583 = vmatprep.mubr.f32.mxu0 %v21414_v29  ;;  %vm21606_vm5 = vmmov %vm21587_vm4 }
 0x5db   : > { %13632 = vmatmul.mubr.msk.f32.gmra.mrb[82].mxu1 %vm7804_vm14, %v19633_v8  ;;  %v19923_v8 = vld [vmem:[%s21293_s5 + $0xc8] sm:$0xff] }
 0x5dc   : > { %9378 = vmatprep.mubr.f32.mxu1 %v21414_v29 }
 0x5dd   : > { %13662 = vmatmul.mubr.msk.f32.gmra.mrb[106].mxu0 %vm21592_vm6, %v19777_v12  ;;  %vm21607_vm6 = vmmov %vm21599_vm1 }
 0x5de   : > { %9589 = vmatprep.mubr.f32.mxu0 %v21414_v29 }
 0x5df   : > { %13633 = vmatmul.mubr.msk.f32.gmra.mrb[84].mxu1 %vm7804_vm14, %v19645_v3  ;;  %v20048_v3 = vld [vmem:[%s21292_s4 + $0x118] sm:$0xff] }
 0x5e0   : > { %9384 = vmatprep.mubr.f32.mxu1 %v21414_v29 }
 0x5e1   : > { %13663 = vmatmul.mubr.msk.f32.gmra.mrb[108].mxu0 %vm21593_vm7, %v19788_v22  ;;  %vm21608_vm7 = vmmov %vm21587_vm4 }
 0x5e2   : > { %9595 = vmatprep.mubr.f32.mxu0 %v21414_v29 }
 0x5e3   : > { %13634 = vmatmul.mubr.msk.f32.gmra.mrb[86].mxu1 %vm7804_vm14, %v19653_v14  ;;  %v20076_v14 = vld [vmem:[%s21292_s4 + $0x128] sm:$0xff] }
 0x5e4   : > { %9390 = vmatprep.mubr.f32.mxu1 %v21414_v29 }
 0x5e5   : > { %13664 = vmatmul.mubr.msk.f32.gmra.mrb[110].mxu0 %vm21594_vm9, %v19799_v60  ;;  %vm21609_vm9 = vmmov %vm21599_vm1 }
 0x5e6   : > { %9803 = vmatprep.mubr.f32.mxu0 %v21414_v29 }
 0x5e7   : > { %13635 = vmatmul.mubr.msk.f32.gmra.mrb[88].mxu1 %vm7804_vm14, %v19662_v51  ;;  %v20087_v51 = vld [vmem:[%s21292_s4 + $0x130] sm:$0xff] }
 0x5e8   : > { %9396 = vmatprep.mubr.f32.mxu1 %v21414_v29 }
 0x5e9   : > { %13677 = vmatmul.mubr.msk.f32.vlgmr.msra.gmra.mrb[96].mxu0 %vm21595_vm2, %v19810_v16  ;;  %vm21610_vm2 = vmmov %vm21587_vm4 }
 0x5ea   : > { %14173 = vmatpush1.bf16.msk.msra.mxu0 %vm15742_vm0, %v21596_v48  ;;  %9809 = vmatprep.mubr.f32.mxu0 %v21414_v29 }
 0x5eb   : > { %13636 = vmatmul.mubr.msk.f32.gmra.mrb[90].mxu1 %vm7804_vm14, %v19675_v43  ;;  %14182 = vmatprep.subr.msk.bf16.mxu0 %vm15742_vm0, %v21597_v30  ;;  %v20098_v43 = vld [vmem:[%s21292_s4 + $0x138] sm:$0xff]  ;;  %v20237_v30 = vld [vmem:[%s21292_s4 + $0x148] sm:$0xff] }
 0x5ec   : > { %9402 = vmatprep.mubr.f32.mxu1 %v21414_v29 }
 0x5ed   : > { %13678 = vmatmul.mubr.msk.f32.gmra.mrb[98].mxu0 %vm21598_vm12, %v19824_v53  ;;  %vm21611_vm12 = vmmov %vm21610_vm2 }
 0x5ee   : > { %9815 = vmatprep.mubr.f32.mxu0 %v21414_v29 }
 0x5ef   : > { %13637 = vmatmul.mubr.msk.f32.gmra.mrb[92].mxu1 %vm7804_vm14, %v19690_v25  ;;  %v20123_v25 = vld [vmem:[%s21293_s5 + $0x108] sm:$0xff] }
 0x5f0   : > { %9408 = vmatprep.mubr.f32.mxu1 %v21414_v29 }
 0x5f1   : > { %13679 = vmatmul.mubr.msk.f32.gmra.mrb[100].mxu0 %vm21599_vm1, %v19838_v4  ;;  %vm21612_vm1 = vmmov %vm21610_vm2 }
 0x5f2   : > { %9821 = vmatprep.mubr.f32.mxu0 %v21414_v29 }
 0x5f3   : > { %13638 = vmatmul.mubr.msk.f32.gmra.mrb[94].mxu1 %vm7804_vm14, %v19701_v40  ;;  %v20159_v40 = vld [vmem:[%s21293_s5 + $0x120] sm:$0xff] }
 0x5f4   : > { %9666 = vmatprep.mubr.f32.mxu1 %v21414_v29 }
 0x5f5   : > { %13680 = vmatmul.mubr.msk.f32.gmra.mrb[102].mxu0 %vm21600_vm3, %v19849_v5  ;;  %vm21613_vm3 = vmmov %vm21612_vm1 }
 0x5f6   : > { %9827 = vmatprep.mubr.f32.mxu0 %v21414_v29 }
 0x5f7   : > { %13667 = vmatmul.mubr.msk.f32.vlgmr.msra.gmra.mrb[96].mxu1 %vm21601_vm15, %v19712_v38  ;;  %vm21614_vm15 = vmmov %vm21612_vm1  ;;  %v21653_v38 = vld [vmem:[#allocation10_spill] sm:$0xff] }
 0x5f8   : > { %13686 = vmatpush1.msk.msra.mxu1 %vm21602_vm13, %v15020_v36  ;;  %9672 = vmatprep.mubr.f32.mxu1 %v21414_v29  ;;  %vm21615_vm13 = vmmov %vm21612_vm1 }
 0x5f9   : > { %14176 = vmatprep.subr.msk.bf16.mxu1 %vm15742_vm0, %v21603_v18  ;;  %13681 = vmatmul.mubr.msk.f32.gmra.mrb[104].mxu0 %vm21604_vm8, %v19860_v7  ;;  %vm21616_vm8 = vmmov %vm21612_vm1 }
 0x5fa   : > { %9833 = vmatprep.mubr.f32.mxu0 %v21414_v29 }
 0x5fb   : > { %13668 = vmatmul.mubr.msk.f32.gmra.mrb[98].mxu1 %vm21587_vm4, %v19725_v45  ;;  %vm21617_vm4 = vmmov %vm21612_vm1  ;;  %v20176_v45 = vld [vmem:[%s21293_s5 + $0x128] sm:$0xff] }
 0x5fc   : > { %9678 = vmatprep.mubr.f32.mxu1 %v21414_v29 }
 0x5fd   : > { %13682 = vmatmul.mubr.msk.f32.gmra.mrb[106].mxu0 %vm21605_vm11, %v19876_v44  ;;  %vm21618_vm11 = vmmov %vm21607_vm6 }
 0x5fe   : > { %9839 = vmatprep.mubr.f32.mxu0 %v21414_v29 }
 0x5ff   : > { %13669 = vmatmul.mubr.msk.f32.gmra.mrb[100].mxu1 %vm21606_vm5, %v19739_v13  ;;  %vm21621_vm5 = vmmov %vm21612_vm1 }
 0x600   : > { %9684 = vmatprep.mubr.f32.mxu1 %v21414_v29 }
 0x601   : > { %13683 = vmatmul.mubr.msk.f32.gmra.mrb[108].mxu0 %vm21607_vm6, %v19887_v6 }
 0x602   : > { %9845 = vmatprep.mubr.f32.mxu0 %v21414_v29 }
 0x603   : > { %13670 = vmatmul.mubr.msk.f32.gmra.mrb[102].mxu1 %vm21608_vm7, %v19750_v55  ;;  %vm21622_vm7 = vmmov %vm21612_vm1  ;;  %v20187_v55 = vld [vmem:[%s21293_s5 + $0x130] sm:$0xff] }
 0x604   : > { %9690 = vmatprep.mubr.f32.mxu1 %v21414_v29 }
 0x605   : > { %13684 = vmatmul.mubr.msk.f32.gmra.mrb[110].mxu0 %vm21609_vm9, %v19898_v54  ;;  %vm21623_vm9 = vmmov %vm21607_vm6 }
 0x606   : > { %10062 = vmatprep.mubr.f32.mxu0 %v21414_v29 }
 0x607   : > { %13671 = vmatmul.mubr.msk.f32.gmra.mrb[104].mxu1 %vm21610_vm2, %v19761_v19  ;;  %vm21624_vm2 = vmmov %vm21612_vm1 }
 0x608   : > { %9696 = vmatprep.mubr.f32.mxu1 %v21414_v29 }
 0x609   : > { %13705 = vmatmul.mubr.msk.f32.vlgmr.msra.gmra.mrb[96].mxu0 %vm21611_vm12, %v19909_v61  ;;  %vm21625_vm12 = vmmov %vm21607_vm6 }
 0x60a   : > { %14185 = vmatpush1.bf16.msk.msra.mxu0 %vm15742_vm0, %v17464_v0  ;;  %10068 = vmatprep.mubr.f32.mxu0 %v21414_v29  ;;  %v19937_v0 = vld [vmem:[%s21293_s5 + $0xd0] sm:$0xff] }
 0x60b   : > { %13672 = vmatmul.mubr.msk.f32.gmra.mrb[106].mxu1 %vm21612_vm1, %v19777_v12  ;;  %14194 = vmatprep.subr.msk.bf16.mxu0 %vm15742_vm0, %v17478_v47  ;;  %v19948_v47 = vld [vmem:[%s21293_s5 + $0xd8] sm:$0xff] }
 0x60c   : > { %9702 = vmatprep.mubr.f32.mxu1 %v21414_v29 }
 0x60d   : > { %13706 = vmatmul.mubr.msk.f32.gmra.mrb[98].mxu0 %vm21613_vm3, %v19923_v8  ;;  %vm21626_vm3 = vmmov %vm21607_vm6 }
 0x60e   : > { %10074 = vmatprep.mubr.f32.mxu0 %v21414_v29 }
 0x60f   : > { %13673 = vmatmul.mubr.msk.f32.gmra.mrb[108].mxu1 %vm21614_vm15, %v19788_v22  ;;  %vm21627_vm15 = vmmov %vm21612_vm1 }
 0x610   : > { %9708 = vmatprep.mubr.f32.mxu1 %v21414_v29 }
 0x611   : > { %13707 = vmatmul.mubr.msk.f32.gmra.mrb[100].mxu0 %vm21615_vm13, %v19937_v0  ;;  %vm21628_vm13 = vmmov %vm21626_vm3 }
 0x612   : > { %10080 = vmatprep.mubr.f32.mxu0 %v21414_v29 }
 0x613   : > { %13674 = vmatmul.mubr.msk.f32.gmra.mrb[110].mxu1 %vm21616_vm8, %v19799_v60  ;;  %vm21630_vm8 = vmmov %vm21612_vm1  ;;  %v20217_v60 = vld [vmem:[%s21292_s4 + $0x140] sm:$0xff] }
 0x614   : > { %9916 = vmatprep.mubr.f32.mxu1 %v21414_v29 }
 0x615   : > { %13708 = vmatmul.mubr.msk.f32.gmra.mrb[102].mxu0 %vm21617_vm4, %v19948_v47  ;;  %vm21631_vm4 = vmmov %vm21626_vm3 }
 0x616   : > { %10086 = vmatprep.mubr.f32.mxu0 %v21414_v29 }
 0x617   : > { %13687 = vmatmul.mubr.msk.f32.vlgmr.msra.gmra.mrb[96].mxu1 %vm21618_vm11, %v19810_v16  ;;  %vm21632_vm11 = vmmov %vm21612_vm1 }
 0x618   : > { %14179 = vmatpush1.bf16.msk.msra.mxu1 %vm15742_vm0, %v21619_v35  ;;  %9922 = vmatprep.mubr.f32.mxu1 %v21414_v29 }
 0x619   : > { %14188 = vmatprep.subr.msk.bf16.mxu1 %vm15742_vm0, %v21620_v41  ;;  %13709 = vmatmul.mubr.msk.f32.gmra.mrb[104].mxu0 %vm21621_vm5, %v19959_v58  ;;  %vm21633_vm5 = vmmov %vm21626_vm3 }
 0x61a   : > { %10092 = vmatprep.mubr.f32.mxu0 %v21414_v29 }
 0x61b   : > { %13688 = vmatmul.mubr.msk.f32.gmra.mrb[98].mxu1 %vm21607_vm6, %v19824_v53  ;;  %vm21634_vm6 = vmmov %vm21612_vm1  ;;  %v20228_v53 = vpop.permute.xlu0 %8787 }
 0x61c   : > { %9928 = vmatprep.mubr.f32.mxu1 %v21414_v29 }
 0x61d   : > { %13710 = vmatmul.mubr.msk.f32.gmra.mrb[106].mxu0 %vm21622_vm7, %v19976_v49  ;;  %vm21635_vm7 = vmmov %vm21612_vm1 }
 0x61e   : > { %10098 = vmatprep.mubr.f32.mxu0 %v21414_v29 }
 0x61f   : > { %13689 = vmatmul.mubr.msk.f32.gmra.mrb[100].mxu1 %vm21623_vm9, %v19838_v4  ;;  %vm21638_vm9 = vmmov %vm21612_vm1  ;;  %v20258_v36 = vpop.permute.xlu0 %9127 }
 0x620   : > { %9934 = vmatprep.mubr.f32.mxu1 %v21414_v29 }
 0x621   : > { %13711 = vmatmul.mubr.msk.f32.gmra.mrb[108].mxu0 %vm21624_vm2, %v19987_v17  ;;  %vm21639_vm2 = vmmov %vm21612_vm1 }
 0x622   : > { %10104 = vmatprep.mubr.f32.mxu0 %v21414_v29 }
 0x623   : > { %13690 = vmatmul.mubr.msk.f32.gmra.mrb[102].mxu1 %vm21625_vm12, %v19849_v5  ;;  %vm21640_vm12 = vmmov %vm21612_vm1 }
 0x624   : > { %9940 = vmatprep.mubr.f32.mxu1 %v21414_v29 }
 0x625   : > { %13712 = vmatmul.mubr.msk.f32.gmra.mrb[110].mxu0 %vm21612_vm1, %v19998_v63 }
 0x626   : > { %10353 = vmatprep.mubr.f32.mxu0 %v21414_v29 }
 0x627   : > { %13691 = vmatmul.mubr.msk.f32.gmra.mrb[104].mxu1 %vm21626_vm3, %v19860_v7  ;;  %vm21641_vm3 = vmmov %vm21612_vm1  ;;  %v20254_v7 = vld [vmem:[%s21292_s4 + $0x150] sm:$0xff] }
 0x628   : > { %9946 = vmatprep.mubr.f32.mxu1 %v21414_v29 }
 0x629   : > { %13733 = vmatmul.mubr.msk.f32.vlgmr.msra.gmra.mrb[96].mxu0 %vm21627_vm15, %v20009_v23  ;;  %vm21642_vm15 = vmmov %vm21612_vm1 }
 0x62a   : > { %14197 = vmatpush1.bf16.msk.msra.mxu0 %vm15742_vm0, %v17556_v28  ;;  %10359 = vmatprep.mubr.f32.mxu0 %v21414_v29  ;;  %v20037_v28 = vld [vmem:[%s21292_s4 + $0x110] sm:$0xff] }
 0x62b   : > { %13692 = vmatmul.mubr.msk.f32.gmra.mrb[106].mxu1 %vm21628_vm13, %v19876_v44  ;;  %14206 = vmatprep.subr.msk.bf16.mxu0 %vm15742_vm0, %v21629_v57  ;;  %vm21643_vm13 = vmmov %vm21612_vm1 }
 0x62c   : > { %9952 = vmatprep.mubr.f32.mxu1 %v21414_v29 }
 0x62d   : > { %13734 = vmatmul.mubr.msk.f32.gmra.mrb[98].mxu0 %vm21630_vm8, %v20023_v50  ;;  %vm21644_vm8 = vmmov %vm21612_vm1 }
 0x62e   : > { %10365 = vmatprep.mubr.f32.mxu0 %v21414_v29 }
 0x62f   : > { %13693 = vmatmul.mubr.msk.f32.gmra.mrb[108].mxu1 %vm21631_vm4, %v19887_v6  ;;  %vm21645_vm4 = vmmov %vm21612_vm1  ;;  %v20271_v6 = vld [vmem:[%s21292_s4 + $0x158] sm:$0xff] }
 0x630   : > { %9958 = vmatprep.mubr.f32.mxu1 %v21414_v29 }
 0x631   : > { %13735 = vmatmul.mubr.msk.f32.gmra.mrb[100].mxu0 %vm21632_vm11, %v20037_v28  ;;  %vm21646_vm11 = vmmov %vm21612_vm1 }
 0x632   : > { %10371 = vmatprep.mubr.f32.mxu0 %v21414_v29 }
 0x633   : > { %13694 = vmatmul.mubr.msk.f32.gmra.mrb[110].mxu1 %vm21633_vm5, %v19898_v54  ;;  %vm21647_vm5 = vmmov %vm21612_vm1 }
 0x634   : > { %10175 = vmatprep.mubr.f32.mxu1 %v21414_v29 }
 0x635   : > { %13736 = vmatmul.mubr.msk.f32.gmra.mrb[102].mxu0 %vm21634_vm6, %v20048_v3  ;;  %vm21648_vm6 = vmmov %vm21612_vm1 }
 0x636   : > { %10377 = vmatprep.mubr.f32.mxu0 %v21414_v29 }
 0x637   : > { %13715 = vmatmul.mubr.msk.f32.vlgmr.msra.gmra.mrb[96].mxu1 %vm21635_vm7, %v19909_v61  ;;  %vm21649_vm7 = vmmov %vm21612_vm1 }
 0x638   : > { %14191 = vmatpush1.bf16.msk.msra.mxu1 %vm15742_vm0, %v21636_v11  ;;  %10181 = vmatprep.mubr.f32.mxu1 %v21414_v29 }
 0x639   : > { %14200 = vmatprep.subr.msk.bf16.mxu1 %vm15742_vm0, %v21637_v33  ;;  %13737 = vmatmul.mubr.msk.f32.gmra.mrb[104].mxu0 %vm21638_vm9, %v20059_v37  ;;  %vm21650_vm9 = vmmov %vm21612_vm1  ;;  %v20334_v33 = vld [vmem:[%s21292_s4 + $0x170] sm:$0xff] }
 0x63a   : > { %10383 = vmatprep.mubr.f32.mxu0 %v21414_v29 }
 0x63b   : > { %13716 = vmatmul.mubr.msk.f32.gmra.mrb[98].mxu1 %vm21639_vm2, %v19923_v8  ;;  %vm21651_vm2 = vmmov %vm21612_vm1 }
 0x63c   : > { %10187 = vmatprep.mubr.f32.mxu1 %v21414_v29 }
 0x63d   : > { %13738 = vmatmul.mubr.msk.f32.gmra.mrb[106].mxu0 %vm21640_vm12, %v20076_v14  ;;  %vm21652_vm12 = vmmov %vm21612_vm1 }
 0x63e   : > { %10389 = vmatprep.mubr.f32.mxu0 %v21414_v29 }
 0x63f   : > { %13717 = vmatmul.mubr.msk.f32.gmra.mrb[100].mxu1 %vm21612_vm1, %v19937_v0  ;;  %v20284_v0 = vpop.permute.xlu0 %8797 }
 0x640   : > { %10193 = vmatprep.mubr.f32.mxu1 %v21414_v29 }
 0x641   : > { %13739 = vmatmul.mubr.msk.f32.gmra.mrb[108].mxu0 %vm21641_vm3, %v20087_v51  ;;  %vm21655_vm3 = vmmov %vm21612_vm1 }
 0x642   : > { %10395 = vmatprep.mubr.f32.mxu0 %v21414_v29 }
 0x643   : > { %13718 = vmatmul.mubr.msk.f32.gmra.mrb[102].mxu1 %vm21642_vm15, %v19948_v47  ;;  %vm21656_vm15 = vmmov %vm21612_vm1  ;;  %v20290_v47 = vld [vmem:[%s21292_s4 + $0x160] sm:$0xff] }
 0x644   : > { %10199 = vmatprep.mubr.f32.mxu1 %v21414_v29 }
 0x645   : > { %13740 = vmatmul.mubr.msk.f32.gmra.mrb[110].mxu0 %vm21643_vm13, %v20098_v43  ;;  %vm21657_vm13 = vmmov %vm21612_vm1 }
 0x646   : > { %10644 = vmatprep.mubr.f32.mxu0 %v21414_v29 }
 0x647   : > { %13719 = vmatmul.mubr.msk.f32.gmra.mrb[104].mxu1 %vm21644_vm8, %v19959_v58  ;;  %vm21658_vm8 = vmmov %vm21612_vm1 }
 0x648   : > { %10205 = vmatprep.mubr.f32.mxu1 %v21414_v29 }
 0x649   : > { %13761 = vmatmul.mubr.msk.f32.vlgmr.msra.gmra.mrb[96].mxu0 %vm21645_vm4, %v20109_v59  ;;  %vm21659_vm4 = vmmov %vm21612_vm1 }
 0x64a   : > { %14209 = vmatpush1.bf16.msk.msra.mxu0 %vm15742_vm0, %v18601_v31  ;;  %10650 = vmatprep.mubr.f32.mxu0 %v21414_v29  ;;  %v20137_v31 = vld [vmem:[%s21293_s5 + $0x110] sm:$0xff] }
 0x64b   : > { %13720 = vmatmul.mubr.msk.f32.gmra.mrb[106].mxu1 %vm21646_vm11, %v19976_v49  ;;  %14218 = vmatprep.subr.msk.bf16.mxu0 %vm15742_vm0, %v18607_v34  ;;  %v20148_v34 = vld [vmem:[%s21293_s5 + $0x118] sm:$0xff]  ;;  %vm21660_vm11 = vmmov %vm21612_vm1 }
 0x64c   : > { %10211 = vmatprep.mubr.f32.mxu1 %v21414_v29 }
 0x64d   : > { %13762 = vmatmul.mubr.msk.f32.gmra.mrb[98].mxu0 %vm21647_vm5, %v20123_v25  ;;  %vm21661_vm5 = vmmov %vm21612_vm1 }
 0x64e   : > { %10656 = vmatprep.mubr.f32.mxu0 %v21414_v29 }
 0x64f   : > { %13721 = vmatmul.mubr.msk.f32.gmra.mrb[108].mxu1 %vm21648_vm6, %v19987_v17  ;;  %vm21662_vm6 = vmmov %vm21612_vm1 }
 0x650   : > { %10217 = vmatprep.mubr.f32.mxu1 %v21414_v29 }
 0x651   : > { %13763 = vmatmul.mubr.msk.f32.gmra.mrb[100].mxu0 %vm21649_vm7, %v20137_v31  ;;  %vm21663_vm7 = vmmov %vm21612_vm1 }
 0x652   : > { %10662 = vmatprep.mubr.f32.mxu0 %v21414_v29 }
 0x653   : > { %13722 = vmatmul.mubr.msk.f32.gmra.mrb[110].mxu1 %vm21650_vm9, %v19998_v63  ;;  %vm21664_vm9 = vmmov %vm21612_vm1 }
 0x654   : > { %10466 = vmatprep.mubr.f32.mxu1 %v21414_v29 }
 0x655   : > { %13764 = vmatmul.mubr.msk.f32.gmra.mrb[102].mxu0 %vm21651_vm2, %v20148_v34  ;;  %vm21665_vm2 = vmmov %vm21612_vm1 }
 0x656   : > { %10668 = vmatprep.mubr.f32.mxu0 %v21414_v29 }
 0x657   : > { %13743 = vmatmul.mubr.msk.f32.vlgmr.msra.gmra.mrb[96].mxu1 %vm21652_vm12, %v20009_v23  ;;  %vm21666_vm12 = vmmov %vm21612_vm1 }
 0x658   : > { %14203 = vmatpush1.bf16.msk.msra.mxu1 %vm15742_vm0, %v21653_v38  ;;  %10472 = vmatprep.mubr.f32.mxu1 %v21414_v29 }
 0x659   : > { %14212 = vmatprep.subr.msk.bf16.mxu1 %vm15742_vm0, %v21654_v27  ;;  %13765 = vmatmul.mubr.msk.f32.gmra.mrb[104].mxu0 %vm21612_vm1, %v20159_v40 }
 0x65a   : > { %10674 = vmatprep.mubr.f32.mxu0 %v21414_v29 }
 0x65b   : > { %13744 = vmatmul.mubr.msk.f32.gmra.mrb[98].mxu1 %vm21655_vm3, %v20023_v50  ;;  %vm21667_vm3 = vmmov %vm21612_vm1 }
 0x65c   : > { %10478 = vmatprep.mubr.f32.mxu1 %v21414_v29  ;;  %v8915_v2 = vpop.f32.mrb[64].mxu0 }
 0x65d   : > { %v8917_v13 = vpop.f32.mrb[65].mxu0  ;;  %13766 = vmatmul.mubr.msk.f32.gmra.mrb[106].mxu0 %vm21656_vm15, %v20176_v45  ;;  %vm21668_vm15 = vmmov %vm21612_vm1  ;;  %v8916_v35 = vadd.f32 %v8915_v2, %v20228_v53 }
 0x65e   : > { %10680 = vmatprep.mubr.f32.mxu0 %v21414_v29  ;;  %v8918_v17 = vadd.f32 %v8917_v13, %v20228_v53 }
 0x65f   : > { %13745 = vmatmul.mubr.msk.f32.gmra.mrb[100].mxu1 %vm21657_vm13, %v20037_v28  ;;  %vm21669_vm13 = vmmov %vm21612_vm1  ;;  %v9075_v23 = vmax.f32 %v8916_v35, 0.0 }
 0x660   : > { %10484 = vmatprep.mubr.f32.mxu1 %v21414_v29  ;;  %v20192_v19 = vpop.f32.mrb[66].mxu0 }
 0x661   : > { %v20194_v21 = vpop.f32.mrb[67].mxu0  ;;  %13767 = vmatmul.mubr.msk.f32.gmra.mrb[108].mxu0 %vm21658_vm8, %v20187_v55  ;;  %vm21670_vm8 = vmmov %vm21612_vm1 }
 0x662   : > { %10686 = vmatprep.mubr.f32.mxu0 %v21414_v29 }
 0x663   : > { %13746 = vmatmul.mubr.msk.f32.gmra.mrb[102].mxu1 %vm21659_vm4, %v20048_v3  ;;  %vm21671_vm4 = vmmov %vm21612_vm1  ;;  %v9076_v3 = vmax.f32 %v8918_v17, 0.0 }
 0x664   : > { %10490 = vmatprep.mubr.f32.mxu1 %v21414_v29  ;;  %v20207_v12 = vpop.f32.mrb[68].mxu0 }
 0x665   : > { %v20209_v22 = vpop.f32.mrb[69].mxu0  ;;  %13768 = vmatmul.mubr.msk.f32.gmra.mrb[110].mxu0 %vm21660_vm11, %v20202_v26  ;;  %vm21672_vm11 = vmmov %vm21612_vm1  ;;  %v8928_v38 = vadd.f32 %v20207_v12, %v20284_v0  ;;  %v20355_v12 = vld [vmem:[%s21292_s4 + $0x178] sm:$0xff] }
 0x666   : > { %10935 = vmatprep.mubr.f32.mxu0 %v21414_v29 }
 0x667   : > { %13747 = vmatmul.mubr.msk.f32.gmra.mrb[104].mxu1 %vm21661_vm5, %v20059_v37  ;;  %vm21673_vm5 = vmmov %vm21612_vm1 }
 0x668   : > { %10496 = vmatprep.mubr.f32.mxu1 %v21414_v29  ;;  %v20222_v16 = vpop.f32.mrb[70].mxu0 }
 0x669   : > { %v20224_v48 = vpop.f32.mrb[71].mxu0  ;;  %13789 = vmatmul.mubr.msk.f32.vlgmr.msra.gmra.mrb[96].mxu0 %vm21662_vm6, %v20217_v60  ;;  %vm21674_vm6 = vmmov %vm21612_vm1 }
 0x66a   : > { %14221 = vmatpush1.bf16.msk.msra.mxu0 %vm15742_vm0, %v18690_v10  ;;  %10941 = vmatprep.mubr.f32.mxu0 %v21414_v29  ;;  %v20248_v10 = vpop.permute.xlu1 %8792 }
 0x66b   : > { %13748 = vmatmul.mubr.msk.f32.gmra.mrb[106].mxu1 %vm21663_vm7, %v20076_v14  ;;  %v8922_v50 = vadd.f32 %v20192_v19, %v20248_v10  ;;  %v8924_v37 = vadd.f32 %v20194_v21, %v20248_v10  ;;  %v8930_v19 = vadd.f32 %v20209_v22, %v20284_v0  ;;  %vm21675_vm7 = vmmov %vm21612_vm1 }
 0x66c   : > { %10502 = vmatprep.mubr.f32.mxu1 %v21414_v29  ;;  %v20242_v4 = vpop.f32.mrb[72].mxu0 }
 0x66d   : > { %v20244_v5 = vpop.f32.mrb[73].mxu0  ;;  %13790 = vmatmul.mubr.msk.f32.gmra.mrb[98].mxu0 %vm21664_vm9, %v20237_v30  ;;  %vm21676_vm9 = vmmov %vm21612_vm1 }
 0x66e   : > { %10947 = vmatprep.mubr.f32.mxu0 %v21414_v29  ;;  %v20275_v54 = vpop.permute.xlu1 %9132 }
 0x66f   : > { %13749 = vmatmul.mubr.msk.f32.gmra.mrb[108].mxu1 %vm21665_vm2, %v20087_v51  ;;  %vm21677_vm2 = vmmov %vm21612_vm1 }
 0x670   : > { %10508 = vmatprep.mubr.f32.mxu1 %v21414_v29  ;;  %v20261_v18 = vpop.f32.mrb[74].mxu0 }
 0x671   : > { %v20263_v44 = vpop.f32.mrb[75].mxu0  ;;  %13791 = vmatmul.mubr.msk.f32.gmra.mrb[100].mxu0 %vm21666_vm12, %v20254_v7  ;;  %vm21678_vm12 = vmmov %vm21612_vm1 }
 0x672   : > { %10953 = vmatprep.mubr.f32.mxu0 %v21414_v29  ;;  %v20308_v49 = vpop.permute.xlu1 %8802 }
 0x673   : > { %13750 = vmatmul.mubr.msk.f32.gmra.mrb[110].mxu1 %vm21612_vm1, %v20098_v43  ;;  %v8934_v22 = vadd.f32 %v20222_v16, %v20308_v49  ;;  %v20374_v16 = vld [vmem:[%s21293_s5 + $0x140] sm:$0xff] }
 0x674   : > { %10757 = vmatprep.mubr.f32.mxu1 %v21414_v29  ;;  %v20278_v61 = vpop.f32.mrb[76].mxu0 }
 0x675   : > { %v20280_v8 = vpop.f32.mrb[77].mxu0  ;;  %13792 = vmatmul.mubr.msk.f32.gmra.mrb[102].mxu0 %vm21667_vm3, %v20271_v6  ;;  %vm21679_vm3 = vmmov %vm21612_vm1 }
 0x676   : > { %10959 = vmatprep.mubr.f32.mxu0 %v21414_v29  ;;  %v20338_v51 = vpop.permute.xlu1 %9142 }
 0x677   : > { %13771 = vmatmul.mubr.msk.f32.vlgmr.msra.gmra.mrb[96].mxu1 %vm21668_vm15, %v20109_v59  ;;  %vm21680_vm15 = vmmov %vm21612_vm1 }
 0x678   : > { %14215 = vmatpush1.bf16.msk.msra.mxu1 %vm15742_vm0, %v18845_v24  ;;  %10763 = vmatprep.mubr.f32.mxu1 %v21414_v29  ;;  %v20298_v58 = vpop.f32.mrb[78].mxu0  ;;  %v20315_v24 = vld [vmem:[%s21292_s4 + $0x168] sm:$0xff] }
 0x679   : > { %14224 = vmatprep.subr.msk.bf16.mxu1 %vm15742_vm0, %v18858_v42  ;;  %v20304_v41 = vpop.f32.mrb[79].mxu0  ;;  %13793 = vmatmul.mubr.msk.f32.gmra.mrb[104].mxu0 %vm21669_vm13, %v20290_v47  ;;  %v20319_v42 = vpop.permute.xlu0 %9137  ;;  %vm21681_vm13 = vmmov %vm21612_vm1 }
 0x67a   : > { %10965 = vmatprep.mubr.f32.mxu0 %v21414_v29 }
 0x67b   : > { %13772 = vmatmul.mubr.msk.f32.gmra.mrb[98].mxu1 %vm21670_vm8, %v20123_v25  ;;  %v9079_v25 = vmax.f32 %v8922_v50, 0.0  ;;  %vm21682_vm8 = vmmov %vm21612_vm1 }
 0x67c   : > { %10769 = vmatprep.mubr.f32.mxu1 %v21414_v29  ;;  %v9255_v63 = vpop.f32.mrb[80].mxu0 }
 0x67d   : > { %v9256_v57 = vadd.f32 %v9255_v63, %v20258_v36  ;;  %v9257_v28 = vpop.f32.mrb[81].mxu0  ;;  %13794 = vmatmul.mubr.msk.f32.gmra.mrb[106].mxu0 %vm21671_vm4, %v20315_v24  ;;  %v20346_v13 = vpop.permute.xlu0 %8807  ;;  %vm21683_vm4 = vmmov %vm21612_vm1 }
 0x67e   : > { %v9258_v11 = vadd.f32 %v9257_v28, %v20258_v36  ;;  %10971 = vmatprep.mubr.f32.mxu0 %v21414_v29 }
 0x67f   : > { %13773 = vmatmul.mubr.msk.f32.gmra.mrb[100].mxu1 %vm21672_vm11, %v20137_v31  ;;  %v9415_v14 = vadd.f32 %v9256_v57, %v9075_v23  ;;  %v9080_v31 = vmax.f32 %v8924_v37, 0.0  ;;  %v9083_v23 = vmax.f32 %v8928_v38, 0.0  ;;  %v9084_v37 = vmax.f32 %v8930_v19, 0.0  ;;  %vm21684_vm11 = vmmov %vm21612_vm1 }
 0x680   : > { %10775 = vmatprep.mubr.f32.mxu1 %v21414_v29  ;;  %v9416_v43 = vadd.f32 %v9258_v11, %v9076_v3  ;;  %v9261_v59 = vpop.f32.mrb[82].mxu0  ;;  %v20365_v3 = vpop.permute.xlu1 %8812 }
 0x681   : > { %v9262_v27 = vadd.f32 %v9261_v59, %v20275_v54  ;;  %v9263_v2 = vpop.f32.mrb[83].mxu0  ;;  %13795 = vmatmul.mubr.msk.f32.gmra.mrb[108].mxu0 %vm21673_vm5, %v20334_v33 }
 0x682   : > { %v9264_v21 = vadd.f32 %v9263_v2, %v20275_v54  ;;  %10977 = vmatprep.mubr.f32.mxu0 %v21414_v29 }
 0x683   : > { %13774 = vmatmul.mubr.msk.f32.gmra.mrb[102].mxu1 %vm21674_vm6, %v20148_v34  ;;  %v9419_v35 = vadd.f32 %v9262_v27, %v9079_v25  ;;  %v8936_v34 = vadd.f32 %v20224_v48, %v20308_v49  ;;  %v20378_v25 = vpop.permute.xlu0 %9147  ;;  %v9087_v27 = vmax.f32 %v8934_v22, 0.0 }
 0x684   : > { %10781 = vmatprep.mubr.f32.mxu1 %v21414_v29  ;;  %v9420_v17 = vadd.f32 %v9264_v21, %v9080_v31  ;;  %v9267_v63 = vpop.f32.mrb[84].mxu0  ;;  %v8942_v21 = vadd.f32 %v20244_v5, %v20346_v13 }
 0x685   : > { %v14230_v50 = vpack.c.bf16 %v9419_v35, %v9415_v14  ;;  %v9268_v57 = vadd.f32 %v9267_v63, %v20319_v42  ;;  %v9269_v28 = vpop.f32.mrb[85].mxu0  ;;  %13796 = vmatmul.mubr.msk.f32.gmra.mrb[110].mxu0 %vm21675_vm7, %v20355_v12 }
 0x686   : > { %v9270_v11 = vadd.f32 %v9269_v28, %v20319_v42  ;;  %11226 = vmatprep.mubr.f32.mxu0 %v21414_v29  ;;  %v14228_v59 = vpack.c.bf16 %v9420_v17, %v9416_v43  ;;  %v8940_v43 = vadd.f32 %v20242_v4, %v20346_v13  ;;  %v20395_v4 = vld [vmem:[%s21293_s5 + $0x148] sm:$0xff] }
 0x687   : > { %13775 = vmatmul.mubr.msk.f32.gmra.mrb[104].mxu1 %vm21676_vm9, %v20159_v40  ;;  %v9423_v14 = vadd.f32 %v9268_v57, %v9083_v23  ;;  %v9088_v40 = vmax.f32 %v8936_v34, 0.0  ;;  %v20401_v23 = vpop.permute.xlu1 %9152  ;;  %v8946_v57 = vadd.f32 %v20261_v18, %v20365_v3 }
 0x688   : > { %10787 = vmatprep.mubr.f32.mxu1 %v21414_v29  ;;  %v9424_v38 = vadd.f32 %v9270_v11, %v9084_v37  ;;  %v9273_v48 = vpop.f32.mrb[86].mxu0  ;;  %14229 = vmatprep.subr.bf16.mxu0 %v14228_v59  ;;  %v20409_v11 = vpop.permute.xlu0 %8817  ;;  %v9092_v59 = vmax.f32 %v8942_v21, 0.0 }
 0x689   : > { %v9274_v2 = vadd.f32 %v9273_v48, %v20338_v51  ;;  %v9275_v31 = vpop.f32.mrb[87].mxu0  ;;  %13817 = vmatmul.mubr.msk.f32.vlgmr.msra.gmra.mrb[96].mxu0 %vm21677_vm2, %v20374_v16  ;;  %v8948_v48 = vadd.f32 %v20263_v44, %v20365_v3 }
 0x68a   : > { %v20386_v19 = vpop.f32.mrb[64].mxu1  ;;  %v9276_v35 = vadd.f32 %v9275_v31, %v20338_v51  ;;  %14231 = vmatpush1.bf16.msra.mxu0 %v14230_v50  ;;  %11232 = vmatprep.mubr.f32.mxu0 %v21414_v29  ;;  %v9091_v50 = vmax.f32 %v8940_v43, 0.0 }
 0x68b   : > { %v20397_v17 = vpop.f32.mrb[65].mxu1  ;;  %13776 = vmatmul.mubr.msk.f32.gmra.mrb[106].mxu1 %vm21678_vm12, %v20176_v45  ;;  %v9427_v63 = vadd.f32 %v9274_v2, %v9087_v27 }
 0x68c   : > { %10793 = vmatprep.mubr.f32.mxu1 %v21414_v29  ;;  %v9428_v5 = vadd.f32 %v9276_v35, %v9088_v40  ;;  %v9279_v22 = vpop.f32.mrb[88].mxu0  ;;  %v9095_v40 = vmax.f32 %v8946_v57, 0.0 }
 0x68d   : > { %v14234_v28 = vpack.c.bf16 %v9427_v63, %v9423_v14  ;;  %v9280_v37 = vadd.f32 %v9279_v22, %v20378_v25  ;;  %v9281_v34 = vpop.f32.mrb[89].mxu0  ;;  %13818 = vmatmul.mubr.msk.f32.gmra.mrb[98].mxu0 %vm21612_vm1, %v20395_v4  ;;  %v20420_v14 = vld [vmem:[%s21293_s5 + $0x150] sm:$0xff]  ;;  %v20432_v63 = vpop.permute.xlu1 %8822  ;;  %v8954_v22 = vadd.f32 %v20280_v8, %v20409_v11 }
 0x68e   : > { %v20411_v45 = vpop.f32.mrb[66].mxu1  ;;  %v9282_v27 = vadd.f32 %v9281_v34, %v20378_v25  ;;  %11238 = vmatprep.mubr.f32.mxu0 %v21414_v29  ;;  %v14232_v18 = vpack.c.bf16 %v9428_v5, %v9424_v38  ;;  %v8952_v38 = vadd.f32 %v20278_v61, %v20409_v11  ;;  %v20443_v61 = vld [vmem:[%s21293_s5 + $0x158] sm:$0xff]  ;;  %v20449_v34 = vpop.permute.xlu0 %9157 }
 0x68f   : > { %v20422_v43 = vpop.f32.mrb[67].mxu1  ;;  %13777 = vmatmul.mubr.msk.f32.gmra.mrb[108].mxu1 %vm21679_vm3, %v20187_v55  ;;  %v9431_v2 = vadd.f32 %v9280_v37, %v9091_v50  ;;  %v9096_v55 = vmax.f32 %v8948_v48, 0.0  ;;  %v8958_v48 = vadd.f32 %v20298_v58, %v20432_v63  ;;  %v20466_v58 = vld [vmem:[%s21293_s5 + $0x160] sm:$0xff] }
 0x690   : > { %10799 = vmatprep.mubr.f32.mxu1 %v21414_v29  ;;  %v9432_v31 = vadd.f32 %v9282_v27, %v9092_v59  ;;  %v9285_v44 = vpop.f32.mrb[90].mxu0  ;;  %14233 = vmatprep.subr.bf16.mxu0 %v14232_v18 }
 0x691   : > { %v9286_v21 = vadd.f32 %v9285_v44, %v20401_v23  ;;  %v9287_v35 = vpop.f32.mrb[91].mxu0  ;;  %13819 = vmatmul.mubr.msk.f32.gmra.mrb[100].mxu0 %vm21680_vm15, %v20420_v14 }
 0x692   : > { %v20434_v5 = vpop.f32.mrb[68].mxu1  ;;  %v9288_v50 = vadd.f32 %v9287_v35, %v20401_v23  ;;  %14235 = vmatpush1.bf16.msra.mxu0 %v14234_v28  ;;  %11244 = vmatprep.mubr.f32.mxu0 %v21414_v29  ;;  %v9099_v28 = vmax.f32 %v8952_v38, 0.0 }
 0x693   : > { %v20445_v57 = vpop.f32.mrb[69].mxu1  ;;  %13778 = vmatmul.mubr.msk.f32.gmra.mrb[110].mxu1 %vm21681_vm13, %v20202_v26  ;;  %v9435_v37 = vadd.f32 %v9286_v21, %v9095_v40  ;;  %v9100_v26 = vmax.f32 %v8954_v22, 0.0  ;;  %v8960_v40 = vadd.f32 %v20304_v41, %v20432_v63  ;;  %v20472_v22 = vpop.permute.xlu1 %9162 }
 0x694   : > { %11048 = vmatprep.mubr.f32.mxu1 %v21414_v29  ;;  %v9436_v8 = vadd.f32 %v9288_v50, %v9096_v55  ;;  %v9291_v59 = vpop.f32.mrb[92].mxu0  ;;  %v9103_v50 = vmax.f32 %v8958_v48, 0.0 }
 0x695   : > { %v14238_v27 = vpack.c.bf16 %v9435_v37, %v9431_v2  ;;  %v9292_v18 = vadd.f32 %v9291_v59, %v20449_v34  ;;  %v9293_v44 = vpop.f32.mrb[93].mxu0  ;;  %13820 = vmatmul.mubr.msk.f32.gmra.mrb[102].mxu0 %vm21682_vm8, %v20443_v61  ;;  %v9104_v59 = vmax.f32 %v8960_v40, 0.0  ;;  %v20503_v40 = vld [vmem:[%s21293_s5 + $0x170] sm:$0xff] }
 0x696   : > { %v20457_v35 = vpop.f32.mrb[70].mxu1  ;;  %v9294_v21 = vadd.f32 %v9293_v44, %v20449_v34  ;;  %11250 = vmatprep.mubr.f32.mxu0 %v21414_v29  ;;  %v14236_v38 = vpack.c.bf16 %v9436_v8, %v9432_v31 }
 0x697   : > { %v20468_v2 = vpop.f32.mrb[71].mxu1  ;;  %13799 = vmatmul.mubr.msk.f32.vlgmr.msra.gmra.mrb[96].mxu1 %vm21683_vm4, %v20217_v60  ;;  %v9439_v55 = vadd.f32 %v9292_v18, %v9099_v28 }
 0x698   : > { %14227 = vmatpush1.bf16.msk.msra.mxu1 %vm15742_vm0, %v18877_v1  ;;  %11054 = vmatprep.mubr.f32.mxu1 %v21414_v29  ;;  %v9440_v41 = vadd.f32 %v9294_v21, %v9100_v26  ;;  %v9297_v31 = vpop.f32.mrb[94].mxu0  ;;  %vm21685_vm0 = vmmov %vm21612_vm1 }
 0x699   : > { %v9298_v37 = vadd.f32 %v9297_v31, %v20472_v22  ;;  %14237 = vmatprep.subr.bf16.mxu0 %v14236_v38  ;;  %v9299_v8 = vpop.f32.mrb[95].mxu0  ;;  %13821 = vmatmul.mubr.msk.f32.gmra.mrb[104].mxu0 %vm21684_vm11, %v20466_v58  ;;  %vm21686_vm5 = vmmov %vm21685_vm0  ;;  %v20518_v38 = vld [vmem:[%s21293_s5 + $0x178] sm:$0xff]  ;;  %v9029_v31 = vadd.f32 %v20386_v19, %v20228_v53  ;;  %v20551_v19 = vld [vmem:[%s21294_s6 + $0x88] sm:$0xff] }
 0x69a   : > { %v20481_v60 = vpop.f32.mrb[72].mxu1  ;;  %v9300_v28 = vadd.f32 %v9299_v8, %v20472_v22  ;;  %14239 = vmatpush1.bf16.msra.mxu0 %v14238_v27  ;;  %11256 = vmatprep.mubr.f32.mxu0 %v21414_v29  ;;  %vm21687_vm6 = vmmov %vm21685_vm0 }
 0x69b   : > { %v20490_v1 = vpop.f32.mrb[73].mxu1  ;;  %13800 = vmatmul.mubr.msk.f32.gmra.mrb[98].mxu1 %vm21685_vm0, %v20237_v30  ;;  %v9443_v48 = vadd.f32 %v9298_v37, %v9103_v50  ;;  %vm21688_vm7 = vmmov %vm21685_vm0  ;;  %v9031_v50 = vadd.f32 %v20397_v17, %v20228_v53  ;;  %v9077_v8 = vmax.f32 %v9029_v31, 0.0 }
 0x69c   : > { %11060 = vmatprep.mubr.f32.mxu1 %v21414_v29  ;;  %v9444_v18 = vadd.f32 %v9300_v28, %v9104_v59  ;;  %vm21689_vm9 = vmmov %vm21685_vm0  ;;  %v9037_v28 = vadd.f32 %v20422_v43, %v20248_v10 }
 0x69d   : > { %v14242_v44 = vpack.c.bf16 %v9443_v48, %v9439_v55  ;;  %13822 = vmatmul.mubr.msk.f32.gmra.mrb[106].mxu0 %vm21686_vm5, %v20488_v20  ;;  %vm21690_vm2 = vmmov %vm21685_vm0  ;;  %v9078_v59 = vmax.f32 %v9031_v50, 0.0  ;;  %v9043_v50 = vadd.f32 %v20445_v57, %v20284_v0 }
 0x69e   : > { %v20497_v27 = vpop.f32.mrb[74].mxu1  ;;  %11262 = vmatprep.mubr.f32.mxu0 %v21414_v29  ;;  %v14240_v26 = vpack.c.bf16 %v9444_v18, %v9440_v41  ;;  %v20534_v41 = vld [vmem:[%s21294_s6 + $0x80] sm:$0xff]  ;;  %vm21691_vm12 = vmmov %vm21685_vm0  ;;  %v9082_v31 = vmax.f32 %v9037_v28, 0.0  ;;  %v9049_v28 = vadd.f32 %v20468_v2, %v20308_v49 }
 0x69f   : > { %v20505_v21 = vpop.f32.mrb[75].mxu1  ;;  %13801 = vmatmul.mubr.msk.f32.gmra.mrb[100].mxu1 %vm21687_vm6, %v20254_v7  ;;  %vm21692_vm1 = vmmov %vm21685_vm0 }
 0x6a0   : > { %11066 = vmatprep.mubr.f32.mxu1 %v21414_v29  ;;  %14241 = vmatprep.subr.bf16.mxu0 %v14240_v26  ;;  %vm21693_vm3 = vmmov %vm21685_vm0 }
 0x6a1   : > { %13823 = vmatmul.mubr.msk.f32.gmra.mrb[108].mxu0 %vm21688_vm7, %v20503_v40  ;;  %vm21694_vm15 = vmmov %vm21685_vm0 }
 0x6a2   : > { %v20512_v30 = vpop.f32.mrb[76].mxu1  ;;  %14243 = vmatpush1.bf16.msra.mxu0 %v14242_v44  ;;  %11268 = vmatprep.mubr.f32.mxu0 %v21414_v29  ;;  %vm21695_vm13 = vmmov %vm21685_vm0 }
 0x6a3   : > { %v20520_v55 = vpop.f32.mrb[77].mxu1  ;;  %13802 = vmatmul.mubr.msk.f32.gmra.mrb[102].mxu1 %vm21689_vm9, %v20271_v6  ;;  %14261 = vmatprep.subr.bf16.mxu0 %v18699_v32  ;;  %vm21696_vm8 = vmmov %vm21685_vm0 }
 0x6a4   : > { %11072 = vmatprep.mubr.f32.mxu1 %v21414_v29  ;;  %vm21697_vm4 = vmmov %vm21685_vm0 }
 0x6a5   : > { %13824 = vmatmul.mubr.msk.f32.gmra.mrb[110].mxu0 %vm21690_vm2, %v20518_v38  ;;  %vm21698_vm11 = vmmov %vm21685_vm0 }
 0x6a6   : > { %v20528_v7 = vpop.f32.mrb[78].mxu1  ;;  %11517 = vmatprep.mubr.f32.mxu0 %v21414_v29  ;;  %vm21699_vm5 = vmmov %vm21685_vm0 }
 0x6a7   : > { %v20538_v6 = vpop.f32.mrb[79].mxu1  ;;  %13803 = vmatmul.mubr.msk.f32.gmra.mrb[104].mxu1 %vm21691_vm12, %v20290_v47  ;;  %v9035_v47 = vadd.f32 %v20411_v45, %v20248_v10  ;;  %vm21700_vm6 = vmmov %vm21685_vm0 }
 0x6a8   : > { %11078 = vmatprep.mubr.f32.mxu1 %v21414_v29  ;;  %vm21701_vm7 = vmmov %vm21685_vm0 }
 0x6a9   : > { %13843 = vmatmul.mubr.msk.f32.vlgmr.msra.gmra.mrb[96].mxu0 %vm8144_vm10, %v20534_v41  ;;  %v9081_v10 = vmax.f32 %v9035_v47, 0.0 }
 0x6aa   : > { %v9368_v37 = vpop.f32.mrb[80].mxu1  ;;  %11523 = vmatprep.mubr.f32.mxu0 %v21414_v29  ;;  %14263 = vmatpush1.bf16.msra.mxu0 %v18788_v56 }
 0x6ab   : > { %v9369_v53 = vadd.f32 %v9368_v37, %v20258_v36  ;;  %v9370_v17 = vpop.f32.mrb[81].mxu1  ;;  %13804 = vmatmul.mubr.msk.f32.gmra.mrb[106].mxu1 %vm21692_vm1, %v20315_v24  ;;  %14265 = vmatprep.subr.bf16.mxu0 %v18791_v62  ;;  %v20570_v24 = vld [vmem:[%s21294_s6 + $0x90] sm:$0xff] }
 0x6ac   : > { %v9371_v48 = vadd.f32 %v9370_v17, %v20258_v36  ;;  %11084 = vmatprep.mubr.f32.mxu1 %v21414_v29  ;;  %v9041_v36 = vadd.f32 %v20434_v5, %v20284_v0  ;;  %v9047_v0 = vadd.f32 %v20457_v35, %v20308_v49 }
 0x6ad   : > { %v9417_v18 = vadd.f32 %v9369_v53, %v9077_v8  ;;  %13844 = vmatmul.mubr.msk.f32.gmra.mrb[98].mxu0 %vm8144_vm10, %v20551_v19 }
 0x6ae   : > { %v9418_v45 = vadd.f32 %v9371_v48, %v9078_v59  ;;  %v9374_v44 = vpop.f32.mrb[82].mxu1  ;;  %11529 = vmatprep.mubr.f32.mxu0 %v21414_v29  ;;  %14267 = vmatpush1.bf16.msra.mxu0 %v18813_v15  ;;  %v9085_v53 = vmax.f32 %v9041_v36, 0.0  ;;  %v9086_v59 = vmax.f32 %v9043_v50, 0.0  ;;  %v9089_v49 = vmax.f32 %v9047_v0, 0.0 }
 0x6af   : > { %v9375_v43 = vadd.f32 %v9374_v44, %v20275_v54  ;;  %v9376_v26 = vpop.f32.mrb[83].mxu1  ;;  %13805 = vmatmul.mubr.msk.f32.gmra.mrb[108].mxu1 %vm21693_vm3, %v20334_v33  ;;  %v20588_v33 = vld [vmem:[%s21294_s6 + $0x98] sm:$0xff]  ;;  %v9090_v36 = vmax.f32 %v9049_v28, 0.0  ;;  %v9067_v28 = vadd.f32 %v20520_v55, %v20409_v11 }
 0x6b0   : > { %v9377_v37 = vadd.f32 %v9376_v26, %v20275_v54  ;;  %11090 = vmatprep.mubr.f32.mxu1 %v21414_v29 }
 0x6b1   : > { %v9421_v8 = vadd.f32 %v9375_v43, %v9081_v10  ;;  %13845 = vmatmul.mubr.msk.f32.gmra.mrb[100].mxu0 %vm8144_vm10, %v20570_v24  ;;  %v9055_v43 = vadd.f32 %v20490_v1, %v20346_v13 }
 0x6b2   : > { %v9422_v47 = vadd.f32 %v9377_v37, %v9082_v31  ;;  %v9380_v5 = vpop.f32.mrb[84].mxu1  ;;  %11535 = vmatprep.mubr.f32.mxu0 %v21414_v29 }
 0x6b3   : > { %v14246_v54 = vpack.c.bf16 %v9421_v8, %v9417_v18  ;;  %v9381_v57 = vadd.f32 %v9380_v5, %v20319_v42  ;;  %v9382_v17 = vpop.f32.mrb[85].mxu1  ;;  %13806 = vmatmul.mubr.msk.f32.gmra.mrb[110].mxu1 %vm21694_vm15, %v20355_v12  ;;  %v20605_v12 = vld [vmem:[%s21294_s6 + $0xa0] sm:$0xff]  ;;  %v9061_v5 = vadd.f32 %v20505_v21, %v20365_v3 }
 0x6b4   : > { %v9383_v48 = vadd.f32 %v9382_v17, %v20319_v42  ;;  %11339 = vmatprep.mubr.f32.mxu1 %v21414_v29  ;;  %v14244_v44 = vpack.c.bf16 %v9422_v47, %v9418_v45  ;;  %v9053_v42 = vadd.f32 %v20481_v60, %v20346_v13  ;;  %v9094_v47 = vmax.f32 %v9055_v43, 0.0 }
 0x6b5   : > { %v9425_v10 = vadd.f32 %v9381_v57, %v9085_v53  ;;  %13846 = vmatmul.mubr.msk.f32.gmra.mrb[102].mxu0 %vm8144_vm10, %v20588_v33 }
 0x6b6   : > { %v9426_v35 = vadd.f32 %v9383_v48, %v9086_v59  ;;  %v9386_v18 = vpop.f32.mrb[86].mxu1  ;;  %14245 = vmatprep.subr.bf16.mxu1 %v14244_v44  ;;  %11541 = vmatprep.mubr.f32.mxu0 %v21414_v29  ;;  %v9093_v37 = vmax.f32 %v9053_v42, 0.0  ;;  %v9098_v59 = vmax.f32 %v9061_v5, 0.0  ;;  %v9073_v42 = vadd.f32 %v20538_v6, %v20432_v63  ;;  %v20772_v5 = vpop.permute.xlu0 %11722 }
 0x6b7   : > { %v9387_v2 = vadd.f32 %v9386_v18, %v20338_v51  ;;  %v9388_v45 = vpop.f32.mrb[87].mxu1  ;;  %13827 = vmatmul.mubr.msk.f32.vlgmr.msra.gmra.mrb[96].mxu1 %vm21695_vm13, %v20374_v16  ;;  %v20622_v16 = vld [vmem:[%s21294_s6 + $0xa8] sm:$0xff] }
 0x6b8   : > { %v9389_v26 = vadd.f32 %v9388_v45, %v20338_v51  ;;  %14247 = vmatpush1.bf16.msra.mxu1 %v14246_v54  ;;  %11345 = vmatprep.mubr.f32.mxu1 %v21414_v29  ;;  %v9059_v51 = vadd.f32 %v20497_v27, %v20365_v3 }
 0x6b9   : > { %v9429_v31 = vadd.f32 %v9387_v2, %v9089_v49  ;;  %13847 = vmatmul.mubr.msk.f32.gmra.mrb[104].mxu0 %vm8144_vm10, %v20605_v12  ;;  %v9102_v49 = vmax.f32 %v9067_v28, 0.0 }
 0x6ba   : > { %v9430_v60 = vadd.f32 %v9389_v26, %v9090_v36  ;;  %v9392_v50 = vpop.f32.mrb[88].mxu1  ;;  %11547 = vmatprep.mubr.f32.mxu0 %v21414_v29  ;;  %v9097_v3 = vmax.f32 %v9059_v51, 0.0  ;;  %v9106_v26 = vmax.f32 %v9073_v42, 0.0 }
 0x6bb   : > { %v14250_v13 = vpack.c.bf16 %v9429_v31, %v9425_v10  ;;  %v9393_v1 = vadd.f32 %v9392_v50, %v20378_v25  ;;  %v9394_v8 = vpop.f32.mrb[89].mxu1  ;;  %13828 = vmatmul.mubr.msk.f32.gmra.mrb[98].mxu1 %vm21696_vm8, %v20395_v4  ;;  %v20639_v4 = vld [vmem:[%s21294_s6 + $0xb0] sm:$0xff] }
 0x6bc   : > { %v9395_v53 = vadd.f32 %v9394_v8, %v20378_v25  ;;  %11351 = vmatprep.mubr.f32.mxu1 %v21414_v29  ;;  %v14248_v0 = vpack.c.bf16 %v9430_v60, %v9426_v35  ;;  %v9065_v25 = vadd.f32 %v20512_v30, %v20409_v11 }
 0x6bd   : > { %v9433_v54 = vadd.f32 %v9393_v1, %v9093_v37  ;;  %13848 = vmatmul.mubr.msk.f32.gmra.mrb[106].mxu0 %vm8144_vm10, %v20622_v16  ;;  %v13868_v37 = vld [vmem:[%s21296_s8 + $0xc8] sm:$0xff] }
 0x6be   : > { %v9434_v27 = vadd.f32 %v9395_v53, %v9094_v47  ;;  %v9398_v57 = vpop.f32.mrb[90].mxu1  ;;  %14249 = vmatprep.subr.bf16.mxu1 %v14248_v0  ;;  %11553 = vmatprep.mubr.f32.mxu0 %v21414_v29  ;;  %v9101_v35 = vmax.f32 %v9065_v25, 0.0 }
 0x6bf   : > { %v9399_v21 = vadd.f32 %v9398_v57, %v20401_v23  ;;  %v9400_v17 = vpop.f32.mrb[91].mxu1  ;;  %13829 = vmatmul.mubr.msk.f32.gmra.mrb[100].mxu1 %vm21697_vm4, %v20420_v14  ;;  %v20656_v14 = vld [vmem:[%s21294_s6 + $0xb8] sm:$0xff] }
 0x6c0   : > { %v9401_v48 = vadd.f32 %v9400_v17, %v20401_v23  ;;  %14251 = vmatpush1.bf16.msra.mxu1 %v14250_v13  ;;  %11357 = vmatprep.mubr.f32.mxu1 %v21414_v29  ;;  %v9071_v23 = vadd.f32 %v20528_v7, %v20432_v63 }
 0x6c1   : > { %v9437_v44 = vadd.f32 %v9399_v21, %v9097_v3  ;;  %13849 = vmatmul.mubr.msk.f32.gmra.mrb[108].mxu0 %vm8144_vm10, %v20639_v4 }
 0x6c2   : > { %v9438_v30 = vadd.f32 %v9401_v48, %v9098_v59  ;;  %v9404_v10 = vpop.f32.mrb[92].mxu1  ;;  %11559 = vmatprep.mubr.f32.mxu0 %v21414_v29  ;;  %v9105_v63 = vmax.f32 %v9071_v23, 0.0 }
 0x6c3   : > { %v14254_v11 = vpack.c.bf16 %v9437_v44, %v9433_v54  ;;  %v9405_v55 = vadd.f32 %v9404_v10, %v20449_v34  ;;  %v9406_v18 = vpop.f32.mrb[93].mxu1  ;;  %13830 = vmatmul.mubr.msk.f32.gmra.mrb[102].mxu1 %vm21698_vm11, %v20443_v61  ;;  %v20673_v61 = vld [vmem:[%s21296_s8 + $0xc0] sm:$0xff]  ;;  %v20774_v54 = vpop.permute.xlu1 %11727 }
 0x6c4   : > { %v9407_v2 = vadd.f32 %v9406_v18, %v20449_v34  ;;  %11363 = vmatprep.mubr.f32.mxu1 %v21414_v29  ;;  %v14252_v45 = vpack.c.bf16 %v9438_v30, %v9434_v27  ;;  %v20776_v27 = vpop.permute.xlu0 %11844 }
 0x6c5   : > { %v9441_v36 = vadd.f32 %v9405_v55, %v9101_v35  ;;  %13850 = vmatmul.mubr.msk.f32.gmra.mrb[110].mxu0 %vm8144_vm10, %v20656_v14 }
 0x6c6   : > { %v9442_v7 = vadd.f32 %v9407_v2, %v9102_v49  ;;  %v9410_v43 = vpop.f32.mrb[94].mxu1  ;;  %14253 = vmatprep.subr.bf16.mxu1 %v14252_v45  ;;  %11970 = vmatprep.mubr.f32.mxu0 %v21414_v29 }
 0x6c7   : > { %v9411_v34 = vadd.f32 %v9410_v43, %v20472_v22  ;;  %v9412_v6 = vpop.f32.mrb[95].mxu1  ;;  %13831 = vmatmul.mubr.msk.f32.gmra.mrb[104].mxu1 %vm21685_vm0, %v20466_v58  ;;  %v20782_v3 = vpop.permute.xlu1 %11849 }
 0x6c8   : > { %v9413_v31 = vadd.f32 %v9412_v6, %v20472_v22  ;;  %14255 = vmatpush1.bf16.msra.mxu1 %v14254_v11  ;;  %11369 = vmatprep.mubr.f32.mxu1 %v21414_v29  ;;  %v13869_v22 = vld [vmem:[%s21296_s8 + $0xd0] sm:$0xff]  ;;  %v20788_v17 = vpop.permute.xlu0 %11732 }
 0x6c9   : > { %v9445_v60 = vadd.f32 %v9411_v34, %v9105_v63  ;;  %13883 = vmatmul.mubr.msk.f32.vlgmr.msra.gmra.mrb[112].mxu0 %vm7804_vm14, %v20673_v61 }
 0x6ca   : > { %v9446_v50 = vadd.f32 %v9413_v31, %v9106_v26  ;;  %11976 = vmatprep.mubr.f32.mxu0 %v21414_v29 }
 0x6cb   : > { %v14258_v51 = vpack.c.bf16 %v9445_v60, %v9441_v36  ;;  %13832 = vmatmul.mubr.msk.f32.gmra.mrb[106].mxu1 %vm21699_vm5, %v20488_v20  ;;  %v13870_v20 = vld [vmem:[%s21296_s8 + $0xd8] sm:$0xff]  ;;  %v20795_v44 = vpop.permute.xlu1 %11737 }
 0x6cc   : > { %11375 = vmatprep.mubr.f32.mxu1 %v21414_v29  ;;  %v14256_v58 = vpack.c.bf16 %v9446_v50, %v9442_v7  ;;  %v20798_v10 = vpop.permute.xlu0 %11854 }
 0x6cd   : > { %13884 = vmatmul.mubr.msk.f32.gmra.mrb[114].mxu0 %vm7804_vm14, %v13868_v37 }
 0x6ce   : > { %14257 = vmatprep.subr.bf16.mxu1 %v14256_v58  ;;  %11982 = vmatprep.mubr.f32.mxu0 %v21414_v29 }
 0x6cf   : > { %13833 = vmatmul.mubr.msk.f32.gmra.mrb[108].mxu1 %vm21700_vm6, %v20503_v40  ;;  %v13871_v40 = vld [vmem:[%s21296_s8 + $0xe0] sm:$0xff]  ;;  %v20804_v45 = vpop.permute.xlu1 %11859 }
 0x6d0   : > { %14259 = vmatpush1.bf16.msra.mxu1 %v14258_v51  ;;  %11381 = vmatprep.mubr.f32.mxu1 %v21414_v29  ;;  %v20808_v6 = vpop.permute.xlu0 %11742 }
 0x6d1   : > { %14269 = vmatprep.subr.bf16.mxu1 %v18873_v39  ;;  %13885 = vmatmul.mubr.msk.f32.gmra.mrb[116].mxu0 %vm7804_vm14, %v13869_v22 }
 0x6d2   : > { %11988 = vmatprep.mubr.f32.mxu0 %v21414_v29 }
 0x6d3   : > { %13834 = vmatmul.mubr.msk.f32.gmra.mrb[110].mxu1 %vm21701_vm7, %v20518_v38  ;;  %v13872_v38 = vld [vmem:[%s21296_s8 + $0xe8] sm:$0xff] }
 0x6d4   : > { %11630 = vmatprep.mubr.f32.mxu1 %v21414_v29 }
 0x6d5   : > { %13886 = vmatmul.mubr.msk.f32.gmra.mrb[118].mxu0 %vm7804_vm14, %v13870_v20 }
 0x6d6   : > { %11994 = vmatprep.mubr.f32.mxu0 %v21414_v29 }
 0x6d7   : > { %13851 = vmatmul.mubr.msk.f32.vlgmr.msra.gmra.mrb[96].mxu1 %vm8144_vm10, %v20534_v41  ;;  %v13873_v41 = vld [vmem:[%s21296_s8 + $0xf0] sm:$0xff] }
 0x6d8   : > { %11636 = vmatprep.mubr.f32.mxu1 %v21414_v29  ;;  %14271 = vmatpush1.bf16.msra.mxu1 %v18989_v46 }
 0x6d9   : > { %14273 = vmatprep.subr.bf16.mxu1 %v18994_v52  ;;  %13887 = vmatmul.mubr.msk.f32.gmra.mrb[120].mxu0 %vm7804_vm14, %v13871_v40 }
 0x6da   : > { %12000 = vmatprep.mubr.f32.mxu0 %v21414_v29 }
 0x6db   : > { %13852 = vmatmul.mubr.msk.f32.gmra.mrb[98].mxu1 %vm8144_vm10, %v20551_v19  ;;  %v13874_v19 = vld [vmem:[%s21296_s8 + $0xf8] sm:$0xff] }
 0x6dc   : > { %11642 = vmatprep.mubr.f32.mxu1 %v21414_v29  ;;  %14275 = vmatpush1.bf16.msra.mxu1 %v19007_v9 }
 0x6dd   : > { %13888 = vmatmul.mubr.msk.f32.gmra.mrb[122].mxu0 %vm7804_vm14, %v13872_v38 }
 0x6de   : > { %12006 = vmatprep.mubr.f32.mxu0 %v21414_v29 }
 0x6df   : > { %13853 = vmatmul.mubr.msk.f32.gmra.mrb[100].mxu1 %vm8144_vm10, %v20570_v24 }
 0x6e0   : > { %11648 = vmatprep.mubr.f32.mxu1 %v21414_v29 }
 0x6e1   : > { %13889 = vmatmul.mubr.msk.f32.gmra.mrb[124].mxu0 %vm7804_vm14, %v13873_v41 }
 0x6e2   : > { %12012 = vmatprep.mubr.f32.mxu0 %v21414_v29 }
 0x6e3   : > { %13854 = vmatmul.mubr.msk.f32.gmra.mrb[102].mxu1 %vm8144_vm10, %v20588_v33 }
 0x6e4   : > { %11654 = vmatprep.mubr.f32.mxu1 %v21414_v29 }
 0x6e5   : > { %13890 = vmatmul.mubr.msk.f32.gmra.mrb[126].mxu0 %vm7804_vm14, %v13874_v19 }
 0x6e6   : > { %12310 = vmatprep.mubr.f32.mxu0 %v21414_v29 }
 0x6e7   : > { %13855 = vmatmul.mubr.msk.f32.gmra.mrb[104].mxu1 %vm8144_vm10, %v20605_v12 }
 0x6e8   : > { %11660 = vmatprep.mubr.f32.mxu1 %v21414_v29 }
 0x6eb   : > { %13856 = vmatmul.mubr.msk.f32.gmra.mrb[106].mxu1 %vm8144_vm10, %v20622_v16 }
 0x6ec   : > { %11666 = vmatprep.mubr.f32.mxu1 %v21414_v29 }
 0x6ef   : > { %13857 = vmatmul.mubr.msk.f32.gmra.mrb[108].mxu1 %vm8144_vm10, %v20639_v4 }
 0x6f0   : > { %11672 = vmatprep.mubr.f32.mxu1 %v21414_v29 }
 0x6f3   : > { %13858 = vmatmul.mubr.msk.f32.gmra.mrb[110].mxu1 %vm8144_vm10, %v20656_v14 }
 0x6f4   : > { %12083 = vmatprep.mubr.f32.mxu1 %v21414_v29 }
 0x6f7   : > { %13891 = vmatmul.mubr.msk.f32.vlgmr.msra.gmra.mrb[112].mxu1 %vm7804_vm14, %v20673_v61 }
 0x6f8   : > { %12089 = vmatprep.mubr.f32.mxu1 %v21414_v29 }
 0x6fb   : > { %13892 = vmatmul.mubr.msk.f32.gmra.mrb[114].mxu1 %vm7804_vm14, %v13868_v37 }
 0x6fc   : > { %12095 = vmatprep.mubr.f32.mxu1 %v21414_v29 }
 0x6ff   : > { %13893 = vmatmul.mubr.msk.f32.gmra.mrb[116].mxu1 %vm7804_vm14, %v13869_v22 }
 0x700   : > { %12101 = vmatprep.mubr.f32.mxu1 %v21414_v29 }
 0x703   : > { %13894 = vmatmul.mubr.msk.f32.gmra.mrb[118].mxu1 %vm7804_vm14, %v13870_v20 }
 0x704   : > { %12107 = vmatprep.mubr.f32.mxu1 %v21414_v29 }
 0x707   : > { %13895 = vmatmul.mubr.msk.f32.gmra.mrb[120].mxu1 %vm7804_vm14, %v13871_v40 }
 0x708   : > { %12113 = vmatprep.mubr.f32.mxu1 %v21414_v29 }
 0x70b   : > { %13896 = vmatmul.mubr.msk.f32.gmra.mrb[122].mxu1 %vm7804_vm14, %v13872_v38 }
 0x70c   : > { %12119 = vmatprep.mubr.f32.mxu1 %v21414_v29 }
 0x70f   : > { %13897 = vmatmul.mubr.msk.f32.gmra.mrb[124].mxu1 %vm7804_vm14, %v13873_v41  ;;  %v20814_v41 = vpop.permute.xlu1 %11747 }
 0x710   : > { %12125 = vmatprep.mubr.f32.mxu1 %v21414_v29 }
 0x713   : > { %13898 = vmatmul.mubr.msk.f32.gmra.mrb[126].mxu1 %vm7804_vm14, %v13874_v19 }
 0x714   : > { %12423 = vmatprep.mubr.f32.mxu1 %v21414_v29 }
 0x77c   : > { %v11519_v24 = vpop.f32.mrb[96].mxu0 }
 0x77d   : > { %v11521_v33 = vpop.f32.mrb[97].mxu0  ;;  %v11760_v28 = vadd.f32 %v20772_v5, %v11519_v24 }
 0x77e   : > { %v11761_v30 = vadd.f32 %v20772_v5, %v11521_v33 }
 0x77f   : > { %v11792_v35 = vmax.f32 %v11760_v28, 0.0 }
 0x780   : > { %v11525_v12 = vpop.f32.mrb[98].mxu0  ;;  %v11793_v18 = vmax.f32 %v11761_v30, 0.0 }
 0x781   : > { %v11527_v16 = vpop.f32.mrb[99].mxu0  ;;  %v11764_v23 = vadd.f32 %v20774_v54, %v11525_v12 }
 0x782   : > { %v11765_v49 = vadd.f32 %v20774_v54, %v11527_v16 }
 0x783   : > { %v11796_v43 = vmax.f32 %v11764_v23, 0.0 }
 0x784   : > { %v11531_v13 = vpop.f32.mrb[100].mxu0  ;;  %v11797_v26 = vmax.f32 %v11765_v49, 0.0 }
 0x785   : > { %v11533_v1 = vpop.f32.mrb[101].mxu0  ;;  %v11768_v61 = vadd.f32 %v20788_v17, %v11531_v13  ;;  %v20818_v13 = vpop.permute.xlu0 %11864 }
 0x786   : > { %v11769_v31 = vadd.f32 %v20788_v17, %v11533_v1 }
 0x787   : > { %v11800_v58 = vmax.f32 %v11768_v61, 0.0 }
 0x788   : > { %v11537_v8 = vpop.f32.mrb[102].mxu0  ;;  %v11801_v19 = vmax.f32 %v11769_v31, 0.0 }
 0x789   : > { %v11539_v47 = vpop.f32.mrb[103].mxu0  ;;  %v11772_v22 = vadd.f32 %v20795_v44, %v11537_v8 }
 0x78a   : > { %v11773_v24 = vadd.f32 %v20795_v44, %v11539_v47 }
 0x78b   : > { %v11804_v30 = vmax.f32 %v11772_v22, 0.0 }
 0x78c   : > { %v11543_v53 = vpop.f32.mrb[104].mxu0 }
 0x78d   : > { %v11545_v0 = vpop.f32.mrb[105].mxu0  ;;  %v11776_v8 = vadd.f32 %v20808_v6, %v11543_v53 }
 0x78e   : > { %v11777_v47 = vadd.f32 %v20808_v6, %v11545_v0 }
 0x790   : > { %v20778_v57 = vpop.f32.mrb[106].mxu0 }
 0x791   : > { %v20780_v4 = vpop.f32.mrb[107].mxu0  ;;  %v11780_v53 = vadd.f32 %v20814_v41, %v20778_v57 }
 0x792   : > { %v11781_v31 = vadd.f32 %v20814_v41, %v20780_v4 }
 0x793   : > { %v11812_v22 = vmax.f32 %v11780_v53, 0.0 }
 0x794   : > { %v20784_v25 = vpop.f32.mrb[108].mxu0 }
 0x795   : > { %v20786_v21 = vpop.f32.mrb[109].mxu0 }
 0x798   : > { %v20790_v59 = vpop.f32.mrb[110].mxu0 }
 0x799   : > { %v20793_v48 = vpop.f32.mrb[111].mxu0 }
 0x79c   : > { %v11972_v14 = vpop.f32.mrb[112].mxu0 }
 0x79d   : > { %v11973_v11 = vadd.f32 %v11972_v14, %v20776_v27  ;;  %v11974_v55 = vpop.f32.mrb[113].mxu0 }
 0x79e   : > { %v11975_v42 = vadd.f32 %v11974_v55, %v20776_v27 }
 0x79f   : > { %v12132_v2 = vadd.f32 %v11973_v11, %v11792_v35  ;;  %v11805_v11 = vmax.f32 %v11773_v24, 0.0  ;;  %v11813_v24 = vmax.f32 %v11781_v31, 0.0 }
 0x7a0   : > { %v12133_v36 = vadd.f32 %v11975_v42, %v11793_v18  ;;  %v11978_v7 = vpop.f32.mrb[114].mxu0  ;;  %v20828_v42 = vpop.permute.xlu1 %11869 }
 0x7a1   : > { %v11979_v63 = vadd.f32 %v11978_v7, %v20782_v3  ;;  %v11980_v34 = vpop.f32.mrb[115].mxu0  ;;  %v11808_v7 = vmax.f32 %v11776_v8, 0.0 }
 0x7a2   : > { %v11981_v60 = vadd.f32 %v11980_v34, %v20782_v3  ;;  %v20833_v34 = vpop.permute.xlu0 %11752 }
 0x7a3   : > { %v12136_v50 = vadd.f32 %v11979_v63, %v11796_v43 }
 0x7a4   : > { %v12137_v37 = vadd.f32 %v11981_v60, %v11797_v26  ;;  %v11984_v51 = vpop.f32.mrb[116].mxu0  ;;  %v11809_v26 = vmax.f32 %v11777_v47, 0.0 }
 0x7a5   : > { %v14278_v20 = vpack.c.bf16 %v12136_v50, %v12132_v2  ;;  %v11985_v40 = vadd.f32 %v11984_v51, %v20798_v10  ;;  %v11986_v38 = vpop.f32.mrb[117].mxu0 }
 0x7a6   : > { %v11987_v33 = vadd.f32 %v11986_v38, %v20798_v10  ;;  %v14276_v12 = vpack.c.bf16 %v12137_v37, %v12133_v36 }
 0x7a7   : > { %v12140_v16 = vadd.f32 %v11985_v40, %v11800_v58 }
 0x7a8   : > { %v12141_v1 = vadd.f32 %v11987_v33, %v11801_v19  ;;  %v11990_v28 = vpop.f32.mrb[118].mxu0  ;;  %14277 = vmatprep.subr.bf16.mxu0 %v14276_v12  ;;  %v20845_v19 = vpop.permute.xlu1 %11757  ;;  %v11785_v33 = vadd.f32 %v20833_v34, %v20786_v21 }
 0x7a9   : > { %v11991_v14 = vadd.f32 %v11990_v28, %v20804_v45  ;;  %v11992_v35 = vpop.f32.mrb[119].mxu0  ;;  %14279 = vmatpush1.bf16.msra.mxu0 %v14278_v20  ;;  %v11784_v20 = vadd.f32 %v20833_v34, %v20784_v25  ;;  %v20854_v28 = vpop.permute.xlu0 %11874 }
 0x7aa   : > { %v20822_v23 = vpop.f32.mrb[96].mxu1  ;;  %v11993_v55 = vadd.f32 %v11992_v35, %v20804_v45  ;;  %v11817_v21 = vmax.f32 %v11785_v33, 0.0 }
 0x7ab   : > { %v20826_v18 = vpop.f32.mrb[97].mxu1  ;;  %v12144_v49 = vadd.f32 %v11991_v14, %v11804_v30  ;;  %v11816_v8 = vmax.f32 %v11784_v20, 0.0  ;;  %v11788_v14 = vadd.f32 %v20845_v19, %v20790_v59 }
 0x7ac   : > { %v12145_v2 = vadd.f32 %v11993_v55, %v11805_v11  ;;  %v11996_v36 = vpop.f32.mrb[120].mxu0 }
 0x7ad   : > { %v14282_v43 = vpack.c.bf16 %v12144_v49, %v12140_v16  ;;  %v11997_v61 = vadd.f32 %v11996_v36, %v20818_v13  ;;  %v11998_v63 = vpop.f32.mrb[121].mxu0  ;;  %v11789_v49 = vadd.f32 %v20845_v19, %v20793_v48 }
 0x7ae   : > { %v20835_v0 = vpop.f32.mrb[98].mxu1  ;;  %v11999_v60 = vadd.f32 %v11998_v63, %v20818_v13  ;;  %v14280_v50 = vpack.c.bf16 %v12145_v2, %v12141_v1  ;;  %v11820_v63 = vmax.f32 %v11788_v14, 0.0 }
 0x7af   : > { %v20840_v37 = vpop.f32.mrb[99].mxu1  ;;  %v12148_v51 = vadd.f32 %v11997_v61, %v11808_v7 }
 0x7b0   : > { %v12149_v58 = vadd.f32 %v11999_v60, %v11809_v26  ;;  %v12002_v57 = vpop.f32.mrb[122].mxu0  ;;  %14281 = vmatprep.subr.bf16.mxu0 %v14280_v50  ;;  %v11821_v50 = vmax.f32 %v11789_v49, 0.0 }
 0x7b1   : > { %v12003_v40 = vadd.f32 %v12002_v57, %v20828_v42  ;;  %v12004_v38 = vpop.f32.mrb[123].mxu0  ;;  %14283 = vmatpush1.bf16.msra.mxu0 %v14282_v43  ;;  %v20866_v43 = vpop.permute.xlu1 %11879 }
 0x7b2   : > { %v20847_v4 = vpop.f32.mrb[100].mxu1  ;;  %v12005_v12 = vadd.f32 %v12004_v38, %v20828_v42 }
 0x7b3   : > { %v20852_v16 = vpop.f32.mrb[101].mxu1  ;;  %v12152_v1 = vadd.f32 %v12003_v40, %v11812_v22 }
 0x7b4   : > { %v12153_v25 = vadd.f32 %v12005_v12, %v11813_v24  ;;  %v12008_v30 = vpop.f32.mrb[124].mxu0  ;;  %v20881_v24 = vld [vmem:[%s21294_s6 + $0xc0] sm:$0xff] }
 0x7b5   : > { %v14286_v35 = vpack.c.bf16 %v12152_v1, %v12148_v51  ;;  %v12009_v11 = vadd.f32 %v12008_v30, %v20854_v28  ;;  %v12010_v47 = vpop.f32.mrb[125].mxu0  ;;  %v20894_v1 = vld [vmem:[%s21294_s6 + $0xc8] sm:$0xff] }
 0x7b6   : > { %v20859_v55 = vpop.f32.mrb[102].mxu1  ;;  %v12011_v2 = vadd.f32 %v12010_v47, %v20854_v28  ;;  %v14284_v36 = vpack.c.bf16 %v12153_v25, %v12149_v58 }
 0x7b7   : > { %v20864_v7 = vpop.f32.mrb[103].mxu1  ;;  %v12156_v53 = vadd.f32 %v12009_v11, %v11816_v8  ;;  %v11763_v8 = vadd.f32 %v20772_v5, %v20826_v18  ;;  %v11767_v11 = vadd.f32 %v20774_v54, %v20840_v37 }
 0x7b8   : > { %v12157_v61 = vadd.f32 %v12011_v2, %v11817_v21  ;;  %v12014_v59 = vpop.f32.mrb[126].mxu0  ;;  %14285 = vmatprep.subr.bf16.mxu0 %v14284_v36  ;;  %v11770_v36 = vadd.f32 %v20788_v17, %v20847_v4 }
 0x7b9   : > { %v12015_v26 = vadd.f32 %v12014_v59, %v20866_v43  ;;  %v12016_v31 = vpop.f32.mrb[127].mxu0  ;;  %14287 = vmatpush1.bf16.msra.mxu0 %v14286_v35  ;;  %v11795_v18 = vmax.f32 %v11763_v8, 0.0  ;;  %v11799_v37 = vmax.f32 %v11767_v11, 0.0 }
 0x7ba   : > { %v20869_v60 = vpop.f32.mrb[104].mxu1  ;;  %v12017_v48 = vadd.f32 %v12016_v31, %v20866_v43  ;;  %v11802_v31 = vmax.f32 %v11770_v36, 0.0 }
 0x7bb   : > { %v20872_v51 = vpop.f32.mrb[105].mxu1  ;;  %v12160_v58 = vadd.f32 %v12015_v26, %v11820_v63  ;;  %v20941_v63 = vld [vmem:[%s21294_s6 + $0xe0] sm:$0xff] }
 0x7bc   : > { %v12161_v57 = vadd.f32 %v12017_v48, %v11821_v50  ;;  %v11774_v50 = vadd.f32 %v20795_v44, %v20859_v55  ;;  %v20955_v55 = vld [vmem:[%s21294_s6 + $0xe8] sm:$0xff] }
 0x7bd   : > { %v14290_v22 = vpack.c.bf16 %v12160_v58, %v12156_v53  ;;  %v11771_v53 = vadd.f32 %v20788_v17, %v20852_v16  ;;  %v11775_v58 = vadd.f32 %v20795_v44, %v20864_v7  ;;  %v11778_v44 = vadd.f32 %v20808_v6, %v20869_v60  ;;  %v20969_v60 = vld [vmem:[%s21294_s6 + $0xf0] sm:$0xff] }
 0x7be   : > { %v20874_v20 = vpop.f32.mrb[106].mxu1  ;;  %v14288_v40 = vpack.c.bf16 %v12161_v57, %v12157_v61 }
 0x7bf   : > { %v20876_v38 = vpop.f32.mrb[107].mxu1  ;;  %v11803_v48 = vmax.f32 %v11771_v53, 0.0 }
 0x7c0   : > { %14289 = vmatprep.subr.bf16.mxu0 %v14288_v40 }
 0x7c1   : > { %14291 = vmatpush1.bf16.msra.mxu0 %v14290_v22 }
 0x7c2   : > { %v20883_v33 = vpop.f32.mrb[108].mxu1  ;;  %14309 = vmatprep.subr.bf16.mxu0 %v18699_v32  ;;  %v11762_v32 = vadd.f32 %v20772_v5, %v20822_v23  ;;  %v11766_v23 = vadd.f32 %v20774_v54, %v20835_v0 }
 0x7c3   : > { %v20886_v12 = vpop.f32.mrb[109].mxu1 }
 0x7c4   : > { %13915 = vmatmul.mubr.msk.f32.vlgmr.msra.gmra.mrb[128].mxu0 %vm8144_vm10, %v20881_v24  ;;  %v11794_v14 = vmax.f32 %v11762_v32, 0.0  ;;  %v11798_v2 = vmax.f32 %v11766_v23, 0.0  ;;  %v11779_v23 = vadd.f32 %v20808_v6, %v20872_v51 }
 0x7c5   : > { %12316 = vmatprep.mubr.f32.mxu0 %v21414_v29  ;;  %14311 = vmatpush1.bf16.msra.mxu0 %v18788_v56  ;;  %v20912_v56 = vld [vmem:[%s21294_s6 + $0xd0] sm:$0xff] }
 0x7c6   : > { %v20897_v25 = vpop.f32.mrb[110].mxu1  ;;  %14313 = vmatprep.subr.bf16.mxu0 %v18791_v62 }
 0x7c7   : > { %v20902_v30 = vpop.f32.mrb[111].mxu1 }
 0x7c8   : > { %13916 = vmatmul.mubr.msk.f32.gmra.mrb[130].mxu0 %vm8144_vm10, %v20894_v1 }
 0x7c9   : > { %12322 = vmatprep.mubr.f32.mxu0 %v21414_v29  ;;  %14315 = vmatpush1.bf16.msra.mxu0 %v18813_v15  ;;  %v20927_v15 = vld [vmem:[%s21294_s6 + $0xd8] sm:$0xff] }
 0x7ca   : > { %v12085_v62 = vpop.f32.mrb[112].mxu1 }
 0x7cb   : > { %v12086_v35 = vadd.f32 %v12085_v62, %v20776_v27  ;;  %v12087_v5 = vpop.f32.mrb[113].mxu1  ;;  %v11806_v62 = vmax.f32 %v11774_v50, 0.0 }
 0x7cc   : > { %v12088_v47 = vadd.f32 %v12087_v5, %v20776_v27  ;;  %13917 = vmatmul.mubr.msk.f32.gmra.mrb[132].mxu0 %vm8144_vm10, %v20912_v56 }
 0x7cd   : > { %v12134_v21 = vadd.f32 %v12086_v35, %v11794_v14  ;;  %12328 = vmatprep.mubr.f32.mxu0 %v21414_v29  ;;  %v11807_v14 = vmax.f32 %v11775_v58, 0.0 }
 0x7ce   : > { %v12135_v0 = vadd.f32 %v12088_v47, %v11795_v18  ;;  %v12091_v49 = vpop.f32.mrb[114].mxu1  ;;  %v11810_v47 = vmax.f32 %v11778_v44, 0.0 }
 0x7cf   : > { %v12092_v54 = vadd.f32 %v12091_v49, %v20782_v3  ;;  %v12093_v27 = vpop.f32.mrb[115].mxu1  ;;  %v11783_v49 = vadd.f32 %v20814_v41, %v20876_v38 }
 0x7d0   : > { %v12094_v61 = vadd.f32 %v12093_v27, %v20782_v3  ;;  %13918 = vmatmul.mubr.msk.f32.gmra.mrb[134].mxu0 %vm8144_vm10, %v20927_v15 }
 0x7d1   : > { %v12138_v59 = vadd.f32 %v12092_v54, %v11798_v2  ;;  %12334 = vmatprep.mubr.f32.mxu0 %v21414_v29 }
 0x7d2   : > { %v12139_v4 = vadd.f32 %v12094_v61, %v11799_v37  ;;  %v12097_v26 = vpop.f32.mrb[116].mxu1  ;;  %v11815_v61 = vmax.f32 %v11783_v49, 0.0 }
 0x7d3   : > { %v14294_v17 = vpack.c.bf16 %v12138_v59, %v12134_v21  ;;  %v12098_v3 = vadd.f32 %v12097_v26, %v20798_v10  ;;  %v12099_v16 = vpop.f32.mrb[117].mxu1  ;;  %v11782_v21 = vadd.f32 %v20814_v41, %v20874_v20  ;;  %v20983_v20 = vld [vmem:[%s21294_s6 + $0xf8] sm:$0xff]  ;;  %v11786_v41 = vadd.f32 %v20833_v34, %v20883_v33  ;;  %v20997_v33 = vld [vmem:[%s21296_s8 + $0x100] sm:$0xff] }
 0x7d4   : > { %v12100_v57 = vadd.f32 %v12099_v16, %v20798_v10  ;;  %v14292_v22 = vpack.c.bf16 %v12139_v4, %v12135_v0  ;;  %13919 = vmatmul.mubr.msk.f32.gmra.mrb[136].mxu0 %vm8144_vm10, %v20941_v63  ;;  %v11811_v0 = vmax.f32 %v11779_v23, 0.0  ;;  %v11787_v59 = vadd.f32 %v20833_v34, %v20886_v12 }
 0x7d5   : > { %v12142_v40 = vadd.f32 %v12098_v3, %v11802_v31  ;;  %12340 = vmatprep.mubr.f32.mxu0 %v21414_v29  ;;  %v11814_v53 = vmax.f32 %v11782_v21, 0.0  ;;  %v11790_v3 = vadd.f32 %v20845_v19, %v20897_v25  ;;  %v13932_v25 = vld [vmem:[%s21296_s8 + $0x108] sm:$0xff] }
 0x7d6   : > { %v12143_v32 = vadd.f32 %v12100_v57, %v11803_v48  ;;  %v12103_v8 = vpop.f32.mrb[118].mxu1  ;;  %14293 = vmatprep.subr.bf16.mxu1 %v14292_v22  ;;  %v11819_v16 = vmax.f32 %v11787_v59, 0.0  ;;  %v11791_v48 = vadd.f32 %v20845_v19, %v20902_v30 }
 0x7d7   : > { %v12104_v10 = vadd.f32 %v12103_v8, %v20804_v45  ;;  %v12105_v7 = vpop.f32.mrb[119].mxu1  ;;  %14295 = vmatpush1.bf16.msra.mxu1 %v14294_v17  ;;  %v11818_v17 = vmax.f32 %v11786_v41, 0.0  ;;  %v11822_v8 = vmax.f32 %v11790_v3, 0.0 }
 0x7d8   : > { %v12106_v35 = vadd.f32 %v12105_v7, %v20804_v45  ;;  %13920 = vmatmul.mubr.msk.f32.gmra.mrb[138].mxu0 %vm8144_vm10, %v20955_v55 }
 0x7d9   : > { %v12146_v5 = vadd.f32 %v12104_v10, %v11806_v62  ;;  %12346 = vmatprep.mubr.f32.mxu0 %v21414_v29  ;;  %v13933_v10 = vld [vmem:[%s21296_s8 + $0x110] sm:$0xff] }
 0x7da   : > { %v12147_v18 = vadd.f32 %v12106_v35, %v11807_v14  ;;  %v12109_v11 = vpop.f32.mrb[120].mxu1  ;;  %v13935_v35 = vld [vmem:[%s21296_s8 + $0x120] sm:$0xff] }
 0x7db   : > { %v14298_v6 = vpack.c.bf16 %v12146_v5, %v12142_v40  ;;  %v12110_v45 = vadd.f32 %v12109_v11, %v20818_v13  ;;  %v12111_v51 = vpop.f32.mrb[121].mxu1 }
 0x7dc   : > { %v12112_v2 = vadd.f32 %v12111_v51, %v20818_v13  ;;  %v14296_v36 = vpack.c.bf16 %v12147_v18, %v12143_v32  ;;  %13921 = vmatmul.mubr.msk.f32.gmra.mrb[140].mxu0 %vm8144_vm10, %v20969_v60 }
 0x7dd   : > { %v12150_v54 = vadd.f32 %v12110_v45, %v11810_v47  ;;  %12352 = vmatprep.mubr.f32.mxu0 %v21414_v29  ;;  %v21092_v47 = vpop.permute.xlu1 %12189 }
 0x7de   : > { %v12151_v27 = vadd.f32 %v12112_v2, %v11811_v0  ;;  %v12115_v37 = vpop.f32.mrb[122].mxu1  ;;  %14297 = vmatprep.subr.bf16.mxu1 %v14296_v36 }
 0x7df   : > { %v12116_v13 = vadd.f32 %v12115_v37, %v20828_v42  ;;  %v12117_v38 = vpop.f32.mrb[123].mxu1  ;;  %14299 = vmatpush1.bf16.msra.mxu1 %v14298_v6 }
 0x7e0   : > { %v12118_v4 = vadd.f32 %v12117_v38, %v20828_v42  ;;  %13922 = vmatmul.mubr.msk.f32.gmra.mrb[142].mxu0 %vm8144_vm10, %v20983_v20 }
 0x7e1   : > { %v12154_v26 = vadd.f32 %v12116_v13, %v11814_v53  ;;  %12650 = vmatprep.mubr.f32.mxu0 %v21414_v29 }
 0x7e2   : > { %v12155_v31 = vadd.f32 %v12118_v4, %v11815_v61  ;;  %v12121_v50 = vpop.f32.mrb[124].mxu1 }
 0x7e3   : > { %v14302_v34 = vpack.c.bf16 %v12154_v26, %v12150_v54  ;;  %v12122_v42 = vadd.f32 %v12121_v50, %v20854_v28  ;;  %v12123_v12 = vpop.f32.mrb[125].mxu1 }
 0x7e4   : > { %v12124_v58 = vadd.f32 %v12123_v12, %v20854_v28  ;;  %v14300_v57 = vpack.c.bf16 %v12155_v31, %v12151_v27  ;;  %13947 = vmatmul.mubr.msk.f32.vlgmr.msra.gmra.mrb[144].mxu0 %vm7804_vm14, %v20997_v33  ;;  %v11823_v28 = vmax.f32 %v11791_v48, 0.0 }
 0x7e5   : > { %v12158_v22 = vadd.f32 %v12122_v42, %v11818_v17  ;;  %12656 = vmatprep.mubr.f32.mxu0 %v21414_v29 }
 0x7e6   : > { %v12159_v40 = vadd.f32 %v12124_v58, %v11819_v16  ;;  %v12127_v32 = vpop.f32.mrb[126].mxu1  ;;  %14301 = vmatprep.subr.bf16.mxu1 %v14300_v57 }
 0x7e7   : > { %v12128_v62 = vadd.f32 %v12127_v32, %v20866_v43  ;;  %v12129_v19 = vpop.f32.mrb[127].mxu1  ;;  %14303 = vmatpush1.bf16.msra.mxu1 %v14302_v34 }
 0x7e8   : > { %v12130_v30 = vadd.f32 %v12129_v19, %v20866_v43  ;;  %13948 = vmatmul.mubr.msk.f32.gmra.mrb[146].mxu0 %vm7804_vm14, %v13932_v25  ;;  %v13934_v43 = vld [vmem:[%s21296_s8 + $0x118] sm:$0xff] }
 0x7e9   : > { %v12162_v44 = vadd.f32 %v12128_v62, %v11822_v8  ;;  %12662 = vmatprep.mubr.f32.mxu0 %v21414_v29 }
 0x7ea   : > { %v12163_v7 = vadd.f32 %v12130_v30, %v11823_v28 }
 0x7eb   : > { %v14306_v14 = vpack.c.bf16 %v12162_v44, %v12158_v22 }
 0x7ec   : > { %v14304_v23 = vpack.c.bf16 %v12163_v7, %v12159_v40  ;;  %13949 = vmatmul.mubr.msk.f32.gmra.mrb[148].mxu0 %vm7804_vm14, %v13933_v10 }
 0x7ed   : > { %12668 = vmatprep.mubr.f32.mxu0 %v21414_v29 }
 0x7ee   : > { %14305 = vmatprep.subr.bf16.mxu1 %v14304_v23 }
 0x7ef   : > { %14307 = vmatpush1.bf16.msra.mxu1 %v14306_v14 }
 0x7f0   : > { %14317 = vmatprep.subr.bf16.mxu1 %v18873_v39  ;;  %13950 = vmatmul.mubr.msk.f32.gmra.mrb[150].mxu0 %vm7804_vm14, %v13934_v43  ;;  %v13936_v39 = vld [vmem:[%s21296_s8 + $0x128] sm:$0xff] }
 0x7f1   : > { %12674 = vmatprep.mubr.f32.mxu0 %v21414_v29 }
 0x7f2   : > { %13923 = vmatmul.mubr.msk.f32.vlgmr.msra.gmra.mrb[128].mxu1 %vm8144_vm10, %v20881_v24 }
 0x7f3   : > { %12429 = vmatprep.mubr.f32.mxu1 %v21414_v29  ;;  %14319 = vmatpush1.bf16.msra.mxu1 %v18989_v46  ;;  %v13937_v46 = vld [vmem:[%s21296_s8 + $0x130] sm:$0xff] }
 0x7f4   : > { %14321 = vmatprep.subr.bf16.mxu1 %v18994_v52  ;;  %13951 = vmatmul.mubr.msk.f32.gmra.mrb[152].mxu0 %vm7804_vm14, %v13935_v35  ;;  %v13938_v52 = vld [vmem:[%s21296_s8 + $0x138] sm:$0xff] }
 0x7f5   : > { %12680 = vmatprep.mubr.f32.mxu0 %v21414_v29 }
 0x7f6   : > { %13924 = vmatmul.mubr.msk.f32.gmra.mrb[130].mxu1 %vm8144_vm10, %v20894_v1 }
 0x7f7   : > { %12435 = vmatprep.mubr.f32.mxu1 %v21414_v29  ;;  %14323 = vmatpush1.bf16.msra.mxu1 %v19007_v9 }
 0x7f8   : > { %13952 = vmatmul.mubr.msk.f32.gmra.mrb[154].mxu0 %vm7804_vm14, %v13936_v39 }
 0x7f9   : > { %12686 = vmatprep.mubr.f32.mxu0 %v21414_v29 }
 0x7fa   : > { %13925 = vmatmul.mubr.msk.f32.gmra.mrb[132].mxu1 %vm8144_vm10, %v20912_v56 }
 0x7fb   : > { %12441 = vmatprep.mubr.f32.mxu1 %v21414_v29 }
 0x7fc   : > { %13953 = vmatmul.mubr.msk.f32.gmra.mrb[156].mxu0 %vm7804_vm14, %v13937_v46 }
 0x7fd   : > { %12692 = vmatprep.mubr.f32.mxu0 %v21414_v29 }
 0x7fe   : > { %13926 = vmatmul.mubr.msk.f32.gmra.mrb[134].mxu1 %vm8144_vm10, %v20927_v15 }
 0x7ff   : > { %12447 = vmatprep.mubr.f32.mxu1 %v21414_v29 }
 0x800   : > { %13954 = vmatmul.mubr.msk.f32.gmra.mrb[158].mxu0 %vm7804_vm14, %v13938_v52 }
 0x801   : > { %12922 = vmatprep.mubr.f32.mxu0 %v21414_v29 }
 0x802   : > { %13927 = vmatmul.mubr.msk.f32.gmra.mrb[136].mxu1 %vm8144_vm10, %v20941_v63 }
 0x803   : > { %12453 = vmatprep.mubr.f32.mxu1 %v21414_v29 }
 0x806   : > { %13928 = vmatmul.mubr.msk.f32.gmra.mrb[138].mxu1 %vm8144_vm10, %v20955_v55 }
 0x807   : > { %12459 = vmatprep.mubr.f32.mxu1 %v21414_v29 }
 0x80a   : > { %13929 = vmatmul.mubr.msk.f32.gmra.mrb[140].mxu1 %vm8144_vm10, %v20969_v60  ;;  %v21090_v60 = vpop.permute.xlu0 %12184 }
 0x80b   : > { %12465 = vmatprep.mubr.f32.mxu1 %v21414_v29 }
 0x80e   : > { %13930 = vmatmul.mubr.msk.f32.gmra.mrb[142].mxu1 %vm8144_vm10, %v20983_v20  ;;  %v21094_v21 = vpop.permute.xlu0 %12524 }
 0x80f   : > { %12763 = vmatprep.mubr.f32.mxu1 %v21414_v29 }
 0x812   : > { %13955 = vmatmul.mubr.msk.f32.vlgmr.msra.gmra.mrb[144].mxu1 %vm7804_vm14, %v20997_v33  ;;  %v21106_v49 = vpop.permute.xlu0 %12194 }
 0x813   : > { %12769 = vmatprep.mubr.f32.mxu1 %v21414_v29 }
 0x816   : > { %13956 = vmatmul.mubr.msk.f32.gmra.mrb[146].mxu1 %vm7804_vm14, %v13932_v25  ;;  %v21116_v37 = vpop.permute.xlu0 %12534 }
 0x817   : > { %12775 = vmatprep.mubr.f32.mxu1 %v21414_v29 }
 0x81a   : > { %13957 = vmatmul.mubr.msk.f32.gmra.mrb[148].mxu1 %vm7804_vm14, %v13933_v10  ;;  %v21126_v16 = vpop.permute.xlu0 %12204 }
 0x81b   : > { %12781 = vmatprep.mubr.f32.mxu1 %v21414_v29 }
 0x81e   : > { %13958 = vmatmul.mubr.msk.f32.gmra.mrb[150].mxu1 %vm7804_vm14, %v13934_v43  ;;  %v21136_v43 = vpop.permute.xlu0 %12544 }
 0x81f   : > { %12787 = vmatprep.mubr.f32.mxu1 %v21414_v29 }
 0x822   : > { %13959 = vmatmul.mubr.msk.f32.gmra.mrb[152].mxu1 %vm7804_vm14, %v13935_v35 }
 0x823   : > { %12793 = vmatprep.mubr.f32.mxu1 %v21414_v29 }
 0x826   : > { %13960 = vmatmul.mubr.msk.f32.gmra.mrb[154].mxu1 %vm7804_vm14, %v13936_v39 }
 0x827   : > { %12799 = vmatprep.mubr.f32.mxu1 %v21414_v29 }
 0x82a   : > { %13961 = vmatmul.mubr.msk.f32.gmra.mrb[156].mxu1 %vm7804_vm14, %v13937_v46 }
 0x82b   : > { %12805 = vmatprep.mubr.f32.mxu1 %v21414_v29 }
 0x82e   : > { %13962 = vmatmul.mubr.msk.f32.gmra.mrb[158].mxu1 %vm7804_vm14, %v13938_v52 }
 0x82f   : > { %12993 = vmatprep.mubr.f32.mxu1 %v21414_v29  ;;  %v21100_v29 = vpop.permute.xlu1 %12529 }
 0x833   : > { %v21113_v20 = vpop.permute.xlu1 %12199 }
 0x837   : > { %v21122_v31 = vpop.permute.xlu1 %12539 }
 0x83b   : > { %v21132_v30 = vpop.permute.xlu1 %12209 }
 0x897   : > { %v12312_v9 = vpop.f32.mrb[128].mxu0 }
 0x898   : > { %v12314_v24 = vpop.f32.mrb[129].mxu0  ;;  %v12313_v36 = vadd.f32 %v12312_v9, %v21090_v60 }
 0x899   : > { %v12315_v27 = vadd.f32 %v12314_v24, %v21090_v60 }
 0x89a   : > { %v12472_v41 = vmax.f32 %v12313_v36, 0.0  ;;  %v21146_v36 = vpop.permute.xlu1 %12549 }
 0x89b   : > { %v12318_v1 = vpop.f32.mrb[130].mxu0  ;;  %v12473_v59 = vmax.f32 %v12315_v27, 0.0 }
 0x89c   : > { %v12320_v56 = vpop.f32.mrb[131].mxu0  ;;  %v12319_v13 = vadd.f32 %v12318_v1, %v21092_v47 }
 0x89d   : > { %v12321_v4 = vadd.f32 %v12320_v56, %v21092_v47 }
 0x89e   : > { %v12476_v3 = vmax.f32 %v12319_v13, 0.0 }
 0x89f   : > { %v12324_v15 = vpop.f32.mrb[132].mxu0  ;;  %v12477_v48 = vmax.f32 %v12321_v4, 0.0 }
 0x8a0   : > { %v12326_v63 = vpop.f32.mrb[133].mxu0  ;;  %v12325_v34 = vadd.f32 %v12324_v15, %v21106_v49 }
 0x8a1   : > { %v12327_v58 = vadd.f32 %v12326_v63, %v21106_v49 }
 0x8a2   : > { %v12480_v32 = vmax.f32 %v12325_v34, 0.0 }
 0x8a3   : > { %v12330_v55 = vpop.f32.mrb[134].mxu0  ;;  %v12481_v44 = vmax.f32 %v12327_v58, 0.0 }
 0x8a4   : > { %v12332_v5 = vpop.f32.mrb[135].mxu0  ;;  %v12331_v8 = vadd.f32 %v12330_v55, %v21113_v20 }
 0x8a5   : > { %v12333_v10 = vadd.f32 %v12332_v5, %v21113_v20 }
 0x8a6   : > { %v12484_v46 = vmax.f32 %v12331_v8, 0.0 }
 0x8a7   : > { %v12336_v18 = vpop.f32.mrb[136].mxu0  ;;  %v12485_v56 = vmax.f32 %v12333_v10, 0.0 }
 0x8a8   : > { %v12338_v11 = vpop.f32.mrb[137].mxu0  ;;  %v12337_v52 = vadd.f32 %v12336_v18, %v21126_v16 }
 0x8a9   : > { %v12339_v15 = vadd.f32 %v12338_v11, %v21126_v16 }
 0x8ab   : > { %v21096_v6 = vpop.f32.mrb[138].mxu0  ;;  %v12489_v4 = vmax.f32 %v12339_v15, 0.0 }
 0x8ac   : > { %v21098_v45 = vpop.f32.mrb[139].mxu0  ;;  %v12343_v18 = vadd.f32 %v21096_v6, %v21132_v30 }
 0x8af   : > { %v21102_v51 = vpop.f32.mrb[140].mxu0 }
 0x8b0   : > { %v21104_v0 = vpop.f32.mrb[141].mxu0 }
 0x8b3   : > { %v21108_v2 = vpop.f32.mrb[142].mxu0 }
 0x8b4   : > { %v21111_v54 = vpop.f32.mrb[143].mxu0 }
 0x8b7   : > { %v12652_v53 = vpop.f32.mrb[144].mxu0 }
 0x8b8   : > { %v12653_v38 = vadd.f32 %v12652_v53, %v21094_v21  ;;  %v12654_v61 = vpop.f32.mrb[145].mxu0 }
 0x8b9   : > { %v12655_v26 = vadd.f32 %v12654_v61, %v21094_v21 }
 0x8ba   : > { %v12812_v33 = vadd.f32 %v12653_v38, %v12472_v41  ;;  %v12488_v41 = vmax.f32 %v12337_v52, 0.0 }
 0x8bb   : > { %v12813_v50 = vadd.f32 %v12655_v26, %v12473_v59  ;;  %v12658_v17 = vpop.f32.mrb[146].mxu0  ;;  %v21151_v59 = vpop.permute.xlu0 %12214  ;;  %v12345_v26 = vadd.f32 %v21098_v45, %v21132_v30 }
 0x8bc   : > { %v12659_v42 = vadd.f32 %v12658_v17, %v21100_v29  ;;  %v12660_v12 = vpop.f32.mrb[147].mxu0 }
 0x8bd   : > { %v12661_v57 = vadd.f32 %v12660_v12, %v21100_v29  ;;  %v12349_v12 = vadd.f32 %v21102_v51, %v21151_v59 }
 0x8be   : > { %v12816_v22 = vadd.f32 %v12659_v42, %v12476_v3  ;;  %v12492_v42 = vmax.f32 %v12343_v18, 0.0 }
 0x8bf   : > { %v12817_v25 = vadd.f32 %v12661_v57, %v12477_v48  ;;  %v12664_v40 = vpop.f32.mrb[148].mxu0  ;;  %v21163_v57 = vpop.permute.xlu1 %12219  ;;  %v12496_v51 = vmax.f32 %v12349_v12, 0.0 }
 0x8c0   : > { %v14326_v62 = vpack.c.bf16 %v12816_v22, %v12812_v33  ;;  %v12665_v19 = vadd.f32 %v12664_v40, %v21116_v37  ;;  %v12666_v28 = vpop.f32.mrb[149].mxu0  ;;  %v12493_v22 = vmax.f32 %v12345_v26, 0.0 }
 0x8c1   : > { %v12667_v7 = vadd.f32 %v12666_v28, %v21116_v37  ;;  %v14324_v14 = vpack.c.bf16 %v12817_v25, %v12813_v50  ;;  %v12351_v25 = vadd.f32 %v21104_v0, %v21151_v59  ;;  %v12357_v0 = vadd.f32 %v21111_v54, %v21163_v57 }
 0x8c2   : > { %v12820_v23 = vadd.f32 %v12665_v19, %v12480_v32 }
 0x8c3   : > { %v12821_v35 = vadd.f32 %v12667_v7, %v12481_v44  ;;  %v12670_v39 = vpop.f32.mrb[150].mxu0  ;;  %14325 = vmatprep.subr.bf16.mxu0 %v14324_v14  ;;  %v12355_v44 = vadd.f32 %v21108_v2, %v21163_v57 }
 0x8c4   : > { %v12671_v9 = vadd.f32 %v12670_v39, %v21122_v31  ;;  %v12672_v24 = vpop.f32.mrb[151].mxu0  ;;  %14327 = vmatpush1.bf16.msra.mxu0 %v14326_v62  ;;  %v21168_v62 = vpop.permute.xlu0 %12554 }
 0x8c5   : > { %v21140_v1 = vpop.f32.mrb[128].mxu1  ;;  %v12673_v63 = vadd.f32 %v12672_v24, %v21122_v31  ;;  %v21176_v24 = vpop.permute.xlu1 %12559  ;;  %v12500_v2 = vmax.f32 %v12355_v44, 0.0 }
 0x8c6   : > { %v21144_v55 = vpop.f32.mrb[129].mxu1  ;;  %v12824_v5 = vadd.f32 %v12671_v9, %v12484_v46 }
 0x8c7   : > { %v12825_v27 = vadd.f32 %v12673_v63, %v12485_v56  ;;  %v12676_v53 = vpop.f32.mrb[152].mxu0  ;;  %v12428_v12 = vadd.f32 %v21144_v55, %v21090_v60 }
 0x8c8   : > { %v14330_v13 = vpack.c.bf16 %v12824_v5, %v12820_v23  ;;  %v12677_v38 = vadd.f32 %v12676_v53, %v21136_v43  ;;  %v12678_v61 = vpop.f32.mrb[153].mxu0  ;;  %v12501_v53 = vmax.f32 %v12357_v0, 0.0 }
 0x8c9   : > { %v21153_v11 = vpop.f32.mrb[130].mxu1  ;;  %v12679_v33 = vadd.f32 %v12678_v61, %v21136_v43  ;;  %v14328_v50 = vpack.c.bf16 %v12825_v27, %v12821_v35  ;;  %v12497_v35 = vmax.f32 %v12351_v25, 0.0 }
 0x8ca   : > { %v21158_v17 = vpop.f32.mrb[131].mxu1  ;;  %v12828_v3 = vadd.f32 %v12677_v38, %v12488_v41 }
 0x8cb   : > { %v12829_v34 = vadd.f32 %v12679_v33, %v12489_v4  ;;  %v12682_v6 = vpop.f32.mrb[154].mxu0  ;;  %14329 = vmatprep.subr.bf16.mxu0 %v14328_v50  ;;  %v21183_v33 = vld [vmem:[%s21298_s10] sm:$0x1] }
 0x8cc   : > { %v12683_v48 = vadd.f32 %v12682_v6, %v21146_v36  ;;  %v12684_v58 = vpop.f32.mrb[155].mxu0  ;;  %14331 = vmatpush1.bf16.msra.mxu0 %v14330_v13  ;;  %v12426_v6 = vadd.f32 %v21140_v1, %v21090_v60 }
 0x8cd   : > { %v12437_v45 = vpop.f32.mrb[132].mxu1  ;;  %v12685_v40 = vadd.f32 %v12684_v58, %v21146_v36 }
 0x8ce   : > { %v12439_v32 = vpop.f32.mrb[133].mxu1  ;;  %v12832_v8 = vadd.f32 %v12683_v48, %v12492_v42  ;;  %v12474_v58 = vmax.f32 %v12426_v6, 0.0  ;;  %v12438_v60 = vadd.f32 %v12437_v45, %v21106_v49 }
 0x8cf   : > { %v12833_v19 = vadd.f32 %v12685_v40, %v12493_v22  ;;  %v12688_v28 = vpop.f32.mrb[156].mxu0  ;;  %v12432_v22 = vadd.f32 %v21153_v11, %v21092_v47  ;;  %v12440_v11 = vadd.f32 %v12439_v32, %v21106_v49 }
 0x8d0   : > { %v14334_v10 = vpack.c.bf16 %v12832_v8, %v12828_v3  ;;  %v12689_v7 = vadd.f32 %v12688_v28, %v21168_v62  ;;  %v12690_v14 = vpop.f32.mrb[157].mxu0  ;;  %v12475_v8 = vmax.f32 %v12428_v12, 0.0 }
 0x8d1   : > { %v12443_v23 = vpop.f32.mrb[134].mxu1  ;;  %v12691_v39 = vadd.f32 %v12690_v14, %v21168_v62  ;;  %v14332_v46 = vpack.c.bf16 %v12833_v19, %v12829_v34  ;;  %v12434_v19 = vadd.f32 %v21158_v17, %v21092_v47  ;;  %v12482_v47 = vmax.f32 %v12438_v60, 0.0 }
 0x8d2   : > { %v12445_v52 = vpop.f32.mrb[135].mxu1  ;;  %v12836_v9 = vadd.f32 %v12689_v7, %v12496_v51 }
 0x8d3   : > { %v12837_v56 = vadd.f32 %v12691_v39, %v12497_v35  ;;  %v12694_v15 = vpop.f32.mrb[158].mxu0  ;;  %14333 = vmatprep.subr.bf16.mxu0 %v14332_v46  ;;  %v12479_v14 = vmax.f32 %v12434_v19, 0.0  ;;  %v12446_v45 = vadd.f32 %v12445_v52, %v21113_v20 }
 0x8d4   : > { %v12695_v63 = vadd.f32 %v12694_v15, %v21176_v24  ;;  %v12696_v5 = vpop.f32.mrb[159].mxu0  ;;  %14335 = vmatpush1.bf16.msra.mxu0 %v14334_v10  ;;  %v12478_v10 = vmax.f32 %v12432_v22, 0.0  ;;  %v12483_v15 = vmax.f32 %v12440_v11, 0.0 }
 0x8d5   : > { %v12449_v27 = vpop.f32.mrb[136].mxu1  ;;  %v12697_v41 = vadd.f32 %v12696_v5, %v21176_v24 }
 0x8d6   : > { %v12451_v54 = vpop.f32.mrb[137].mxu1  ;;  %v12840_v18 = vadd.f32 %v12695_v63, %v12500_v2 }
 0x8d7   : > { %v12841_v13 = vadd.f32 %v12697_v41, %v12501_v53  ;;  %v12450_v53 = vadd.f32 %v12449_v27, %v21126_v16 }
 0x8d8   : > { %v14338_v38 = vpack.c.bf16 %v12840_v18, %v12836_v9  ;;  %v12487_v18 = vmax.f32 %v12446_v45, 0.0 }
 0x8d9   : > { %v12455_v61 = vpop.f32.mrb[138].mxu1  ;;  %v14336_v4 = vpack.c.bf16 %v12841_v13, %v12837_v56  ;;  %v12452_v13 = vadd.f32 %v12451_v54, %v21126_v16 }
 0x8da   : > { %v12457_v26 = vpop.f32.mrb[139].mxu1  ;;  %v12456_v6 = vadd.f32 %v12455_v61, %v21132_v30 }
 0x8db   : > { %14337 = vmatprep.subr.bf16.mxu0 %v14336_v4  ;;  %v12490_v4 = vmax.f32 %v12450_v53, 0.0  ;;  %v12491_v27 = vmax.f32 %v12452_v13, 0.0  ;;  %v12458_v22 = vadd.f32 %v12457_v26, %v21132_v30 }
 0x8dc   : > { %14339 = vmatpush1.bf16.msra.mxu0 %v14338_v38 }
 0x8dd   : > { %v21185_v50 = vpop.f32.mrb[140].mxu1 }
 0x8de   : > { %v21187_v3 = vpop.f32.mrb[141].mxu1  ;;  %v12462_v19 = vadd.f32 %v21185_v50, %v21151_v59 }
 0x8df   : > { %13963 = vmatmul.mubr.msk.f32.vlgmr.msra.gmra.mrb[160].mxu0 %vm8144_vm10, %v21183_v33 }
 0x8e1   : > { %v21191_v34 = vpop.f32.mrb[142].mxu1 }
 0x8e2   : > { %v21195_v42 = vpop.f32.mrb[143].mxu1  ;;  %v12468_v60 = vadd.f32 %v21191_v34, %v21163_v57 }
 0x8e3   : > { %v12470_v11 = vadd.f32 %v21195_v42, %v21163_v57  ;;  %v12849_v57 = vpop.permute.xlu0 %12848 }
 0x8e5   : > { %v12765_v48 = vpop.f32.mrb[144].mxu1  ;;  %v12503_v34 = vmax.f32 %v12470_v11, 0.0 }
 0x8e6   : > { %v12766_v25 = vadd.f32 %v12765_v48, %v21094_v21  ;;  %v12767_v40 = vpop.f32.mrb[145].mxu1 }
 0x8e7   : > { %v12768_v28 = vadd.f32 %v12767_v40, %v21094_v21  ;;  %v12444_v21 = vadd.f32 %v12443_v23, %v21113_v20 }
 0x8e8   : > { %v12814_v1 = vadd.f32 %v12766_v25, %v12474_v58 }
 0x8e9   : > { %v12815_v51 = vadd.f32 %v12768_v28, %v12475_v8  ;;  %v12771_v44 = vpop.f32.mrb[146].mxu1 }
 0x8ea   : > { %v12772_v55 = vadd.f32 %v12771_v44, %v21100_v29  ;;  %v12773_v7 = vpop.f32.mrb[147].mxu1 }
 0x8eb   : > { %v12774_v35 = vadd.f32 %v12773_v7, %v21100_v29  ;;  %v12486_v29 = vmax.f32 %v12444_v21, 0.0 }
 0x8ec   : > { %v12818_v0 = vadd.f32 %v12772_v55, %v12478_v10  ;;  %v12498_v10 = vmax.f32 %v12462_v19, 0.0 }
 0x8ed   : > { %v12819_v39 = vadd.f32 %v12774_v35, %v12479_v14  ;;  %v12777_v46 = vpop.f32.mrb[148].mxu1 }
 0x8ee   : > { %v14342_v17 = vpack.c.bf16 %v12818_v0, %v12814_v1  ;;  %v12778_v9 = vadd.f32 %v12777_v46, %v21116_v37  ;;  %v12779_v56 = vpop.f32.mrb[149].mxu1  ;;  %v12495_v1 = vmax.f32 %v12458_v22, 0.0 }
 0x8ef   : > { %v12780_v2 = vadd.f32 %v12779_v56, %v21116_v37  ;;  %v14340_v63 = vpack.c.bf16 %v12819_v39, %v12815_v51  ;;  %v12464_v51 = vadd.f32 %v21187_v3, %v21151_v59  ;;  %v12502_v39 = vmax.f32 %v12468_v60, 0.0 }
 0x8f0   : > { %v12822_v5 = vadd.f32 %v12778_v9, %v12482_v47 }
 0x8f1   : > { %v12823_v49 = vadd.f32 %v12780_v2, %v12483_v15  ;;  %v12783_v32 = vpop.f32.mrb[150].mxu1  ;;  %14341 = vmatprep.subr.bf16.mxu1 %v14340_v63  ;;  %v12499_v14 = vmax.f32 %v12464_v51, 0.0 }
 0x8f2   : > { %v12784_v41 = vadd.f32 %v12783_v32, %v21122_v31  ;;  %v12785_v23 = vpop.f32.mrb[151].mxu1  ;;  %14343 = vmatpush1.bf16.msra.mxu1 %v14342_v17 }
 0x8f3   : > { %v12786_v38 = vadd.f32 %v12785_v23, %v21122_v31  ;;  %v12494_v31 = vmax.f32 %v12456_v6, 0.0 }
 0x8f4   : > { %v12826_v20 = vadd.f32 %v12784_v41, %v12486_v29  ;;  %v21703_v41 = vld [vmem:[#allocation7_spill] sm:$0xff] }
 0x8f5   : > { %v12827_v52 = vadd.f32 %v12786_v38, %v12487_v18  ;;  %v12789_v37 = vpop.f32.mrb[152].mxu1 }
 0x8f6   : > { %v14346_v12 = vpack.c.bf16 %v12826_v20, %v12822_v5  ;;  %v12790_v48 = vadd.f32 %v12789_v37, %v21136_v43  ;;  %v12791_v58 = vpop.f32.mrb[153].mxu1 }
 0x8f7   : > { %v12792_v25 = vadd.f32 %v12791_v58, %v21136_v43  ;;  %v14344_v40 = vpack.c.bf16 %v12827_v52, %v12823_v49 }
 0x8f8   : > { %v12830_v8 = vadd.f32 %v12790_v48, %v12490_v4  ;;  %v21704_v4 = vlaneseq }
 0x8f9   : > { %v12831_v16 = vadd.f32 %v12792_v25, %v12491_v27  ;;  %v12795_v54 = vpop.f32.mrb[154].mxu1  ;;  %14345 = vmatprep.subr.bf16.mxu1 %v14344_v40 }
 0x8fa   : > { %v12796_v61 = vadd.f32 %v12795_v54, %v21146_v36  ;;  %v12797_v28 = vpop.f32.mrb[155].mxu1  ;;  %14347 = vmatpush1.bf16.msra.mxu1 %v14346_v12  ;;  %vm13031_vm14 = vcmp.lt.s32.totalorder %v21704_v4, 512 }
 0x8fb   : > { %v12798_v30 = vadd.f32 %v12797_v28, %v21146_v36 }
 0x8fc   : > { %v12834_v43 = vadd.f32 %v12796_v61, %v12494_v31 }
 0x8fd   : > { %v12835_v26 = vadd.f32 %v12798_v30, %v12495_v1  ;;  %v12801_v44 = vpop.f32.mrb[156].mxu1 }
 0x8fe   : > { %v14350_v55 = vpack.c.bf16 %v12834_v43, %v12830_v8  ;;  %v12802_v50 = vadd.f32 %v12801_v44, %v21168_v62  ;;  %v12803_v7 = vpop.f32.mrb[157].mxu1 }
 0x8ff   : > { %v12804_v35 = vadd.f32 %v12803_v7, %v21168_v62  ;;  %v14348_v59 = vpack.c.bf16 %v12835_v26, %v12831_v16  ;;  %v21702_v62 = vld [vmem:[#allocation11_spill] sm:$0xff] }
 0x900   : > { %v12838_v3 = vadd.f32 %v12802_v50, %v12498_v10  ;;  %v12854_v42 = vrot.slane %v12849_v57, %v21702_v62 }
 0x901   : > { %v12839_v36 = vadd.f32 %v12804_v35, %v12499_v14  ;;  %v12807_v0 = vpop.f32.mrb[158].mxu1  ;;  %14349 = vmatprep.subr.bf16.mxu1 %v14348_v59 }
 0x902   : > { %v12808_v46 = vadd.f32 %v12807_v0, %v21176_v24  ;;  %v12809_v47 = vpop.f32.mrb[159].mxu1  ;;  %14351 = vmatpush1.bf16.msra.mxu1 %v14350_v55 }
 0x903   : > { %v12810_v21 = vadd.f32 %v12809_v47, %v21176_v24  ;;  %v15094_v24 = vmov 1966171168  }
 0x904   : > { %v12842_v17 = vadd.f32 %v12808_v46, %v12502_v39  ;;  %v13007_v32 = vunpack.c.l.s4 %v15094_v24 }
 0x905   : > { %v12843_v9 = vadd.f32 %v12810_v21, %v12503_v34 }
 0x906   : > { %v14354_v56 = vpack.c.bf16 %v12842_v17, %v12838_v3  ;;  %v13008_v29 = vunpack.c.0.s8 %v13007_v32 }
 0x907   : > { %v14352_v15 = vpack.c.bf16 %v12843_v9, %v12839_v36 }
 0x908   : > { %v13011_v23 = vsub.s32 %v13008_v29, %v21703_v41 }
 0x909   : > { %14353 = vmatprep.subr.bf16.mxu1 %v14352_v15 }
 0x90a   : > { %14355 = vmatpush1.bf16.msra.mxu1 %v14354_v56 }
 0x90d   : > { %13964 = vmatmul.mubr.msk.f32.vlgmr.msra.gmra.mrb[160].mxu1 %vm8144_vm10, %v21183_v33 }
 0x9b2   : > { %v12924_v45 = vpop.f32.mrb[160].mxu0 }
 0x9b3   : > { %v12925_v2 = vadd.f32 %v12924_v45, %v12854_v42  ;;  %v12926_v63 = vpop.f32.mrb[161].mxu0 }
 0x9b4   : > { %v12927_v5 = vadd.f32 %v12926_v63, %v12854_v42 }
 0x9b6   : > { %v13004_v49 = vcombine.low %v12925_v2, %v12927_v5 }
 0x9b8   : > { %v13012_v38 = vrot.slane %v13004_v49, %v13011_v23 }
 0x9e0   : > { %v12995_v53 = vpop.f32.mrb[160].mxu1 }
 0x9e1   : > { %v12996_v18 = vadd.f32 %v12995_v53, %v12854_v42  ;;  %v12997_v13 = vpop.f32.mrb[161].mxu1 }
 0x9e2   : > { %v12998_v33 = vadd.f32 %v12997_v13, %v12854_v42 }
 0x9e4   : > { %v13005_v20 = vcombine.low %v12996_v18, %v12998_v33 }
 0x9e6   : > { %v13019_v52 = vrot.slane %v13005_v20, %v13011_v23 }
 0x9e8   : > { %v13020_v37 = vcombine.low %v13012_v38, %v13019_v52 }
 0x9ea   : > { %v13027_v6 = vrot.slane %v13020_v37, %v13011_v23 }
 0x9ec   : > { %13033 = vst.msk [vmem:[%s479_s30] sm:$0xf] %vm13031_vm14, %v13027_v6 }
 0x9ed   : > { %15034 = shalt.err (!%p15031_p7)
}
 0x9ee   : > { %s15035_s17 = scalar_lea.hbm %s21245_s19, 64  ;;  %s15039_s16 = scalar_lea.hbm %s21300_s12, 256 }
 0x9ef   : > { %p15036_p9 = scmp.ne.s32.totalorder %s21245_s19, %s15035_s17  ;;  %p15040_p12 = scmp.lt.u32.totalorder %s21245_s19, %s21300_s12 }
 0x9f0   : > { %p15041_p13 = scmp.lt.u32.totalorder %s15039_s16, %s15035_s17  ;;  %p15043_p1 = scmp.lt.u32.totalorder %s15035_s17, %s21245_s19 }
 0x9f1   : > { %p15037_p10 = pnand %p15036_p9, %p15203_p6 }
 0x9f2   : > { %p15042_p0 = por %p15041_p13, %p15040_p12 }
 0x9f3   : > { %p15038_p11 = pneg %p15037_p10 }
 0x9f4   : > { %p15044_p2 = por %p15043_p1, %p15042_p0 }
 0x9f6   : > { %p15045_p3 = pnand %p15044_p2, %p15038_p11 }
 0x9f8   : > { %15048 = shalt.err (!%p15045_p3)
}
 0x9f9   : > { %14868 = dma.vmem_to_hbm [thread:$0]  (%p15203_p6), %s21247_s20, 64, %s21245_s19, %s13035_s21  }
 0x9fa PF: > { %p14874_p4 = scmp.ge.s32.totalorder %s15083_s26, 2  ;;  %s13061_s0 = sand.u32 1, %s15071_s23  }
 0x9fb   : > { %s13062_s27 = scalar_lea.sflag [#allocation5], %s13061_s0 }
 0x9fc   : > { %p14871_p5 = pnand %p14874_p4, %p15207_p8 }
 0x9fe   : > { %15066 = dma.done.wait (!%p14871_p5), %s13062_s27, 64  }
 0x9ff   : > { %15068 = vsyncadd (!%p14871_p5), %s13062_s27, 4294967232  ;;  %p24_p7 = scmp.ge.s32.totalorder %s15189_s28, 6   ;;  %s21705_s23 = smov %s15075_s24 }
 0xa00   : > { %s21706_s24 = smov %s15079_s25  ;;  %s21707_s25 = smov %s15201_s13 }
 0xa01   : > { %s21708_s26 = smov %s15189_s28  ;;  %26 = sbr.rel (!%p24_p7) target bundleno = 6 (0x6), region = 162 }
 0xa08   :  { %13067 = vsyncpa [#allocation5], 1 }
 0xa09   :  { %13069 = vsyncpa [#allocation5 + $0x1], 1 }

</bundles_post_ra>
